<compile_context>
chip_gen: v6e
topology: v6e:2x2x1
jax: 0.10.0
libtpu: 0.0.40
codegen_flags: <defaults>
</compile_context>

<pallas_src>
import functools

import jax
import jax.numpy as jnp
from jax import lax
from jax.experimental import pallas as pl
from jax.experimental.pallas import tpu as pltpu


LANE = 128
_VMEM_TILE_BUDGET = 12 * 1024 * 1024     # A/B double-buffered + acc + out, per matmul


def _round_up(x, m):
    return ((x + m - 1) // m) * m


# ----------------------------------------------------------------------------
# Pallas kernels
# ----------------------------------------------------------------------------

def _mm_kernel(*refs, prologue, residual, relu):
    """out = [relu]((relu(A*ps+pb) @ B) * es + eb) [+ R], f32 accumulator.

    Ref order: A, B, [ps, pb], es, eb, [R], O, acc (prologue/residual optional, static).
    """
    it = iter(refs)
    a_ref = next(it)
    b_ref = next(it)
    if prologue:
        ps_ref = next(it)
        pb_ref = next(it)
    es_ref = next(it)
    eb_ref = next(it)
    if residual:
        r_ref = next(it)
    o_ref = next(it)
    acc_ref = next(it)

    @pl.when(pl.program_id(2) == 0)
    def _():
        acc_ref[...] = jnp.zeros_like(acc_ref)

    a = a_ref[...]
    if prologue:
        # Preceding BatchNorm(+ReLU) folded as a per-K-column affine on the A tile.
        a = jnp.maximum(a.astype(jnp.float32) * ps_ref[...] + pb_ref[...], 0.0)
        a = a.astype(jnp.bfloat16)
    acc_ref[...] += jnp.dot(a, b_ref[...], preferred_element_type=jnp.float32)

    @pl.when(pl.program_id(2) == pl.num_programs(2) - 1)
    def _():
        y = acc_ref[...] * es_ref[...] + eb_ref[...]
        if relu:
            y = jnp.maximum(y, 0.0)
        if residual:
            y = y + r_ref[...].astype(jnp.float32)
        o_ref[...] = y.astype(o_ref.dtype)


def _recam_kernel(cam_ref, g_ref, o_ref, *, inv_hw):
    # recam_pred[b] = cam_b^T @ g_b / HW  (contraction over the spatial axis).
    o_ref[0] = lax.dot_general(
        cam_ref[0], g_ref[0],
        dimension_numbers=(((0,), (0,)), ((), ())),
        preferred_element_type=jnp.float32) * inv_hw


# ----------------------------------------------------------------------------
# Tile choices
# ----------------------------------------------------------------------------

def _choose_m(M):
    Mp = _round_up(M, 8)
    if Mp > 256:
        tm = 256                              # >=2 M blocks for the largest layers
        Mp = _round_up(Mp, tm)
    elif Mp >= 128 and Mp % 16 == 0:
        tm = Mp // 2                          # keep 2 parallel blocks (v7x 2-TC megacore)
    else:
        tm = Mp
    return Mp, tm


def _choose_tk(Kp, tm, tn):
    """Largest K step whose double-buffered A/B tiles fit the VMEM budget (single K step
    whenever possible -> no extra grid-step overhead / accumulator passes)."""
    def fits(tk):
        vmem = (2 * (tm * tk + tk * tn) * 2   # A, B double-buffered, bf16
                + tm * tn * 4                 # f32 accumulator
                + 2 * tm * tn * 4)            # output double-buffered (<= f32)
        return vmem <= _VMEM_TILE_BUDGET
    if fits(Kp):
        return Kp
    for tk in (4096, 3072, 2048, 1536, 1152, 1024, 768, 640, 512, 384, 256, 128):
        if Kp % tk == 0 and fits(tk):
            return tk
    return Kp                                 # only reachable for tiny, non-128-multiple Kp


# ----------------------------------------------------------------------------
# Pallas wrappers
# ----------------------------------------------------------------------------

def matmul_fused(a, cw, *, residual=None, out_dtype=jnp.bfloat16):
    """(M, K) @ prepared bf16 weight (Kp, Np) with fused prologue/epilogue/residual."""
    M, K = a.shape
    wm = cw['wm']
    Kp, Np = wm.shape
    tn = cw['tn']
    Mp, tm = _choose_m(M)
    tk = _choose_tk(Kp, tm, tn)

    a = a.astype(jnp.bfloat16)
    if Mp != M or Kp != K:
        a = jnp.pad(a, ((0, Mp - M), (0, Kp - K)))

    prologue = cw['ps'] is not None
    has_res = residual is not None

    inputs = [a, wm]
    in_specs = [pl.BlockSpec((tm, tk), lambda i, j, k: (i, k)),
                pl.BlockSpec((tk, tn), lambda i, j, k: (k, j))]
    if prologue:
        inputs += [cw['ps'], cw['pb']]
        in_specs += [pl.BlockSpec((1, tk), lambda i, j, k: (0, k)),
                     pl.BlockSpec((1, tk), lambda i, j, k: (0, k))]
    inputs += [cw['es'], cw['eb']]
    in_specs += [pl.BlockSpec((1, tn), lambda i, j, k: (0, j)),
                 pl.BlockSpec((1, tn), lambda i, j, k: (0, j))]
    if has_res:
        r = residual.astype(jnp.bfloat16)
        if Mp != M:
            r = jnp.pad(r, ((0, Mp - M), (0, 0)))
        inputs.append(r)
        in_specs.append(pl.BlockSpec((tm, tn), lambda i, j, k: (i, j)))

    out = pl.pallas_call(
        functools.partial(_mm_kernel, prologue=prologue, residual=has_res,
                          relu=cw['relu']),
        out_shape=jax.ShapeDtypeStruct((Mp, Np), out_dtype),
        grid_spec=pltpu.PrefetchScalarGridSpec(
            num_scalar_prefetch=0,
            grid=(Mp // tm, Np // tn, Kp // tk),
            in_specs=in_specs,
            out_specs=pl.BlockSpec((tm, tn), lambda i, j, k: (i, j)),
            scratch_shapes=[pltpu.VMEM((tm, tn), jnp.float32)],
        ),
        compiler_params=pltpu.CompilerParams(
            dimension_semantics=("parallel", "parallel", "arbitrary"),
            vmem_limit_bytes=32 * 1024 * 1024),
    )(*inputs)
    if Mp != M:
        out = out[:M]
    return out                                # kept channel-padded (lane dense) on purpose


def conv2d(x, cw, *, stride=1, dilation=1, padding=0, pre_act=None,
           residual=None, out_dtype=jnp.bfloat16):
    """x: (B, H, W, Cin_padded) NHWC -> (B, Ho, Wo, Np) with Np lane padded.

    pre_act=(scale, bias): BN(+ReLU) affine applied to x in XLA (fuses into the im2col /
    stride slicing); used for spatially padded 3x3 convs.
    residual: (B, Ho, Wo, Np) added inside the matmul epilogue.
    """
    B, H, W, Cin = x.shape
    KH, KW = cw['kh'], cw['kw']
    x = x.astype(jnp.bfloat16)

    if pre_act is not None:
        s, b = pre_act
        x = jnp.maximum(x.astype(jnp.float32) * s + b, 0.0).astype(jnp.bfloat16)

    if KH == 1 and KW == 1 and padding == 0:
        if stride > 1:
            x = x[:, ::stride, ::stride, :]
        Ho, Wo = x.shape[1], x.shape[2]
        a = x.reshape(B * Ho * Wo, Cin)
    else:
        # TODO(synk): fold the KHxKW taps into the matmul K grid axis (shifted-window
        # index_map / manual DMA) instead of materializing bf16 im2col patches in HBM.
        if padding > 0:
            x = jnp.pad(x, ((0, 0), (padding, padding), (padding, padding), (0, 0)))
        Hp, Wp = H + 2 * padding, W + 2 * padding
        Ho = (Hp - dilation * (KH - 1) - 1) // stride + 1
        Wo = (Wp - dilation * (KW - 1) - 1) // stride + 1
        patches = []
        for kh in range(KH):
            for kw in range(KW):
                h0, w0 = kh * dilation, kw * dilation
                patches.append(x[:, h0:h0 + (Ho - 1) * stride + 1:stride,
                                 w0:w0 + (Wo - 1) * stride + 1:stride, :])
        a = jnp.concatenate(patches, axis=-1).reshape(B * Ho * Wo, KH * KW * Cin)

    res2d = None
    if residual is not None:
        res2d = residual.reshape(B * Ho * Wo, residual.shape[-1])

    y = matmul_fused(a, cw, residual=res2d, out_dtype=out_dtype)
    return y.reshape(B, Ho, Wo, cw['np'])


def recam_pred_pallas(cam, g):
    """recam_pred[b] = cam_b^T @ g_b / HW, batched over B.  cam, g: (B, H, W, Cp)."""
    B, H, W, Cp = cam.shape
    HW = H * W
    HWp = max(_round_up(HW, 8), 8)
    camf = cam.reshape(B, HW, Cp).astype(jnp.bfloat16)
    gf = g.reshape(B, HW, Cp).astype(jnp.bfloat16)
    if HWp != HW:
        camf = jnp.pad(camf, ((0, 0), (0, HWp - HW), (0, 0)))
        gf = jnp.pad(gf, ((0, 0), (0, HWp - HW), (0, 0)))
    return pl.pallas_call(
        functools.partial(_recam_kernel, inv_hw=1.0 / HW),
        out_shape=jax.ShapeDtypeStruct((B, Cp, Cp), jnp.float32),
        grid_spec=pltpu.PrefetchScalarGridSpec(
            num_scalar_prefetch=0,
            grid=(B,),
            in_specs=[pl.BlockSpec((1, HWp, Cp), lambda b: (b, 0, 0)),
                      pl.BlockSpec((1, HWp, Cp), lambda b: (b, 0, 0))],
            out_specs=pl.BlockSpec((1, Cp, Cp), lambda b: (b, 0, 0)),
        ),
        compiler_params=pltpu.CompilerParams(dimension_semantics=("parallel",)),
    )(camf, gf)


# ----------------------------------------------------------------------------
# Parameter init (deterministic, synthetic)
# ----------------------------------------------------------------------------

def init_conv(key, out_c, in_c, kh, kw):
    fan_in = in_c * kh * kw
    return (jax.random.normal(key, (out_c, in_c, kh, kw), jnp.float32)
            / jnp.sqrt(float(fan_in)))


def init_bn(key, c):
    k1, k2, k3, k4 = jax.random.split(key, 4)
    return dict(
        gamma=1.0 + 0.1 * jax.random.normal(k1, (c,), jnp.float32),
        beta=0.1 * jax.random.normal(k2, (c,), jnp.float32),
        mean=0.1 * jax.random.normal(k3, (c,), jnp.float32),
        var=jnp.abs(jax.random.normal(k4, (c,), jnp.float32)) + 0.5,
    )


def init_resblock(key, in_c, mid_c, out_c, stride=1, first_dilation=None, dilation=1):
    if first_dilation is None:
        first_dilation = dilation
    same_shape = (in_c == out_c and stride == 1)
    k = jax.random.split(key, 5)
    p = dict(
        bn_branch2a=init_bn(k[0], in_c),
        conv_branch2a=init_conv(k[1], mid_c, in_c, 3, 3),
        bn_branch2b1=init_bn(k[2], mid_c),
        conv_branch2b1=init_conv(k[3], out_c, mid_c, 3, 3),
        cfg=dict(stride=stride, first_dilation=first_dilation,
                 dilation=dilation, same_shape=same_shape),
    )
    if not same_shape:
        p['conv_branch1'] = init_conv(k[4], out_c, in_c, 1, 1)
    return p


def init_resblock_bot(key, in_c, out_c, stride=1, dilation=1):
    same_shape = (in_c == out_c and stride == 1)
    k = jax.random.split(key, 8)
    p = dict(
        bn_branch2a=init_bn(k[0], in_c),
        conv_branch2a=init_conv(k[1], out_c // 4, in_c, 1, 1),
        bn_branch2b1=init_bn(k[2], out_c // 4),
        conv_branch2b1=init_conv(k[3], out_c // 2, out_c // 4, 3, 3),
        bn_branch2b2=init_bn(k[4], out_c // 2),
        conv_branch2b2=init_conv(k[5], out_c, out_c // 2, 1, 1),
        cfg=dict(stride=stride, dilation=dilation, same_shape=same_shape),
    )
    if not same_shape:
        p['conv_branch1'] = init_conv(k[6], out_c, in_c, 1, 1)
    return p


def init_net(key, D=32, C=4, width_div=8):
    """Channel widths of ResNet38 (64..4096) scaled by 1/width_div for a small demo."""
    ch = lambda c: max(c // width_div, 4)
    keys = iter(jax.random.split(key, 40))
    P = {}
    P['conv1a'] = init_conv(next(keys), ch(64), 3, 3, 3)
    P['b2'] = init_resblock(next(keys), ch(64), ch(128), ch(128), stride=2)
    P['b2_1'] = init_resblock(next(keys), ch(128), ch(128), ch(128))
    P['b2_2'] = init_resblock(next(keys), ch(128), ch(128), ch(128))
    P['b3'] = init_resblock(next(keys), ch(128), ch(256), ch(256), stride=2)
    P['b3_1'] = init_resblock(next(keys), ch(256), ch(256), ch(256))
    P['b3_2'] = init_resblock(next(keys), ch(256), ch(256), ch(256))
    P['b4'] = init_resblock(next(keys), ch(256), ch(512), ch(512), stride=2)
    for n in ['b4_1', 'b4_2', 'b4_3', 'b4_4', 'b4_5']:
        P[n] = init_resblock(next(keys), ch(512), ch(512), ch(512))
    P['b5'] = init_resblock(next(keys), ch(512), ch(512), ch(1024),
                            stride=1, first_dilation=1, dilation=2)
    P['b5_1'] = init_resblock(next(keys), ch(1024), ch(512), ch(1024), dilation=2)
    P['b5_2'] = init_resblock(next(keys), ch(1024), ch(512), ch(1024), dilation=2)
    P['b6'] = init_resblock_bot(next(keys), ch(1024), ch(2048), stride=1, dilation=4)
    P['b7'] = init_resblock_bot(next(keys), ch(2048), ch(4096), dilation=4)
    P['bn7'] = init_bn(next(keys), ch(4096))
    P['fc8'] = init_conv(next(keys), D, ch(4096), 1, 1)
    P['fc9'] = init_conv(next(keys), C, D, 1, 1)
    P['fc9_re'] = init_conv(next(keys), C, D, 1, 1)
    P['meta'] = dict(D=D, C=C)
    return P


# ----------------------------------------------------------------------------
# One-time preparation: fold BN, transpose/pad weights, build fused-op descriptors
# ----------------------------------------------------------------------------

def prepare_bn(bn, eps=1e-5):
    scale = bn['gamma'] / jnp.sqrt(bn['var'] + eps)
    bias = bn['beta'] - bn['mean'] * scale
    return scale.astype(jnp.float32), bias.astype(jnp.float32)


def _pad_vec(v, n):
    return jnp.pad(v.astype(jnp.float32), (0, n - v.shape[0]))


def prepare_conv(w, in_pad=None):
    """Fold a conv weight (O, I, KH, KW) into a padded bf16 (Kp, Np) matmul matrix.

    in_pad: lane-padded input channel count carried by the activations (>= I).  Padded K
    rows and padded N columns are zero, so padded channels stay exactly zero layer-to-layer.
    """
    O, I, KH, KW = w.shape
    Ip = I if in_pad is None else in_pad
    K = KH * KW * Ip
    if K % LANE == 0:
        Kp = K
    elif K < LANE:
        Kp = _round_up(K, 16)            # tiny K (conv1a): no wasteful 128-padding
    else:
        Kp = _round_up(K, LANE)
    Np = _round_up(O, LANE)              # lane-dense output stores, carried to next layer
    tn = Np if Np <= 256 else 256        # keep >=2 N blocks on the widest layers (v7x)

    wm = jnp.transpose(w, (2, 3, 1, 0))                        # (KH, KW, I, O)
    wm = jnp.pad(wm, ((0, 0), (0, 0), (0, Ip - I), (0, Np - O)))
    wm = wm.reshape(KH * KW * Ip, Np)
    wm = jnp.pad(wm, ((0, Kp - KH * KW * Ip), (0, 0))).astype(jnp.bfloat16)

    return dict(wm=wm, np=Np, kh=KH, kw=KW, tn=tn,
                ps=None, pb=None,
                es=jnp.ones((1, Np), jnp.float32),
                eb=jnp.zeros((1, Np), jnp.float32),
                relu=False)


def attach_prologue(cw, scale, bias):
    """Fold the preceding BN(+ReLU) into the matmul as a per-K-column prologue (1x1 convs)."""
    Kp = cw['wm'].shape[0]
    cw = dict(cw)
    cw['ps'] = _pad_vec(scale, Kp).reshape(1, Kp)
    cw['pb'] = _pad_vec(bias, Kp).reshape(1, Kp)
    return cw


def attach_epilogue(cw, scale, bias, relu=True):
    """Fold the following BN(+ReLU) into the matmul epilogue."""
    Np = cw['np']
    cw = dict(cw)
    cw['es'] = _pad_vec(scale, Np).reshape(1, Np)
    cw['eb'] = _pad_vec(bias, Np).reshape(1, Np)
    cw['relu'] = relu
    return cw


def with_relu(cw):
    cw = dict(cw)
    cw['relu'] = True
    return cw


def prepare_block(rp, in_pad):
    """ResBlock -> 2 fused matmuls (+1 for non-same-shape): BN2a folded into the XLA im2col
    of conv2a and into the K-prologue of conv_branch1; BN2b1+ReLU is conv2a's epilogue;
    the residual add is conv2b1's epilogue."""
    s2a, b2a = prepare_bn(rp['bn_branch2a'])
    s2b1, b2b1 = prepare_bn(rp['bn_branch2b1'])
    mid_pad = _round_up(rp['conv_branch2a'].shape[0], LANE)

    p = dict(cfg=rp['cfg'],
             bn2a=(_pad_vec(s2a, in_pad), _pad_vec(b2a, in_pad)),
             conv2a=attach_epilogue(prepare_conv(rp['conv_branch2a'], in_pad=in_pad),
                                    s2b1, b2b1, relu=True),
             conv2b1=prepare_conv(rp['conv_branch2b1'], in_pad=mid_pad))
    if 'conv_branch1' in rp:
        p['conv1'] = attach_prologue(prepare_conv(rp['conv_branch1'], in_pad=in_pad),
                                     s2a, b2a)
    return p


def prepare_block_bot(rp, in_pad):
    """ResBlock_bot -> 4 fused matmuls: all three BNs folded as prologues/epilogues and the
    residual add fused into conv2b2 (dropouts are identity at inference)."""
    s2a, b2a = prepare_bn(rp['bn_branch2a'])
    s2b1, b2b1 = prepare_bn(rp['bn_branch2b1'])
    s2b2, b2b2 = prepare_bn(rp['bn_branch2b2'])
    q_pad = _round_up(rp['conv_branch2a'].shape[0], LANE)
    h_pad = _round_up(rp['conv_branch2b1'].shape[0], LANE)

    p = dict(cfg=rp['cfg'],
             conv2a=attach_epilogue(
                 attach_prologue(prepare_conv(rp['conv_branch2a'], in_pad=in_pad),
                                 s2a, b2a),
                 s2b1, b2b1, relu=True),
             conv2b1=attach_epilogue(prepare_conv(rp['conv_branch2b1'], in_pad=q_pad),
                                     s2b2, b2b2, relu=True),
             conv2b2=prepare_conv(rp['conv_branch2b2'], in_pad=h_pad))
    if 'conv_branch1' in rp:
        p['conv1'] = attach_prologue(prepare_conv(rp['conv_branch1'], in_pad=in_pad),
                                     s2a, b2a)
    return p


_BLOCKS = ['b2', 'b2_1', 'b2_2', 'b3', 'b3_1', 'b3_2',
           'b4', 'b4_1', 'b4_2', 'b4_3', 'b4_4', 'b4_5',
           'b5', 'b5_1', 'b5_2', 'b6', 'b7']


def prepare_net(raw):
    P = dict(meta=raw['meta'])
    P['conv1a'] = prepare_conv(raw['conv1a'])              # image input, 3 channels
    for name in _BLOCKS:
        rp = raw[name]
        in_pad = _round_up(rp['conv_branch2a'].shape[1], LANE)
        P[name] = (prepare_block_bot(rp, in_pad) if 'bn_branch2b2' in rp
                   else prepare_block(rp, in_pad))
    s7, b7 = prepare_bn(raw['bn7'])
    P['fc8'] = with_relu(attach_prologue(
        prepare_conv(raw['fc8'], in_pad=_round_up(raw['fc8'].shape[1], LANE)), s7, b7))
    d_pad = _round_up(raw['fc9'].shape[1], LANE)
    P['fc9'] = prepare_conv(raw['fc9'], in_pad=d_pad)
    P['fc9_re'] = prepare_conv(raw['fc9_re'], in_pad=d_pad)
    return P


# ----------------------------------------------------------------------------
# Forward pass (mirrors Net_reCAM.forward, inference mode)
# ----------------------------------------------------------------------------

def resblock_forward(p, x):
    cfg = p['cfg']
    # branch2: im2col of relu(bn2a(x)) (XLA-fused affine) -> conv2a with bn2b1+relu epilogue
    br2 = conv2d(x, p['conv2a'], stride=cfg['stride'],
                 dilation=cfg['first_dilation'], padding=cfg['first_dilation'],
                 pre_act=p['bn2a'])
    # branch1: identity, or 1x1 conv with relu(bn2a(.)) as the in-kernel K-prologue
    br1 = conv2d(x, p['conv1'], stride=cfg['stride']) if 'conv1' in p else x
    # last conv of the block: residual add fused into the epilogue
    return conv2d(br2, p['conv2b1'], dilation=cfg['dilation'], padding=cfg['dilation'],
                  residual=br1)


def resblock_bot_forward(p, x):
    cfg = p['cfg']
    br1 = conv2d(x, p['conv1'], stride=cfg['stride']) if 'conv1' in p else x
    br2 = conv2d(x, p['conv2a'], stride=cfg['stride'])     # bn2a prologue + bn2b1 epilogue
    # dropout_2b1: identity (inference)
    br2 = conv2d(br2, p['conv2b1'], dilation=cfg['dilation'], padding=cfg['dilation'])
    # dropout_2b2: identity (inference)
    return conv2d(br2, p['conv2b2'], residual=br1)


def net_recam_forward(P, x_nchw):
    D, C = P['meta']['D'], P['meta']['C']
    x = jnp.transpose(x_nchw, (0, 2, 3, 1)).astype(jnp.bfloat16)   # NCHW -> NHWC

    x = conv2d(x, P['conv1a'], padding=1)
    for name in _BLOCKS:
        p = P[name]
        x = resblock_bot_forward(p, x) if 'conv2b2' in p else resblock_forward(p, x)

    # relu(bn7(x)) folded as fc8's K-prologue; feat = relu(fc8(.)) via the epilogue relu.
    feat = conv2d(x, P['fc8'], out_dtype=jnp.float32)
    cam = conv2d(feat, P['fc9'], out_dtype=jnp.float32)
    g = conv2d(feat, P['fc9_re'], out_dtype=jnp.float32)

    pred = jnp.mean(cam[..., :C], axis=(1, 2))                     # tiny (B, C) reduce
    # recam_pred[b, c, c'] = mean_hw cam[b,hw,c] * (feat @ W_re^T)[b,hw,c']
    recam_pred = recam_pred_pallas(cam, g)[:, :C, :C]

    return {
        'feat': jnp.transpose(feat[..., :D], (0, 3, 1, 2)),        # NCHW, like torch
        'cam': jnp.transpose(cam[..., :C], (0, 3, 1, 2)),          # NCHW
        'pred': pred,                                              # (B, C)
        'recam_pred': recam_pred,                                  # (B, C, C)
    }


# ----------------------------------------------------------------------------
# Demo
# ----------------------------------------------------------------------------

if __name__ == "__main__":
    key = jax.random.PRNGKey(0)
    k_params, k_input = jax.random.split(key)

    D, C = 32, 4
    raw = init_net(k_params, D=D, C=C, width_div=8)
    params = prepare_net(raw)                                      # one-time folding/padding

    x = jax.random.normal(k_input, (2, 3, 16, 16), jnp.float32)    # NCHW input

    fwd = jax.jit(functools.partial(net_recam_forward, params))
    out = jax.block_until_ready(fwd(x))

    B = x.shape[0]
    Hs = Ws = 16 // 8                                              # three stride-2 stages
    assert out['feat'].shape == (B, D, Hs, Ws)
    assert out['cam'].shape == (B, C, Hs, Ws)
    assert out['pred'].shape == (B, C)
    assert out['recam_pred'].shape == (B, C, C)
    assert all(bool(jnp.all(jnp.isfinite(v))) for v in out.values())

    print("KERNEL_OK")
</pallas_src>

<mosaic_0001>
module attributes {stable_mosaic.version = 11 : i64} {
  func.func @_mm_kernel(%arg0: i32, %arg1: i32, %arg2: i32, %arg3: memref<256x32xbf16, #tpu.memory_space<vmem>>, %arg4: memref<32x128xbf16, #tpu.memory_space<vmem>>, %arg5: memref<1x128xf32, #tpu.memory_space<vmem>>, %arg6: memref<1x128xf32, #tpu.memory_space<vmem>>, %arg7: memref<256x128xbf16, #tpu.memory_space<vmem>>, %arg8: memref<256x128xf32, #tpu.memory_space<vmem>>) attributes {dimension_semantics = [#tpu.dimension_semantics<parallel>, #tpu.dimension_semantics<parallel>, #tpu.dimension_semantics<arbitrary>], iteration_bounds = array<i64: 2, 1, 1>, scalar_prefetch = 0 : i64, scratch_operands = 1 : i64, tpu.core_type = #tpu.core_type<tc>, window_params = [{transform_indices = @transform_0, window_bounds = array<i64: 256, 32>}, {transform_indices = @transform_1, window_bounds = array<i64: 32, 128>}, {transform_indices = @transform_2, window_bounds = array<i64: 1, 128>}, {transform_indices = @transform_3, window_bounds = array<i64: 1, 128>}, {transform_indices = @transform_4, window_bounds = array<i64: 256, 128>}]} {
    %c0_i32 = arith.constant 0 : i32
    %0 = arith.cmpi eq, %arg2, %c0_i32 : i32
    %1 = arith.extui %0 : i1 to i32
    %c0_i32_0 = arith.constant 0 : i32
    %2 = arith.cmpi ne, %1, %c0_i32_0 : i32
    scf.if %2 {
      %cst_10 = arith.constant 0.000000e+00 : f32
      %12 = vector.broadcast %cst_10 : f32 to vector<256x128xf32>
      %c0_11 = arith.constant 0 : index
      %c0_12 = arith.constant 0 : index
      %13 = vector.load %arg8[%c0_11, %c0_12] : memref<256x128xf32, #tpu.memory_space<vmem>>, vector<256x128xf32>
      tpu.vector_store %arg8[%c0_11, %c0_12], %12 {strides = array<i32>} : memref<256x128xf32, #tpu.memory_space<vmem>>, vector<256x128xf32>,
    } else {
    }
    %c0 = arith.constant 0 : index
    %c0_1 = arith.constant 0 : index
    %3 = vector.load %arg3[%c0, %c0_1] : memref<256x32xbf16, #tpu.memory_space<vmem>>, vector<256x32xbf16>
    %c0_2 = arith.constant 0 : index
    %c0_3 = arith.constant 0 : index
    %4 = vector.load %arg8[%c0_2, %c0_3] : memref<256x128xf32, #tpu.memory_space<vmem>>, vector<256x128xf32>
    %c0_4 = arith.constant 0 : index
    %c0_5 = arith.constant 0 : index
    %5 = vector.load %arg4[%c0_4, %c0_5] : memref<32x128xbf16, #tpu.memory_space<vmem>>, vector<32x128xbf16>
    %cst = arith.constant dense<0.000000e+00> : vector<256x128xf32>
    %6 = tpu.matmul %3, %5, %cst {dimension_numbers = #tpu.dot_dimension_numbers<[1], [0], [0], [1], [0, 0, 1, 1], [], []>} : vector<256x32xbf16>, vector<32x128xbf16>, vector<256x128xf32> -> vector<256x128xf32>
    %7 = arith.addf %4, %6 : vector<256x128xf32>
    %c0_6 = arith.constant 0 : index
    %c0_7 = arith.constant 0 : index
    %8 = vector.load %arg8[%c0_6, %c0_7] : memref<256x128xf32, #tpu.memory_space<vmem>>, vector<256x128xf32>
    tpu.vector_store %arg8[%c0_6, %c0_7], %7 {strides = array<i32>} : memref<256x128xf32, #tpu.memory_space<vmem>>, vector<256x128xf32>,
    %c0_i32_8 = arith.constant 0 : i32
    %9 = arith.cmpi eq, %arg2, %c0_i32_8 : i32
    %10 = arith.extui %9 : i1 to i32
    %c0_i32_9 = arith.constant 0 : i32
    %11 = arith.cmpi ne, %10, %c0_i32_9 : i32
    scf.if %11 {
      %c0_10 = arith.constant 0 : index
      %c0_11 = arith.constant 0 : index
      %12 = vector.load %arg8[%c0_10, %c0_11] : memref<256x128xf32, #tpu.memory_space<vmem>>, vector<256x128xf32>
      %c0_12 = arith.constant 0 : index
      %c0_13 = arith.constant 0 : index
      %13 = vector.load %arg5[%c0_12, %c0_13] : memref<1x128xf32, #tpu.memory_space<vmem>>, vector<1x128xf32>
      %14 = vector.broadcast %13 : vector<1x128xf32> to vector<256x128xf32>
      %15 = arith.mulf %12, %14 : vector<256x128xf32>
      %c0_14 = arith.constant 0 : index
      %c0_15 = arith.constant 0 : index
      %16 = vector.load %arg6[%c0_14, %c0_15] : memref<1x128xf32, #tpu.memory_space<vmem>>, vector<1x128xf32>
      %17 = vector.broadcast %16 : vector<1x128xf32> to vector<256x128xf32>
      %18 = arith.addf %15, %17 : vector<256x128xf32>
      %19 = arith.truncf %18 : vector<256x128xf32> to vector<256x128xbf16>
      %c0_16 = arith.constant 0 : index
      %c0_17 = arith.constant 0 : index
      %20 = vector.load %arg7[%c0_16, %c0_17] : memref<256x128xbf16, #tpu.memory_space<vmem>>, vector<256x128xbf16>
      tpu.vector_store %arg7[%c0_16, %c0_17], %19 {strides = array<i32>} : memref<256x128xbf16, #tpu.memory_space<vmem>>, vector<256x128xbf16>,
    } else {
    }
    return
  }
  func.func @transform_0(%arg0: i32, %arg1: i32, %arg2: i32) -> (i32, i32) {
    %c0_i32 = arith.constant 0 : i32
    return %arg0, %arg2 : i32, i32
  }
  func.func @transform_1(%arg0: i32, %arg1: i32, %arg2: i32) -> (i32, i32) {
    %c0_i32 = arith.constant 0 : i32
    return %arg2, %arg1 : i32, i32
  }
  func.func @transform_2(%arg0: i32, %arg1: i32, %arg2: i32) -> (i32, i32) {
    %c0_i32 = arith.constant 0 : i32
    %c0_i32_0 = arith.constant 0 : i32
    return %c0_i32, %arg1 : i32, i32
  }
  func.func @transform_3(%arg0: i32, %arg1: i32, %arg2: i32) -> (i32, i32) {
    %c0_i32 = arith.constant 0 : i32
    %c0_i32_0 = arith.constant 0 : i32
    return %c0_i32, %arg1 : i32, i32
  }
  func.func @transform_4(%arg0: i32, %arg1: i32, %arg2: i32) -> (i32, i32) {
    %c0_i32 = arith.constant 0 : i32
    return %arg0, %arg1 : i32, i32
  }
}

module attributes {stable_mosaic.version = 11 : i64} {
  func.func @_mm_kernel(%arg0: i32, %arg1: i32, %arg2: i32, %arg3: memref<64x1152xbf16, #tpu.memory_space<vmem>>, %arg4: memref<1152x128xbf16, #tpu.memory_space<vmem>>, %arg5: memref<1x128xf32, #tpu.memory_space<vmem>>, %arg6: memref<1x128xf32, #tpu.memory_space<vmem>>, %arg7: memref<64x128xbf16, #tpu.memory_space<vmem>>, %arg8: memref<64x128xf32, #tpu.memory_space<vmem>>) attributes {dimension_semantics = [#tpu.dimension_semantics<parallel>, #tpu.dimension_semantics<parallel>, #tpu.dimension_semantics<arbitrary>], iteration_bounds = array<i64: 2, 1, 1>, scalar_prefetch = 0 : i64, scratch_operands = 1 : i64, tpu.core_type = #tpu.core_type<tc>, window_params = [{transform_indices = @transform_0, window_bounds = array<i64: 64, 1152>}, {transform_indices = @transform_1, window_bounds = array<i64: 1152, 128>}, {transform_indices = @transform_2, window_bounds = array<i64: 1, 128>}, {transform_indices = @transform_3, window_bounds = array<i64: 1, 128>}, {transform_indices = @transform_4, window_bounds = array<i64: 64, 128>}]} {
    %c0_i32 = arith.constant 0 : i32
    %0 = arith.cmpi eq, %arg2, %c0_i32 : i32
    %1 = arith.extui %0 : i1 to i32
    %c0_i32_0 = arith.constant 0 : i32
    %2 = arith.cmpi ne, %1, %c0_i32_0 : i32
    scf.if %2 {
      %cst_10 = arith.constant 0.000000e+00 : f32
      %12 = vector.broadcast %cst_10 : f32 to vector<64x128xf32>
      %c0_11 = arith.constant 0 : index
      %c0_12 = arith.constant 0 : index
      %13 = vector.load %arg8[%c0_11, %c0_12] : memref<64x128xf32, #tpu.memory_space<vmem>>, vector<64x128xf32>
      tpu.vector_store %arg8[%c0_11, %c0_12], %12 {strides = array<i32>} : memref<64x128xf32, #tpu.memory_space<vmem>>, vector<64x128xf32>,
    } else {
    }
    %c0 = arith.constant 0 : index
    %c0_1 = arith.constant 0 : index
    %3 = vector.load %arg3[%c0, %c0_1] : memref<64x1152xbf16, #tpu.memory_space<vmem>>, vector<64x1152xbf16>
    %c0_2 = arith.constant 0 : index
    %c0_3 = arith.constant 0 : index
    %4 = vector.load %arg8[%c0_2, %c0_3] : memref<64x128xf32, #tpu.memory_space<vmem>>, vector<64x128xf32>
    %c0_4 = arith.constant 0 : index
    %c0_5 = arith.constant 0 : index
    %5 = vector.load %arg4[%c0_4, %c0_5] : memref<1152x128xbf16, #tpu.memory_space<vmem>>, vector<1152x128xbf16>
    %cst = arith.constant dense<0.000000e+00> : vector<64x128xf32>
    %6 = tpu.matmul %3, %5, %cst {dimension_numbers = #tpu.dot_dimension_numbers<[1], [0], [0], [1], [0, 0, 1, 1], [], []>} : vector<64x1152xbf16>, vector<1152x128xbf16>, vector<64x128xf32> -> vector<64x128xf32>
    %7 = arith.addf %4, %6 : vector<64x128xf32>
    %c0_6 = arith.constant 0 : index
    %c0_7 = arith.constant 0 : index
    %8 = vector.load %arg8[%c0_6, %c0_7] : memref<64x128xf32, #tpu.memory_space<vmem>>, vector<64x128xf32>
    tpu.vector_store %arg8[%c0_6, %c0_7], %7 {strides = array<i32>} : memref<64x128xf32, #tpu.memory_space<vmem>>, vector<64x128xf32>,
    %c0_i32_8 = arith.constant 0 : i32
    %9 = arith.cmpi eq, %arg2, %c0_i32_8 : i32
    %10 = arith.extui %9 : i1 to i32
    %c0_i32_9 = arith.constant 0 : i32
    %11 = arith.cmpi ne, %10, %c0_i32_9 : i32
    scf.if %11 {
      %c0_10 = arith.constant 0 : index
      %c0_11 = arith.constant 0 : index
      %12 = vector.load %arg8[%c0_10, %c0_11] : memref<64x128xf32, #tpu.memory_space<vmem>>, vector<64x128xf32>
      %c0_12 = arith.constant 0 : index
      %c0_13 = arith.constant 0 : index
      %13 = vector.load %arg5[%c0_12, %c0_13] : memref<1x128xf32, #tpu.memory_space<vmem>>, vector<1x128xf32>
      %14 = vector.broadcast %13 : vector<1x128xf32> to vector<64x128xf32>
      %15 = arith.mulf %12, %14 : vector<64x128xf32>
      %c0_14 = arith.constant 0 : index
      %c0_15 = arith.constant 0 : index
      %16 = vector.load %arg6[%c0_14, %c0_15] : memref<1x128xf32, #tpu.memory_space<vmem>>, vector<1x128xf32>
      %17 = vector.broadcast %16 : vector<1x128xf32> to vector<64x128xf32>
      %18 = arith.addf %15, %17 : vector<64x128xf32>
      %cst_16 = arith.constant 0.000000e+00 : f32
      %19 = vector.broadcast %cst_16 : f32 to vector<64x128xf32>
      %20 = arith.maximumf %18, %19 : vector<64x128xf32>
      %21 = arith.truncf %20 : vector<64x128xf32> to vector<64x128xbf16>
      %c0_17 = arith.constant 0 : index
      %c0_18 = arith.constant 0 : index
      %22 = vector.load %arg7[%c0_17, %c0_18] : memref<64x128xbf16, #tpu.memory_space<vmem>>, vector<64x128xbf16>
      tpu.vector_store %arg7[%c0_17, %c0_18], %21 {strides = array<i32>} : memref<64x128xbf16, #tpu.memory_space<vmem>>, vector<64x128xbf16>,
    } else {
    }
    return
  }
  func.func @transform_0(%arg0: i32, %arg1: i32, %arg2: i32) -> (i32, i32) {
    %c0_i32 = arith.constant 0 : i32
    return %arg0, %arg2 : i32, i32
  }
  func.func @transform_1(%arg0: i32, %arg1: i32, %arg2: i32) -> (i32, i32) {
    %c0_i32 = arith.constant 0 : i32
    return %arg2, %arg1 : i32, i32
  }
  func.func @transform_2(%arg0: i32, %arg1: i32, %arg2: i32) -> (i32, i32) {
    %c0_i32 = arith.constant 0 : i32
    %c0_i32_0 = arith.constant 0 : i32
    return %c0_i32, %arg1 : i32, i32
  }
  func.func @transform_3(%arg0: i32, %arg1: i32, %arg2: i32) -> (i32, i32) {
    %c0_i32 = arith.constant 0 : i32
    %c0_i32_0 = arith.constant 0 : i32
    return %c0_i32, %arg1 : i32, i32
  }
  func.func @transform_4(%arg0: i32, %arg1: i32, %arg2: i32) -> (i32, i32) {
    %c0_i32 = arith.constant 0 : i32
    return %arg0, %arg1 : i32, i32
  }
}

module attributes {stable_mosaic.version = 11 : i64} {
  func.func @_mm_kernel(%arg0: i32, %arg1: i32, %arg2: i32, %arg3: memref<64x1152xbf16, #tpu.memory_space<vmem>>, %arg4: memref<1152x128xbf16, #tpu.memory_space<vmem>>, %arg5: memref<1x128xf32, #tpu.memory_space<vmem>>, %arg6: memref<1x128xf32, #tpu.memory_space<vmem>>, %arg7: memref<64x128xbf16, #tpu.memory_space<vmem>>, %arg8: memref<64x128xbf16, #tpu.memory_space<vmem>>, %arg9: memref<64x128xf32, #tpu.memory_space<vmem>>) attributes {dimension_semantics = [#tpu.dimension_semantics<parallel>, #tpu.dimension_semantics<parallel>, #tpu.dimension_semantics<arbitrary>], iteration_bounds = array<i64: 2, 1, 1>, scalar_prefetch = 0 : i64, scratch_operands = 1 : i64, tpu.core_type = #tpu.core_type<tc>, window_params = [{transform_indices = @transform_0, window_bounds = array<i64: 64, 1152>}, {transform_indices = @transform_1, window_bounds = array<i64: 1152, 128>}, {transform_indices = @transform_2, window_bounds = array<i64: 1, 128>}, {transform_indices = @transform_3, window_bounds = array<i64: 1, 128>}, {transform_indices = @transform_4, window_bounds = array<i64: 64, 128>}, {transform_indices = @transform_5, window_bounds = array<i64: 64, 128>}]} {
    %c0_i32 = arith.constant 0 : i32
    %0 = arith.cmpi eq, %arg2, %c0_i32 : i32
    %1 = arith.extui %0 : i1 to i32
    %c0_i32_0 = arith.constant 0 : i32
    %2 = arith.cmpi ne, %1, %c0_i32_0 : i32
    scf.if %2 {
      %cst_10 = arith.constant 0.000000e+00 : f32
      %12 = vector.broadcast %cst_10 : f32 to vector<64x128xf32>
      %c0_11 = arith.constant 0 : index
      %c0_12 = arith.constant 0 : index
      %13 = vector.load %arg9[%c0_11, %c0_12] : memref<64x128xf32, #tpu.memory_space<vmem>>, vector<64x128xf32>
      tpu.vector_store %arg9[%c0_11, %c0_12], %12 {strides = array<i32>} : memref<64x128xf32, #tpu.memory_space<vmem>>, vector<64x128xf32>,
    } else {
    }
    %c0 = arith.constant 0 : index
    %c0_1 = arith.constant 0 : index
    %3 = vector.load %arg3[%c0, %c0_1] : memref<64x1152xbf16, #tpu.memory_space<vmem>>, vector<64x1152xbf16>
    %c0_2 = arith.constant 0 : index
    %c0_3 = arith.constant 0 : index
    %4 = vector.load %arg9[%c0_2, %c0_3] : memref<64x128xf32, #tpu.memory_space<vmem>>, vector<64x128xf32>
    %c0_4 = arith.constant 0 : index
    %c0_5 = arith.constant 0 : index
    %5 = vector.load %arg4[%c0_4, %c0_5] : memref<1152x128xbf16, #tpu.memory_space<vmem>>, vector<1152x128xbf16>
    %cst = arith.constant dense<0.000000e+00> : vector<64x128xf32>
    %6 = tpu.matmul %3, %5, %cst {dimension_numbers = #tpu.dot_dimension_numbers<[1], [0], [0], [1], [0, 0, 1, 1], [], []>} : vector<64x1152xbf16>, vector<1152x128xbf16>, vector<64x128xf32> -> vector<64x128xf32>
    %7 = arith.addf %4, %6 : vector<64x128xf32>
    %c0_6 = arith.constant 0 : index
    %c0_7 = arith.constant 0 : index
    %8 = vector.load %arg9[%c0_6, %c0_7] : memref<64x128xf32, #tpu.memory_space<vmem>>, vector<64x128xf32>
    tpu.vector_store %arg9[%c0_6, %c0_7], %7 {strides = array<i32>} : memref<64x128xf32, #tpu.memory_space<vmem>>, vector<64x128xf32>,
    %c0_i32_8 = arith.constant 0 : i32
    %9 = arith.cmpi eq, %arg2, %c0_i32_8 : i32
    %10 = arith.extui %9 : i1 to i32
    %c0_i32_9 = arith.constant 0 : i32
    %11 = arith.cmpi ne, %10, %c0_i32_9 : i32
    scf.if %11 {
      %c0_10 = arith.constant 0 : index
      %c0_11 = arith.constant 0 : index
      %12 = vector.load %arg9[%c0_10, %c0_11] : memref<64x128xf32, #tpu.memory_space<vmem>>, vector<64x128xf32>
      %c0_12 = arith.constant 0 : index
      %c0_13 = arith.constant 0 : index
      %13 = vector.load %arg5[%c0_12, %c0_13] : memref<1x128xf32, #tpu.memory_space<vmem>>, vector<1x128xf32>
      %14 = vector.broadcast %13 : vector<1x128xf32> to vector<64x128xf32>
      %15 = arith.mulf %12, %14 : vector<64x128xf32>
      %c0_14 = arith.constant 0 : index
      %c0_15 = arith.constant 0 : index
      %16 = vector.load %arg6[%c0_14, %c0_15] : memref<1x128xf32, #tpu.memory_space<vmem>>, vector<1x128xf32>
      %17 = vector.broadcast %16 : vector<1x128xf32> to vector<64x128xf32>
      %18 = arith.addf %15, %17 : vector<64x128xf32>
      %c0_16 = arith.constant 0 : index
      %c0_17 = arith.constant 0 : index
      %19 = vector.load %arg7[%c0_16, %c0_17] : memref<64x128xbf16, #tpu.memory_space<vmem>>, vector<64x128xbf16>
      %20 = arith.extf %19 : vector<64x128xbf16> to vector<64x128xf32>
      %21 = arith.addf %18, %20 : vector<64x128xf32>
      %22 = arith.truncf %21 : vector<64x128xf32> to vector<64x128xbf16>
      %c0_18 = arith.constant 0 : index
      %c0_19 = arith.constant 0 : index
      %23 = vector.load %arg8[%c0_18, %c0_19] : memref<64x128xbf16, #tpu.memory_space<vmem>>, vector<64x128xbf16>
      tpu.vector_store %arg8[%c0_18, %c0_19], %22 {strides = array<i32>} : memref<64x128xbf16, #tpu.memory_space<vmem>>, vector<64x128xbf16>,
    } else {
    }
    return
  }
  func.func @transform_0(%arg0: i32, %arg1: i32, %arg2: i32) -> (i32, i32) {
    %c0_i32 = arith.constant 0 : i32
    return %arg0, %arg2 : i32, i32
  }
  func.func @transform_1(%arg0: i32, %arg1: i32, %arg2: i32) -> (i32, i32) {
    %c0_i32 = arith.constant 0 : i32
    return %arg2, %arg1 : i32, i32
  }
  func.func @transform_2(%arg0: i32, %arg1: i32, %arg2: i32) -> (i32, i32) {
    %c0_i32 = arith.constant 0 : i32
    %c0_i32_0 = arith.constant 0 : i32
    return %c0_i32, %arg1 : i32, i32
  }
  func.func @transform_3(%arg0: i32, %arg1: i32, %arg2: i32) -> (i32, i32) {
    %c0_i32 = arith.constant 0 : i32
    %c0_i32_0 = arith.constant 0 : i32
    return %c0_i32, %arg1 : i32, i32
  }
  func.func @transform_4(%arg0: i32, %arg1: i32, %arg2: i32) -> (i32, i32) {
    %c0_i32 = arith.constant 0 : i32
    return %arg0, %arg1 : i32, i32
  }
  func.func @transform_5(%arg0: i32, %arg1: i32, %arg2: i32) -> (i32, i32) {
    %c0_i32 = arith.constant 0 : i32
    return %arg0, %arg1 : i32, i32
  }
}

module attributes {stable_mosaic.version = 11 : i64} {
  func.func @_mm_kernel(%arg0: i32, %arg1: i32, %arg2: i32, %arg3: memref<64x128xbf16, #tpu.memory_space<vmem>>, %arg4: memref<128x128xbf16, #tpu.memory_space<vmem>>, %arg5: memref<1x128xf32, #tpu.memory_space<vmem>>, %arg6: memref<1x128xf32, #tpu.memory_space<vmem>>, %arg7: memref<1x128xf32, #tpu.memory_space<vmem>>, %arg8: memref<1x128xf32, #tpu.memory_space<vmem>>, %arg9: memref<64x128xbf16, #tpu.memory_space<vmem>>, %arg10: memref<64x128xf32, #tpu.memory_space<vmem>>) attributes {dimension_semantics = [#tpu.dimension_semantics<parallel>, #tpu.dimension_semantics<parallel>, #tpu.dimension_semantics<arbitrary>], iteration_bounds = array<i64: 2, 1, 1>, scalar_prefetch = 0 : i64, scratch_operands = 1 : i64, tpu.core_type = #tpu.core_type<tc>, window_params = [{transform_indices = @transform_0, window_bounds = array<i64: 64, 128>}, {transform_indices = @transform_1, window_bounds = array<i64: 128, 128>}, {transform_indices = @transform_2, window_bounds = array<i64: 1, 128>}, {transform_indices = @transform_3, window_bounds = array<i64: 1, 128>}, {transform_indices = @transform_4, window_bounds = array<i64: 1, 128>}, {transform_indices = @transform_5, window_bounds = array<i64: 1, 128>}, {transform_indices = @transform_6, window_bounds = array<i64: 64, 128>}]} {
    %c0_i32 = arith.constant 0 : i32
    %0 = arith.cmpi eq, %arg2, %c0_i32 : i32
    %1 = arith.extui %0 : i1 to i32
    %c0_i32_0 = arith.constant 0 : i32
    %2 = arith.cmpi ne, %1, %c0_i32_0 : i32
    scf.if %2 {
      %cst_15 = arith.constant 0.000000e+00 : f32
      %22 = vector.broadcast %cst_15 : f32 to vector<64x128xf32>
      %c0_16 = arith.constant 0 : index
      %c0_17 = arith.constant 0 : index
      %23 = vector.load %arg10[%c0_16, %c0_17] : memref<64x128xf32, #tpu.memory_space<vmem>>, vector<64x128xf32>
      tpu.vector_store %arg10[%c0_16, %c0_17], %22 {strides = array<i32>} : memref<64x128xf32, #tpu.memory_space<vmem>>, vector<64x128xf32>,
    } else {
    }
    %c0 = arith.constant 0 : index
    %c0_1 = arith.constant 0 : index
    %3 = vector.load %arg3[%c0, %c0_1] : memref<64x128xbf16, #tpu.memory_space<vmem>>, vector<64x128xbf16>
    %4 = arith.extf %3 : vector<64x128xbf16> to vector<64x128xf32>
    %c0_2 = arith.constant 0 : index
    %c0_3 = arith.constant 0 : index
    %5 = vector.load %arg5[%c0_2, %c0_3] : memref<1x128xf32, #tpu.memory_space<vmem>>, vector<1x128xf32>
    %6 = vector.broadcast %5 : vector<1x128xf32> to vector<64x128xf32>
    %7 = arith.mulf %4, %6 : vector<64x128xf32>
    %c0_4 = arith.constant 0 : index
    %c0_5 = arith.constant 0 : index
    %8 = vector.load %arg6[%c0_4, %c0_5] : memref<1x128xf32, #tpu.memory_space<vmem>>, vector<1x128xf32>
    %9 = vector.broadcast %8 : vector<1x128xf32> to vector<64x128xf32>
    %10 = arith.addf %7, %9 : vector<64x128xf32>
    %cst = arith.constant 0.000000e+00 : f32
    %11 = vector.broadcast %cst : f32 to vector<64x128xf32>
    %12 = arith.maximumf %10, %11 : vector<64x128xf32>
    %13 = arith.truncf %12 : vector<64x128xf32> to vector<64x128xbf16>
    %c0_6 = arith.constant 0 : index
    %c0_7 = arith.constant 0 : index
    %14 = vector.load %arg10[%c0_6, %c0_7] : memref<64x128xf32, #tpu.memory_space<vmem>>, vector<64x128xf32>
    %c0_8 = arith.constant 0 : index
    %c0_9 = arith.constant 0 : index
    %15 = vector.load %arg4[%c0_8, %c0_9] : memref<128x128xbf16, #tpu.memory_space<vmem>>, vector<128x128xbf16>
    %cst_10 = arith.constant dense<0.000000e+00> : vector<64x128xf32>
    %16 = tpu.matmul %13, %15, %cst_10 {dimension_numbers = #tpu.dot_dimension_numbers<[1], [0], [0], [1], [0, 0, 1, 1], [], []>} : vector<64x128xbf16>, vector<128x128xbf16>, vector<64x128xf32> -> vector<64x128xf32>
    %17 = arith.addf %14, %16 : vector<64x128xf32>
    %c0_11 = arith.constant 0 : index
    %c0_12 = arith.constant 0 : index
    %18 = vector.load %arg10[%c0_11, %c0_12] : memref<64x128xf32, #tpu.memory_space<vmem>>, vector<64x128xf32>
    tpu.vector_store %arg10[%c0_11, %c0_12], %17 {strides = array<i32>} : memref<64x128xf32, #tpu.memory_space<vmem>>, vector<64x128xf32>,
    %c0_i32_13 = arith.constant 0 : i32
    %19 = arith.cmpi eq, %arg2, %c0_i32_13 : i32
    %20 = arith.extui %19 : i1 to i32
    %c0_i32_14 = arith.constant 0 : i32
    %21 = arith.cmpi ne, %20, %c0_i32_14 : i32
    scf.if %21 {
      %c0_15 = arith.constant 0 : index
      %c0_16 = arith.constant 0 : index
      %22 = vector.load %arg10[%c0_15, %c0_16] : memref<64x128xf32, #tpu.memory_space<vmem>>, vector<64x128xf32>
      %c0_17 = arith.constant 0 : index
      %c0_18 = arith.constant 0 : index
      %23 = vector.load %arg7[%c0_17, %c0_18] : memref<1x128xf32, #tpu.memory_space<vmem>>, vector<1x128xf32>
      %24 = vector.broadcast %23 : vector<1x128xf32> to vector<64x128xf32>
      %25 = arith.mulf %22, %24 : vector<64x128xf32>
      %c0_19 = arith.constant 0 : index
      %c0_20 = arith.constant 0 : index
      %26 = vector.load %arg8[%c0_19, %c0_20] : memref<1x128xf32, #tpu.memory_space<vmem>>, vector<1x128xf32>
      %27 = vector.broadcast %26 : vector<1x128xf32> to vector<64x128xf32>
      %28 = arith.addf %25, %27 : vector<64x128xf32>
      %29 = arith.truncf %28 : vector<64x128xf32> to vector<64x128xbf16>
      %c0_21 = arith.constant 0 : index
      %c0_22 = arith.constant 0 : index
      %30 = vector.load %arg9[%c0_21, %c0_22] : memref<64x128xbf16, #tpu.memory_space<vmem>>, vector<64x128xbf16>
      tpu.vector_store %arg9[%c0_21, %c0_22], %29 {strides = array<i32>} : memref<64x128xbf16, #tpu.memory_space<vmem>>, vector<64x128xbf16>,
    } else {
    }
    return
  }
  func.func @transform_0(%arg0: i32, %arg1: i32, %arg2: i32) -> (i32, i32) {
    %c0_i32 = arith.constant 0 : i32
    return %arg0, %arg2 : i32, i32
  }
  func.func @transform_1(%arg0: i32, %arg1: i32, %arg2: i32) -> (i32, i32) {
    %c0_i32 = arith.constant 0 : i32
    return %arg2, %arg1 : i32, i32
  }
  func.func @transform_2(%arg0: i32, %arg1: i32, %arg2: i32) -> (i32, i32) {
    %c0_i32 = arith.constant 0 : i32
    %c0_i32_0 = arith.constant 0 : i32
    return %c0_i32, %arg2 : i32, i32
  }
  func.func @transform_3(%arg0: i32, %arg1: i32, %arg2: i32) -> (i32, i32) {
    %c0_i32 = arith.constant 0 : i32
    %c0_i32_0 = arith.constant 0 : i32
    return %c0_i32, %arg2 : i32, i32
  }
  func.func @transform_4(%arg0: i32, %arg1: i32, %arg2: i32) -> (i32, i32) {
    %c0_i32 = arith.constant 0 : i32
    %c0_i32_0 = arith.constant 0 : i32
    return %c0_i32, %arg1 : i32, i32
  }
  func.func @transform_5(%arg0: i32, %arg1: i32, %arg2: i32) -> (i32, i32) {
    %c0_i32 = arith.constant 0 : i32
    %c0_i32_0 = arith.constant 0 : i32
    return %c0_i32, %arg1 : i32, i32
  }
  func.func @transform_6(%arg0: i32, %arg1: i32, %arg2: i32) -> (i32, i32) {
    %c0_i32 = arith.constant 0 : i32
    return %arg0, %arg1 : i32, i32
  }
}

module attributes {stable_mosaic.version = 11 : i64} {
  func.func @_mm_kernel(%arg0: i32, %arg1: i32, %arg2: i32, %arg3: memref<32x1152xbf16, #tpu.memory_space<vmem>>, %arg4: memref<1152x128xbf16, #tpu.memory_space<vmem>>, %arg5: memref<1x128xf32, #tpu.memory_space<vmem>>, %arg6: memref<1x128xf32, #tpu.memory_space<vmem>>, %arg7: memref<32x128xbf16, #tpu.memory_space<vmem>>, %arg8: memref<32x128xf32, #tpu.memory_space<vmem>>) attributes {dimension_semantics = [#tpu.dimension_semantics<parallel>, #tpu.dimension_semantics<parallel>, #tpu.dimension_semantics<arbitrary>], iteration_bounds = array<i64: 1, 1, 1>, scalar_prefetch = 0 : i64, scratch_operands = 1 : i64, tpu.core_type = #tpu.core_type<tc>, window_params = [{transform_indices = @transform_0, window_bounds = array<i64: 32, 1152>}, {transform_indices = @transform_1, window_bounds = array<i64: 1152, 128>}, {transform_indices = @transform_2, window_bounds = array<i64: 1, 128>}, {transform_indices = @transform_3, window_bounds = array<i64: 1, 128>}, {transform_indices = @transform_4, window_bounds = array<i64: 32, 128>}]} {
    %c0_i32 = arith.constant 0 : i32
    %0 = arith.cmpi eq, %arg2, %c0_i32 : i32
    %1 = arith.extui %0 : i1 to i32
    %c0_i32_0 = arith.constant 0 : i32
    %2 = arith.cmpi ne, %1, %c0_i32_0 : i32
    scf.if %2 {
      %cst_10 = arith.constant 0.000000e+00 : f32
      %12 = vector.broadcast %cst_10 : f32 to vector<32x128xf32>
      %c0_11 = arith.constant 0 : index
      %c0_12 = arith.constant 0 : index
      %13 = vector.load %arg8[%c0_11, %c0_12] : memref<32x128xf32, #tpu.memory_space<vmem>>, vector<32x128xf32>
      tpu.vector_store %arg8[%c0_11, %c0_12], %12 {strides = array<i32>} : memref<32x128xf32, #tpu.memory_space<vmem>>, vector<32x128xf32>,
    } else {
    }
    %c0 = arith.constant 0 : index
    %c0_1 = arith.constant 0 : index
    %3 = vector.load %arg3[%c0, %c0_1] : memref<32x1152xbf16, #tpu.memory_space<vmem>>, vector<32x1152xbf16>
    %c0_2 = arith.constant 0 : index
    %c0_3 = arith.constant 0 : index
    %4 = vector.load %arg8[%c0_2, %c0_3] : memref<32x128xf32, #tpu.memory_space<vmem>>, vector<32x128xf32>
    %c0_4 = arith.constant 0 : index
    %c0_5 = arith.constant 0 : index
    %5 = vector.load %arg4[%c0_4, %c0_5] : memref<1152x128xbf16, #tpu.memory_space<vmem>>, vector<1152x128xbf16>
    %cst = arith.constant dense<0.000000e+00> : vector<32x128xf32>
    %6 = tpu.matmul %3, %5, %cst {dimension_numbers = #tpu.dot_dimension_numbers<[1], [0], [0], [1], [0, 0, 1, 1], [], []>} : vector<32x1152xbf16>, vector<1152x128xbf16>, vector<32x128xf32> -> vector<32x128xf32>
    %7 = arith.addf %4, %6 : vector<32x128xf32>
    %c0_6 = arith.constant 0 : index
    %c0_7 = arith.constant 0 : index
    %8 = vector.load %arg8[%c0_6, %c0_7] : memref<32x128xf32, #tpu.memory_space<vmem>>, vector<32x128xf32>
    tpu.vector_store %arg8[%c0_6, %c0_7], %7 {strides = array<i32>} : memref<32x128xf32, #tpu.memory_space<vmem>>, vector<32x128xf32>,
    %c0_i32_8 = arith.constant 0 : i32
    %9 = arith.cmpi eq, %arg2, %c0_i32_8 : i32
    %10 = arith.extui %9 : i1 to i32
    %c0_i32_9 = arith.constant 0 : i32
    %11 = arith.cmpi ne, %10, %c0_i32_9 : i32
    scf.if %11 {
      %c0_10 = arith.constant 0 : index
      %c0_11 = arith.constant 0 : index
      %12 = vector.load %arg8[%c0_10, %c0_11] : memref<32x128xf32, #tpu.memory_space<vmem>>, vector<32x128xf32>
      %c0_12 = arith.constant 0 : index
      %c0_13 = arith.constant 0 : index
      %13 = vector.load %arg5[%c0_12, %c0_13] : memref<1x128xf32, #tpu.memory_space<vmem>>, vector<1x128xf32>
      %14 = vector.broadcast %13 : vector<1x128xf32> to vector<32x128xf32>
      %15 = arith.mulf %12, %14 : vector<32x128xf32>
      %c0_14 = arith.constant 0 : index
      %c0_15 = arith.constant 0 : index
      %16 = vector.load %arg6[%c0_14, %c0_15] : memref<1x128xf32, #tpu.memory_space<vmem>>, vector<1x128xf32>
      %17 = vector.broadcast %16 : vector<1x128xf32> to vector<32x128xf32>
      %18 = arith.addf %15, %17 : vector<32x128xf32>
      %cst_16 = arith.constant 0.000000e+00 : f32
      %19 = vector.broadcast %cst_16 : f32 to vector<32x128xf32>
      %20 = arith.maximumf %18, %19 : vector<32x128xf32>
      %21 = arith.truncf %20 : vector<32x128xf32> to vector<32x128xbf16>
      %c0_17 = arith.constant 0 : index
      %c0_18 = arith.constant 0 : index
      %22 = vector.load %arg7[%c0_17, %c0_18] : memref<32x128xbf16, #tpu.memory_space<vmem>>, vector<32x128xbf16>
      tpu.vector_store %arg7[%c0_17, %c0_18], %21 {strides = array<i32>} : memref<32x128xbf16, #tpu.memory_space<vmem>>, vector<32x128xbf16>,
    } else {
    }
    return
  }
  func.func @transform_0(%arg0: i32, %arg1: i32, %arg2: i32) -> (i32, i32) {
    %c0_i32 = arith.constant 0 : i32
    return %arg0, %arg2 : i32, i32
  }
  func.func @transform_1(%arg0: i32, %arg1: i32, %arg2: i32) -> (i32, i32) {
    %c0_i32 = arith.constant 0 : i32
    return %arg2, %arg1 : i32, i32
  }
  func.func @transform_2(%arg0: i32, %arg1: i32, %arg2: i32) -> (i32, i32) {
    %c0_i32 = arith.constant 0 : i32
    %c0_i32_0 = arith.constant 0 : i32
    return %c0_i32, %arg1 : i32, i32
  }
  func.func @transform_3(%arg0: i32, %arg1: i32, %arg2: i32) -> (i32, i32) {
    %c0_i32 = arith.constant 0 : i32
    %c0_i32_0 = arith.constant 0 : i32
    return %c0_i32, %arg1 : i32, i32
  }
  func.func @transform_4(%arg0: i32, %arg1: i32, %arg2: i32) -> (i32, i32) {
    %c0_i32 = arith.constant 0 : i32
    return %arg0, %arg1 : i32, i32
  }
}

module attributes {stable_mosaic.version = 11 : i64} {
  func.func @_mm_kernel(%arg0: i32, %arg1: i32, %arg2: i32, %arg3: memref<32x128xbf16, #tpu.memory_space<vmem>>, %arg4: memref<128x128xbf16, #tpu.memory_space<vmem>>, %arg5: memref<1x128xf32, #tpu.memory_space<vmem>>, %arg6: memref<1x128xf32, #tpu.memory_space<vmem>>, %arg7: memref<1x128xf32, #tpu.memory_space<vmem>>, %arg8: memref<1x128xf32, #tpu.memory_space<vmem>>, %arg9: memref<32x128xbf16, #tpu.memory_space<vmem>>, %arg10: memref<32x128xf32, #tpu.memory_space<vmem>>) attributes {dimension_semantics = [#tpu.dimension_semantics<parallel>, #tpu.dimension_semantics<parallel>, #tpu.dimension_semantics<arbitrary>], iteration_bounds = array<i64: 1, 1, 1>, scalar_prefetch = 0 : i64, scratch_operands = 1 : i64, tpu.core_type = #tpu.core_type<tc>, window_params = [{transform_indices = @transform_0, window_bounds = array<i64: 32, 128>}, {transform_indices = @transform_1, window_bounds = array<i64: 128, 128>}, {transform_indices = @transform_2, window_bounds = array<i64: 1, 128>}, {transform_indices = @transform_3, window_bounds = array<i64: 1, 128>}, {transform_indices = @transform_4, window_bounds = array<i64: 1, 128>}, {transform_indices = @transform_5, window_bounds = array<i64: 1, 128>}, {transform_indices = @transform_6, window_bounds = array<i64: 32, 128>}]} {
    %c0_i32 = arith.constant 0 : i32
    %0 = arith.cmpi eq, %arg2, %c0_i32 : i32
    %1 = arith.extui %0 : i1 to i32
    %c0_i32_0 = arith.constant 0 : i32
    %2 = arith.cmpi ne, %1, %c0_i32_0 : i32
    scf.if %2 {
      %cst_15 = arith.constant 0.000000e+00 : f32
      %22 = vector.broadcast %cst_15 : f32 to vector<32x128xf32>
      %c0_16 = arith.constant 0 : index
      %c0_17 = arith.constant 0 : index
      %23 = vector.load %arg10[%c0_16, %c0_17] : memref<32x128xf32, #tpu.memory_space<vmem>>, vector<32x128xf32>
      tpu.vector_store %arg10[%c0_16, %c0_17], %22 {strides = array<i32>} : memref<32x128xf32, #tpu.memory_space<vmem>>, vector<32x128xf32>,
    } else {
    }
    %c0 = arith.constant 0 : index
    %c0_1 = arith.constant 0 : index
    %3 = vector.load %arg3[%c0, %c0_1] : memref<32x128xbf16, #tpu.memory_space<vmem>>, vector<32x128xbf16>
    %4 = arith.extf %3 : vector<32x128xbf16> to vector<32x128xf32>
    %c0_2 = arith.constant 0 : index
    %c0_3 = arith.constant 0 : index
    %5 = vector.load %arg5[%c0_2, %c0_3] : memref<1x128xf32, #tpu.memory_space<vmem>>, vector<1x128xf32>
    %6 = vector.broadcast %5 : vector<1x128xf32> to vector<32x128xf32>
    %7 = arith.mulf %4, %6 : vector<32x128xf32>
    %c0_4 = arith.constant 0 : index
    %c0_5 = arith.constant 0 : index
    %8 = vector.load %arg6[%c0_4, %c0_5] : memref<1x128xf32, #tpu.memory_space<vmem>>, vector<1x128xf32>
    %9 = vector.broadcast %8 : vector<1x128xf32> to vector<32x128xf32>
    %10 = arith.addf %7, %9 : vector<32x128xf32>
    %cst = arith.constant 0.000000e+00 : f32
    %11 = vector.broadcast %cst : f32 to vector<32x128xf32>
    %12 = arith.maximumf %10, %11 : vector<32x128xf32>
    %13 = arith.truncf %12 : vector<32x128xf32> to vector<32x128xbf16>
    %c0_6 = arith.constant 0 : index
    %c0_7 = arith.constant 0 : index
    %14 = vector.load %arg10[%c0_6, %c0_7] : memref<32x128xf32, #tpu.memory_space<vmem>>, vector<32x128xf32>
    %c0_8 = arith.constant 0 : index
    %c0_9 = arith.constant 0 : index
    %15 = vector.load %arg4[%c0_8, %c0_9] : memref<128x128xbf16, #tpu.memory_space<vmem>>, vector<128x128xbf16>
    %cst_10 = arith.constant dense<0.000000e+00> : vector<32x128xf32>
    %16 = tpu.matmul %13, %15, %cst_10 {dimension_numbers = #tpu.dot_dimension_numbers<[1], [0], [0], [1], [0, 0, 1, 1], [], []>} : vector<32x128xbf16>, vector<128x128xbf16>, vector<32x128xf32> -> vector<32x128xf32>
    %17 = arith.addf %14, %16 : vector<32x128xf32>
    %c0_11 = arith.constant 0 : index
    %c0_12 = arith.constant 0 : index
    %18 = vector.load %arg10[%c0_11, %c0_12] : memref<32x128xf32, #tpu.memory_space<vmem>>, vector<32x128xf32>
    tpu.vector_store %arg10[%c0_11, %c0_12], %17 {strides = array<i32>} : memref<32x128xf32, #tpu.memory_space<vmem>>, vector<32x128xf32>,
    %c0_i32_13 = arith.constant 0 : i32
    %19 = arith.cmpi eq, %arg2, %c0_i32_13 : i32
    %20 = arith.extui %19 : i1 to i32
    %c0_i32_14 = arith.constant 0 : i32
    %21 = arith.cmpi ne, %20, %c0_i32_14 : i32
    scf.if %21 {
      %c0_15 = arith.constant 0 : index
      %c0_16 = arith.constant 0 : index
      %22 = vector.load %arg10[%c0_15, %c0_16] : memref<32x128xf32, #tpu.memory_space<vmem>>, vector<32x128xf32>
      %c0_17 = arith.constant 0 : index
      %c0_18 = arith.constant 0 : index
      %23 = vector.load %arg7[%c0_17, %c0_18] : memref<1x128xf32, #tpu.memory_space<vmem>>, vector<1x128xf32>
      %24 = vector.broadcast %23 : vector<1x128xf32> to vector<32x128xf32>
      %25 = arith.mulf %22, %24 : vector<32x128xf32>
      %c0_19 = arith.constant 0 : index
      %c0_20 = arith.constant 0 : index
      %26 = vector.load %arg8[%c0_19, %c0_20] : memref<1x128xf32, #tpu.memory_space<vmem>>, vector<1x128xf32>
      %27 = vector.broadcast %26 : vector<1x128xf32> to vector<32x128xf32>
      %28 = arith.addf %25, %27 : vector<32x128xf32>
      %29 = arith.truncf %28 : vector<32x128xf32> to vector<32x128xbf16>
      %c0_21 = arith.constant 0 : index
      %c0_22 = arith.constant 0 : index
      %30 = vector.load %arg9[%c0_21, %c0_22] : memref<32x128xbf16, #tpu.memory_space<vmem>>, vector<32x128xbf16>
      tpu.vector_store %arg9[%c0_21, %c0_22], %29 {strides = array<i32>} : memref<32x128xbf16, #tpu.memory_space<vmem>>, vector<32x128xbf16>,
    } else {
    }
    return
  }
  func.func @transform_0(%arg0: i32, %arg1: i32, %arg2: i32) -> (i32, i32) {
    %c0_i32 = arith.constant 0 : i32
    return %arg0, %arg2 : i32, i32
  }
  func.func @transform_1(%arg0: i32, %arg1: i32, %arg2: i32) -> (i32, i32) {
    %c0_i32 = arith.constant 0 : i32
    return %arg2, %arg1 : i32, i32
  }
  func.func @transform_2(%arg0: i32, %arg1: i32, %arg2: i32) -> (i32, i32) {
    %c0_i32 = arith.constant 0 : i32
    %c0_i32_0 = arith.constant 0 : i32
    return %c0_i32, %arg2 : i32, i32
  }
  func.func @transform_3(%arg0: i32, %arg1: i32, %arg2: i32) -> (i32, i32) {
    %c0_i32 = arith.constant 0 : i32
    %c0_i32_0 = arith.constant 0 : i32
    return %c0_i32, %arg2 : i32, i32
  }
  func.func @transform_4(%arg0: i32, %arg1: i32, %arg2: i32) -> (i32, i32) {
    %c0_i32 = arith.constant 0 : i32
    %c0_i32_0 = arith.constant 0 : i32
    return %c0_i32, %arg1 : i32, i32
  }
  func.func @transform_5(%arg0: i32, %arg1: i32, %arg2: i32) -> (i32, i32) {
    %c0_i32 = arith.constant 0 : i32
    %c0_i32_0 = arith.constant 0 : i32
    return %c0_i32, %arg1 : i32, i32
  }
  func.func @transform_6(%arg0: i32, %arg1: i32, %arg2: i32) -> (i32, i32) {
    %c0_i32 = arith.constant 0 : i32
    return %arg0, %arg1 : i32, i32
  }
}

module attributes {stable_mosaic.version = 11 : i64} {
  func.func @_mm_kernel(%arg0: i32, %arg1: i32, %arg2: i32, %arg3: memref<32x1152xbf16, #tpu.memory_space<vmem>>, %arg4: memref<1152x128xbf16, #tpu.memory_space<vmem>>, %arg5: memref<1x128xf32, #tpu.memory_space<vmem>>, %arg6: memref<1x128xf32, #tpu.memory_space<vmem>>, %arg7: memref<32x128xbf16, #tpu.memory_space<vmem>>, %arg8: memref<32x128xbf16, #tpu.memory_space<vmem>>, %arg9: memref<32x128xf32, #tpu.memory_space<vmem>>) attributes {dimension_semantics = [#tpu.dimension_semantics<parallel>, #tpu.dimension_semantics<parallel>, #tpu.dimension_semantics<arbitrary>], iteration_bounds = array<i64: 1, 1, 1>, scalar_prefetch = 0 : i64, scratch_operands = 1 : i64, tpu.core_type = #tpu.core_type<tc>, window_params = [{transform_indices = @transform_0, window_bounds = array<i64: 32, 1152>}, {transform_indices = @transform_1, window_bounds = array<i64: 1152, 128>}, {transform_indices = @transform_2, window_bounds = array<i64: 1, 128>}, {transform_indices = @transform_3, window_bounds = array<i64: 1, 128>}, {transform_indices = @transform_4, window_bounds = array<i64: 32, 128>}, {transform_indices = @transform_5, window_bounds = array<i64: 32, 128>}]} {
    %c0_i32 = arith.constant 0 : i32
    %0 = arith.cmpi eq, %arg2, %c0_i32 : i32
    %1 = arith.extui %0 : i1 to i32
    %c0_i32_0 = arith.constant 0 : i32
    %2 = arith.cmpi ne, %1, %c0_i32_0 : i32
    scf.if %2 {
      %cst_10 = arith.constant 0.000000e+00 : f32
      %12 = vector.broadcast %cst_10 : f32 to vector<32x128xf32>
      %c0_11 = arith.constant 0 : index
      %c0_12 = arith.constant 0 : index
      %13 = vector.load %arg9[%c0_11, %c0_12] : memref<32x128xf32, #tpu.memory_space<vmem>>, vector<32x128xf32>
      tpu.vector_store %arg9[%c0_11, %c0_12], %12 {strides = array<i32>} : memref<32x128xf32, #tpu.memory_space<vmem>>, vector<32x128xf32>,
    } else {
    }
    %c0 = arith.constant 0 : index
    %c0_1 = arith.constant 0 : index
    %3 = vector.load %arg3[%c0, %c0_1] : memref<32x1152xbf16, #tpu.memory_space<vmem>>, vector<32x1152xbf16>
    %c0_2 = arith.constant 0 : index
    %c0_3 = arith.constant 0 : index
    %4 = vector.load %arg9[%c0_2, %c0_3] : memref<32x128xf32, #tpu.memory_space<vmem>>, vector<32x128xf32>
    %c0_4 = arith.constant 0 : index
    %c0_5 = arith.constant 0 : index
    %5 = vector.load %arg4[%c0_4, %c0_5] : memref<1152x128xbf16, #tpu.memory_space<vmem>>, vector<1152x128xbf16>
    %cst = arith.constant dense<0.000000e+00> : vector<32x128xf32>
    %6 = tpu.matmul %3, %5, %cst {dimension_numbers = #tpu.dot_dimension_numbers<[1], [0], [0], [1], [0, 0, 1, 1], [], []>} : vector<32x1152xbf16>, vector<1152x128xbf16>, vector<32x128xf32> -> vector<32x128xf32>
    %7 = arith.addf %4, %6 : vector<32x128xf32>
    %c0_6 = arith.constant 0 : index
    %c0_7 = arith.constant 0 : index
    %8 = vector.load %arg9[%c0_6, %c0_7] : memref<32x128xf32, #tpu.memory_space<vmem>>, vector<32x128xf32>
    tpu.vector_store %arg9[%c0_6, %c0_7], %7 {strides = array<i32>} : memref<32x128xf32, #tpu.memory_space<vmem>>, vector<32x128xf32>,
    %c0_i32_8 = arith.constant 0 : i32
    %9 = arith.cmpi eq, %arg2, %c0_i32_8 : i32
    %10 = arith.extui %9 : i1 to i32
    %c0_i32_9 = arith.constant 0 : i32
    %11 = arith.cmpi ne, %10, %c0_i32_9 : i32
    scf.if %11 {
      %c0_10 = arith.constant 0 : index
      %c0_11 = arith.constant 0 : index
      %12 = vector.load %arg9[%c0_10, %c0_11] : memref<32x128xf32, #tpu.memory_space<vmem>>, vector<32x128xf32>
      %c0_12 = arith.constant 0 : index
      %c0_13 = arith.constant 0 : index
      %13 = vector.load %arg5[%c0_12, %c0_13] : memref<1x128xf32, #tpu.memory_space<vmem>>, vector<1x128xf32>
      %14 = vector.broadcast %13 : vector<1x128xf32> to vector<32x128xf32>
      %15 = arith.mulf %12, %14 : vector<32x128xf32>
      %c0_14 = arith.constant 0 : index
      %c0_15 = arith.constant 0 : index
      %16 = vector.load %arg6[%c0_14, %c0_15] : memref<1x128xf32, #tpu.memory_space<vmem>>, vector<1x128xf32>
      %17 = vector.broadcast %16 : vector<1x128xf32> to vector<32x128xf32>
      %18 = arith.addf %15, %17 : vector<32x128xf32>
      %c0_16 = arith.constant 0 : index
      %c0_17 = arith.constant 0 : index
      %19 = vector.load %arg7[%c0_16, %c0_17] : memref<32x128xbf16, #tpu.memory_space<vmem>>, vector<32x128xbf16>
      %20 = arith.extf %19 : vector<32x128xbf16> to vector<32x128xf32>
      %21 = arith.addf %18, %20 : vector<32x128xf32>
      %22 = arith.truncf %21 : vector<32x128xf32> to vector<32x128xbf16>
      %c0_18 = arith.constant 0 : index
      %c0_19 = arith.constant 0 : index
      %23 = vector.load %arg8[%c0_18, %c0_19] : memref<32x128xbf16, #tpu.memory_space<vmem>>, vector<32x128xbf16>
      tpu.vector_store %arg8[%c0_18, %c0_19], %22 {strides = array<i32>} : memref<32x128xbf16, #tpu.memory_space<vmem>>, vector<32x128xbf16>,
    } else {
    }
    return
  }
  func.func @transform_0(%arg0: i32, %arg1: i32, %arg2: i32) -> (i32, i32) {
    %c0_i32 = arith.constant 0 : i32
    return %arg0, %arg2 : i32, i32
  }
  func.func @transform_1(%arg0: i32, %arg1: i32, %arg2: i32) -> (i32, i32) {
    %c0_i32 = arith.constant 0 : i32
    return %arg2, %arg1 : i32, i32
  }
  func.func @transform_2(%arg0: i32, %arg1: i32, %arg2: i32) -> (i32, i32) {
    %c0_i32 = arith.constant 0 : i32
    %c0_i32_0 = arith.constant 0 : i32
    return %c0_i32, %arg1 : i32, i32
  }
  func.func @transform_3(%arg0: i32, %arg1: i32, %arg2: i32) -> (i32, i32) {
    %c0_i32 = arith.constant 0 : i32
    %c0_i32_0 = arith.constant 0 : i32
    return %c0_i32, %arg1 : i32, i32
  }
  func.func @transform_4(%arg0: i32, %arg1: i32, %arg2: i32) -> (i32, i32) {
    %c0_i32 = arith.constant 0 : i32
    return %arg0, %arg1 : i32, i32
  }
  func.func @transform_5(%arg0: i32, %arg1: i32, %arg2: i32) -> (i32, i32) {
    %c0_i32 = arith.constant 0 : i32
    return %arg0, %arg1 : i32, i32
  }
}

module attributes {stable_mosaic.version = 11 : i64} {
  func.func @_mm_kernel(%arg0: i32, %arg1: i32, %arg2: i32, %arg3: memref<8x1152xbf16, #tpu.memory_space<vmem>>, %arg4: memref<1152x128xbf16, #tpu.memory_space<vmem>>, %arg5: memref<1x128xf32, #tpu.memory_space<vmem>>, %arg6: memref<1x128xf32, #tpu.memory_space<vmem>>, %arg7: memref<8x128xbf16, #tpu.memory_space<vmem>>, %arg8: memref<8x128xf32, #tpu.memory_space<vmem>>) attributes {dimension_semantics = [#tpu.dimension_semantics<parallel>, #tpu.dimension_semantics<parallel>, #tpu.dimension_semantics<arbitrary>], iteration_bounds = array<i64: 1, 1, 1>, scalar_prefetch = 0 : i64, scratch_operands = 1 : i64, tpu.core_type = #tpu.core_type<tc>, window_params = [{transform_indices = @transform_0, window_bounds = array<i64: 8, 1152>}, {transform_indices = @transform_1, window_bounds = array<i64: 1152, 128>}, {transform_indices = @transform_2, window_bounds = array<i64: 1, 128>}, {transform_indices = @transform_3, window_bounds = array<i64: 1, 128>}, {transform_indices = @transform_4, window_bounds = array<i64: 8, 128>}]} {
    %c0_i32 = arith.constant 0 : i32
    %0 = arith.cmpi eq, %arg2, %c0_i32 : i32
    %1 = arith.extui %0 : i1 to i32
    %c0_i32_0 = arith.constant 0 : i32
    %2 = arith.cmpi ne, %1, %c0_i32_0 : i32
    scf.if %2 {
      %cst_10 = arith.constant 0.000000e+00 : f32
      %12 = vector.broadcast %cst_10 : f32 to vector<8x128xf32>
      %c0_11 = arith.constant 0 : index
      %c0_12 = arith.constant 0 : index
      %13 = vector.load %arg8[%c0_11, %c0_12] : memref<8x128xf32, #tpu.memory_space<vmem>>, vector<8x128xf32>
      tpu.vector_store %arg8[%c0_11, %c0_12], %12 {strides = array<i32>} : memref<8x128xf32, #tpu.memory_space<vmem>>, vector<8x128xf32>,
    } else {
    }
    %c0 = arith.constant 0 : index
    %c0_1 = arith.constant 0 : index
    %3 = vector.load %arg3[%c0, %c0_1] : memref<8x1152xbf16, #tpu.memory_space<vmem>>, vector<8x1152xbf16>
    %c0_2 = arith.constant 0 : index
    %c0_3 = arith.constant 0 : index
    %4 = vector.load %arg8[%c0_2, %c0_3] : memref<8x128xf32, #tpu.memory_space<vmem>>, vector<8x128xf32>
    %c0_4 = arith.constant 0 : index
    %c0_5 = arith.constant 0 : index
    %5 = vector.load %arg4[%c0_4, %c0_5] : memref<1152x128xbf16, #tpu.memory_space<vmem>>, vector<1152x128xbf16>
    %cst = arith.constant dense<0.000000e+00> : vector<8x128xf32>
    %6 = tpu.matmul %3, %5, %cst {dimension_numbers = #tpu.dot_dimension_numbers<[1], [0], [0], [1], [0, 0, 1, 1], [], []>} : vector<8x1152xbf16>, vector<1152x128xbf16>, vector<8x128xf32> -> vector<8x128xf32>
    %7 = arith.addf %4, %6 : vector<8x128xf32>
    %c0_6 = arith.constant 0 : index
    %c0_7 = arith.constant 0 : index
    %8 = vector.load %arg8[%c0_6, %c0_7] : memref<8x128xf32, #tpu.memory_space<vmem>>, vector<8x128xf32>
    tpu.vector_store %arg8[%c0_6, %c0_7], %7 {strides = array<i32>} : memref<8x128xf32, #tpu.memory_space<vmem>>, vector<8x128xf32>,
    %c0_i32_8 = arith.constant 0 : i32
    %9 = arith.cmpi eq, %arg2, %c0_i32_8 : i32
    %10 = arith.extui %9 : i1 to i32
    %c0_i32_9 = arith.constant 0 : i32
    %11 = arith.cmpi ne, %10, %c0_i32_9 : i32
    scf.if %11 {
      %c0_10 = arith.constant 0 : index
      %c0_11 = arith.constant 0 : index
      %12 = vector.load %arg8[%c0_10, %c0_11] : memref<8x128xf32, #tpu.memory_space<vmem>>, vector<8x128xf32>
      %c0_12 = arith.constant 0 : index
      %c0_13 = arith.constant 0 : index
      %13 = vector.load %arg5[%c0_12, %c0_13] : memref<1x128xf32, #tpu.memory_space<vmem>>, vector<1x128xf32>
      %14 = vector.broadcast %13 : vector<1x128xf32> to vector<8x128xf32>
      %15 = arith.mulf %12, %14 : vector<8x128xf32>
      %c0_14 = arith.constant 0 : index
      %c0_15 = arith.constant 0 : index
      %16 = vector.load %arg6[%c0_14, %c0_15] : memref<1x128xf32, #tpu.memory_space<vmem>>, vector<1x128xf32>
      %17 = vector.broadcast %16 : vector<1x128xf32> to vector<8x128xf32>
      %18 = arith.addf %15, %17 : vector<8x128xf32>
      %cst_16 = arith.constant 0.000000e+00 : f32
      %19 = vector.broadcast %cst_16 : f32 to vector<8x128xf32>
      %20 = arith.maximumf %18, %19 : vector<8x128xf32>
      %21 = arith.truncf %20 : vector<8x128xf32> to vector<8x128xbf16>
      %c0_17 = arith.constant 0 : index
      %c0_18 = arith.constant 0 : index
      %22 = vector.load %arg7[%c0_17, %c0_18] : memref<8x128xbf16, #tpu.memory_space<vmem>>, vector<8x128xbf16>
      tpu.vector_store %arg7[%c0_17, %c0_18], %21 {strides = array<i32>} : memref<8x128xbf16, #tpu.memory_space<vmem>>, vector<8x128xbf16>,
    } else {
    }
    return
  }
  func.func @transform_0(%arg0: i32, %arg1: i32, %arg2: i32) -> (i32, i32) {
    %c0_i32 = arith.constant 0 : i32
    return %arg0, %arg2 : i32, i32
  }
  func.func @transform_1(%arg0: i32, %arg1: i32, %arg2: i32) -> (i32, i32) {
    %c0_i32 = arith.constant 0 : i32
    return %arg2, %arg1 : i32, i32
  }
  func.func @transform_2(%arg0: i32, %arg1: i32, %arg2: i32) -> (i32, i32) {
    %c0_i32 = arith.constant 0 : i32
    %c0_i32_0 = arith.constant 0 : i32
    return %c0_i32, %arg1 : i32, i32
  }
  func.func @transform_3(%arg0: i32, %arg1: i32, %arg2: i32) -> (i32, i32) {
    %c0_i32 = arith.constant 0 : i32
    %c0_i32_0 = arith.constant 0 : i32
    return %c0_i32, %arg1 : i32, i32
  }
  func.func @transform_4(%arg0: i32, %arg1: i32, %arg2: i32) -> (i32, i32) {
    %c0_i32 = arith.constant 0 : i32
    return %arg0, %arg1 : i32, i32
  }
}

module attributes {stable_mosaic.version = 11 : i64} {
  func.func @_mm_kernel(%arg0: i32, %arg1: i32, %arg2: i32, %arg3: memref<8x128xbf16, #tpu.memory_space<vmem>>, %arg4: memref<128x128xbf16, #tpu.memory_space<vmem>>, %arg5: memref<1x128xf32, #tpu.memory_space<vmem>>, %arg6: memref<1x128xf32, #tpu.memory_space<vmem>>, %arg7: memref<1x128xf32, #tpu.memory_space<vmem>>, %arg8: memref<1x128xf32, #tpu.memory_space<vmem>>, %arg9: memref<8x128xbf16, #tpu.memory_space<vmem>>, %arg10: memref<8x128xf32, #tpu.memory_space<vmem>>) attributes {dimension_semantics = [#tpu.dimension_semantics<parallel>, #tpu.dimension_semantics<parallel>, #tpu.dimension_semantics<arbitrary>], iteration_bounds = array<i64: 1, 1, 1>, scalar_prefetch = 0 : i64, scratch_operands = 1 : i64, tpu.core_type = #tpu.core_type<tc>, window_params = [{transform_indices = @transform_0, window_bounds = array<i64: 8, 128>}, {transform_indices = @transform_1, window_bounds = array<i64: 128, 128>}, {transform_indices = @transform_2, window_bounds = array<i64: 1, 128>}, {transform_indices = @transform_3, window_bounds = array<i64: 1, 128>}, {transform_indices = @transform_4, window_bounds = array<i64: 1, 128>}, {transform_indices = @transform_5, window_bounds = array<i64: 1, 128>}, {transform_indices = @transform_6, window_bounds = array<i64: 8, 128>}]} {
    %c0_i32 = arith.constant 0 : i32
    %0 = arith.cmpi eq, %arg2, %c0_i32 : i32
    %1 = arith.extui %0 : i1 to i32
    %c0_i32_0 = arith.constant 0 : i32
    %2 = arith.cmpi ne, %1, %c0_i32_0 : i32
    scf.if %2 {
      %cst_15 = arith.constant 0.000000e+00 : f32
      %22 = vector.broadcast %cst_15 : f32 to vector<8x128xf32>
      %c0_16 = arith.constant 0 : index
      %c0_17 = arith.constant 0 : index
      %23 = vector.load %arg10[%c0_16, %c0_17] : memref<8x128xf32, #tpu.memory_space<vmem>>, vector<8x128xf32>
      tpu.vector_store %arg10[%c0_16, %c0_17], %22 {strides = array<i32>} : memref<8x128xf32, #tpu.memory_space<vmem>>, vector<8x128xf32>,
    } else {
    }
    %c0 = arith.constant 0 : index
    %c0_1 = arith.constant 0 : index
    %3 = vector.load %arg3[%c0, %c0_1] : memref<8x128xbf16, #tpu.memory_space<vmem>>, vector<8x128xbf16>
    %4 = arith.extf %3 : vector<8x128xbf16> to vector<8x128xf32>
    %c0_2 = arith.constant 0 : index
    %c0_3 = arith.constant 0 : index
    %5 = vector.load %arg5[%c0_2, %c0_3] : memref<1x128xf32, #tpu.memory_space<vmem>>, vector<1x128xf32>
    %6 = vector.broadcast %5 : vector<1x128xf32> to vector<8x128xf32>
    %7 = arith.mulf %4, %6 : vector<8x128xf32>
    %c0_4 = arith.constant 0 : index
    %c0_5 = arith.constant 0 : index
    %8 = vector.load %arg6[%c0_4, %c0_5] : memref<1x128xf32, #tpu.memory_space<vmem>>, vector<1x128xf32>
    %9 = vector.broadcast %8 : vector<1x128xf32> to vector<8x128xf32>
    %10 = arith.addf %7, %9 : vector<8x128xf32>
    %cst = arith.constant 0.000000e+00 : f32
    %11 = vector.broadcast %cst : f32 to vector<8x128xf32>
    %12 = arith.maximumf %10, %11 : vector<8x128xf32>
    %13 = arith.truncf %12 : vector<8x128xf32> to vector<8x128xbf16>
    %c0_6 = arith.constant 0 : index
    %c0_7 = arith.constant 0 : index
    %14 = vector.load %arg10[%c0_6, %c0_7] : memref<8x128xf32, #tpu.memory_space<vmem>>, vector<8x128xf32>
    %c0_8 = arith.constant 0 : index
    %c0_9 = arith.constant 0 : index
    %15 = vector.load %arg4[%c0_8, %c0_9] : memref<128x128xbf16, #tpu.memory_space<vmem>>, vector<128x128xbf16>
    %cst_10 = arith.constant dense<0.000000e+00> : vector<8x128xf32>
    %16 = tpu.matmul %13, %15, %cst_10 {dimension_numbers = #tpu.dot_dimension_numbers<[1], [0], [0], [1], [0, 0, 1, 1], [], []>} : vector<8x128xbf16>, vector<128x128xbf16>, vector<8x128xf32> -> vector<8x128xf32>
    %17 = arith.addf %14, %16 : vector<8x128xf32>
    %c0_11 = arith.constant 0 : index
    %c0_12 = arith.constant 0 : index
    %18 = vector.load %arg10[%c0_11, %c0_12] : memref<8x128xf32, #tpu.memory_space<vmem>>, vector<8x128xf32>
    tpu.vector_store %arg10[%c0_11, %c0_12], %17 {strides = array<i32>} : memref<8x128xf32, #tpu.memory_space<vmem>>, vector<8x128xf32>,
    %c0_i32_13 = arith.constant 0 : i32
    %19 = arith.cmpi eq, %arg2, %c0_i32_13 : i32
    %20 = arith.extui %19 : i1 to i32
    %c0_i32_14 = arith.constant 0 : i32
    %21 = arith.cmpi ne, %20, %c0_i32_14 : i32
    scf.if %21 {
      %c0_15 = arith.constant 0 : index
      %c0_16 = arith.constant 0 : index
      %22 = vector.load %arg10[%c0_15, %c0_16] : memref<8x128xf32, #tpu.memory_space<vmem>>, vector<8x128xf32>
      %c0_17 = arith.constant 0 : index
      %c0_18 = arith.constant 0 : index
      %23 = vector.load %arg7[%c0_17, %c0_18] : memref<1x128xf32, #tpu.memory_space<vmem>>, vector<1x128xf32>
      %24 = vector.broadcast %23 : vector<1x128xf32> to vector<8x128xf32>
      %25 = arith.mulf %22, %24 : vector<8x128xf32>
      %c0_19 = arith.constant 0 : index
      %c0_20 = arith.constant 0 : index
      %26 = vector.load %arg8[%c0_19, %c0_20] : memref<1x128xf32, #tpu.memory_space<vmem>>, vector<1x128xf32>
      %27 = vector.broadcast %26 : vector<1x128xf32> to vector<8x128xf32>
      %28 = arith.addf %25, %27 : vector<8x128xf32>
      %29 = arith.truncf %28 : vector<8x128xf32> to vector<8x128xbf16>
      %c0_21 = arith.constant 0 : index
      %c0_22 = arith.constant 0 : index
      %30 = vector.load %arg9[%c0_21, %c0_22] : memref<8x128xbf16, #tpu.memory_space<vmem>>, vector<8x128xbf16>
      tpu.vector_store %arg9[%c0_21, %c0_22], %29 {strides = array<i32>} : memref<8x128xbf16, #tpu.memory_space<vmem>>, vector<8x128xbf16>,
    } else {
    }
    return
  }
  func.func @transform_0(%arg0: i32, %arg1: i32, %arg2: i32) -> (i32, i32) {
    %c0_i32 = arith.constant 0 : i32
    return %arg0, %arg2 : i32, i32
  }
  func.func @transform_1(%arg0: i32, %arg1: i32, %arg2: i32) -> (i32, i32) {
    %c0_i32 = arith.constant 0 : i32
    return %arg2, %arg1 : i32, i32
  }
  func.func @transform_2(%arg0: i32, %arg1: i32, %arg2: i32) -> (i32, i32) {
    %c0_i32 = arith.constant 0 : i32
    %c0_i32_0 = arith.constant 0 : i32
    return %c0_i32, %arg2 : i32, i32
  }
  func.func @transform_3(%arg0: i32, %arg1: i32, %arg2: i32) -> (i32, i32) {
    %c0_i32 = arith.constant 0 : i32
    %c0_i32_0 = arith.constant 0 : i32
    return %c0_i32, %arg2 : i32, i32
  }
  func.func @transform_4(%arg0: i32, %arg1: i32, %arg2: i32) -> (i32, i32) {
    %c0_i32 = arith.constant 0 : i32
    %c0_i32_0 = arith.constant 0 : i32
    return %c0_i32, %arg1 : i32, i32
  }
  func.func @transform_5(%arg0: i32, %arg1: i32, %arg2: i32) -> (i32, i32) {
    %c0_i32 = arith.constant 0 : i32
    %c0_i32_0 = arith.constant 0 : i32
    return %c0_i32, %arg1 : i32, i32
  }
  func.func @transform_6(%arg0: i32, %arg1: i32, %arg2: i32) -> (i32, i32) {
    %c0_i32 = arith.constant 0 : i32
    return %arg0, %arg1 : i32, i32
  }
}

module attributes {stable_mosaic.version = 11 : i64} {
  func.func @_mm_kernel(%arg0: i32, %arg1: i32, %arg2: i32, %arg3: memref<8x1152xbf16, #tpu.memory_space<vmem>>, %arg4: memref<1152x128xbf16, #tpu.memory_space<vmem>>, %arg5: memref<1x128xf32, #tpu.memory_space<vmem>>, %arg6: memref<1x128xf32, #tpu.memory_space<vmem>>, %arg7: memref<8x128xbf16, #tpu.memory_space<vmem>>, %arg8: memref<8x128xbf16, #tpu.memory_space<vmem>>, %arg9: memref<8x128xf32, #tpu.memory_space<vmem>>) attributes {dimension_semantics = [#tpu.dimension_semantics<parallel>, #tpu.dimension_semantics<parallel>, #tpu.dimension_semantics<arbitrary>], iteration_bounds = array<i64: 1, 1, 1>, scalar_prefetch = 0 : i64, scratch_operands = 1 : i64, tpu.core_type = #tpu.core_type<tc>, window_params = [{transform_indices = @transform_0, window_bounds = array<i64: 8, 1152>}, {transform_indices = @transform_1, window_bounds = array<i64: 1152, 128>}, {transform_indices = @transform_2, window_bounds = array<i64: 1, 128>}, {transform_indices = @transform_3, window_bounds = array<i64: 1, 128>}, {transform_indices = @transform_4, window_bounds = array<i64: 8, 128>}, {transform_indices = @transform_5, window_bounds = array<i64: 8, 128>}]} {
    %c0_i32 = arith.constant 0 : i32
    %0 = arith.cmpi eq, %arg2, %c0_i32 : i32
    %1 = arith.extui %0 : i1 to i32
    %c0_i32_0 = arith.constant 0 : i32
    %2 = arith.cmpi ne, %1, %c0_i32_0 : i32
    scf.if %2 {
      %cst_10 = arith.constant 0.000000e+00 : f32
      %12 = vector.broadcast %cst_10 : f32 to vector<8x128xf32>
      %c0_11 = arith.constant 0 : index
      %c0_12 = arith.constant 0 : index
      %13 = vector.load %arg9[%c0_11, %c0_12] : memref<8x128xf32, #tpu.memory_space<vmem>>, vector<8x128xf32>
      tpu.vector_store %arg9[%c0_11, %c0_12], %12 {strides = array<i32>} : memref<8x128xf32, #tpu.memory_space<vmem>>, vector<8x128xf32>,
    } else {
    }
    %c0 = arith.constant 0 : index
    %c0_1 = arith.constant 0 : index
    %3 = vector.load %arg3[%c0, %c0_1] : memref<8x1152xbf16, #tpu.memory_space<vmem>>, vector<8x1152xbf16>
    %c0_2 = arith.constant 0 : index
    %c0_3 = arith.constant 0 : index
    %4 = vector.load %arg9[%c0_2, %c0_3] : memref<8x128xf32, #tpu.memory_space<vmem>>, vector<8x128xf32>
    %c0_4 = arith.constant 0 : index
    %c0_5 = arith.constant 0 : index
    %5 = vector.load %arg4[%c0_4, %c0_5] : memref<1152x128xbf16, #tpu.memory_space<vmem>>, vector<1152x128xbf16>
    %cst = arith.constant dense<0.000000e+00> : vector<8x128xf32>
    %6 = tpu.matmul %3, %5, %cst {dimension_numbers = #tpu.dot_dimension_numbers<[1], [0], [0], [1], [0, 0, 1, 1], [], []>} : vector<8x1152xbf16>, vector<1152x128xbf16>, vector<8x128xf32> -> vector<8x128xf32>
    %7 = arith.addf %4, %6 : vector<8x128xf32>
    %c0_6 = arith.constant 0 : index
    %c0_7 = arith.constant 0 : index
    %8 = vector.load %arg9[%c0_6, %c0_7] : memref<8x128xf32, #tpu.memory_space<vmem>>, vector<8x128xf32>
    tpu.vector_store %arg9[%c0_6, %c0_7], %7 {strides = array<i32>} : memref<8x128xf32, #tpu.memory_space<vmem>>, vector<8x128xf32>,
    %c0_i32_8 = arith.constant 0 : i32
    %9 = arith.cmpi eq, %arg2, %c0_i32_8 : i32
    %10 = arith.extui %9 : i1 to i32
    %c0_i32_9 = arith.constant 0 : i32
    %11 = arith.cmpi ne, %10, %c0_i32_9 : i32
    scf.if %11 {
      %c0_10 = arith.constant 0 : index
      %c0_11 = arith.constant 0 : index
      %12 = vector.load %arg9[%c0_10, %c0_11] : memref<8x128xf32, #tpu.memory_space<vmem>>, vector<8x128xf32>
      %c0_12 = arith.constant 0 : index
      %c0_13 = arith.constant 0 : index
      %13 = vector.load %arg5[%c0_12, %c0_13] : memref<1x128xf32, #tpu.memory_space<vmem>>, vector<1x128xf32>
      %14 = vector.broadcast %13 : vector<1x128xf32> to vector<8x128xf32>
      %15 = arith.mulf %12, %14 : vector<8x128xf32>
      %c0_14 = arith.constant 0 : index
      %c0_15 = arith.constant 0 : index
      %16 = vector.load %arg6[%c0_14, %c0_15] : memref<1x128xf32, #tpu.memory_space<vmem>>, vector<1x128xf32>
      %17 = vector.broadcast %16 : vector<1x128xf32> to vector<8x128xf32>
      %18 = arith.addf %15, %17 : vector<8x128xf32>
      %c0_16 = arith.constant 0 : index
      %c0_17 = arith.constant 0 : index
      %19 = vector.load %arg7[%c0_16, %c0_17] : memref<8x128xbf16, #tpu.memory_space<vmem>>, vector<8x128xbf16>
      %20 = arith.extf %19 : vector<8x128xbf16> to vector<8x128xf32>
      %21 = arith.addf %18, %20 : vector<8x128xf32>
      %22 = arith.truncf %21 : vector<8x128xf32> to vector<8x128xbf16>
      %c0_18 = arith.constant 0 : index
      %c0_19 = arith.constant 0 : index
      %23 = vector.load %arg8[%c0_18, %c0_19] : memref<8x128xbf16, #tpu.memory_space<vmem>>, vector<8x128xbf16>
      tpu.vector_store %arg8[%c0_18, %c0_19], %22 {strides = array<i32>} : memref<8x128xbf16, #tpu.memory_space<vmem>>, vector<8x128xbf16>,
    } else {
    }
    return
  }
  func.func @transform_0(%arg0: i32, %arg1: i32, %arg2: i32) -> (i32, i32) {
    %c0_i32 = arith.constant 0 : i32
    return %arg0, %arg2 : i32, i32
  }
  func.func @transform_1(%arg0: i32, %arg1: i32, %arg2: i32) -> (i32, i32) {
    %c0_i32 = arith.constant 0 : i32
    return %arg2, %arg1 : i32, i32
  }
  func.func @transform_2(%arg0: i32, %arg1: i32, %arg2: i32) -> (i32, i32) {
    %c0_i32 = arith.constant 0 : i32
    %c0_i32_0 = arith.constant 0 : i32
    return %c0_i32, %arg1 : i32, i32
  }
  func.func @transform_3(%arg0: i32, %arg1: i32, %arg2: i32) -> (i32, i32) {
    %c0_i32 = arith.constant 0 : i32
    %c0_i32_0 = arith.constant 0 : i32
    return %c0_i32, %arg1 : i32, i32
  }
  func.func @transform_4(%arg0: i32, %arg1: i32, %arg2: i32) -> (i32, i32) {
    %c0_i32 = arith.constant 0 : i32
    return %arg0, %arg1 : i32, i32
  }
  func.func @transform_5(%arg0: i32, %arg1: i32, %arg2: i32) -> (i32, i32) {
    %c0_i32 = arith.constant 0 : i32
    return %arg0, %arg1 : i32, i32
  }
}

module attributes {stable_mosaic.version = 11 : i64} {
  func.func @_mm_kernel(%arg0: i32, %arg1: i32, %arg2: i32, %arg3: memref<8x128xbf16, #tpu.memory_space<vmem>>, %arg4: memref<128x256xbf16, #tpu.memory_space<vmem>>, %arg5: memref<1x256xf32, #tpu.memory_space<vmem>>, %arg6: memref<1x256xf32, #tpu.memory_space<vmem>>, %arg7: memref<8x256xbf16, #tpu.memory_space<vmem>>, %arg8: memref<8x256xbf16, #tpu.memory_space<vmem>>, %arg9: memref<8x256xf32, #tpu.memory_space<vmem>>) attributes {dimension_semantics = [#tpu.dimension_semantics<parallel>, #tpu.dimension_semantics<parallel>, #tpu.dimension_semantics<arbitrary>], iteration_bounds = array<i64: 1, 1, 1>, scalar_prefetch = 0 : i64, scratch_operands = 1 : i64, tpu.core_type = #tpu.core_type<tc>, window_params = [{transform_indices = @transform_0, window_bounds = array<i64: 8, 128>}, {transform_indices = @transform_1, window_bounds = array<i64: 128, 256>}, {transform_indices = @transform_2, window_bounds = array<i64: 1, 256>}, {transform_indices = @transform_3, window_bounds = array<i64: 1, 256>}, {transform_indices = @transform_4, window_bounds = array<i64: 8, 256>}, {transform_indices = @transform_5, window_bounds = array<i64: 8, 256>}]} {
    %c0_i32 = arith.constant 0 : i32
    %0 = arith.cmpi eq, %arg2, %c0_i32 : i32
    %1 = arith.extui %0 : i1 to i32
    %c0_i32_0 = arith.constant 0 : i32
    %2 = arith.cmpi ne, %1, %c0_i32_0 : i32
    scf.if %2 {
      %cst_10 = arith.constant 0.000000e+00 : f32
      %12 = vector.broadcast %cst_10 : f32 to vector<8x256xf32>
      %c0_11 = arith.constant 0 : index
      %c0_12 = arith.constant 0 : index
      %13 = vector.load %arg9[%c0_11, %c0_12] : memref<8x256xf32, #tpu.memory_space<vmem>>, vector<8x256xf32>
      tpu.vector_store %arg9[%c0_11, %c0_12], %12 {strides = array<i32>} : memref<8x256xf32, #tpu.memory_space<vmem>>, vector<8x256xf32>,
    } else {
    }
    %c0 = arith.constant 0 : index
    %c0_1 = arith.constant 0 : index
    %3 = vector.load %arg3[%c0, %c0_1] : memref<8x128xbf16, #tpu.memory_space<vmem>>, vector<8x128xbf16>
    %c0_2 = arith.constant 0 : index
    %c0_3 = arith.constant 0 : index
    %4 = vector.load %arg9[%c0_2, %c0_3] : memref<8x256xf32, #tpu.memory_space<vmem>>, vector<8x256xf32>
    %c0_4 = arith.constant 0 : index
    %c0_5 = arith.constant 0 : index
    %5 = vector.load %arg4[%c0_4, %c0_5] : memref<128x256xbf16, #tpu.memory_space<vmem>>, vector<128x256xbf16>
    %cst = arith.constant dense<0.000000e+00> : vector<8x256xf32>
    %6 = tpu.matmul %3, %5, %cst {dimension_numbers = #tpu.dot_dimension_numbers<[1], [0], [0], [1], [0, 0, 1, 1], [], []>} : vector<8x128xbf16>, vector<128x256xbf16>, vector<8x256xf32> -> vector<8x256xf32>
    %7 = arith.addf %4, %6 : vector<8x256xf32>
    %c0_6 = arith.constant 0 : index
    %c0_7 = arith.constant 0 : index
    %8 = vector.load %arg9[%c0_6, %c0_7] : memref<8x256xf32, #tpu.memory_space<vmem>>, vector<8x256xf32>
    tpu.vector_store %arg9[%c0_6, %c0_7], %7 {strides = array<i32>} : memref<8x256xf32, #tpu.memory_space<vmem>>, vector<8x256xf32>,
    %c0_i32_8 = arith.constant 0 : i32
    %9 = arith.cmpi eq, %arg2, %c0_i32_8 : i32
    %10 = arith.extui %9 : i1 to i32
    %c0_i32_9 = arith.constant 0 : i32
    %11 = arith.cmpi ne, %10, %c0_i32_9 : i32
    scf.if %11 {
      %c0_10 = arith.constant 0 : index
      %c0_11 = arith.constant 0 : index
      %12 = vector.load %arg9[%c0_10, %c0_11] : memref<8x256xf32, #tpu.memory_space<vmem>>, vector<8x256xf32>
      %c0_12 = arith.constant 0 : index
      %c0_13 = arith.constant 0 : index
      %13 = vector.load %arg5[%c0_12, %c0_13] : memref<1x256xf32, #tpu.memory_space<vmem>>, vector<1x256xf32>
      %14 = vector.broadcast %13 : vector<1x256xf32> to vector<8x256xf32>
      %15 = arith.mulf %12, %14 : vector<8x256xf32>
      %c0_14 = arith.constant 0 : index
      %c0_15 = arith.constant 0 : index
      %16 = vector.load %arg6[%c0_14, %c0_15] : memref<1x256xf32, #tpu.memory_space<vmem>>, vector<1x256xf32>
      %17 = vector.broadcast %16 : vector<1x256xf32> to vector<8x256xf32>
      %18 = arith.addf %15, %17 : vector<8x256xf32>
      %c0_16 = arith.constant 0 : index
      %c0_17 = arith.constant 0 : index
      %19 = vector.load %arg7[%c0_16, %c0_17] : memref<8x256xbf16, #tpu.memory_space<vmem>>, vector<8x256xbf16>
      %20 = arith.extf %19 : vector<8x256xbf16> to vector<8x256xf32>
      %21 = arith.addf %18, %20 : vector<8x256xf32>
      %22 = arith.truncf %21 : vector<8x256xf32> to vector<8x256xbf16>
      %c0_18 = arith.constant 0 : index
      %c0_19 = arith.constant 0 : index
      %23 = vector.load %arg8[%c0_18, %c0_19] : memref<8x256xbf16, #tpu.memory_space<vmem>>, vector<8x256xbf16>
      tpu.vector_store %arg8[%c0_18, %c0_19], %22 {strides = array<i32>} : memref<8x256xbf16, #tpu.memory_space<vmem>>, vector<8x256xbf16>,
    } else {
    }
    return
  }
  func.func @transform_0(%arg0: i32, %arg1: i32, %arg2: i32) -> (i32, i32) {
    %c0_i32 = arith.constant 0 : i32
    return %arg0, %arg2 : i32, i32
  }
  func.func @transform_1(%arg0: i32, %arg1: i32, %arg2: i32) -> (i32, i32) {
    %c0_i32 = arith.constant 0 : i32
    return %arg2, %arg1 : i32, i32
  }
  func.func @transform_2(%arg0: i32, %arg1: i32, %arg2: i32) -> (i32, i32) {
    %c0_i32 = arith.constant 0 : i32
    %c0_i32_0 = arith.constant 0 : i32
    return %c0_i32, %arg1 : i32, i32
  }
  func.func @transform_3(%arg0: i32, %arg1: i32, %arg2: i32) -> (i32, i32) {
    %c0_i32 = arith.constant 0 : i32
    %c0_i32_0 = arith.constant 0 : i32
    return %c0_i32, %arg1 : i32, i32
  }
  func.func @transform_4(%arg0: i32, %arg1: i32, %arg2: i32) -> (i32, i32) {
    %c0_i32 = arith.constant 0 : i32
    return %arg0, %arg1 : i32, i32
  }
  func.func @transform_5(%arg0: i32, %arg1: i32, %arg2: i32) -> (i32, i32) {
    %c0_i32 = arith.constant 0 : i32
    return %arg0, %arg1 : i32, i32
  }
}

module attributes {stable_mosaic.version = 11 : i64} {
  func.func @_mm_kernel(%arg0: i32, %arg1: i32, %arg2: i32, %arg3: memref<8x128xbf16, #tpu.memory_space<vmem>>, %arg4: memref<128x256xbf16, #tpu.memory_space<vmem>>, %arg5: memref<1x128xf32, #tpu.memory_space<vmem>>, %arg6: memref<1x128xf32, #tpu.memory_space<vmem>>, %arg7: memref<1x256xf32, #tpu.memory_space<vmem>>, %arg8: memref<1x256xf32, #tpu.memory_space<vmem>>, %arg9: memref<8x256xbf16, #tpu.memory_space<vmem>>, %arg10: memref<8x256xf32, #tpu.memory_space<vmem>>) attributes {dimension_semantics = [#tpu.dimension_semantics<parallel>, #tpu.dimension_semantics<parallel>, #tpu.dimension_semantics<arbitrary>], iteration_bounds = array<i64: 1, 1, 1>, scalar_prefetch = 0 : i64, scratch_operands = 1 : i64, tpu.core_type = #tpu.core_type<tc>, window_params = [{transform_indices = @transform_0, window_bounds = array<i64: 8, 128>}, {transform_indices = @transform_1, window_bounds = array<i64: 128, 256>}, {transform_indices = @transform_2, window_bounds = array<i64: 1, 128>}, {transform_indices = @transform_3, window_bounds = array<i64: 1, 128>}, {transform_indices = @transform_4, window_bounds = array<i64: 1, 256>}, {transform_indices = @transform_5, window_bounds = array<i64: 1, 256>}, {transform_indices = @transform_6, window_bounds = array<i64: 8, 256>}]} {
    %c0_i32 = arith.constant 0 : i32
    %0 = arith.cmpi eq, %arg2, %c0_i32 : i32
    %1 = arith.extui %0 : i1 to i32
    %c0_i32_0 = arith.constant 0 : i32
    %2 = arith.cmpi ne, %1, %c0_i32_0 : i32
    scf.if %2 {
      %cst_15 = arith.constant 0.000000e+00 : f32
      %22 = vector.broadcast %cst_15 : f32 to vector<8x256xf32>
      %c0_16 = arith.constant 0 : index
      %c0_17 = arith.constant 0 : index
      %23 = vector.load %arg10[%c0_16, %c0_17] : memref<8x256xf32, #tpu.memory_space<vmem>>, vector<8x256xf32>
      tpu.vector_store %arg10[%c0_16, %c0_17], %22 {strides = array<i32>} : memref<8x256xf32, #tpu.memory_space<vmem>>, vector<8x256xf32>,
    } else {
    }
    %c0 = arith.constant 0 : index
    %c0_1 = arith.constant 0 : index
    %3 = vector.load %arg3[%c0, %c0_1] : memref<8x128xbf16, #tpu.memory_space<vmem>>, vector<8x128xbf16>
    %4 = arith.extf %3 : vector<8x128xbf16> to vector<8x128xf32>
    %c0_2 = arith.constant 0 : index
    %c0_3 = arith.constant 0 : index
    %5 = vector.load %arg5[%c0_2, %c0_3] : memref<1x128xf32, #tpu.memory_space<vmem>>, vector<1x128xf32>
    %6 = vector.broadcast %5 : vector<1x128xf32> to vector<8x128xf32>
    %7 = arith.mulf %4, %6 : vector<8x128xf32>
    %c0_4 = arith.constant 0 : index
    %c0_5 = arith.constant 0 : index
    %8 = vector.load %arg6[%c0_4, %c0_5] : memref<1x128xf32, #tpu.memory_space<vmem>>, vector<1x128xf32>
    %9 = vector.broadcast %8 : vector<1x128xf32> to vector<8x128xf32>
    %10 = arith.addf %7, %9 : vector<8x128xf32>
    %cst = arith.constant 0.000000e+00 : f32
    %11 = vector.broadcast %cst : f32 to vector<8x128xf32>
    %12 = arith.maximumf %10, %11 : vector<8x128xf32>
    %13 = arith.truncf %12 : vector<8x128xf32> to vector<8x128xbf16>
    %c0_6 = arith.constant 0 : index
    %c0_7 = arith.constant 0 : index
    %14 = vector.load %arg10[%c0_6, %c0_7] : memref<8x256xf32, #tpu.memory_space<vmem>>, vector<8x256xf32>
    %c0_8 = arith.constant 0 : index
    %c0_9 = arith.constant 0 : index
    %15 = vector.load %arg4[%c0_8, %c0_9] : memref<128x256xbf16, #tpu.memory_space<vmem>>, vector<128x256xbf16>
    %cst_10 = arith.constant dense<0.000000e+00> : vector<8x256xf32>
    %16 = tpu.matmul %13, %15, %cst_10 {dimension_numbers = #tpu.dot_dimension_numbers<[1], [0], [0], [1], [0, 0, 1, 1], [], []>} : vector<8x128xbf16>, vector<128x256xbf16>, vector<8x256xf32> -> vector<8x256xf32>
    %17 = arith.addf %14, %16 : vector<8x256xf32>
    %c0_11 = arith.constant 0 : index
    %c0_12 = arith.constant 0 : index
    %18 = vector.load %arg10[%c0_11, %c0_12] : memref<8x256xf32, #tpu.memory_space<vmem>>, vector<8x256xf32>
    tpu.vector_store %arg10[%c0_11, %c0_12], %17 {strides = array<i32>} : memref<8x256xf32, #tpu.memory_space<vmem>>, vector<8x256xf32>,
    %c0_i32_13 = arith.constant 0 : i32
    %19 = arith.cmpi eq, %arg2, %c0_i32_13 : i32
    %20 = arith.extui %19 : i1 to i32
    %c0_i32_14 = arith.constant 0 : i32
    %21 = arith.cmpi ne, %20, %c0_i32_14 : i32
    scf.if %21 {
      %c0_15 = arith.constant 0 : index
      %c0_16 = arith.constant 0 : index
      %22 = vector.load %arg10[%c0_15, %c0_16] : memref<8x256xf32, #tpu.memory_space<vmem>>, vector<8x256xf32>
      %c0_17 = arith.constant 0 : index
      %c0_18 = arith.constant 0 : index
      %23 = vector.load %arg7[%c0_17, %c0_18] : memref<1x256xf32, #tpu.memory_space<vmem>>, vector<1x256xf32>
      %24 = vector.broadcast %23 : vector<1x256xf32> to vector<8x256xf32>
      %25 = arith.mulf %22, %24 : vector<8x256xf32>
      %c0_19 = arith.constant 0 : index
      %c0_20 = arith.constant 0 : index
      %26 = vector.load %arg8[%c0_19, %c0_20] : memref<1x256xf32, #tpu.memory_space<vmem>>, vector<1x256xf32>
      %27 = vector.broadcast %26 : vector<1x256xf32> to vector<8x256xf32>
      %28 = arith.addf %25, %27 : vector<8x256xf32>
      %29 = arith.truncf %28 : vector<8x256xf32> to vector<8x256xbf16>
      %c0_21 = arith.constant 0 : index
      %c0_22 = arith.constant 0 : index
      %30 = vector.load %arg9[%c0_21, %c0_22] : memref<8x256xbf16, #tpu.memory_space<vmem>>, vector<8x256xbf16>
      tpu.vector_store %arg9[%c0_21, %c0_22], %29 {strides = array<i32>} : memref<8x256xbf16, #tpu.memory_space<vmem>>, vector<8x256xbf16>,
    } else {
    }
    return
  }
  func.func @transform_0(%arg0: i32, %arg1: i32, %arg2: i32) -> (i32, i32) {
    %c0_i32 = arith.constant 0 : i32
    return %arg0, %arg2 : i32, i32
  }
  func.func @transform_1(%arg0: i32, %arg1: i32, %arg2: i32) -> (i32, i32) {
    %c0_i32 = arith.constant 0 : i32
    return %arg2, %arg1 : i32, i32
  }
  func.func @transform_2(%arg0: i32, %arg1: i32, %arg2: i32) -> (i32, i32) {
    %c0_i32 = arith.constant 0 : i32
    %c0_i32_0 = arith.constant 0 : i32
    return %c0_i32, %arg2 : i32, i32
  }
  func.func @transform_3(%arg0: i32, %arg1: i32, %arg2: i32) -> (i32, i32) {
    %c0_i32 = arith.constant 0 : i32
    %c0_i32_0 = arith.constant 0 : i32
    return %c0_i32, %arg2 : i32, i32
  }
  func.func @transform_4(%arg0: i32, %arg1: i32, %arg2: i32) -> (i32, i32) {
    %c0_i32 = arith.constant 0 : i32
    %c0_i32_0 = arith.constant 0 : i32
    return %c0_i32, %arg1 : i32, i32
  }
  func.func @transform_5(%arg0: i32, %arg1: i32, %arg2: i32) -> (i32, i32) {
    %c0_i32 = arith.constant 0 : i32
    %c0_i32_0 = arith.constant 0 : i32
    return %c0_i32, %arg1 : i32, i32
  }
  func.func @transform_6(%arg0: i32, %arg1: i32, %arg2: i32) -> (i32, i32) {
    %c0_i32 = arith.constant 0 : i32
    return %arg0, %arg1 : i32, i32
  }
}

module attributes {stable_mosaic.version = 11 : i64} {
  func.func @_mm_kernel(%arg0: i32, %arg1: i32, %arg2: i32, %arg3: memref<8x128xbf16, #tpu.memory_space<vmem>>, %arg4: memref<128x128xbf16, #tpu.memory_space<vmem>>, %arg5: memref<1x128xf32, #tpu.memory_space<vmem>>, %arg6: memref<1x128xf32, #tpu.memory_space<vmem>>, %arg7: memref<1x128xf32, #tpu.memory_space<vmem>>, %arg8: memref<1x128xf32, #tpu.memory_space<vmem>>, %arg9: memref<8x128xbf16, #tpu.memory_space<vmem>>, %arg10: memref<8x128xf32, #tpu.memory_space<vmem>>) attributes {dimension_semantics = [#tpu.dimension_semantics<parallel>, #tpu.dimension_semantics<parallel>, #tpu.dimension_semantics<arbitrary>], iteration_bounds = array<i64: 1, 1, 1>, scalar_prefetch = 0 : i64, scratch_operands = 1 : i64, tpu.core_type = #tpu.core_type<tc>, window_params = [{transform_indices = @transform_0, window_bounds = array<i64: 8, 128>}, {transform_indices = @transform_1, window_bounds = array<i64: 128, 128>}, {transform_indices = @transform_2, window_bounds = array<i64: 1, 128>}, {transform_indices = @transform_3, window_bounds = array<i64: 1, 128>}, {transform_indices = @transform_4, window_bounds = array<i64: 1, 128>}, {transform_indices = @transform_5, window_bounds = array<i64: 1, 128>}, {transform_indices = @transform_6, window_bounds = array<i64: 8, 128>}]} {
    %c0_i32 = arith.constant 0 : i32
    %0 = arith.cmpi eq, %arg2, %c0_i32 : i32
    %1 = arith.extui %0 : i1 to i32
    %c0_i32_0 = arith.constant 0 : i32
    %2 = arith.cmpi ne, %1, %c0_i32_0 : i32
    scf.if %2 {
      %cst_15 = arith.constant 0.000000e+00 : f32
      %22 = vector.broadcast %cst_15 : f32 to vector<8x128xf32>
      %c0_16 = arith.constant 0 : index
      %c0_17 = arith.constant 0 : index
      %23 = vector.load %arg10[%c0_16, %c0_17] : memref<8x128xf32, #tpu.memory_space<vmem>>, vector<8x128xf32>
      tpu.vector_store %arg10[%c0_16, %c0_17], %22 {strides = array<i32>} : memref<8x128xf32, #tpu.memory_space<vmem>>, vector<8x128xf32>,
    } else {
    }
    %c0 = arith.constant 0 : index
    %c0_1 = arith.constant 0 : index
    %3 = vector.load %arg3[%c0, %c0_1] : memref<8x128xbf16, #tpu.memory_space<vmem>>, vector<8x128xbf16>
    %4 = arith.extf %3 : vector<8x128xbf16> to vector<8x128xf32>
    %c0_2 = arith.constant 0 : index
    %c0_3 = arith.constant 0 : index
    %5 = vector.load %arg5[%c0_2, %c0_3] : memref<1x128xf32, #tpu.memory_space<vmem>>, vector<1x128xf32>
    %6 = vector.broadcast %5 : vector<1x128xf32> to vector<8x128xf32>
    %7 = arith.mulf %4, %6 : vector<8x128xf32>
    %c0_4 = arith.constant 0 : index
    %c0_5 = arith.constant 0 : index
    %8 = vector.load %arg6[%c0_4, %c0_5] : memref<1x128xf32, #tpu.memory_space<vmem>>, vector<1x128xf32>
    %9 = vector.broadcast %8 : vector<1x128xf32> to vector<8x128xf32>
    %10 = arith.addf %7, %9 : vector<8x128xf32>
    %cst = arith.constant 0.000000e+00 : f32
    %11 = vector.broadcast %cst : f32 to vector<8x128xf32>
    %12 = arith.maximumf %10, %11 : vector<8x128xf32>
    %13 = arith.truncf %12 : vector<8x128xf32> to vector<8x128xbf16>
    %c0_6 = arith.constant 0 : index
    %c0_7 = arith.constant 0 : index
    %14 = vector.load %arg10[%c0_6, %c0_7] : memref<8x128xf32, #tpu.memory_space<vmem>>, vector<8x128xf32>
    %c0_8 = arith.constant 0 : index
    %c0_9 = arith.constant 0 : index
    %15 = vector.load %arg4[%c0_8, %c0_9] : memref<128x128xbf16, #tpu.memory_space<vmem>>, vector<128x128xbf16>
    %cst_10 = arith.constant dense<0.000000e+00> : vector<8x128xf32>
    %16 = tpu.matmul %13, %15, %cst_10 {dimension_numbers = #tpu.dot_dimension_numbers<[1], [0], [0], [1], [0, 0, 1, 1], [], []>} : vector<8x128xbf16>, vector<128x128xbf16>, vector<8x128xf32> -> vector<8x128xf32>
    %17 = arith.addf %14, %16 : vector<8x128xf32>
    %c0_11 = arith.constant 0 : index
    %c0_12 = arith.constant 0 : index
    %18 = vector.load %arg10[%c0_11, %c0_12] : memref<8x128xf32, #tpu.memory_space<vmem>>, vector<8x128xf32>
    tpu.vector_store %arg10[%c0_11, %c0_12], %17 {strides = array<i32>} : memref<8x128xf32, #tpu.memory_space<vmem>>, vector<8x128xf32>,
    %c0_i32_13 = arith.constant 0 : i32
    %19 = arith.cmpi eq, %arg2, %c0_i32_13 : i32
    %20 = arith.extui %19 : i1 to i32
    %c0_i32_14 = arith.constant 0 : i32
    %21 = arith.cmpi ne, %20, %c0_i32_14 : i32
    scf.if %21 {
      %c0_15 = arith.constant 0 : index
      %c0_16 = arith.constant 0 : index
      %22 = vector.load %arg10[%c0_15, %c0_16] : memref<8x128xf32, #tpu.memory_space<vmem>>, vector<8x128xf32>
      %c0_17 = arith.constant 0 : index
      %c0_18 = arith.constant 0 : index
      %23 = vector.load %arg7[%c0_17, %c0_18] : memref<1x128xf32, #tpu.memory_space<vmem>>, vector<1x128xf32>
      %24 = vector.broadcast %23 : vector<1x128xf32> to vector<8x128xf32>
      %25 = arith.mulf %22, %24 : vector<8x128xf32>
      %c0_19 = arith.constant 0 : index
      %c0_20 = arith.constant 0 : index
      %26 = vector.load %arg8[%c0_19, %c0_20] : memref<1x128xf32, #tpu.memory_space<vmem>>, vector<1x128xf32>
      %27 = vector.broadcast %26 : vector<1x128xf32> to vector<8x128xf32>
      %28 = arith.addf %25, %27 : vector<8x128xf32>
      %cst_21 = arith.constant 0.000000e+00 : f32
      %29 = vector.broadcast %cst_21 : f32 to vector<8x128xf32>
      %30 = arith.maximumf %28, %29 : vector<8x128xf32>
      %31 = arith.truncf %30 : vector<8x128xf32> to vector<8x128xbf16>
      %c0_22 = arith.constant 0 : index
      %c0_23 = arith.constant 0 : index
      %32 = vector.load %arg9[%c0_22, %c0_23] : memref<8x128xbf16, #tpu.memory_space<vmem>>, vector<8x128xbf16>
      tpu.vector_store %arg9[%c0_22, %c0_23], %31 {strides = array<i32>} : memref<8x128xbf16, #tpu.memory_space<vmem>>, vector<8x128xbf16>,
    } else {
    }
    return
  }
  func.func @transform_0(%arg0: i32, %arg1: i32, %arg2: i32) -> (i32, i32) {
    %c0_i32 = arith.constant 0 : i32
    return %arg0, %arg2 : i32, i32
  }
  func.func @transform_1(%arg0: i32, %arg1: i32, %arg2: i32) -> (i32, i32) {
    %c0_i32 = arith.constant 0 : i32
    return %arg2, %arg1 : i32, i32
  }
  func.func @transform_2(%arg0: i32, %arg1: i32, %arg2: i32) -> (i32, i32) {
    %c0_i32 = arith.constant 0 : i32
    %c0_i32_0 = arith.constant 0 : i32
    return %c0_i32, %arg2 : i32, i32
  }
  func.func @transform_3(%arg0: i32, %arg1: i32, %arg2: i32) -> (i32, i32) {
    %c0_i32 = arith.constant 0 : i32
    %c0_i32_0 = arith.constant 0 : i32
    return %c0_i32, %arg2 : i32, i32
  }
  func.func @transform_4(%arg0: i32, %arg1: i32, %arg2: i32) -> (i32, i32) {
    %c0_i32 = arith.constant 0 : i32
    %c0_i32_0 = arith.constant 0 : i32
    return %c0_i32, %arg1 : i32, i32
  }
  func.func @transform_5(%arg0: i32, %arg1: i32, %arg2: i32) -> (i32, i32) {
    %c0_i32 = arith.constant 0 : i32
    %c0_i32_0 = arith.constant 0 : i32
    return %c0_i32, %arg1 : i32, i32
  }
  func.func @transform_6(%arg0: i32, %arg1: i32, %arg2: i32) -> (i32, i32) {
    %c0_i32 = arith.constant 0 : i32
    return %arg0, %arg1 : i32, i32
  }
}

module attributes {stable_mosaic.version = 11 : i64} {
  func.func @_mm_kernel(%arg0: i32, %arg1: i32, %arg2: i32, %arg3: memref<8x1152xbf16, #tpu.memory_space<vmem>>, %arg4: memref<1152x256xbf16, #tpu.memory_space<vmem>>, %arg5: memref<1x256xf32, #tpu.memory_space<vmem>>, %arg6: memref<1x256xf32, #tpu.memory_space<vmem>>, %arg7: memref<8x256xbf16, #tpu.memory_space<vmem>>, %arg8: memref<8x256xf32, #tpu.memory_space<vmem>>) attributes {dimension_semantics = [#tpu.dimension_semantics<parallel>, #tpu.dimension_semantics<parallel>, #tpu.dimension_semantics<arbitrary>], iteration_bounds = array<i64: 1, 1, 1>, scalar_prefetch = 0 : i64, scratch_operands = 1 : i64, tpu.core_type = #tpu.core_type<tc>, window_params = [{transform_indices = @transform_0, window_bounds = array<i64: 8, 1152>}, {transform_indices = @transform_1, window_bounds = array<i64: 1152, 256>}, {transform_indices = @transform_2, window_bounds = array<i64: 1, 256>}, {transform_indices = @transform_3, window_bounds = array<i64: 1, 256>}, {transform_indices = @transform_4, window_bounds = array<i64: 8, 256>}]} {
    %c0_i32 = arith.constant 0 : i32
    %0 = arith.cmpi eq, %arg2, %c0_i32 : i32
    %1 = arith.extui %0 : i1 to i32
    %c0_i32_0 = arith.constant 0 : i32
    %2 = arith.cmpi ne, %1, %c0_i32_0 : i32
    scf.if %2 {
      %cst_10 = arith.constant 0.000000e+00 : f32
      %12 = vector.broadcast %cst_10 : f32 to vector<8x256xf32>
      %c0_11 = arith.constant 0 : index
      %c0_12 = arith.constant 0 : index
      %13 = vector.load %arg8[%c0_11, %c0_12] : memref<8x256xf32, #tpu.memory_space<vmem>>, vector<8x256xf32>
      tpu.vector_store %arg8[%c0_11, %c0_12], %12 {strides = array<i32>} : memref<8x256xf32, #tpu.memory_space<vmem>>, vector<8x256xf32>,
    } else {
    }
    %c0 = arith.constant 0 : index
    %c0_1 = arith.constant 0 : index
    %3 = vector.load %arg3[%c0, %c0_1] : memref<8x1152xbf16, #tpu.memory_space<vmem>>, vector<8x1152xbf16>
    %c0_2 = arith.constant 0 : index
    %c0_3 = arith.constant 0 : index
    %4 = vector.load %arg8[%c0_2, %c0_3] : memref<8x256xf32, #tpu.memory_space<vmem>>, vector<8x256xf32>
    %c0_4 = arith.constant 0 : index
    %c0_5 = arith.constant 0 : index
    %5 = vector.load %arg4[%c0_4, %c0_5] : memref<1152x256xbf16, #tpu.memory_space<vmem>>, vector<1152x256xbf16>
    %cst = arith.constant dense<0.000000e+00> : vector<8x256xf32>
    %6 = tpu.matmul %3, %5, %cst {dimension_numbers = #tpu.dot_dimension_numbers<[1], [0], [0], [1], [0, 0, 1, 1], [], []>} : vector<8x1152xbf16>, vector<1152x256xbf16>, vector<8x256xf32> -> vector<8x256xf32>
    %7 = arith.addf %4, %6 : vector<8x256xf32>
    %c0_6 = arith.constant 0 : index
    %c0_7 = arith.constant 0 : index
    %8 = vector.load %arg8[%c0_6, %c0_7] : memref<8x256xf32, #tpu.memory_space<vmem>>, vector<8x256xf32>
    tpu.vector_store %arg8[%c0_6, %c0_7], %7 {strides = array<i32>} : memref<8x256xf32, #tpu.memory_space<vmem>>, vector<8x256xf32>,
    %c0_i32_8 = arith.constant 0 : i32
    %9 = arith.cmpi eq, %arg2, %c0_i32_8 : i32
    %10 = arith.extui %9 : i1 to i32
    %c0_i32_9 = arith.constant 0 : i32
    %11 = arith.cmpi ne, %10, %c0_i32_9 : i32
    scf.if %11 {
      %c0_10 = arith.constant 0 : index
      %c0_11 = arith.constant 0 : index
      %12 = vector.load %arg8[%c0_10, %c0_11] : memref<8x256xf32, #tpu.memory_space<vmem>>, vector<8x256xf32>
      %c0_12 = arith.constant 0 : index
      %c0_13 = arith.constant 0 : index
      %13 = vector.load %arg5[%c0_12, %c0_13] : memref<1x256xf32, #tpu.memory_space<vmem>>, vector<1x256xf32>
      %14 = vector.broadcast %13 : vector<1x256xf32> to vector<8x256xf32>
      %15 = arith.mulf %12, %14 : vector<8x256xf32>
      %c0_14 = arith.constant 0 : index
      %c0_15 = arith.constant 0 : index
      %16 = vector.load %arg6[%c0_14, %c0_15] : memref<1x256xf32, #tpu.memory_space<vmem>>, vector<1x256xf32>
      %17 = vector.broadcast %16 : vector<1x256xf32> to vector<8x256xf32>
      %18 = arith.addf %15, %17 : vector<8x256xf32>
      %cst_16 = arith.constant 0.000000e+00 : f32
      %19 = vector.broadcast %cst_16 : f32 to vector<8x256xf32>
      %20 = arith.maximumf %18, %19 : vector<8x256xf32>
      %21 = arith.truncf %20 : vector<8x256xf32> to vector<8x256xbf16>
      %c0_17 = arith.constant 0 : index
      %c0_18 = arith.constant 0 : index
      %22 = vector.load %arg7[%c0_17, %c0_18] : memref<8x256xbf16, #tpu.memory_space<vmem>>, vector<8x256xbf16>
      tpu.vector_store %arg7[%c0_17, %c0_18], %21 {strides = array<i32>} : memref<8x256xbf16, #tpu.memory_space<vmem>>, vector<8x256xbf16>,
    } else {
    }
    return
  }
  func.func @transform_0(%arg0: i32, %arg1: i32, %arg2: i32) -> (i32, i32) {
    %c0_i32 = arith.constant 0 : i32
    return %arg0, %arg2 : i32, i32
  }
  func.func @transform_1(%arg0: i32, %arg1: i32, %arg2: i32) -> (i32, i32) {
    %c0_i32 = arith.constant 0 : i32
    return %arg2, %arg1 : i32, i32
  }
  func.func @transform_2(%arg0: i32, %arg1: i32, %arg2: i32) -> (i32, i32) {
    %c0_i32 = arith.constant 0 : i32
    %c0_i32_0 = arith.constant 0 : i32
    return %c0_i32, %arg1 : i32, i32
  }
  func.func @transform_3(%arg0: i32, %arg1: i32, %arg2: i32) -> (i32, i32) {
    %c0_i32 = arith.constant 0 : i32
    %c0_i32_0 = arith.constant 0 : i32
    return %c0_i32, %arg1 : i32, i32
  }
  func.func @transform_4(%arg0: i32, %arg1: i32, %arg2: i32) -> (i32, i32) {
    %c0_i32 = arith.constant 0 : i32
    return %arg0, %arg1 : i32, i32
  }
}

module attributes {stable_mosaic.version = 11 : i64} {
  func.func @_mm_kernel(%arg0: i32, %arg1: i32, %arg2: i32, %arg3: memref<8x256xbf16, #tpu.memory_space<vmem>>, %arg4: memref<256x128xbf16, #tpu.memory_space<vmem>>, %arg5: memref<1x256xf32, #tpu.memory_space<vmem>>, %arg6: memref<1x256xf32, #tpu.memory_space<vmem>>, %arg7: memref<1x128xf32, #tpu.memory_space<vmem>>, %arg8: memref<1x128xf32, #tpu.memory_space<vmem>>, %arg9: memref<8x128xbf16, #tpu.memory_space<vmem>>, %arg10: memref<8x128xf32, #tpu.memory_space<vmem>>) attributes {dimension_semantics = [#tpu.dimension_semantics<parallel>, #tpu.dimension_semantics<parallel>, #tpu.dimension_semantics<arbitrary>], iteration_bounds = array<i64: 1, 1, 1>, scalar_prefetch = 0 : i64, scratch_operands = 1 : i64, tpu.core_type = #tpu.core_type<tc>, window_params = [{transform_indices = @transform_0, window_bounds = array<i64: 8, 256>}, {transform_indices = @transform_1, window_bounds = array<i64: 256, 128>}, {transform_indices = @transform_2, window_bounds = array<i64: 1, 256>}, {transform_indices = @transform_3, window_bounds = array<i64: 1, 256>}, {transform_indices = @transform_4, window_bounds = array<i64: 1, 128>}, {transform_indices = @transform_5, window_bounds = array<i64: 1, 128>}, {transform_indices = @transform_6, window_bounds = array<i64: 8, 128>}]} {
    %c0_i32 = arith.constant 0 : i32
    %0 = arith.cmpi eq, %arg2, %c0_i32 : i32
    %1 = arith.extui %0 : i1 to i32
    %c0_i32_0 = arith.constant 0 : i32
    %2 = arith.cmpi ne, %1, %c0_i32_0 : i32
    scf.if %2 {
      %cst_15 = arith.constant 0.000000e+00 : f32
      %22 = vector.broadcast %cst_15 : f32 to vector<8x128xf32>
      %c0_16 = arith.constant 0 : index
      %c0_17 = arith.constant 0 : index
      %23 = vector.load %arg10[%c0_16, %c0_17] : memref<8x128xf32, #tpu.memory_space<vmem>>, vector<8x128xf32>
      tpu.vector_store %arg10[%c0_16, %c0_17], %22 {strides = array<i32>} : memref<8x128xf32, #tpu.memory_space<vmem>>, vector<8x128xf32>,
    } else {
    }
    %c0 = arith.constant 0 : index
    %c0_1 = arith.constant 0 : index
    %3 = vector.load %arg3[%c0, %c0_1] : memref<8x256xbf16, #tpu.memory_space<vmem>>, vector<8x256xbf16>
    %4 = arith.extf %3 : vector<8x256xbf16> to vector<8x256xf32>
    %c0_2 = arith.constant 0 : index
    %c0_3 = arith.constant 0 : index
    %5 = vector.load %arg5[%c0_2, %c0_3] : memref<1x256xf32, #tpu.memory_space<vmem>>, vector<1x256xf32>
    %6 = vector.broadcast %5 : vector<1x256xf32> to vector<8x256xf32>
    %7 = arith.mulf %4, %6 : vector<8x256xf32>
    %c0_4 = arith.constant 0 : index
    %c0_5 = arith.constant 0 : index
    %8 = vector.load %arg6[%c0_4, %c0_5] : memref<1x256xf32, #tpu.memory_space<vmem>>, vector<1x256xf32>
    %9 = vector.broadcast %8 : vector<1x256xf32> to vector<8x256xf32>
    %10 = arith.addf %7, %9 : vector<8x256xf32>
    %cst = arith.constant 0.000000e+00 : f32
    %11 = vector.broadcast %cst : f32 to vector<8x256xf32>
    %12 = arith.maximumf %10, %11 : vector<8x256xf32>
    %13 = arith.truncf %12 : vector<8x256xf32> to vector<8x256xbf16>
    %c0_6 = arith.constant 0 : index
    %c0_7 = arith.constant 0 : index
    %14 = vector.load %arg10[%c0_6, %c0_7] : memref<8x128xf32, #tpu.memory_space<vmem>>, vector<8x128xf32>
    %c0_8 = arith.constant 0 : index
    %c0_9 = arith.constant 0 : index
    %15 = vector.load %arg4[%c0_8, %c0_9] : memref<256x128xbf16, #tpu.memory_space<vmem>>, vector<256x128xbf16>
    %cst_10 = arith.constant dense<0.000000e+00> : vector<8x128xf32>
    %16 = tpu.matmul %13, %15, %cst_10 {dimension_numbers = #tpu.dot_dimension_numbers<[1], [0], [0], [1], [0, 0, 1, 1], [], []>} : vector<8x256xbf16>, vector<256x128xbf16>, vector<8x128xf32> -> vector<8x128xf32>
    %17 = arith.addf %14, %16 : vector<8x128xf32>
    %c0_11 = arith.constant 0 : index
    %c0_12 = arith.constant 0 : index
    %18 = vector.load %arg10[%c0_11, %c0_12] : memref<8x128xf32, #tpu.memory_space<vmem>>, vector<8x128xf32>
    tpu.vector_store %arg10[%c0_11, %c0_12], %17 {strides = array<i32>} : memref<8x128xf32, #tpu.memory_space<vmem>>, vector<8x128xf32>,
    %c0_i32_13 = arith.constant 0 : i32
    %19 = arith.cmpi eq, %arg2, %c0_i32_13 : i32
    %20 = arith.extui %19 : i1 to i32
    %c0_i32_14 = arith.constant 0 : i32
    %21 = arith.cmpi ne, %20, %c0_i32_14 : i32
    scf.if %21 {
      %c0_15 = arith.constant 0 : index
      %c0_16 = arith.constant 0 : index
      %22 = vector.load %arg10[%c0_15, %c0_16] : memref<8x128xf32, #tpu.memory_space<vmem>>, vector<8x128xf32>
      %c0_17 = arith.constant 0 : index
      %c0_18 = arith.constant 0 : index
      %23 = vector.load %arg7[%c0_17, %c0_18] : memref<1x128xf32, #tpu.memory_space<vmem>>, vector<1x128xf32>
      %24 = vector.broadcast %23 : vector<1x128xf32> to vector<8x128xf32>
      %25 = arith.mulf %22, %24 : vector<8x128xf32>
      %c0_19 = arith.constant 0 : index
      %c0_20 = arith.constant 0 : index
      %26 = vector.load %arg8[%c0_19, %c0_20] : memref<1x128xf32, #tpu.memory_space<vmem>>, vector<1x128xf32>
      %27 = vector.broadcast %26 : vector<1x128xf32> to vector<8x128xf32>
      %28 = arith.addf %25, %27 : vector<8x128xf32>
      %cst_21 = arith.constant 0.000000e+00 : f32
      %29 = vector.broadcast %cst_21 : f32 to vector<8x128xf32>
      %30 = arith.maximumf %28, %29 : vector<8x128xf32>
      %31 = arith.truncf %30 : vector<8x128xf32> to vector<8x128xbf16>
      %c0_22 = arith.constant 0 : index
      %c0_23 = arith.constant 0 : index
      %32 = vector.load %arg9[%c0_22, %c0_23] : memref<8x128xbf16, #tpu.memory_space<vmem>>, vector<8x128xbf16>
      tpu.vector_store %arg9[%c0_22, %c0_23], %31 {strides = array<i32>} : memref<8x128xbf16, #tpu.memory_space<vmem>>, vector<8x128xbf16>,
    } else {
    }
    return
  }
  func.func @transform_0(%arg0: i32, %arg1: i32, %arg2: i32) -> (i32, i32) {
    %c0_i32 = arith.constant 0 : i32
    return %arg0, %arg2 : i32, i32
  }
  func.func @transform_1(%arg0: i32, %arg1: i32, %arg2: i32) -> (i32, i32) {
    %c0_i32 = arith.constant 0 : i32
    return %arg2, %arg1 : i32, i32
  }
  func.func @transform_2(%arg0: i32, %arg1: i32, %arg2: i32) -> (i32, i32) {
    %c0_i32 = arith.constant 0 : i32
    %c0_i32_0 = arith.constant 0 : i32
    return %c0_i32, %arg2 : i32, i32
  }
  func.func @transform_3(%arg0: i32, %arg1: i32, %arg2: i32) -> (i32, i32) {
    %c0_i32 = arith.constant 0 : i32
    %c0_i32_0 = arith.constant 0 : i32
    return %c0_i32, %arg2 : i32, i32
  }
  func.func @transform_4(%arg0: i32, %arg1: i32, %arg2: i32) -> (i32, i32) {
    %c0_i32 = arith.constant 0 : i32
    %c0_i32_0 = arith.constant 0 : i32
    return %c0_i32, %arg1 : i32, i32
  }
  func.func @transform_5(%arg0: i32, %arg1: i32, %arg2: i32) -> (i32, i32) {
    %c0_i32 = arith.constant 0 : i32
    %c0_i32_0 = arith.constant 0 : i32
    return %c0_i32, %arg1 : i32, i32
  }
  func.func @transform_6(%arg0: i32, %arg1: i32, %arg2: i32) -> (i32, i32) {
    %c0_i32 = arith.constant 0 : i32
    return %arg0, %arg1 : i32, i32
  }
}

module attributes {stable_mosaic.version = 11 : i64} {
  func.func @_mm_kernel(%arg0: i32, %arg1: i32, %arg2: i32, %arg3: memref<8x256xbf16, #tpu.memory_space<vmem>>, %arg4: memref<256x256xbf16, #tpu.memory_space<vmem>>, %arg5: memref<1x256xf32, #tpu.memory_space<vmem>>, %arg6: memref<1x256xf32, #tpu.memory_space<vmem>>, %arg7: memref<1x256xf32, #tpu.memory_space<vmem>>, %arg8: memref<1x256xf32, #tpu.memory_space<vmem>>, %arg9: memref<8x256xbf16, #tpu.memory_space<vmem>>, %arg10: memref<8x256xf32, #tpu.memory_space<vmem>>) attributes {dimension_semantics = [#tpu.dimension_semantics<parallel>, #tpu.dimension_semantics<parallel>, #tpu.dimension_semantics<arbitrary>], iteration_bounds = array<i64: 1, 2, 1>, scalar_prefetch = 0 : i64, scratch_operands = 1 : i64, tpu.core_type = #tpu.core_type<tc>, window_params = [{transform_indices = @transform_0, window_bounds = array<i64: 8, 256>}, {transform_indices = @transform_1, window_bounds = array<i64: 256, 256>}, {transform_indices = @transform_2, window_bounds = array<i64: 1, 256>}, {transform_indices = @transform_3, window_bounds = array<i64: 1, 256>}, {transform_indices = @transform_4, window_bounds = array<i64: 1, 256>}, {transform_indices = @transform_5, window_bounds = array<i64: 1, 256>}, {transform_indices = @transform_6, window_bounds = array<i64: 8, 256>}]} {
    %c0_i32 = arith.constant 0 : i32
    %0 = arith.cmpi eq, %arg2, %c0_i32 : i32
    %1 = arith.extui %0 : i1 to i32
    %c0_i32_0 = arith.constant 0 : i32
    %2 = arith.cmpi ne, %1, %c0_i32_0 : i32
    scf.if %2 {
      %cst_15 = arith.constant 0.000000e+00 : f32
      %22 = vector.broadcast %cst_15 : f32 to vector<8x256xf32>
      %c0_16 = arith.constant 0 : index
      %c0_17 = arith.constant 0 : index
      %23 = vector.load %arg10[%c0_16, %c0_17] : memref<8x256xf32, #tpu.memory_space<vmem>>, vector<8x256xf32>
      tpu.vector_store %arg10[%c0_16, %c0_17], %22 {strides = array<i32>} : memref<8x256xf32, #tpu.memory_space<vmem>>, vector<8x256xf32>,
    } else {
    }
    %c0 = arith.constant 0 : index
    %c0_1 = arith.constant 0 : index
    %3 = vector.load %arg3[%c0, %c0_1] : memref<8x256xbf16, #tpu.memory_space<vmem>>, vector<8x256xbf16>
    %4 = arith.extf %3 : vector<8x256xbf16> to vector<8x256xf32>
    %c0_2 = arith.constant 0 : index
    %c0_3 = arith.constant 0 : index
    %5 = vector.load %arg5[%c0_2, %c0_3] : memref<1x256xf32, #tpu.memory_space<vmem>>, vector<1x256xf32>
    %6 = vector.broadcast %5 : vector<1x256xf32> to vector<8x256xf32>
    %7 = arith.mulf %4, %6 : vector<8x256xf32>
    %c0_4 = arith.constant 0 : index
    %c0_5 = arith.constant 0 : index
    %8 = vector.load %arg6[%c0_4, %c0_5] : memref<1x256xf32, #tpu.memory_space<vmem>>, vector<1x256xf32>
    %9 = vector.broadcast %8 : vector<1x256xf32> to vector<8x256xf32>
    %10 = arith.addf %7, %9 : vector<8x256xf32>
    %cst = arith.constant 0.000000e+00 : f32
    %11 = vector.broadcast %cst : f32 to vector<8x256xf32>
    %12 = arith.maximumf %10, %11 : vector<8x256xf32>
    %13 = arith.truncf %12 : vector<8x256xf32> to vector<8x256xbf16>
    %c0_6 = arith.constant 0 : index
    %c0_7 = arith.constant 0 : index
    %14 = vector.load %arg10[%c0_6, %c0_7] : memref<8x256xf32, #tpu.memory_space<vmem>>, vector<8x256xf32>
    %c0_8 = arith.constant 0 : index
    %c0_9 = arith.constant 0 : index
    %15 = vector.load %arg4[%c0_8, %c0_9] : memref<256x256xbf16, #tpu.memory_space<vmem>>, vector<256x256xbf16>
    %cst_10 = arith.constant dense<0.000000e+00> : vector<8x256xf32>
    %16 = tpu.matmul %13, %15, %cst_10 {dimension_numbers = #tpu.dot_dimension_numbers<[1], [0], [0], [1], [0, 0, 1, 1], [], []>} : vector<8x256xbf16>, vector<256x256xbf16>, vector<8x256xf32> -> vector<8x256xf32>
    %17 = arith.addf %14, %16 : vector<8x256xf32>
    %c0_11 = arith.constant 0 : index
    %c0_12 = arith.constant 0 : index
    %18 = vector.load %arg10[%c0_11, %c0_12] : memref<8x256xf32, #tpu.memory_space<vmem>>, vector<8x256xf32>
    tpu.vector_store %arg10[%c0_11, %c0_12], %17 {strides = array<i32>} : memref<8x256xf32, #tpu.memory_space<vmem>>, vector<8x256xf32>,
    %c0_i32_13 = arith.constant 0 : i32
    %19 = arith.cmpi eq, %arg2, %c0_i32_13 : i32
    %20 = arith.extui %19 : i1 to i32
    %c0_i32_14 = arith.constant 0 : i32
    %21 = arith.cmpi ne, %20, %c0_i32_14 : i32
    scf.if %21 {
      %c0_15 = arith.constant 0 : index
      %c0_16 = arith.constant 0 : index
      %22 = vector.load %arg10[%c0_15, %c0_16] : memref<8x256xf32, #tpu.memory_space<vmem>>, vector<8x256xf32>
      %c0_17 = arith.constant 0 : index
      %c0_18 = arith.constant 0 : index
      %23 = vector.load %arg7[%c0_17, %c0_18] : memref<1x256xf32, #tpu.memory_space<vmem>>, vector<1x256xf32>
      %24 = vector.broadcast %23 : vector<1x256xf32> to vector<8x256xf32>
      %25 = arith.mulf %22, %24 : vector<8x256xf32>
      %c0_19 = arith.constant 0 : index
      %c0_20 = arith.constant 0 : index
      %26 = vector.load %arg8[%c0_19, %c0_20] : memref<1x256xf32, #tpu.memory_space<vmem>>, vector<1x256xf32>
      %27 = vector.broadcast %26 : vector<1x256xf32> to vector<8x256xf32>
      %28 = arith.addf %25, %27 : vector<8x256xf32>
      %29 = arith.truncf %28 : vector<8x256xf32> to vector<8x256xbf16>
      %c0_21 = arith.constant 0 : index
      %c0_22 = arith.constant 0 : index
      %30 = vector.load %arg9[%c0_21, %c0_22] : memref<8x256xbf16, #tpu.memory_space<vmem>>, vector<8x256xbf16>
      tpu.vector_store %arg9[%c0_21, %c0_22], %29 {strides = array<i32>} : memref<8x256xbf16, #tpu.memory_space<vmem>>, vector<8x256xbf16>,
    } else {
    }
    return
  }
  func.func @transform_0(%arg0: i32, %arg1: i32, %arg2: i32) -> (i32, i32) {
    %c0_i32 = arith.constant 0 : i32
    return %arg0, %arg2 : i32, i32
  }
  func.func @transform_1(%arg0: i32, %arg1: i32, %arg2: i32) -> (i32, i32) {
    %c0_i32 = arith.constant 0 : i32
    return %arg2, %arg1 : i32, i32
  }
  func.func @transform_2(%arg0: i32, %arg1: i32, %arg2: i32) -> (i32, i32) {
    %c0_i32 = arith.constant 0 : i32
    %c0_i32_0 = arith.constant 0 : i32
    return %c0_i32, %arg2 : i32, i32
  }
  func.func @transform_3(%arg0: i32, %arg1: i32, %arg2: i32) -> (i32, i32) {
    %c0_i32 = arith.constant 0 : i32
    %c0_i32_0 = arith.constant 0 : i32
    return %c0_i32, %arg2 : i32, i32
  }
  func.func @transform_4(%arg0: i32, %arg1: i32, %arg2: i32) -> (i32, i32) {
    %c0_i32 = arith.constant 0 : i32
    %c0_i32_0 = arith.constant 0 : i32
    return %c0_i32, %arg1 : i32, i32
  }
  func.func @transform_5(%arg0: i32, %arg1: i32, %arg2: i32) -> (i32, i32) {
    %c0_i32 = arith.constant 0 : i32
    %c0_i32_0 = arith.constant 0 : i32
    return %c0_i32, %arg1 : i32, i32
  }
  func.func @transform_6(%arg0: i32, %arg1: i32, %arg2: i32) -> (i32, i32) {
    %c0_i32 = arith.constant 0 : i32
    return %arg0, %arg1 : i32, i32
  }
}

module attributes {stable_mosaic.version = 11 : i64} {
  func.func @_mm_kernel(%arg0: i32, %arg1: i32, %arg2: i32, %arg3: memref<8x256xbf16, #tpu.memory_space<vmem>>, %arg4: memref<256x256xbf16, #tpu.memory_space<vmem>>, %arg5: memref<1x256xf32, #tpu.memory_space<vmem>>, %arg6: memref<1x256xf32, #tpu.memory_space<vmem>>, %arg7: memref<8x256xbf16, #tpu.memory_space<vmem>>, %arg8: memref<8x256xbf16, #tpu.memory_space<vmem>>, %arg9: memref<8x256xf32, #tpu.memory_space<vmem>>) attributes {dimension_semantics = [#tpu.dimension_semantics<parallel>, #tpu.dimension_semantics<parallel>, #tpu.dimension_semantics<arbitrary>], iteration_bounds = array<i64: 1, 2, 1>, scalar_prefetch = 0 : i64, scratch_operands = 1 : i64, tpu.core_type = #tpu.core_type<tc>, window_params = [{transform_indices = @transform_0, window_bounds = array<i64: 8, 256>}, {transform_indices = @transform_1, window_bounds = array<i64: 256, 256>}, {transform_indices = @transform_2, window_bounds = array<i64: 1, 256>}, {transform_indices = @transform_3, window_bounds = array<i64: 1, 256>}, {transform_indices = @transform_4, window_bounds = array<i64: 8, 256>}, {transform_indices = @transform_5, window_bounds = array<i64: 8, 256>}]} {
    %c0_i32 = arith.constant 0 : i32
    %0 = arith.cmpi eq, %arg2, %c0_i32 : i32
    %1 = arith.extui %0 : i1 to i32
    %c0_i32_0 = arith.constant 0 : i32
    %2 = arith.cmpi ne, %1, %c0_i32_0 : i32
    scf.if %2 {
      %cst_10 = arith.constant 0.000000e+00 : f32
      %12 = vector.broadcast %cst_10 : f32 to vector<8x256xf32>
      %c0_11 = arith.constant 0 : index
      %c0_12 = arith.constant 0 : index
      %13 = vector.load %arg9[%c0_11, %c0_12] : memref<8x256xf32, #tpu.memory_space<vmem>>, vector<8x256xf32>
      tpu.vector_store %arg9[%c0_11, %c0_12], %12 {strides = array<i32>} : memref<8x256xf32, #tpu.memory_space<vmem>>, vector<8x256xf32>,
    } else {
    }
    %c0 = arith.constant 0 : index
    %c0_1 = arith.constant 0 : index
    %3 = vector.load %arg3[%c0, %c0_1] : memref<8x256xbf16, #tpu.memory_space<vmem>>, vector<8x256xbf16>
    %c0_2 = arith.constant 0 : index
    %c0_3 = arith.constant 0 : index
    %4 = vector.load %arg9[%c0_2, %c0_3] : memref<8x256xf32, #tpu.memory_space<vmem>>, vector<8x256xf32>
    %c0_4 = arith.constant 0 : index
    %c0_5 = arith.constant 0 : index
    %5 = vector.load %arg4[%c0_4, %c0_5] : memref<256x256xbf16, #tpu.memory_space<vmem>>, vector<256x256xbf16>
    %cst = arith.constant dense<0.000000e+00> : vector<8x256xf32>
    %6 = tpu.matmul %3, %5, %cst {dimension_numbers = #tpu.dot_dimension_numbers<[1], [0], [0], [1], [0, 0, 1, 1], [], []>} : vector<8x256xbf16>, vector<256x256xbf16>, vector<8x256xf32> -> vector<8x256xf32>
    %7 = arith.addf %4, %6 : vector<8x256xf32>
    %c0_6 = arith.constant 0 : index
    %c0_7 = arith.constant 0 : index
    %8 = vector.load %arg9[%c0_6, %c0_7] : memref<8x256xf32, #tpu.memory_space<vmem>>, vector<8x256xf32>
    tpu.vector_store %arg9[%c0_6, %c0_7], %7 {strides = array<i32>} : memref<8x256xf32, #tpu.memory_space<vmem>>, vector<8x256xf32>,
    %c0_i32_8 = arith.constant 0 : i32
    %9 = arith.cmpi eq, %arg2, %c0_i32_8 : i32
    %10 = arith.extui %9 : i1 to i32
    %c0_i32_9 = arith.constant 0 : i32
    %11 = arith.cmpi ne, %10, %c0_i32_9 : i32
    scf.if %11 {
      %c0_10 = arith.constant 0 : index
      %c0_11 = arith.constant 0 : index
      %12 = vector.load %arg9[%c0_10, %c0_11] : memref<8x256xf32, #tpu.memory_space<vmem>>, vector<8x256xf32>
      %c0_12 = arith.constant 0 : index
      %c0_13 = arith.constant 0 : index
      %13 = vector.load %arg5[%c0_12, %c0_13] : memref<1x256xf32, #tpu.memory_space<vmem>>, vector<1x256xf32>
      %14 = vector.broadcast %13 : vector<1x256xf32> to vector<8x256xf32>
      %15 = arith.mulf %12, %14 : vector<8x256xf32>
      %c0_14 = arith.constant 0 : index
      %c0_15 = arith.constant 0 : index
      %16 = vector.load %arg6[%c0_14, %c0_15] : memref<1x256xf32, #tpu.memory_space<vmem>>, vector<1x256xf32>
      %17 = vector.broadcast %16 : vector<1x256xf32> to vector<8x256xf32>
      %18 = arith.addf %15, %17 : vector<8x256xf32>
      %c0_16 = arith.constant 0 : index
      %c0_17 = arith.constant 0 : index
      %19 = vector.load %arg7[%c0_16, %c0_17] : memref<8x256xbf16, #tpu.memory_space<vmem>>, vector<8x256xbf16>
      %20 = arith.extf %19 : vector<8x256xbf16> to vector<8x256xf32>
      %21 = arith.addf %18, %20 : vector<8x256xf32>
      %22 = arith.truncf %21 : vector<8x256xf32> to vector<8x256xbf16>
      %c0_18 = arith.constant 0 : index
      %c0_19 = arith.constant 0 : index
      %23 = vector.load %arg8[%c0_18, %c0_19] : memref<8x256xbf16, #tpu.memory_space<vmem>>, vector<8x256xbf16>
      tpu.vector_store %arg8[%c0_18, %c0_19], %22 {strides = array<i32>} : memref<8x256xbf16, #tpu.memory_space<vmem>>, vector<8x256xbf16>,
    } else {
    }
    return
  }
  func.func @transform_0(%arg0: i32, %arg1: i32, %arg2: i32) -> (i32, i32) {
    %c0_i32 = arith.constant 0 : i32
    return %arg0, %arg2 : i32, i32
  }
  func.func @transform_1(%arg0: i32, %arg1: i32, %arg2: i32) -> (i32, i32) {
    %c0_i32 = arith.constant 0 : i32
    return %arg2, %arg1 : i32, i32
  }
  func.func @transform_2(%arg0: i32, %arg1: i32, %arg2: i32) -> (i32, i32) {
    %c0_i32 = arith.constant 0 : i32
    %c0_i32_0 = arith.constant 0 : i32
    return %c0_i32, %arg1 : i32, i32
  }
  func.func @transform_3(%arg0: i32, %arg1: i32, %arg2: i32) -> (i32, i32) {
    %c0_i32 = arith.constant 0 : i32
    %c0_i32_0 = arith.constant 0 : i32
    return %c0_i32, %arg1 : i32, i32
  }
  func.func @transform_4(%arg0: i32, %arg1: i32, %arg2: i32) -> (i32, i32) {
    %c0_i32 = arith.constant 0 : i32
    return %arg0, %arg1 : i32, i32
  }
  func.func @transform_5(%arg0: i32, %arg1: i32, %arg2: i32) -> (i32, i32) {
    %c0_i32 = arith.constant 0 : i32
    return %arg0, %arg1 : i32, i32
  }
}

module attributes {stable_mosaic.version = 11 : i64} {
  func.func @_mm_kernel(%arg0: i32, %arg1: i32, %arg2: i32, %arg3: memref<8x512xbf16, #tpu.memory_space<vmem>>, %arg4: memref<512x128xbf16, #tpu.memory_space<vmem>>, %arg5: memref<1x512xf32, #tpu.memory_space<vmem>>, %arg6: memref<1x512xf32, #tpu.memory_space<vmem>>, %arg7: memref<1x128xf32, #tpu.memory_space<vmem>>, %arg8: memref<1x128xf32, #tpu.memory_space<vmem>>, %arg9: memref<8x128xf32, #tpu.memory_space<vmem>>, %arg10: memref<8x128xf32, #tpu.memory_space<vmem>>) attributes {dimension_semantics = [#tpu.dimension_semantics<parallel>, #tpu.dimension_semantics<parallel>, #tpu.dimension_semantics<arbitrary>], iteration_bounds = array<i64: 1, 1, 1>, scalar_prefetch = 0 : i64, scratch_operands = 1 : i64, tpu.core_type = #tpu.core_type<tc>, window_params = [{transform_indices = @transform_0, window_bounds = array<i64: 8, 512>}, {transform_indices = @transform_1, window_bounds = array<i64: 512, 128>}, {transform_indices = @transform_2, window_bounds = array<i64: 1, 512>}, {transform_indices = @transform_3, window_bounds = array<i64: 1, 512>}, {transform_indices = @transform_4, window_bounds = array<i64: 1, 128>}, {transform_indices = @transform_5, window_bounds = array<i64: 1, 128>}, {transform_indices = @transform_6, window_bounds = array<i64: 8, 128>}]} {
    %c0_i32 = arith.constant 0 : i32
    %0 = arith.cmpi eq, %arg2, %c0_i32 : i32
    %1 = arith.extui %0 : i1 to i32
    %c0_i32_0 = arith.constant 0 : i32
    %2 = arith.cmpi ne, %1, %c0_i32_0 : i32
    scf.if %2 {
      %cst_15 = arith.constant 0.000000e+00 : f32
      %22 = vector.broadcast %cst_15 : f32 to vector<8x128xf32>
      %c0_16 = arith.constant 0 : index
      %c0_17 = arith.constant 0 : index
      %23 = vector.load %arg10[%c0_16, %c0_17] : memref<8x128xf32, #tpu.memory_space<vmem>>, vector<8x128xf32>
      tpu.vector_store %arg10[%c0_16, %c0_17], %22 {strides = array<i32>} : memref<8x128xf32, #tpu.memory_space<vmem>>, vector<8x128xf32>,
    } else {
    }
    %c0 = arith.constant 0 : index
    %c0_1 = arith.constant 0 : index
    %3 = vector.load %arg3[%c0, %c0_1] : memref<8x512xbf16, #tpu.memory_space<vmem>>, vector<8x512xbf16>
    %4 = arith.extf %3 : vector<8x512xbf16> to vector<8x512xf32>
    %c0_2 = arith.constant 0 : index
    %c0_3 = arith.constant 0 : index
    %5 = vector.load %arg5[%c0_2, %c0_3] : memref<1x512xf32, #tpu.memory_space<vmem>>, vector<1x512xf32>
    %6 = vector.broadcast %5 : vector<1x512xf32> to vector<8x512xf32>
    %7 = arith.mulf %4, %6 : vector<8x512xf32>
    %c0_4 = arith.constant 0 : index
    %c0_5 = arith.constant 0 : index
    %8 = vector.load %arg6[%c0_4, %c0_5] : memref<1x512xf32, #tpu.memory_space<vmem>>, vector<1x512xf32>
    %9 = vector.broadcast %8 : vector<1x512xf32> to vector<8x512xf32>
    %10 = arith.addf %7, %9 : vector<8x512xf32>
    %cst = arith.constant 0.000000e+00 : f32
    %11 = vector.broadcast %cst : f32 to vector<8x512xf32>
    %12 = arith.maximumf %10, %11 : vector<8x512xf32>
    %13 = arith.truncf %12 : vector<8x512xf32> to vector<8x512xbf16>
    %c0_6 = arith.constant 0 : index
    %c0_7 = arith.constant 0 : index
    %14 = vector.load %arg10[%c0_6, %c0_7] : memref<8x128xf32, #tpu.memory_space<vmem>>, vector<8x128xf32>
    %c0_8 = arith.constant 0 : index
    %c0_9 = arith.constant 0 : index
    %15 = vector.load %arg4[%c0_8, %c0_9] : memref<512x128xbf16, #tpu.memory_space<vmem>>, vector<512x128xbf16>
    %cst_10 = arith.constant dense<0.000000e+00> : vector<8x128xf32>
    %16 = tpu.matmul %13, %15, %cst_10 {dimension_numbers = #tpu.dot_dimension_numbers<[1], [0], [0], [1], [0, 0, 1, 1], [], []>} : vector<8x512xbf16>, vector<512x128xbf16>, vector<8x128xf32> -> vector<8x128xf32>
    %17 = arith.addf %14, %16 : vector<8x128xf32>
    %c0_11 = arith.constant 0 : index
    %c0_12 = arith.constant 0 : index
    %18 = vector.load %arg10[%c0_11, %c0_12] : memref<8x128xf32, #tpu.memory_space<vmem>>, vector<8x128xf32>
    tpu.vector_store %arg10[%c0_11, %c0_12], %17 {strides = array<i32>} : memref<8x128xf32, #tpu.memory_space<vmem>>, vector<8x128xf32>,
    %c0_i32_13 = arith.constant 0 : i32
    %19 = arith.cmpi eq, %arg2, %c0_i32_13 : i32
    %20 = arith.extui %19 : i1 to i32
    %c0_i32_14 = arith.constant 0 : i32
    %21 = arith.cmpi ne, %20, %c0_i32_14 : i32
    scf.if %21 {
      %c0_15 = arith.constant 0 : index
      %c0_16 = arith.constant 0 : index
      %22 = vector.load %arg10[%c0_15, %c0_16] : memref<8x128xf32, #tpu.memory_space<vmem>>, vector<8x128xf32>
      %c0_17 = arith.constant 0 : index
      %c0_18 = arith.constant 0 : index
      %23 = vector.load %arg7[%c0_17, %c0_18] : memref<1x128xf32, #tpu.memory_space<vmem>>, vector<1x128xf32>
      %24 = vector.broadcast %23 : vector<1x128xf32> to vector<8x128xf32>
      %25 = arith.mulf %22, %24 : vector<8x128xf32>
      %c0_19 = arith.constant 0 : index
      %c0_20 = arith.constant 0 : index
      %26 = vector.load %arg8[%c0_19, %c0_20] : memref<1x128xf32, #tpu.memory_space<vmem>>, vector<1x128xf32>
      %27 = vector.broadcast %26 : vector<1x128xf32> to vector<8x128xf32>
      %28 = arith.addf %25, %27 : vector<8x128xf32>
      %cst_21 = arith.constant 0.000000e+00 : f32
      %29 = vector.broadcast %cst_21 : f32 to vector<8x128xf32>
      %30 = arith.maximumf %28, %29 : vector<8x128xf32>
      %c0_22 = arith.constant 0 : index
      %c0_23 = arith.constant 0 : index
      %31 = vector.load %arg9[%c0_22, %c0_23] : memref<8x128xf32, #tpu.memory_space<vmem>>, vector<8x128xf32>
      tpu.vector_store %arg9[%c0_22, %c0_23], %30 {strides = array<i32>} : memref<8x128xf32, #tpu.memory_space<vmem>>, vector<8x128xf32>,
    } else {
    }
    return
  }
  func.func @transform_0(%arg0: i32, %arg1: i32, %arg2: i32) -> (i32, i32) {
    %c0_i32 = arith.constant 0 : i32
    return %arg0, %arg2 : i32, i32
  }
  func.func @transform_1(%arg0: i32, %arg1: i32, %arg2: i32) -> (i32, i32) {
    %c0_i32 = arith.constant 0 : i32
    return %arg2, %arg1 : i32, i32
  }
  func.func @transform_2(%arg0: i32, %arg1: i32, %arg2: i32) -> (i32, i32) {
    %c0_i32 = arith.constant 0 : i32
    %c0_i32_0 = arith.constant 0 : i32
    return %c0_i32, %arg2 : i32, i32
  }
  func.func @transform_3(%arg0: i32, %arg1: i32, %arg2: i32) -> (i32, i32) {
    %c0_i32 = arith.constant 0 : i32
    %c0_i32_0 = arith.constant 0 : i32
    return %c0_i32, %arg2 : i32, i32
  }
  func.func @transform_4(%arg0: i32, %arg1: i32, %arg2: i32) -> (i32, i32) {
    %c0_i32 = arith.constant 0 : i32
    %c0_i32_0 = arith.constant 0 : i32
    return %c0_i32, %arg1 : i32, i32
  }
  func.func @transform_5(%arg0: i32, %arg1: i32, %arg2: i32) -> (i32, i32) {
    %c0_i32 = arith.constant 0 : i32
    %c0_i32_0 = arith.constant 0 : i32
    return %c0_i32, %arg1 : i32, i32
  }
  func.func @transform_6(%arg0: i32, %arg1: i32, %arg2: i32) -> (i32, i32) {
    %c0_i32 = arith.constant 0 : i32
    return %arg0, %arg1 : i32, i32
  }
}

module attributes {stable_mosaic.version = 11 : i64} {
  func.func @_mm_kernel(%arg0: i32, %arg1: i32, %arg2: i32, %arg3: memref<8x128xbf16, #tpu.memory_space<vmem>>, %arg4: memref<128x128xbf16, #tpu.memory_space<vmem>>, %arg5: memref<1x128xf32, #tpu.memory_space<vmem>>, %arg6: memref<1x128xf32, #tpu.memory_space<vmem>>, %arg7: memref<8x128xf32, #tpu.memory_space<vmem>>, %arg8: memref<8x128xf32, #tpu.memory_space<vmem>>) attributes {dimension_semantics = [#tpu.dimension_semantics<parallel>, #tpu.dimension_semantics<parallel>, #tpu.dimension_semantics<arbitrary>], iteration_bounds = array<i64: 1, 1, 1>, scalar_prefetch = 0 : i64, scratch_operands = 1 : i64, tpu.core_type = #tpu.core_type<tc>, window_params = [{transform_indices = @transform_0, window_bounds = array<i64: 8, 128>}, {transform_indices = @transform_1, window_bounds = array<i64: 128, 128>}, {transform_indices = @transform_2, window_bounds = array<i64: 1, 128>}, {transform_indices = @transform_3, window_bounds = array<i64: 1, 128>}, {transform_indices = @transform_4, window_bounds = array<i64: 8, 128>}]} {
    %c0_i32 = arith.constant 0 : i32
    %0 = arith.cmpi eq, %arg2, %c0_i32 : i32
    %1 = arith.extui %0 : i1 to i32
    %c0_i32_0 = arith.constant 0 : i32
    %2 = arith.cmpi ne, %1, %c0_i32_0 : i32
    scf.if %2 {
      %cst_10 = arith.constant 0.000000e+00 : f32
      %12 = vector.broadcast %cst_10 : f32 to vector<8x128xf32>
      %c0_11 = arith.constant 0 : index
      %c0_12 = arith.constant 0 : index
      %13 = vector.load %arg8[%c0_11, %c0_12] : memref<8x128xf32, #tpu.memory_space<vmem>>, vector<8x128xf32>
      tpu.vector_store %arg8[%c0_11, %c0_12], %12 {strides = array<i32>} : memref<8x128xf32, #tpu.memory_space<vmem>>, vector<8x128xf32>,
    } else {
    }
    %c0 = arith.constant 0 : index
    %c0_1 = arith.constant 0 : index
    %3 = vector.load %arg3[%c0, %c0_1] : memref<8x128xbf16, #tpu.memory_space<vmem>>, vector<8x128xbf16>
    %c0_2 = arith.constant 0 : index
    %c0_3 = arith.constant 0 : index
    %4 = vector.load %arg8[%c0_2, %c0_3] : memref<8x128xf32, #tpu.memory_space<vmem>>, vector<8x128xf32>
    %c0_4 = arith.constant 0 : index
    %c0_5 = arith.constant 0 : index
    %5 = vector.load %arg4[%c0_4, %c0_5] : memref<128x128xbf16, #tpu.memory_space<vmem>>, vector<128x128xbf16>
    %cst = arith.constant dense<0.000000e+00> : vector<8x128xf32>
    %6 = tpu.matmul %3, %5, %cst {dimension_numbers = #tpu.dot_dimension_numbers<[1], [0], [0], [1], [0, 0, 1, 1], [], []>} : vector<8x128xbf16>, vector<128x128xbf16>, vector<8x128xf32> -> vector<8x128xf32>
    %7 = arith.addf %4, %6 : vector<8x128xf32>
    %c0_6 = arith.constant 0 : index
    %c0_7 = arith.constant 0 : index
    %8 = vector.load %arg8[%c0_6, %c0_7] : memref<8x128xf32, #tpu.memory_space<vmem>>, vector<8x128xf32>
    tpu.vector_store %arg8[%c0_6, %c0_7], %7 {strides = array<i32>} : memref<8x128xf32, #tpu.memory_space<vmem>>, vector<8x128xf32>,
    %c0_i32_8 = arith.constant 0 : i32
    %9 = arith.cmpi eq, %arg2, %c0_i32_8 : i32
    %10 = arith.extui %9 : i1 to i32
    %c0_i32_9 = arith.constant 0 : i32
    %11 = arith.cmpi ne, %10, %c0_i32_9 : i32
    scf.if %11 {
      %c0_10 = arith.constant 0 : index
      %c0_11 = arith.constant 0 : index
      %12 = vector.load %arg8[%c0_10, %c0_11] : memref<8x128xf32, #tpu.memory_space<vmem>>, vector<8x128xf32>
      %c0_12 = arith.constant 0 : index
      %c0_13 = arith.constant 0 : index
      %13 = vector.load %arg5[%c0_12, %c0_13] : memref<1x128xf32, #tpu.memory_space<vmem>>, vector<1x128xf32>
      %14 = vector.broadcast %13 : vector<1x128xf32> to vector<8x128xf32>
      %15 = arith.mulf %12, %14 : vector<8x128xf32>
      %c0_14 = arith.constant 0 : index
      %c0_15 = arith.constant 0 : index
      %16 = vector.load %arg6[%c0_14, %c0_15] : memref<1x128xf32, #tpu.memory_space<vmem>>, vector<1x128xf32>
      %17 = vector.broadcast %16 : vector<1x128xf32> to vector<8x128xf32>
      %18 = arith.addf %15, %17 : vector<8x128xf32>
      %c0_16 = arith.constant 0 : index
      %c0_17 = arith.constant 0 : index
      %19 = vector.load %arg7[%c0_16, %c0_17] : memref<8x128xf32, #tpu.memory_space<vmem>>, vector<8x128xf32>
      tpu.vector_store %arg7[%c0_16, %c0_17], %18 {strides = array<i32>} : memref<8x128xf32, #tpu.memory_space<vmem>>, vector<8x128xf32>,
    } else {
    }
    return
  }
  func.func @transform_0(%arg0: i32, %arg1: i32, %arg2: i32) -> (i32, i32) {
    %c0_i32 = arith.constant 0 : i32
    return %arg0, %arg2 : i32, i32
  }
  func.func @transform_1(%arg0: i32, %arg1: i32, %arg2: i32) -> (i32, i32) {
    %c0_i32 = arith.constant 0 : i32
    return %arg2, %arg1 : i32, i32
  }
  func.func @transform_2(%arg0: i32, %arg1: i32, %arg2: i32) -> (i32, i32) {
    %c0_i32 = arith.constant 0 : i32
    %c0_i32_0 = arith.constant 0 : i32
    return %c0_i32, %arg1 : i32, i32
  }
  func.func @transform_3(%arg0: i32, %arg1: i32, %arg2: i32) -> (i32, i32) {
    %c0_i32 = arith.constant 0 : i32
    %c0_i32_0 = arith.constant 0 : i32
    return %c0_i32, %arg1 : i32, i32
  }
  func.func @transform_4(%arg0: i32, %arg1: i32, %arg2: i32) -> (i32, i32) {
    %c0_i32 = arith.constant 0 : i32
    return %arg0, %arg1 : i32, i32
  }
}

module attributes {stable_mosaic.version = 11 : i64} {
  func.func @_recam_kernel(%arg0: i32, %arg1: memref<1x8x128xbf16, #tpu.memory_space<vmem>>, %arg2: memref<1x8x128xbf16, #tpu.memory_space<vmem>>, %arg3: memref<1x128x128xf32, #tpu.memory_space<vmem>>) attributes {dimension_semantics = [#tpu.dimension_semantics<parallel>], iteration_bounds = array<i64: 2>, scalar_prefetch = 0 : i64, scratch_operands = 0 : i64, tpu.core_type = #tpu.core_type<tc>, window_params = [{transform_indices = @transform_0, window_bounds = array<i64: 1, 8, 128>}, {transform_indices = @transform_1, window_bounds = array<i64: 1, 8, 128>}, {transform_indices = @transform_2, window_bounds = array<i64: 1, 128, 128>}]} {
    %c0 = arith.constant 0 : index
    %c0_0 = arith.constant 0 : index
    %c0_1 = arith.constant 0 : index
    %0 = vector.load %arg1[%c0, %c0_0, %c0_1] : memref<1x8x128xbf16, #tpu.memory_space<vmem>>, vector<1x8x128xbf16>
    %1 = vector.shape_cast %0 : vector<1x8x128xbf16> to vector<8x128xbf16>
    %c0_2 = arith.constant 0 : index
    %c0_3 = arith.constant 0 : index
    %c0_4 = arith.constant 0 : index
    %2 = vector.load %arg2[%c0_2, %c0_3, %c0_4] : memref<1x8x128xbf16, #tpu.memory_space<vmem>>, vector<1x8x128xbf16>
    %3 = vector.shape_cast %2 : vector<1x8x128xbf16> to vector<8x128xbf16>
    %cst = arith.constant dense<0.000000e+00> : vector<128x128xf32>
    %4 = tpu.matmul %1, %3, %cst {dimension_numbers = #tpu.dot_dimension_numbers<[0], [0], [1], [1], [0, 1, 1, 1], [], []>} : vector<8x128xbf16>, vector<8x128xbf16>, vector<128x128xf32> -> vector<128x128xf32>
    %cst_5 = arith.constant 2.500000e-01 : f32
    %5 = vector.broadcast %cst_5 : f32 to vector<128x128xf32>
    %6 = arith.mulf %4, %5 : vector<128x128xf32>
    %c0_6 = arith.constant 0 : index
    %c0_7 = arith.constant 0 : index
    %c0_8 = arith.constant 0 : index
    %7 = vector.load %arg3[%c0_6, %c0_7, %c0_8] : memref<1x128x128xf32, #tpu.memory_space<vmem>>, vector<1x128x128xf32>
    %8 = vector.shape_cast %7 : vector<1x128x128xf32> to vector<128x128xf32>
    %9 = vector.shape_cast %6 : vector<128x128xf32> to vector<1x128x128xf32>
    tpu.vector_store %arg3[%c0_6, %c0_7, %c0_8], %9 {strides = array<i32>} : memref<1x128x128xf32, #tpu.memory_space<vmem>>, vector<1x128x128xf32>,
    return
  }
  func.func @transform_0(%arg0: i32) -> (i32, i32, i32) {
    %c0_i32 = arith.constant 0 : i32
    %c0_i32_0 = arith.constant 0 : i32
    %c0_i32_1 = arith.constant 0 : i32
    return %arg0, %c0_i32, %c0_i32_0 : i32, i32, i32
  }
  func.func @transform_1(%arg0: i32) -> (i32, i32, i32) {
    %c0_i32 = arith.constant 0 : i32
    %c0_i32_0 = arith.constant 0 : i32
    %c0_i32_1 = arith.constant 0 : i32
    return %arg0, %c0_i32, %c0_i32_0 : i32, i32, i32
  }
  func.func @transform_2(%arg0: i32) -> (i32, i32, i32) {
    %c0_i32 = arith.constant 0 : i32
    %c0_i32_0 = arith.constant 0 : i32
    %c0_i32_1 = arith.constant 0 : i32
    return %arg0, %c0_i32, %c0_i32_0 : i32, i32, i32
  }
}

</mosaic_0001>

<bundles_post_ra>
// kernel: net_recam_forward.47
= control target key start
LH: loop header
LB: loop body
LE: loop exit
PB: predicated region body
PF: predicated region fallthrough
CT: control target
= control target key end

     0   :  { %s1525_s15 = smov 0   ;;  %s1527_s16 = smov 0   ;;  %s1697_s0 = inlined_call_operand.vmem [shape: bf16[512,32], index: 0, kind: input, shape index: {}]   ;;  %s1698_s1 = inlined_call_operand.vmem [shape: bf16[32,128], index: 1, kind: input, shape index: {}]   ;;  %s1699_s2 = inlined_call_operand.vmem [shape: f32[1,128], index: 2, kind: input, shape index: {}]   ;;  %s1700_s3 = inlined_call_operand.vmem [shape: f32[1,128], index: 3, kind: input, shape index: {}]   ;;  %s1701_s4 = inlined_call_operand.vmem [shape: bf16[512,128], index: 4, kind: output, shape index: {}]  }
   0x1   :  { %s1529_s17 = smov 0  }
   0x2 LB: > { %s33_s18 = sadd.s32 1, %s1494_s16  ;;  %p1174_p0 = scmp.ge.s32.totalorder %s1498_s17, 1  ;;  %s1498_s17 = sphi %s1529_s17, %s14_s17   ;;  %s1494_s16 = sphi %s1527_s16, %s1703_s16   ;;  %s1490_s15 = sphi %s1525_s15, %s1702_s15  }
   0x3   : > { %p35_p1 = scmp.ge.s32.totalorder %s33_s18, 2  ;;  %p221_p2 = scmp.lt.s32.totalorder %s1498_s17, 3 }
   0x5   : > { %s1705_s18 = smov (%p35_p1, %s33_s18), 0  ;;  %p222_p3 = pnand %p1174_p0, %p221_p2 }
   0x6   : > { %s1175_s21 = sshll.u32 (!%p222_p3), %s1490_s15, 5 }
   0x7   : > { %225 = sbr.rel (%p222_p3) target bundleno = 251 (0xfb), region = 36  ;;  %p268_p4 = scmp.lt.s32.totalorder (!%p222_p3), %s1175_s21, 63 }
   0xc   : > { %v1458_v0 = vld [vmem:[%s1698_s1 + $0x8] sm:$0xff]   ;;  %v1459_v1 = vld [vmem:[%s1698_s1] sm:$0xff]   ;;  %s1707_s21 = smov (!%p268_p4, %s1175_s21), 63  ;;  %vm497_vm0 = vcmask 261120  }
   0xd   : > { %1394 = vmatprep.subr.bf16.mxu0 %v1458_v0  ;;  %1430 = vmatprep.subr.bf16.mxu1 %v1458_v0  ;;  %s1176_s24 = sshll.u32 %s1707_s21, 2  ;;  %v1594_v19 = vld [vmem:[%s1699_s2] ss:$0 sm:$0xff] }
   0xe   : > { %1395 = vmatpush3.bf16.msra.mxu0 %v1458_v0  ;;  %1432 = vmatpush3.bf16.msra.mxu1 %v1458_v0  ;;  %s1557_s27 = scalar_lea.vmem %s1697_s0, %s1176_s24  ;;  %v1600_v24 = vld [vmem:[%s1700_s3] ss:$0 sm:$0xff]  ;;  %s1616_s8 = scalar_lea.vmem %s1701_s4, %s1176_s24 }
   0xf   : > { %1396 = vmatprep.subr.bf16.mxu0 %v1459_v1  ;;  %1431 = vmatprep.subr.bf16.mxu1 %v1459_v1  ;;  %v1460_v2 = vld [vmem:[%s1557_s27] sm:$0xff]   ;;  %v1462_v4 = vld [vmem:[%s1557_s27 + $0x8] sm:$0xff]   ;;  %v1464_v6 = vld [vmem:[%s1557_s27 + $0x10] sm:$0xff]  }
  0x10   : > { %v1461_v3 = vld [vmem:[%s1557_s27 + $0x40] sm:$0xff]   ;;  %1398 = vmatprep.mubr.msk.bf16.mxu0 %vm497_vm0, %v1460_v2  ;;  %v1463_v5 = vld [vmem:[%s1557_s27 + $0x48] sm:$0xff]   ;;  %v1465_v7 = vld [vmem:[%s1557_s27 + $0x50] sm:$0xff]  }
  0x11   : > { %1414 = vmatprep.mubr.msk.bf16.mxu1 %vm497_vm0, %v1461_v3  ;;  %v1466_v8 = vld [vmem:[%s1557_s27 + $0x18] sm:$0xff]   ;;  %v1468_v10 = vld [vmem:[%s1557_s27 + $0x20] sm:$0xff]   ;;  %v1470_v12 = vld [vmem:[%s1557_s27 + $0x28] sm:$0xff]  }
  0x12   : > { %1397 = vmatpush3.bf16.msra.mxu0 %v1459_v1  ;;  %1433 = vmatpush3.bf16.msra.mxu1 %v1459_v1  ;;  %v1467_v9 = vld [vmem:[%s1557_s27 + $0x58] sm:$0xff]   ;;  %v1469_v11 = vld [vmem:[%s1557_s27 + $0x60] sm:$0xff]   ;;  %v1471_v13 = vld [vmem:[%s1557_s27 + $0x68] sm:$0xff]  }
  0x13   : > { %v1472_v14 = vld [vmem:[%s1557_s27 + $0x30] sm:$0xff]   ;;  %v1474_v16 = vld [vmem:[%s1557_s27 + $0x38] sm:$0xff]  }
  0x14   : > { %v1473_v15 = vld [vmem:[%s1557_s27 + $0x70] sm:$0xff]   ;;  %v1475_v17 = vld [vmem:[%s1557_s27 + $0x78] sm:$0xff]  }
  0x15   : > { %1399 = vmatmul.mubr.msk.bf16.vlgmr.msra.gmra.mxu0 %vm497_vm0, %v1462_v4  ;;  %1415 = vmatmul.mubr.msk.bf16.vlgmr.msra.gmra.mxu1 %vm497_vm0, %v1463_v5 }
  0x16   : > { %1402 = vmatprep.mubr.msk.bf16.mxu0 %vm497_vm0, %v1464_v6  ;;  %1418 = vmatprep.mubr.msk.bf16.mxu1 %vm497_vm0, %v1465_v7 }
  0x1d   : > { %1403 = vmatmul.mubr.msk.bf16.gmra.mxu0 %vm497_vm0, %v1466_v8  ;;  %1419 = vmatmul.mubr.msk.bf16.gmra.mxu1 %vm497_vm0, %v1467_v9 }
  0x1e   : > { %1406 = vmatprep.mubr.msk.bf16.mxu0 %vm497_vm0, %v1468_v10  ;;  %1422 = vmatprep.mubr.msk.bf16.mxu1 %vm497_vm0, %v1469_v11 }
  0x25   : > { %1407 = vmatmul.mubr.msk.bf16.gmra.mxu0 %vm497_vm0, %v1470_v12  ;;  %1423 = vmatmul.mubr.msk.bf16.gmra.mxu1 %vm497_vm0, %v1471_v13 }
  0x26   : > { %1410 = vmatprep.mubr.msk.bf16.mxu0 %vm497_vm0, %v1472_v14  ;;  %1426 = vmatprep.mubr.msk.bf16.mxu1 %vm497_vm0, %v1473_v15 }
  0x2d   : > { %1411 = vmatmul.mubr.msk.bf16.gmra.mxu0 %vm497_vm0, %v1474_v16  ;;  %1427 = vmatmul.mubr.msk.bf16.gmra.mxu1 %vm497_vm0, %v1475_v17 }
  0xd5   : > { %v1400_v18 = vpop.f32.mrf.mxu0  ;;  %v1416_v20 = vpop.f32.mrf.mxu1 }
  0xd6   : > { %v815_v22 = vmul.f32 %v1400_v18, %v1594_v19  ;;  %v831_v25 = vmul.f32 %v1416_v20, %v1594_v19 }
  0xd7   : > { %v580_v21 = vpop.f32.mrf.mxu0  ;;  %v644_v23 = vpop.f32.mrf.mxu1 }
  0xd8   : > { %v813_v27 = vmul.f32 %v1594_v19, %v580_v21  ;;  %v829_v30 = vmul.f32 %v1594_v19, %v644_v23  ;;  %v854_v33 = vadd.f32 %v1600_v24, %v815_v22  ;;  %v870_v37 = vadd.f32 %v1600_v24, %v831_v25 }
  0xd9   : > { %v1401_v26 = vpop.f32.mrf.mxu0  ;;  %v1417_v29 = vpop.f32.mrf.mxu1 }
  0xda   : > { %v816_v28 = vmul.f32 %v1401_v26, %v1594_v19  ;;  %v832_v31 = vmul.f32 %v1417_v29, %v1594_v19  ;;  %v852_v41 = vadd.f32 %v1600_v24, %v813_v27  ;;  %v868_v45 = vadd.f32 %v1600_v24, %v829_v30 }
  0xdb   : > { %v583_v32 = vpop.f32.mrf.mxu0  ;;  %v647_v36 = vpop.f32.mrf.mxu1 }
  0xdc   : > { %v855_v34 = vadd.f32 %v1600_v24, %v816_v28  ;;  %v814_v35 = vmul.f32 %v1594_v19, %v583_v32  ;;  %v871_v38 = vadd.f32 %v1600_v24, %v832_v31  ;;  %v830_v39 = vmul.f32 %v1594_v19, %v647_v36 }
  0xdd   : > { %v1404_v40 = vpop.f32.mrf.mxu0  ;;  %v1420_v44 = vpop.f32.mrf.mxu1 }
  0xde   : > { %v1289_v42 = vpack.c.bf16 %v855_v34, %v854_v33  ;;  %v853_v43 = vadd.f32 %v1600_v24, %v814_v35  ;;  %v1329_v46 = vpack.c.bf16 %v871_v38, %v870_v37  ;;  %v869_v47 = vadd.f32 %v1600_v24, %v830_v39 }
  0xdf   : > { %v596_v48 = vpop.f32.mrf.mxu0  ;;  %v819_v50 = vmul.f32 %v1404_v40, %v1594_v19  ;;  %v660_v51 = vpop.f32.mrf.mxu1  ;;  %v835_v53 = vmul.f32 %v1420_v44, %v1594_v19 }
  0xe0   : > { %1361 = vst [vmem:[%s1616_s8 + $0x8] sm:$0xff] %v1289_v42   ;;  %v1284_v49 = vpack.c.bf16 %v853_v43, %v852_v41  ;;  %1369 = vst [vmem:[%s1616_s8 + $0x48] sm:$0xff] %v1329_v46   ;;  %v1324_v52 = vpack.c.bf16 %v869_v47, %v868_v45  ;;  %v817_v55 = vmul.f32 %v1594_v19, %v596_v48 }
  0xe1   : > { %v1405_v54 = vpop.f32.mrf.mxu0  ;;  %v1421_v57 = vpop.f32.mrf.mxu1  ;;  %v833_v58 = vmul.f32 %v1594_v19, %v660_v51  ;;  %v858_v61 = vadd.f32 %v1600_v24, %v819_v50  ;;  %v874_v1 = vadd.f32 %v1600_v24, %v835_v53 }
  0xe2   : > { %1285 = vst [vmem:[%s1616_s8] sm:$0xff] %v1284_v49   ;;  %v820_v56 = vmul.f32 %v1405_v54, %v1594_v19  ;;  %1368 = vst [vmem:[%s1616_s8 + $0x40] sm:$0xff] %v1324_v52   ;;  %v836_v59 = vmul.f32 %v1421_v57, %v1594_v19  ;;  %v856_v5 = vadd.f32 %v1600_v24, %v817_v55 }
  0xe3   : > { %v599_v60 = vpop.f32.mrf.mxu0  ;;  %v663_v0 = vpop.f32.mrf.mxu1  ;;  %v872_v9 = vadd.f32 %v1600_v24, %v833_v58 }
  0xe4   : > { %v859_v62 = vadd.f32 %v1600_v24, %v820_v56  ;;  %v818_v63 = vmul.f32 %v1594_v19, %v599_v60  ;;  %v875_v2 = vadd.f32 %v1600_v24, %v836_v59  ;;  %v834_v3 = vmul.f32 %v1594_v19, %v663_v0 }
  0xe5   : > { %v1408_v4 = vpop.f32.mrf.mxu0  ;;  %v1424_v8 = vpop.f32.mrf.mxu1 }
  0xe6   : > { %v1299_v6 = vpack.c.bf16 %v859_v62, %v858_v61  ;;  %v857_v7 = vadd.f32 %v1600_v24, %v818_v63  ;;  %v1339_v10 = vpack.c.bf16 %v875_v2, %v874_v1  ;;  %v873_v11 = vadd.f32 %v1600_v24, %v834_v3 }
  0xe7   : > { %v612_v12 = vpop.f32.mrf.mxu0  ;;  %v823_v14 = vmul.f32 %v1408_v4, %v1594_v19  ;;  %v676_v15 = vpop.f32.mrf.mxu1  ;;  %v839_v17 = vmul.f32 %v1424_v8, %v1594_v19 }
  0xe8   : > { %1363 = vst [vmem:[%s1616_s8 + $0x18] sm:$0xff] %v1299_v6   ;;  %v1294_v13 = vpack.c.bf16 %v857_v7, %v856_v5  ;;  %1371 = vst [vmem:[%s1616_s8 + $0x58] sm:$0xff] %v1339_v10   ;;  %v1334_v16 = vpack.c.bf16 %v873_v11, %v872_v9  ;;  %v821_v20 = vmul.f32 %v1594_v19, %v612_v12 }
  0xe9   : > { %v1409_v18 = vpop.f32.mrf.mxu0  ;;  %v1425_v22 = vpop.f32.mrf.mxu1  ;;  %v837_v23 = vmul.f32 %v1594_v19, %v676_v15  ;;  %v862_v27 = vadd.f32 %v1600_v24, %v823_v14  ;;  %v878_v31 = vadd.f32 %v1600_v24, %v839_v17 }
  0xea   : > { %1362 = vst [vmem:[%s1616_s8 + $0x10] sm:$0xff] %v1294_v13   ;;  %v824_v21 = vmul.f32 %v1409_v18, %v1594_v19  ;;  %1370 = vst [vmem:[%s1616_s8 + $0x50] sm:$0xff] %v1334_v16   ;;  %v840_v25 = vmul.f32 %v1425_v22, %v1594_v19  ;;  %v860_v35 = vadd.f32 %v1600_v24, %v821_v20 }
  0xeb   : > { %v615_v26 = vpop.f32.mrf.mxu0  ;;  %v679_v30 = vpop.f32.mrf.mxu1  ;;  %v876_v39 = vadd.f32 %v1600_v24, %v837_v23 }
  0xec   : > { %v863_v28 = vadd.f32 %v1600_v24, %v824_v21  ;;  %v822_v29 = vmul.f32 %v1594_v19, %v615_v26  ;;  %v879_v32 = vadd.f32 %v1600_v24, %v840_v25  ;;  %v838_v33 = vmul.f32 %v1594_v19, %v679_v30 }
  0xed   : > { %v1412_v34 = vpop.f32.mrf.mxu0  ;;  %v1428_v38 = vpop.f32.mrf.mxu1 }
  0xee   : > { %v1309_v36 = vpack.c.bf16 %v863_v28, %v862_v27  ;;  %v861_v37 = vadd.f32 %v1600_v24, %v822_v29  ;;  %v1349_v40 = vpack.c.bf16 %v879_v32, %v878_v31  ;;  %v877_v41 = vadd.f32 %v1600_v24, %v838_v33 }
  0xef   : > { %v628_v42 = vpop.f32.mrf.mxu0  ;;  %v827_v44 = vmul.f32 %v1412_v34, %v1594_v19  ;;  %v692_v45 = vpop.f32.mrf.mxu1  ;;  %v843_v47 = vmul.f32 %v1428_v38, %v1594_v19 }
  0xf0   : > { %1365 = vst [vmem:[%s1616_s8 + $0x28] sm:$0xff] %v1309_v36   ;;  %v1304_v43 = vpack.c.bf16 %v861_v37, %v860_v35  ;;  %1373 = vst [vmem:[%s1616_s8 + $0x68] sm:$0xff] %v1349_v40   ;;  %v1344_v46 = vpack.c.bf16 %v877_v41, %v876_v39  ;;  %v825_v49 = vmul.f32 %v1594_v19, %v628_v42 }
  0xf1   : > { %v1413_v48 = vpop.f32.mrf.mxu0  ;;  %v1429_v51 = vpop.f32.mrf.mxu1  ;;  %v841_v52 = vmul.f32 %v1594_v19, %v692_v45  ;;  %v866_v55 = vadd.f32 %v1600_v24, %v827_v44  ;;  %v882_v59 = vadd.f32 %v1600_v24, %v843_v47 }
  0xf2   : > { %1364 = vst [vmem:[%s1616_s8 + $0x20] sm:$0xff] %v1304_v43   ;;  %v828_v50 = vmul.f32 %v1413_v48, %v1594_v19  ;;  %1372 = vst [vmem:[%s1616_s8 + $0x60] sm:$0xff] %v1344_v46   ;;  %v844_v53 = vmul.f32 %v1429_v51, %v1594_v19  ;;  %v864_v62 = vadd.f32 %v1600_v24, %v825_v49 }
  0xf3   : > { %v631_v54 = vpop.f32.mrf.mxu0  ;;  %v695_v58 = vpop.f32.mrf.mxu1  ;;  %v880_v1 = vadd.f32 %v1600_v24, %v841_v52 }
  0xf4   : > { %v867_v56 = vadd.f32 %v1600_v24, %v828_v50  ;;  %v826_v57 = vmul.f32 %v1594_v19, %v631_v54  ;;  %v883_v60 = vadd.f32 %v1600_v24, %v844_v53  ;;  %v842_v61 = vmul.f32 %v1594_v19, %v695_v58 }
  0xf6   : > { %v1319_v63 = vpack.c.bf16 %v867_v56, %v866_v55  ;;  %v865_v0 = vadd.f32 %v1600_v24, %v826_v57  ;;  %v1359_v2 = vpack.c.bf16 %v883_v60, %v882_v59  ;;  %v881_v3 = vadd.f32 %v1600_v24, %v842_v61 }
  0xf8   : > { %1367 = vst [vmem:[%s1616_s8 + $0x38] sm:$0xff] %v1319_v63   ;;  %v1314_v4 = vpack.c.bf16 %v865_v0, %v864_v62  ;;  %1375 = vst [vmem:[%s1616_s8 + $0x78] sm:$0xff] %v1359_v2   ;;  %v1354_v5 = vpack.c.bf16 %v881_v3, %v880_v1 }
  0xfa   : > { %1366 = vst [vmem:[%s1616_s8 + $0x30] sm:$0xff] %v1314_v4   ;;  %1374 = vst [vmem:[%s1616_s8 + $0x70] sm:$0xff] %v1354_v5  }
  0xfb PF: > { %s14_s17 = sadd.s32 1, %s1498_s17   ;;  %s1702_s15 = smov %s1494_s16 }
  0xfc   : > { %p11_p5 = scmp.ge.s32.totalorder %s14_s17, 4   ;;  %s1703_s16 = smov %s1705_s18 }
  0xfe   :  { %13 = sbr.rel (!%p11_p5) target bundleno = 2 (0x2), region = 83 }

// kernel: net_recam_forward.48
= control target key start
LH: loop header
LB: loop body
LE: loop exit
PB: predicated region body
PF: predicated region fallthrough
CT: control target
= control target key end

     0   :  { %s2258_s15 = smov 0   ;;  %s2260_s16 = smov 0   ;;  %s2606_s0 = inlined_call_operand.vmem [shape: bf16[128,1152], index: 0, kind: input, shape index: {}]   ;;  %s2607_s1 = inlined_call_operand.vmem [shape: bf16[1152,128], index: 1, kind: input, shape index: {}]   ;;  %s2608_s2 = inlined_call_operand.vmem [shape: f32[1,128], index: 2, kind: input, shape index: {}]   ;;  %s2609_s3 = inlined_call_operand.vmem [shape: f32[1,128], index: 3, kind: input, shape index: {}]   ;;  %s2610_s4 = inlined_call_operand.vmem [shape: bf16[128,128], index: 4, kind: output, shape index: {}]  }
   0x1   :  { %s2262_s17 = smov 0  }
   0x2 LB: > { %s33_s18 = sadd.s32 1, %s2227_s16  ;;  %p1692_p0 = scmp.ge.s32.totalorder %s2231_s17, 1  ;;  %s2231_s17 = sphi %s2262_s17, %s14_s17   ;;  %s2227_s16 = sphi %s2260_s16, %s2628_s16   ;;  %s2223_s15 = sphi %s2258_s15, %s2627_s15  }
   0x3   : > { %p35_p1 = scmp.ge.s32.totalorder %s33_s18, 2  ;;  %p224_p2 = scmp.lt.s32.totalorder %s2231_s17, 3 }
   0x5   : > { %s2630_s18 = smov (%p35_p1, %s33_s18), 0  ;;  %p225_p3 = pnand %p1692_p0, %p224_p2 }
   0x7   : > { %228 = sbr.rel (%p225_p3) target bundleno = 322 (0x142), region = 36 }
   0xc   : > { %v2085_v0 = vld [vmem:[%s2607_s1 + $0x78] sm:$0xff]   ;;  %v2089_v4 = vld [vmem:[%s2607_s1 + $0x70] sm:$0xff]   ;;  %v2093_v8 = vld [vmem:[%s2607_s1 + $0x68] sm:$0xff]   ;;  %s1693_s27 = sshll.u32 %s2223_s15, 3 }
   0xd   : > { %v2086_v1 = vld [vmem:[%s2607_s1 + $0xf8] sm:$0xff]   ;;  %1848 = vmatprep.subr.bf16.mxu0 %v2085_v0  ;;  %v2090_v5 = vld [vmem:[%s2607_s1 + $0xf0] sm:$0xff]   ;;  %v2094_v9 = vld [vmem:[%s2607_s1 + $0xe8] sm:$0xff]   ;;  %p274_p4 = scmp.lt.s32.totalorder %s1693_s27, 15 }
   0xe   : > { %v2087_v2 = vld [vmem:[%s2607_s1 + $0x38] sm:$0xff]   ;;  %1888 = vmatprep.subr.bf16.mxu1 %v2086_v1  ;;  %v2091_v6 = vld [vmem:[%s2607_s1 + $0x30] sm:$0xff]   ;;  %v2095_v10 = vld [vmem:[%s2607_s1 + $0x28] sm:$0xff]  }
   0xf   : > { %v2088_v3 = vld [vmem:[%s2607_s1 + $0xb8] sm:$0xff]   ;;  %1849 = vmatpush3.bf16.msra.mxu0 %v2087_v2  ;;  %v2092_v7 = vld [vmem:[%s2607_s1 + $0xb0] sm:$0xff]   ;;  %v2096_v11 = vld [vmem:[%s2607_s1 + $0xa8] sm:$0xff]   ;;  %s2632_s27 = smov (!%p274_p4, %s1693_s27), 15 }
  0x10   : > { %1889 = vmatpush3.bf16.msra.mxu1 %v2088_v3  ;;  %1850 = vmatprep.subr.bf16.mxu0 %v2089_v4  ;;  %v2097_v12 = vld [vmem:[%s2607_s1 + $0x60] sm:$0xff]   ;;  %v2101_v16 = vld [vmem:[%s2607_s1 + $0x58] sm:$0xff]   ;;  %v2105_v20 = vld [vmem:[%s2607_s1 + $0x50] sm:$0xff]   ;;  %s2060_s28 = smul.u32 36, %s2632_s27  ;;  %s1696_s20 = sshll.u32 %s2632_s27, 2 }
  0x11   : > { %1890 = vmatprep.subr.bf16.mxu1 %v2090_v5  ;;  %v2098_v13 = vld [vmem:[%s2607_s1 + $0xe0] sm:$0xff]   ;;  %v2102_v17 = vld [vmem:[%s2607_s1 + $0xd8] sm:$0xff]   ;;  %v2106_v21 = vld [vmem:[%s2607_s1 + $0xd0] sm:$0xff]   ;;  %s306_s23 = scalar_lea.vmem %s2610_s4, %s1696_s20 }
  0x12   : > { %v2099_v14 = vld [vmem:[%s2607_s1 + $0x20] sm:$0xff]   ;;  %v2103_v18 = vld [vmem:[%s2607_s1 + $0x18] sm:$0xff]   ;;  %v2107_v22 = vld [vmem:[%s2607_s1 + $0x10] sm:$0xff]   ;;  %s2375_s12 = scalar_lea.vmem %s2606_s0, %s2060_s28 }
  0x13   : > { %1851 = vmatpush3.bf16.msra.mxu0 %v2091_v6  ;;  %v2100_v15 = vld [vmem:[%s2607_s1 + $0xa0] sm:$0xff]   ;;  %v2104_v19 = vld [vmem:[%s2607_s1 + $0x98] sm:$0xff]   ;;  %v2108_v23 = vld [vmem:[%s2607_s1 + $0x90] sm:$0xff]  }
  0x14   : > { %1891 = vmatpush3.bf16.msra.mxu1 %v2092_v7  ;;  %1852 = vmatprep.subr.bf16.mxu0 %v2093_v8  ;;  %v2109_v24 = vld [vmem:[%s2607_s1 + $0x48] sm:$0xff]   ;;  %v2113_v28 = vld [vmem:[%s2607_s1 + $0x40] sm:$0xff]   ;;  %v2123_v36 = vld [vmem:[%s2607_s1 + $0x178] sm:$0xff]  }
  0x15   : > { %1892 = vmatprep.subr.bf16.mxu1 %v2094_v9  ;;  %v2110_v25 = vld [vmem:[%s2607_s1 + $0xc8] sm:$0xff]   ;;  %v2114_v29 = vld [vmem:[%s2607_s1 + $0xc0] sm:$0xff]   ;;  %v2124_v37 = vld [vmem:[%s2607_s1 + $0x1f8] sm:$0xff]  }
  0x16   : > { %v2111_v26 = vld [vmem:[%s2607_s1 + $0x8] sm:$0xff]   ;;  %v2115_v30 = vld [vmem:[%s2607_s1] sm:$0xff]   ;;  %v2125_v38 = vld [vmem:[%s2607_s1 + $0x138] sm:$0xff]  }
  0x17   : > { %1853 = vmatpush3.bf16.msra.mxu0 %v2095_v10  ;;  %v2112_v27 = vld [vmem:[%s2607_s1 + $0x88] sm:$0xff]   ;;  %v2116_v31 = vld [vmem:[%s2607_s1 + $0x80] sm:$0xff]   ;;  %v2126_v39 = vld [vmem:[%s2607_s1 + $0x1b8] sm:$0xff]  }
  0x18   : > { %1893 = vmatpush3.bf16.msra.mxu1 %v2096_v11  ;;  %1854 = vmatprep.subr.bf16.mxu0 %v2097_v12  ;;  %v2117_v32 = vld [vmem:[%s2375_s12] ss:$36 sps:$4 sm:$0xff]   ;;  %v2120_v34 = vld [vmem:[%s2375_s12 + $0x8] ss:$36 sps:$4 sm:$0xff]   ;;  %v2127_v40 = vld [vmem:[%s2607_s1 + $0x170] sm:$0xff]  }
  0x19   : > { %1894 = vmatprep.subr.bf16.mxu1 %v2098_v13  ;;  %v2119_v33 = vld [vmem:[%s2375_s12 + $0x4] ss:$36 sps:$4 sm:$0xff]   ;;  %v2122_v35 = vld [vmem:[%s2375_s12 + $0xc] ss:$36 sps:$4 sm:$0xff]   ;;  %v2133_v45 = vld [vmem:[%s2375_s12 + $0x54] ss:$36 sps:$4 sm:$0xff]  }
  0x1a   : > { %1161 = vmatprep.mubr.bf16.mxu0 %v2119_v33  ;;  %1226 = vmatprep.mubr.bf16.mxu1 %v2122_v35  ;;  %v2128_v41 = vld [vmem:[%s2607_s1 + $0x1f0] sm:$0xff]   ;;  %v2135_v46 = vld [vmem:[%s2375_s12 + $0x48] ss:$36 sps:$4 sm:$0xff]   ;;  %v2141_v52 = vld [vmem:[%s2607_s1 + $0x160] sm:$0xff]  }
  0x1b   : > { %1855 = vmatpush3.bf16.msra.mxu0 %v2099_v14  ;;  %v2129_v42 = vld [vmem:[%s2607_s1 + $0x130] sm:$0xff]   ;;  %v2137_v48 = vld [vmem:[%s2607_s1 + $0x168] sm:$0xff]   ;;  %v2142_v53 = vld [vmem:[%s2607_s1 + $0x1e0] sm:$0xff]  }
  0x1c   : > { %1895 = vmatpush3.bf16.msra.mxu1 %v2100_v15  ;;  %1856 = vmatprep.subr.bf16.mxu0 %v2101_v16  ;;  %v2130_v43 = vld [vmem:[%s2607_s1 + $0x1b0] sm:$0xff]   ;;  %v2138_v49 = vld [vmem:[%s2607_s1 + $0x1e8] sm:$0xff]   ;;  %v2143_v54 = vld [vmem:[%s2607_s1 + $0x120] sm:$0xff]  }
  0x1d   : > { %1896 = vmatprep.subr.bf16.mxu1 %v2102_v17  ;;  %v2131_v44 = vld [vmem:[%s2375_s12 + $0x4c] ss:$36 sps:$4 sm:$0xff]   ;;  %v2144_v55 = vld [vmem:[%s2607_s1 + $0x1a0] sm:$0xff]   ;;  %v2145_v56 = vld [vmem:[%s2375_s12 + $0x94] ss:$36 sps:$4 sm:$0xff]  }
  0x1e   : > { %v2136_v47 = vld [vmem:[%s2375_s12 + $0x50] ss:$36 sps:$4 sm:$0xff]   ;;  %v2139_v50 = vld [vmem:[%s2607_s1 + $0x128] sm:$0xff]   ;;  %v2147_v57 = vld [vmem:[%s2375_s12 + $0x9c] ss:$36 sps:$4 sm:$0xff]  }
  0x1f   : > { %1857 = vmatpush3.bf16.msra.mxu0 %v2103_v18  ;;  %v2140_v51 = vld [vmem:[%s2607_s1 + $0x1a8] sm:$0xff]   ;;  %v2149_v58 = vld [vmem:[%s2375_s12 + $0x90] ss:$36 sps:$4 sm:$0xff]   ;;  %v2150_v59 = vld [vmem:[%s2375_s12 + $0x98] ss:$36 sps:$4 sm:$0xff]  }
  0x20   : > { %1897 = vmatpush3.bf16.msra.mxu1 %v2104_v19  ;;  %1858 = vmatprep.subr.bf16.mxu0 %v2105_v20  ;;  %v2151_v60 = vld [vmem:[%s2607_s1 + $0x158] sm:$0xff]   ;;  %v2155_v0 = vld [vmem:[%s2607_s1 + $0x150] sm:$0xff]   ;;  %v2161_v5 = vld [vmem:[%s2375_s12 + $0xe4] ss:$36 sps:$4 sm:$0xff]  }
  0x21   : > { %1898 = vmatprep.subr.bf16.mxu1 %v2106_v21  ;;  %v2152_v61 = vld [vmem:[%s2607_s1 + $0x1d8] sm:$0xff]   ;;  %v2156_v1 = vld [vmem:[%s2607_s1 + $0x1d0] sm:$0xff]   ;;  %v2164_v7 = vld [vmem:[%s2375_s12 + $0xe0] ss:$36 sps:$4 sm:$0xff]  }
  0x22   : > { %v2153_v62 = vld [vmem:[%s2607_s1 + $0x118] sm:$0xff]   ;;  %v2157_v2 = vld [vmem:[%s2607_s1 + $0x110] sm:$0xff]   ;;  %v2165_v8 = vld [vmem:[%s2607_s1 + $0x148] sm:$0xff]  }
  0x23   : > { %1859 = vmatpush3.bf16.msra.mxu0 %v2107_v22  ;;  %v2154_v63 = vld [vmem:[%s2607_s1 + $0x198] sm:$0xff]   ;;  %v2158_v3 = vld [vmem:[%s2607_s1 + $0x190] sm:$0xff]   ;;  %v2166_v9 = vld [vmem:[%s2607_s1 + $0x1c8] sm:$0xff]  }
  0x24   : > { %1899 = vmatpush3.bf16.msra.mxu1 %v2108_v23  ;;  %1860 = vmatprep.subr.bf16.mxu0 %v2109_v24  ;;  %v2159_v4 = vld [vmem:[%s2375_s12 + $0xdc] ss:$36 sps:$4 sm:$0xff]   ;;  %v2167_v10 = vld [vmem:[%s2607_s1 + $0x108] sm:$0xff]   ;;  %v2173_v16 = vld [vmem:[%s2375_s12 + $0x10] ss:$36 sps:$4 sm:$0xff]  }
  0x25   : > { %1900 = vmatprep.subr.bf16.mxu1 %v2110_v25  ;;  %v2163_v6 = vld [vmem:[%s2375_s12 + $0xd8] ss:$36 sps:$4 sm:$0xff]   ;;  %v2168_v11 = vld [vmem:[%s2607_s1 + $0x188] sm:$0xff]   ;;  %v2169_v12 = vld [vmem:[%s2607_s1 + $0x140] sm:$0xff]  }
  0x26   : > { %v2170_v13 = vld [vmem:[%s2607_s1 + $0x1c0] sm:$0xff]   ;;  %v2175_v17 = vld [vmem:[%s2375_s12 + $0x14] ss:$36 sps:$4 sm:$0xff]   ;;  %v2197_v33 = vld [vmem:[%s2375_s12 + $0xec] ss:$36 sps:$4 sm:$0xff]  }
  0x27   : > { %1861 = vmatpush3.bf16.msra.mxu0 %v2111_v26  ;;  %v2171_v14 = vld [vmem:[%s2607_s1 + $0x100] sm:$0xff]   ;;  %v2176_v18 = vld [vmem:[%s2375_s12 + $0x18] ss:$36 sps:$4 sm:$0xff]   ;;  %v2180_v21 = vld [vmem:[%s2607_s1 + $0x230] sm:$0xff]  }
  0x28   : > { %1901 = vmatpush3.bf16.msra.mxu1 %v2112_v27  ;;  %1862 = vmatprep.subr.bf16.mxu0 %v2113_v28  ;;  %v2172_v15 = vld [vmem:[%s2607_s1 + $0x180] sm:$0xff]   ;;  %v2179_v20 = vld [vmem:[%s2607_s1 + $0x238] sm:$0xff]   ;;  %v2187_v26 = vld [vmem:[%s2607_s1 + $0x228] sm:$0xff]  }
  0x29   : > { %1902 = vmatprep.subr.bf16.mxu1 %v2114_v29  ;;  %v2178_v19 = vld [vmem:[%s2375_s12 + $0x1c] ss:$36 sps:$4 sm:$0xff]   ;;  %v2183_v23 = vld [vmem:[%s2375_s12 + $0x64] ss:$36 sps:$4 sm:$0xff]   ;;  %v2191_v28 = vld [vmem:[%s2375_s12 + $0xac] ss:$36 sps:$4 sm:$0xff]  }
  0x2a   : > { %v2181_v22 = vld [vmem:[%s2375_s12 + $0x5c] ss:$36 sps:$4 sm:$0xff]   ;;  %v2189_v27 = vld [vmem:[%s2375_s12 + $0xa4] ss:$36 sps:$4 sm:$0xff]   ;;  %v2196_v35 = vld [vmem:[%s2607_s1 + $0x210] sm:$0xff]  }
  0x2b   : > { %1863 = vmatpush3.bf16.msra.mxu0 %v2115_v30  ;;  %v2185_v24 = vld [vmem:[%s2375_s12 + $0x58] ss:$36 sps:$4 sm:$0xff]   ;;  %v2186_v25 = vld [vmem:[%s2375_s12 + $0x60] ss:$36 sps:$4 sm:$0xff]  }
  0x2c   : > { %1903 = vmatpush3.bf16.msra.mxu1 %v2116_v31  ;;  %1928 = vmatprep.subr.bf16.mxu0 %v2123_v36  ;;  %v2188_v29 = vld [vmem:[%s2607_s1 + $0x220] sm:$0xff]   ;;  %v2194_v31 = vld [vmem:[%s2375_s12 + $0xa8] ss:$36 sps:$4 sm:$0xff]  }
  0x2d   : > { %1968 = vmatprep.subr.bf16.mxu1 %v2124_v37  ;;  %v2193_v30 = vld [vmem:[%s2375_s12 + $0xa0] ss:$36 sps:$4 sm:$0xff]   ;;  %v2201_v36 = vld [vmem:[%s2375_s12 + $0xe8] ss:$36 sps:$4 sm:$0xff]  }
  0x2e   : > { %1162 = vmatmul.mubr.bf16.vlgmr.msra.gmra.mxu0 %v2117_v32  ;;  %v2195_v32 = vld [vmem:[%s2607_s1 + $0x218] sm:$0xff]   ;;  %v2203_v37 = vld [vmem:[%s2607_s1 + $0x208] sm:$0xff]  }
  0x2f   : > { %1227 = vmatmul.mubr.bf16.vlgmr.msra.gmra.mxu1 %v2120_v34  ;;  %1929 = vmatpush3.bf16.msra.mxu0 %v2125_v38  ;;  %v2199_v34 = vld [vmem:[%s2375_s12 + $0xf4] ss:$36 sps:$4 sm:$0xff]  }
  0x30   : > { %1969 = vmatpush3.bf16.msra.mxu1 %v2126_v39  ;;  %1930 = vmatprep.subr.bf16.mxu0 %v2127_v40  ;;  %v2202_v38 = vld [vmem:[%s2375_s12 + $0xf0] ss:$36 sps:$4 sm:$0xff]   ;;  %v2205_v39 = vld [vmem:[%s2375_s12 + $0x20] ss:$36 sps:$4 sm:$0xff]  }
  0x31   : > { %1970 = vmatprep.subr.bf16.mxu1 %v2128_v41  ;;  %1169 = vmatprep.mubr.bf16.mxu0 %v2131_v44  ;;  %v2206_v40 = vld [vmem:[%s2375_s12 + $0xb0] ss:$36 sps:$4 sm:$0xff]   ;;  %v2204_v41 = vld [vmem:[%s2607_s1 + $0x200] sm:$0xff]  }
  0x32   : > { %1234 = vmatprep.mubr.bf16.mxu1 %v2133_v45 }
  0x33   : > { %1931 = vmatpush3.bf16.msra.mxu0 %v2129_v42  ;;  %v2207_v42 = vld [vmem:[%s2375_s12 + $0x68] ss:$36 sps:$4 sm:$0xff]  }
  0x34   : > { %1971 = vmatpush3.bf16.msra.mxu1 %v2130_v43  ;;  %1932 = vmatprep.subr.bf16.mxu0 %v2137_v48  ;;  %v2208_v43 = vld [vmem:[%s2375_s12 + $0xf8] ss:$36 sps:$4 sm:$0xff]  }
  0x35   : > { %1972 = vmatprep.subr.bf16.mxu1 %v2138_v49 }
  0x36   : > { %1170 = vmatmul.mubr.bf16.gmra.mxu0 %v2135_v46 }
  0x37   : > { %1235 = vmatmul.mubr.bf16.gmra.mxu1 %v2136_v47  ;;  %1933 = vmatpush3.bf16.msra.mxu0 %v2139_v50 }
  0x38   : > { %1973 = vmatpush3.bf16.msra.mxu1 %v2140_v51  ;;  %1934 = vmatprep.subr.bf16.mxu0 %v2141_v52 }
  0x39   : > { %1974 = vmatprep.subr.bf16.mxu1 %v2142_v53  ;;  %1177 = vmatprep.mubr.bf16.mxu0 %v2145_v56 }
  0x3a   : > { %1242 = vmatprep.mubr.bf16.mxu1 %v2147_v57 }
  0x3b   : > { %1935 = vmatpush3.bf16.msra.mxu0 %v2143_v54 }
  0x3c   : > { %1975 = vmatpush3.bf16.msra.mxu1 %v2144_v55  ;;  %1936 = vmatprep.subr.bf16.mxu0 %v2151_v60 }
  0x3d   : > { %1976 = vmatprep.subr.bf16.mxu1 %v2152_v61 }
  0x3e   : > { %1178 = vmatmul.mubr.bf16.gmra.mxu0 %v2149_v58 }
  0x3f   : > { %1243 = vmatmul.mubr.bf16.gmra.mxu1 %v2150_v59  ;;  %1937 = vmatpush3.bf16.msra.mxu0 %v2153_v62 }
  0x40   : > { %1977 = vmatpush3.bf16.msra.mxu1 %v2154_v63  ;;  %1938 = vmatprep.subr.bf16.mxu0 %v2155_v0 }
  0x41   : > { %1978 = vmatprep.subr.bf16.mxu1 %v2156_v1  ;;  %1185 = vmatprep.mubr.bf16.mxu0 %v2159_v4 }
  0x42   : > { %1250 = vmatprep.mubr.bf16.mxu1 %v2161_v5 }
  0x43   : > { %1939 = vmatpush3.bf16.msra.mxu0 %v2157_v2 }
  0x44   : > { %1979 = vmatpush3.bf16.msra.mxu1 %v2158_v3  ;;  %1940 = vmatprep.subr.bf16.mxu0 %v2165_v8 }
  0x45   : > { %1980 = vmatprep.subr.bf16.mxu1 %v2166_v9 }
  0x46   : > { %1186 = vmatmul.mubr.bf16.gmra.mxu0 %v2163_v6 }
  0x47   : > { %1251 = vmatmul.mubr.bf16.gmra.mxu1 %v2164_v7  ;;  %1941 = vmatpush3.bf16.msra.mxu0 %v2167_v10 }
  0x48   : > { %1981 = vmatpush3.bf16.msra.mxu1 %v2168_v11  ;;  %1942 = vmatprep.subr.bf16.mxu0 %v2169_v12 }
  0x49   : > { %1982 = vmatprep.subr.bf16.mxu1 %v2170_v13  ;;  %1291 = vmatprep.mubr.bf16.mxu0 %v2175_v17 }
  0x4a   : > { %1356 = vmatprep.mubr.bf16.mxu1 %v2178_v19 }
  0x4b   : > { %1943 = vmatpush3.bf16.msra.mxu0 %v2171_v14 }
  0x4c   : > { %1983 = vmatpush3.bf16.msra.mxu1 %v2172_v15  ;;  %2020 = vmatprep.subr.bf16.mxu0 %v2179_v20 }
  0x4d   : > { %2044 = vmatprep.subr.bf16.mxu1 %v2179_v20 }
  0x4e   : > { %1292 = vmatmul.mubr.bf16.vlgmr.msra.gmra.mxu0 %v2173_v16 }
  0x4f   : > { %1357 = vmatmul.mubr.bf16.vlgmr.msra.gmra.mxu1 %v2176_v18  ;;  %2021 = vmatpush3.bf16.msra.mxu0 %v2179_v20 }
  0x50   : > { %2052 = vmatpush3.bf16.msra.mxu1 %v2179_v20  ;;  %2022 = vmatprep.subr.bf16.mxu0 %v2180_v21 }
  0x51   : > { %2045 = vmatprep.subr.bf16.mxu1 %v2180_v21  ;;  %1299 = vmatprep.mubr.bf16.mxu0 %v2181_v22 }
  0x52   : > { %1364 = vmatprep.mubr.bf16.mxu1 %v2183_v23 }
  0x53   : > { %2023 = vmatpush3.bf16.msra.mxu0 %v2180_v21 }
  0x54   : > { %2053 = vmatpush3.bf16.msra.mxu1 %v2180_v21  ;;  %2024 = vmatprep.subr.bf16.mxu0 %v2187_v26 }
  0x55   : > { %2046 = vmatprep.subr.bf16.mxu1 %v2187_v26 }
  0x56   : > { %1300 = vmatmul.mubr.bf16.gmra.mxu0 %v2185_v24 }
  0x57   : > { %1365 = vmatmul.mubr.bf16.gmra.mxu1 %v2186_v25  ;;  %1307 = vmatprep.mubr.bf16.mxu0 %v2189_v27 }
  0x58   : > { %2025 = vmatpush3.bf16.msra.mxu0 %v2187_v26  ;;  %1372 = vmatprep.mubr.bf16.mxu1 %v2191_v28 }
  0x59   : > { %2054 = vmatpush3.bf16.msra.mxu1 %v2187_v26  ;;  %2026 = vmatprep.subr.bf16.mxu0 %v2188_v29 }
  0x5a   : > { %2047 = vmatprep.subr.bf16.mxu1 %v2188_v29 }
  0x5c   : > { %2027 = vmatpush3.bf16.msra.mxu0 %v2188_v29 }
  0x5d   : > { %2055 = vmatpush3.bf16.msra.mxu1 %v2188_v29  ;;  %2028 = vmatprep.subr.bf16.mxu0 %v2195_v32 }
  0x5e   : > { %1308 = vmatmul.mubr.bf16.gmra.mxu0 %v2193_v30  ;;  %2048 = vmatprep.subr.bf16.mxu1 %v2195_v32 }
  0x5f   : > { %1373 = vmatmul.mubr.bf16.gmra.mxu1 %v2194_v31  ;;  %1315 = vmatprep.mubr.bf16.mxu0 %v2197_v33 }
  0x60   : > { %2029 = vmatpush3.bf16.msra.mxu0 %v2195_v32  ;;  %1380 = vmatprep.mubr.bf16.mxu1 %v2199_v34 }
  0x61   : > { %2056 = vmatpush3.bf16.msra.mxu1 %v2195_v32  ;;  %2030 = vmatprep.subr.bf16.mxu0 %v2196_v35 }
  0x62   : > { %2049 = vmatprep.subr.bf16.mxu1 %v2196_v35 }
  0x64   : > { %2031 = vmatpush3.bf16.msra.mxu0 %v2196_v35 }
  0x65   : > { %2057 = vmatpush3.bf16.msra.mxu1 %v2196_v35  ;;  %2032 = vmatprep.subr.bf16.mxu0 %v2203_v37 }
  0x66   : > { %1316 = vmatmul.mubr.bf16.gmra.mxu0 %v2201_v36  ;;  %2050 = vmatprep.subr.bf16.mxu1 %v2203_v37 }
  0x67   : > { %1381 = vmatmul.mubr.bf16.gmra.mxu1 %v2202_v38  ;;  %2036 = vmatprep.mubr.bf16.mxu0 %v2205_v39 }
  0x68   : > { %2033 = vmatpush3.bf16.msra.mxu0 %v2203_v37  ;;  %2040 = vmatprep.mubr.bf16.mxu1 %v2206_v40 }
  0x69   : > { %2058 = vmatpush3.bf16.msra.mxu1 %v2203_v37  ;;  %2034 = vmatprep.subr.bf16.mxu0 %v2204_v41 }
  0x6a   : > { %2051 = vmatprep.subr.bf16.mxu1 %v2204_v41 }
  0x6c   : > { %2035 = vmatpush3.bf16.msra.mxu0 %v2204_v41 }
  0x6d   : > { %2059 = vmatpush3.bf16.msra.mxu1 %v2204_v41 }
  0x6f   : > { %2037 = vmatmul.mubr.bf16.vlgmr.msra.gmra.mxu0 %v2207_v42 }
  0x70   : > { %2041 = vmatmul.mubr.bf16.vlgmr.msra.gmra.mxu1 %v2208_v43 }
  0xee   : > { %v1864_v44 = vpop.f32.mrf.mxu0 }
  0xef   : > { %v1904_v45 = vpop.f32.mrf.mxu1 }
  0xf0   : > { %v1865_v46 = vpop.f32.mrf.mxu0 }
  0xf1   : > { %v1905_v47 = vpop.f32.mrf.mxu1  ;;  %v1866_v33 = vadd.f32 %v1865_v46, %v1864_v44 }
  0xf2   : > { %v2539_v48 = vpop.f32.mrf.mxu0  ;;  %v1906_v34 = vadd.f32 %v1905_v47, %v1904_v45 }
  0xf3   : > { %v2541_v49 = vpop.f32.mrf.mxu1 }
  0xf4   : > { %v2543_v50 = vpop.f32.mrf.mxu0 }
  0xf5   : > { %v2545_v51 = vpop.f32.mrf.mxu1 }
  0xf6   : > { %v1870_v52 = vpop.f32.mrf.mxu0 }
  0xf7   : > { %v1910_v53 = vpop.f32.mrf.mxu1 }
  0xf8   : > { %v1871_v54 = vpop.f32.mrf.mxu0 }
  0xf9   : > { %v1911_v55 = vpop.f32.mrf.mxu1  ;;  %v1872_v37 = vadd.f32 %v1871_v54, %v1870_v52  ;;  %v1909_v54 = vadd.f32 %v2545_v51, %v2541_v49 }
  0xfa   : > { %v1873_v56 = vpop.f32.mrf.mxu0  ;;  %v1912_v38 = vadd.f32 %v1911_v55, %v1910_v53  ;;  %v1869_v53 = vadd.f32 %v2543_v50, %v2539_v48 }
  0xfb   : > { %v1913_v57 = vpop.f32.mrf.mxu1 }
  0xfc   : > { %v1874_v58 = vpop.f32.mrf.mxu0  ;;  %v1237_v46 = vadd.f32 %v1912_v38, %v1872_v37 }
  0xfd   : > { %v1914_v59 = vpop.f32.mrf.mxu1  ;;  %v1875_v41 = vadd.f32 %v1874_v58, %v1873_v56 }
  0xfe   : > { %v1876_v60 = vpop.f32.mrf.mxu0  ;;  %v1915_v42 = vadd.f32 %v1914_v59, %v1913_v57 }
  0xff   : > { %v1916_v61 = vpop.f32.mrf.mxu1 }
 0x100   : > { %v1877_v62 = vpop.f32.mrf.mxu0  ;;  %v1240_v55 = vadd.f32 %v1915_v42, %v1875_v41 }
 0x101   : > { %v1917_v63 = vpop.f32.mrf.mxu1 }
 0x102   : > { %v2547_v0 = vpop.f32.mrf.mxu0 }
 0x103   : > { %v2549_v1 = vpop.f32.mrf.mxu1 }
 0x104   : > { %v2551_v2 = vpop.f32.mrf.mxu0 }
 0x105   : > { %v2553_v3 = vpop.f32.mrf.mxu1 }
 0x106   : > { %2611 = vst [vmem:[#allocation3_spill] sm:$0xff] %v2553_v3  ;;  %v1882_v4 = vpop.f32.mrf.mxu0 }
 0x107   : > { %v1922_v5 = vpop.f32.mrf.mxu1 }
 0x108   : > { %v1883_v6 = vpop.f32.mrf.mxu0 }
 0x109   : > { %v1923_v7 = vpop.f32.mrf.mxu1  ;;  %v1884_v39 = vadd.f32 %v1883_v6, %v1882_v4 }
 0x10a   : > { %v1885_v8 = vpop.f32.mrf.mxu0  ;;  %v1924_v40 = vadd.f32 %v1923_v7, %v1922_v5 }
 0x10b   : > { %v1925_v9 = vpop.f32.mrf.mxu1 }
 0x10c   : > { %v1886_v10 = vpop.f32.mrf.mxu0  ;;  %v1253_v47 = vadd.f32 %v1924_v40, %v1884_v39 }
 0x10d   : > { %v1926_v11 = vpop.f32.mrf.mxu1  ;;  %v2619_v4 = vld [vmem:[#allocation3_spill] sm:$0xff] }
 0x10e   : > { %v1944_v12 = vpop.f32.mrf.mxu0  ;;  %v1927_v3 = vadd.f32 %v1926_v11, %v1925_v9  ;;  %v1921_v5 = vadd.f32 %v2619_v4, %v2549_v1 }
 0x10f   : > { %v2555_v13 = vpop.f32.mrf.mxu1 }
 0x110   : > { %2612 = vst [vmem:[#allocation4_spill] sm:$0xff] %v2555_v13  ;;  %v1945_v14 = vpop.f32.mrf.mxu0  ;;  %v1887_v13 = vadd.f32 %v1886_v10, %v1885_v8  ;;  %v1232_v10 = vadd.f32 %v1909_v54, %v1869_v53 }
 0x111   : > { %v2557_v15 = vpop.f32.mrf.mxu1 }
 0x112   : > { %2613 = vst [vmem:[#allocation5_spill] sm:$0xff] %v2557_v15  ;;  %v1947_v16 = vpop.f32.mrf.mxu0  ;;  %v1229_v15 = vadd.f32 %v1906_v34, %v1866_v33  ;;  %v1256_v6 = vadd.f32 %v1927_v3, %v1887_v13 }
 0x113   : > { %v2559_v17 = vpop.f32.mrf.mxu1 }
 0x114   : > { %2614 = vst [vmem:[#allocation6_spill] sm:$0xff] %v2559_v17  ;;  %v1948_v18 = vpop.f32.mrf.mxu0  ;;  %v1878_v17 = vadd.f32 %v1877_v62, %v1876_v60 }
 0x115   : > { %v2561_v19 = vpop.f32.mrf.mxu1  ;;  %v1949_v49 = vadd.f32 %v1948_v18, %v1947_v16 }
 0x116   : > { %2615 = vst [vmem:[#allocation7_spill] sm:$0xff] %v2561_v19  ;;  %v1950_v20 = vpop.f32.mrf.mxu0 }
 0x117   : > { %v1990_v21 = vpop.f32.mrf.mxu1  ;;  %v1297_v16 = vadd.f32 %v1949_v49, %v1232_v10 }
 0x118   : > { %v1951_v22 = vpop.f32.mrf.mxu0 }
 0x119   : > { %v1991_v23 = vpop.f32.mrf.mxu1 }
 0x11a   : > { %v1953_v24 = vpop.f32.mrf.mxu0  ;;  %v1992_v51 = vadd.f32 %v1991_v23, %v1990_v21 }
 0x11b   : > { %v2563_v25 = vpop.f32.mrf.mxu1 }
 0x11c   : > { %2616 = vst [vmem:[#allocation8_spill] sm:$0xff] %v2563_v25  ;;  %v1954_v26 = vpop.f32.mrf.mxu0  ;;  %v1952_v25 = vadd.f32 %v1951_v22, %v1950_v20  ;;  %v2621_v20 = vld [vmem:[#allocation5_spill] sm:$0xff] }
 0x11d   : > { %v2565_v27 = vpop.f32.mrf.mxu1 }
 0x11e   : > { %2617 = vst [vmem:[#allocation9_spill] sm:$0xff] %v2565_v27  ;;  %v1956_v28 = vpop.f32.mrf.mxu0  ;;  %v1918_v27 = vadd.f32 %v1917_v63, %v1916_v61  ;;  %v1302_v60 = vadd.f32 %v1952_v25, %v1237_v46  ;;  %v1955_v61 = vadd.f32 %v1954_v26, %v1953_v24  ;;  %v1881_v63 = vadd.f32 %v2551_v2, %v2547_v0 }
 0x11f   : > { %v1996_v29 = vpop.f32.mrf.mxu1 }
 0x120   : > { %v1957_v30 = vpop.f32.mrf.mxu0  ;;  %v1245_v59 = vadd.f32 %v1918_v27, %v1878_v17  ;;  %v1305_v0 = vadd.f32 %v1955_v61, %v1240_v55  ;;  %v1367_v24 = vadd.f32 %v1992_v51, %v1302_v60  ;;  %v1248_v1 = vadd.f32 %v1921_v5, %v1881_v63 }
 0x121   : > { %v1997_v31 = vpop.f32.mrf.mxu1  ;;  %v1958_v56 = vadd.f32 %v1957_v30, %v1956_v28 }
 0x122   : > { %v1959_v32 = vpop.f32.mrf.mxu0  ;;  %v1998_v3 = vadd.f32 %v1997_v31, %v1996_v29  ;;  %v2625_v29 = vld [vmem:[#allocation7_spill] sm:$0xff] }
 0x123   : > { %v2567_v35 = vpop.f32.mrf.mxu1  ;;  %v1310_v11 = vadd.f32 %v1958_v56, %v1245_v59  ;;  %v2622_v18 = vld [vmem:[#allocation8_spill] sm:$0xff] }
 0x124   : > { %2618 = vst [vmem:[#allocation10_spill] sm:$0xff] %v2567_v35  ;;  %v1960_v36 = vpop.f32.mrf.mxu0  ;;  %v1946_v35 = vadd.f32 %v1945_v14, %v1944_v12 }
 0x125   : > { %v2569_v43 = vpop.f32.mrf.mxu1  ;;  %v1961_v12 = vadd.f32 %v1960_v36, %v1959_v32  ;;  %v2623_v21 = vld [vmem:[#allocation9_spill] sm:$0xff]  ;;  %v1375_v34 = vadd.f32 %v1998_v3, %v1310_v11  ;;  %v2624_v36 = vld [vmem:[#allocation6_spill] sm:$0xff] }
 0x126   : > { %v1962_v19 = vpop.f32.mrf.mxu0  ;;  %v1294_v8 = vadd.f32 %v1946_v35, %v1229_v15  ;;  %v1805_v15 = vld [vmem:[%s2608_s2] ss:$0 sm:$0xff]  ;;  %v1995_v23 = vadd.f32 %v2623_v21, %v2622_v18  ;;  %v1989_v31 = vadd.f32 %v2625_v29, %v2624_v36 }
 0x127   : > { %v2002_v44 = vpop.f32.mrf.mxu1  ;;  %v1313_v30 = vadd.f32 %v1961_v12, %v1248_v1 }
 0x128   : > { %v1963_v45 = vpop.f32.mrf.mxu0  ;;  %v1370_v40 = vadd.f32 %v1995_v23, %v1305_v0  ;;  %v1362_v55 = vadd.f32 %v1989_v31, %v1297_v16 }
 0x129   : > { %v1964_v52 = vadd.f32 %v1963_v45, %v1962_v19  ;;  %v2003_v57 = vpop.f32.mrf.mxu1  ;;  %v2620_v19 = vld [vmem:[#allocation4_spill] sm:$0xff] }
 0x12a   : > { %v1965_v58 = vpop.f32.mrf.mxu0  ;;  %v2004_v7 = vadd.f32 %v2003_v57, %v2002_v44  ;;  %v1986_v22 = vadd.f32 %v2621_v20, %v2620_v19  ;;  %v1806_v44 = vld [vmem:[%s2609_s3] ss:$0 sm:$0xff] }
 0x12b   : > { %v1318_v62 = vadd.f32 %v1964_v52, %v1253_v47  ;;  %v2005_v48 = vpop.f32.mrf.mxu1  ;;  %v2626_v41 = vld [vmem:[#allocation10_spill] sm:$0xff] }
 0x12c   : > { %v1966_v50 = vpop.f32.mrf.mxu0  ;;  %v1359_v28 = vadd.f32 %v1986_v22, %v1294_v8  ;;  %v2001_v42 = vadd.f32 %v2569_v43, %v2626_v41 }
 0x12d   : > { %v1967_v9 = vadd.f32 %v1966_v50, %v1965_v58  ;;  %v2006_v14 = vpop.f32.mrf.mxu1  ;;  %v1383_v17 = vadd.f32 %v2004_v7, %v1318_v62 }
 0x12e   : > { %v2007_v13 = vadd.f32 %v2006_v14, %v2005_v48  ;;  %v1378_v59 = vadd.f32 %v2001_v42, %v1313_v30 }
 0x12f   : > { %v1321_v2 = vadd.f32 %v1967_v9, %v1256_v6  ;;  %v2038_v25 = vpop.f32.mrf.mxu0 }
 0x130   : > { %v1432_v26 = vadd.f32 %v2038_v25, %v1367_v24  ;;  %v2042_v27 = vpop.f32.mrf.mxu1 }
 0x131   : > { %v1448_v32 = vadd.f32 %v2042_v27, %v1383_v17  ;;  %v1423_v33 = vpop.f32.mrf.mxu0  ;;  %v1386_v35 = vadd.f32 %v2007_v13, %v1321_v2 }
 0x132   : > { %v1490_v37 = vmul.f32 %v1805_v15, %v1432_v26  ;;  %v1424_v38 = vadd.f32 %v1423_v33, %v1359_v28  ;;  %v1439_v39 = vpop.f32.mrf.mxu1 }
 0x133   : > { %v1494_v45 = vmul.f32 %v1805_v15, %v1448_v32  ;;  %v1440_v46 = vadd.f32 %v1439_v39, %v1375_v34  ;;  %v2039_v47 = vpop.f32.mrf.mxu0 }
 0x134   : > { %v1488_v52 = vmul.f32 %v1805_v15, %v1424_v38  ;;  %v1435_v53 = vadd.f32 %v2039_v47, %v1370_v40  ;;  %v2043_v54 = vpop.f32.mrf.mxu1  ;;  %v1505_v60 = vadd.f32 %v1806_v44, %v1490_v37 }
 0x135   : > { %v1492_v56 = vmul.f32 %v1805_v15, %v1440_v46  ;;  %v1451_v57 = vadd.f32 %v2043_v54, %v1386_v35  ;;  %v1426_v58 = vpop.f32.mrf.mxu0  ;;  %v1509_v63 = vadd.f32 %v1806_v44, %v1494_v45 }
 0x136   : > { %v1491_v61 = vmul.f32 %v1805_v15, %v1435_v53  ;;  %v1427_v62 = vadd.f32 %v1426_v58, %v1362_v55  ;;  %v1442_v43 = vpop.f32.mrf.mxu1  ;;  %v1503_v6 = vadd.f32 %v1806_v44, %v1488_v52  ;;  %v1513_v51 = vmax.f32 %v1505_v60, 0.0 }
 0x137   : > { %v1495_v4 = vmul.f32 %v1805_v15, %v1451_v57  ;;  %v1443_v5 = vadd.f32 %v1442_v43, %v1378_v59  ;;  %v1507_v50 = vadd.f32 %v1806_v44, %v1492_v56  ;;  %v1517_v11 = vmax.f32 %v1509_v63, 0.0 }
 0x138   : > { %v1506_v7 = vadd.f32 %v1806_v44, %v1491_v61  ;;  %v1489_v48 = vmul.f32 %v1805_v15, %v1427_v62  ;;  %v1511_v17 = vmax.f32 %v1503_v6, 0.0 }
 0x139   : > { %v1510_v8 = vadd.f32 %v1806_v44, %v1495_v4  ;;  %v1493_v49 = vmul.f32 %v1805_v15, %v1443_v5  ;;  %v1515_v22 = vmax.f32 %v1507_v50, 0.0 }
 0x13a   : > { %v1514_v9 = vmax.f32 %v1506_v7, 0.0  ;;  %v1504_v10 = vadd.f32 %v1806_v44, %v1489_v48 }
 0x13b   : > { %v1518_v12 = vmax.f32 %v1510_v8, 0.0  ;;  %v1508_v14 = vadd.f32 %v1806_v44, %v1493_v49 }
 0x13c   : > { %v1833_v19 = vpack.c.bf16 %v1514_v9, %v1513_v51  ;;  %v1512_v20 = vmax.f32 %v1504_v10, 0.0 }
 0x13d   : > { %v1843_v0 = vpack.c.bf16 %v1518_v12, %v1517_v11  ;;  %v1516_v2 = vmax.f32 %v1508_v14, 0.0 }
 0x13e   : > { %1845 = vst [vmem:[%s306_s23 + $0x8] sm:$0xff] %v1833_v19   ;;  %v1828_v24 = vpack.c.bf16 %v1512_v20, %v1511_v17 }
 0x13f   : > { %1847 = vst [vmem:[%s306_s23 + $0x18] sm:$0xff] %v1843_v0   ;;  %v1838_v1 = vpack.c.bf16 %v1516_v2, %v1515_v22 }
 0x140   : > { %1829 = vst [vmem:[%s306_s23] sm:$0xff] %v1828_v24  }
 0x141   : > { %1846 = vst [vmem:[%s306_s23 + $0x10] sm:$0xff] %v1838_v1  }
 0x142 PF: > { %s14_s17 = sadd.s32 1, %s2231_s17   ;;  %s2627_s15 = smov %s2227_s16 }
 0x143   : > { %p11_p5 = scmp.ge.s32.totalorder %s14_s17, 4   ;;  %s2628_s16 = smov %s2630_s18 }
 0x145   :  { %13 = sbr.rel (!%p11_p5) target bundleno = 2 (0x2), region = 83 }

// kernel: net_recam_forward.49
= control target key start
LH: loop header
LB: loop body
LE: loop exit
PB: predicated region body
PF: predicated region fallthrough
CT: control target
= control target key end

     0   :  { %s1063_s21 = smov 0   ;;  %s1065_s22 = smov 0   ;;  %s1139_s0 = inlined_call_operand.vmem [shape: bf16[128,128], index: 0, kind: input, shape index: {}]   ;;  %s1140_s1 = inlined_call_operand.vmem [shape: bf16[128,128], index: 1, kind: input, shape index: {}]   ;;  %s1141_s2 = inlined_call_operand.vmem [shape: f32[1,128], index: 2, kind: input, shape index: {}]   ;;  %s1142_s3 = inlined_call_operand.vmem [shape: f32[1,128], index: 3, kind: input, shape index: {}]   ;;  %s1143_s4 = inlined_call_operand.vmem [shape: f32[1,128], index: 4, kind: input, shape index: {}]   ;;  %s1144_s5 = inlined_call_operand.vmem [shape: f32[1,128], index: 5, kind: input, shape index: {}]   ;;  %s1145_s6 = inlined_call_operand.vmem [shape: bf16[128,128], index: 6, kind: output, shape index: {}]  }
   0x1   :  { %s1067_s23 = smov 0  }
   0x2 LB: > { %s35_s24 = sadd.s32 1, %s1022_s22  ;;  %p843_p0 = scmp.ge.s32.totalorder %s1026_s23, 1  ;;  %s1026_s23 = sphi %s1067_s23, %s16_s23   ;;  %s1022_s22 = sphi %s1065_s22, %s1147_s22   ;;  %s1018_s21 = sphi %s1063_s21, %s1146_s21  }
   0x3   : > { %p37_p1 = scmp.ge.s32.totalorder %s35_s24, 2  ;;  %p287_p2 = scmp.lt.s32.totalorder %s1026_s23, 3 }
   0x5   : > { %s1149_s24 = smov (%p37_p1, %s35_s24), 0  ;;  %p288_p3 = pnand %p843_p0, %p287_p2 }
   0x6   : > { %s844_s27 = sshll.u32 (!%p288_p3), %s1018_s21, 3 }
   0x7   : > { %291 = sbr.rel (%p288_p3) target bundleno = 251 (0xfb), region = 44  ;;  %p344_p4 = scmp.lt.s32.totalorder (!%p288_p3), %s844_s27, 15 }
   0xc   : > { %v996_v0 = vld [vmem:[%s1140_s1 + $0x38] sm:$0xff]   ;;  %v997_v1 = vld [vmem:[%s1140_s1 + $0x30] sm:$0xff]   ;;  %s1151_s27 = smov (!%p344_p4, %s844_s27), 15  ;;  %v998_v2 = vld [vmem:[%s1140_s1 + $0x28] sm:$0xff]  }
   0xd   : > { %932 = vmatprep.subr.bf16.mxu0 %v996_v0  ;;  %956 = vmatprep.subr.bf16.mxu1 %v996_v0  ;;  %s845_s8 = sshll.u32 %s1151_s27, 2  ;;  %v999_v3 = vld [vmem:[%s1140_s1 + $0x20] sm:$0xff]   ;;  %v1000_v16 = vld [vmem:[%s1140_s1 + $0x18] sm:$0xff]   ;;  %v1001_v29 = vld [vmem:[%s1140_s1 + $0x10] sm:$0xff]  }
   0xe   : > { %933 = vmatpush3.bf16.msra.mxu0 %v996_v0  ;;  %964 = vmatpush3.bf16.msra.mxu1 %v996_v0  ;;  %s350_s11 = scalar_lea.vmem %s1139_s0, %s845_s8  ;;  %v848_v5 = vld [vmem:[%s1141_s2] ss:$0 sm:$0xff]  ;;  %v1002_v38 = vld [vmem:[%s1140_s1 + $0x8] sm:$0xff]   ;;  %s380_s13 = scalar_lea.vmem %s1145_s6, %s845_s8 }
   0xf   : > { %934 = vmatprep.subr.bf16.mxu0 %v997_v1  ;;  %957 = vmatprep.subr.bf16.mxu1 %v997_v1  ;;  %v879_v4 = vld [vmem:[%s350_s11] sm:$0xff]   ;;  %v915_v8 = vld [vmem:[%s350_s11 + $0x10] sm:$0xff]   ;;  %v914_v12 = vld [vmem:[%s350_s11 + $0x8] sm:$0xff]  }
  0x10   : > { %v880_v6 = vunpack.c.l.bf16 %v879_v4  ;;  %v881_v7 = vunpack.c.h.bf16 %v879_v4  ;;  %v849_v9 = vld [vmem:[%s1142_s3] ss:$0 sm:$0xff]  ;;  %v888_v10 = vunpack.c.l.bf16 %v915_v8  ;;  %v889_v11 = vunpack.c.h.bf16 %v915_v8  ;;  %v916_v15 = vld [vmem:[%s350_s11 + $0x18] sm:$0xff]  }
  0x11   : > { %v884_v21 = vunpack.c.l.bf16 %v914_v12  ;;  %v885_v22 = vunpack.c.h.bf16 %v914_v12  ;;  %v892_v25 = vunpack.c.l.bf16 %v916_v15  ;;  %v893_v26 = vunpack.c.h.bf16 %v916_v15  ;;  %v1003_v43 = vld [vmem:[%s1140_s1] sm:$0xff]  }
  0x12   : > { %935 = vmatpush3.bf16.msra.mxu0 %v997_v1  ;;  %965 = vmatpush3.bf16.msra.mxu1 %v997_v1  ;;  %v418_v13 = vmul.f32 %v880_v6, %v848_v5  ;;  %v419_v14 = vmul.f32 %v881_v7, %v848_v5  ;;  %v422_v17 = vmul.f32 %v888_v10, %v848_v5  ;;  %v858_v50 = vld [vmem:[%s1143_s4] ss:$0 sm:$0xff] }
  0x13   : > { %936 = vmatprep.subr.bf16.mxu0 %v998_v2  ;;  %958 = vmatprep.subr.bf16.mxu1 %v998_v2  ;;  %v423_v18 = vmul.f32 %v889_v11, %v848_v5  ;;  %v420_v33 = vmul.f32 %v884_v21, %v848_v5  ;;  %v421_v35 = vmul.f32 %v885_v22, %v848_v5  ;;  %v859_v57 = vld [vmem:[%s1144_s5] ss:$0 sm:$0xff] }
  0x14   : > { %v433_v19 = vadd.f32 %v849_v9, %v418_v13  ;;  %v434_v20 = vadd.f32 %v849_v9, %v419_v14  ;;  %v437_v23 = vadd.f32 %v849_v9, %v422_v17  ;;  %v424_v36 = vmul.f32 %v892_v25, %v848_v5 }
  0x15   : > { %v438_v24 = vadd.f32 %v849_v9, %v423_v18  ;;  %v425_v37 = vmul.f32 %v893_v26, %v848_v5  ;;  %v435_v39 = vadd.f32 %v849_v9, %v420_v33  ;;  %v436_v40 = vadd.f32 %v849_v9, %v421_v35 }
  0x16   : > { %937 = vmatpush3.bf16.msra.mxu0 %v998_v2  ;;  %966 = vmatpush3.bf16.msra.mxu1 %v998_v2  ;;  %v441_v27 = vmax.f32 %v433_v19, 0.0  ;;  %v442_v28 = vmax.f32 %v434_v20, 0.0  ;;  %v445_v30 = vmax.f32 %v437_v23, 0.0  ;;  %v439_v41 = vadd.f32 %v849_v9, %v424_v36 }
  0x17   : > { %938 = vmatprep.subr.bf16.mxu0 %v999_v3  ;;  %959 = vmatprep.subr.bf16.mxu1 %v999_v3  ;;  %v446_v31 = vmax.f32 %v438_v24, 0.0  ;;  %v440_v42 = vadd.f32 %v849_v9, %v425_v37  ;;  %v443_v44 = vmax.f32 %v435_v39, 0.0  ;;  %v444_v45 = vmax.f32 %v436_v40, 0.0 }
  0x18   : > { %v449_v32 = vpack.c.bf16 %v442_v28, %v441_v27  ;;  %v447_v46 = vmax.f32 %v439_v41, 0.0 }
  0x19   : > { %v451_v34 = vpack.c.bf16 %v446_v31, %v445_v30  ;;  %v448_v47 = vmax.f32 %v440_v42, 0.0  ;;  %v450_v48 = vpack.c.bf16 %v444_v45, %v443_v44 }
  0x1a   : > { %939 = vmatpush3.bf16.msra.mxu0 %v999_v3  ;;  %967 = vmatpush3.bf16.msra.mxu1 %v999_v3 }
  0x1b   : > { %940 = vmatprep.subr.bf16.mxu0 %v1000_v16  ;;  %960 = vmatprep.subr.bf16.mxu1 %v1000_v16  ;;  %v452_v49 = vpack.c.bf16 %v448_v47, %v447_v46 }
  0x1c   : > { %948 = vmatprep.mubr.bf16.mxu0 %v449_v32  ;;  %952 = vmatprep.mubr.bf16.mxu1 %v451_v34 }
  0x1e   : > { %941 = vmatpush3.bf16.msra.mxu0 %v1000_v16  ;;  %968 = vmatpush3.bf16.msra.mxu1 %v1000_v16 }
  0x1f   : > { %942 = vmatprep.subr.bf16.mxu0 %v1001_v29  ;;  %961 = vmatprep.subr.bf16.mxu1 %v1001_v29 }
  0x22   : > { %943 = vmatpush3.bf16.msra.mxu0 %v1001_v29  ;;  %969 = vmatpush3.bf16.msra.mxu1 %v1001_v29 }
  0x23   : > { %944 = vmatprep.subr.bf16.mxu0 %v1002_v38  ;;  %962 = vmatprep.subr.bf16.mxu1 %v1002_v38 }
  0x26   : > { %945 = vmatpush3.bf16.msra.mxu0 %v1002_v38  ;;  %970 = vmatpush3.bf16.msra.mxu1 %v1002_v38 }
  0x27   : > { %946 = vmatprep.subr.bf16.mxu0 %v1003_v43  ;;  %963 = vmatprep.subr.bf16.mxu1 %v1003_v43 }
  0x2a   : > { %947 = vmatpush3.bf16.msra.mxu0 %v1003_v43  ;;  %971 = vmatpush3.bf16.msra.mxu1 %v1003_v43 }
  0x2d   : > { %949 = vmatmul.mubr.bf16.vlgmr.msra.gmra.mxu0 %v450_v48  ;;  %953 = vmatmul.mubr.bf16.vlgmr.msra.gmra.mxu1 %v452_v49 }
  0xed   : > { %v950_v51 = vpop.f32.mrf.mxu0  ;;  %v954_v52 = vpop.f32.mrf.mxu1 }
  0xee   : > { %v626_v53 = vmul.f32 %v950_v51, %v858_v50  ;;  %v630_v54 = vmul.f32 %v954_v52, %v858_v50 }
  0xef   : > { %v559_v55 = vpop.f32.mrf.mxu0  ;;  %v575_v56 = vpop.f32.mrf.mxu1 }
  0xf0   : > { %v624_v58 = vmul.f32 %v858_v50, %v559_v55  ;;  %v628_v59 = vmul.f32 %v858_v50, %v575_v56  ;;  %v641_v0 = vadd.f32 %v859_v57, %v626_v53  ;;  %v645_v1 = vadd.f32 %v859_v57, %v630_v54 }
  0xf1   : > { %v951_v60 = vpop.f32.mrf.mxu0  ;;  %v955_v61 = vpop.f32.mrf.mxu1 }
  0xf2   : > { %v627_v62 = vmul.f32 %v951_v60, %v858_v50  ;;  %v631_v63 = vmul.f32 %v955_v61, %v858_v50  ;;  %v639_v8 = vadd.f32 %v859_v57, %v624_v58  ;;  %v643_v9 = vadd.f32 %v859_v57, %v628_v59 }
  0xf3   : > { %v562_v2 = vpop.f32.mrf.mxu0  ;;  %v578_v3 = vpop.f32.mrf.mxu1 }
  0xf4   : > { %v642_v4 = vadd.f32 %v859_v57, %v627_v62  ;;  %v646_v5 = vadd.f32 %v859_v57, %v631_v63  ;;  %v625_v6 = vmul.f32 %v858_v50, %v562_v2  ;;  %v629_v7 = vmul.f32 %v858_v50, %v578_v3 }
  0xf6   : > { %v902_v10 = vpack.c.bf16 %v642_v4, %v641_v0  ;;  %v912_v11 = vpack.c.bf16 %v646_v5, %v645_v1  ;;  %v640_v12 = vadd.f32 %v859_v57, %v625_v6  ;;  %v644_v13 = vadd.f32 %v859_v57, %v629_v7 }
  0xf8   : > { %917 = vst [vmem:[%s380_s13 + $0x8] sm:$0xff] %v902_v10   ;;  %919 = vst [vmem:[%s380_s13 + $0x18] sm:$0xff] %v912_v11   ;;  %v897_v14 = vpack.c.bf16 %v640_v12, %v639_v8  ;;  %v907_v15 = vpack.c.bf16 %v644_v13, %v643_v9 }
  0xfa   : > { %898 = vst [vmem:[%s380_s13] sm:$0xff] %v897_v14   ;;  %918 = vst [vmem:[%s380_s13 + $0x10] sm:$0xff] %v907_v15  }
  0xfb PF: > { %s16_s23 = sadd.s32 1, %s1026_s23   ;;  %s1146_s21 = smov %s1022_s22 }
  0xfc   : > { %p13_p5 = scmp.ge.s32.totalorder %s16_s23, 4   ;;  %s1147_s22 = smov %s1149_s24 }
  0xfe   :  { %15 = sbr.rel (!%p13_p5) target bundleno = 2 (0x2), region = 97 }

// kernel: net_recam_forward.50
= control target key start
LH: loop header
LB: loop body
LE: loop exit
PB: predicated region body
PF: predicated region fallthrough
CT: control target
= control target key end

     0   :  { %s2375_s18 = smov 0   ;;  %s2377_s19 = smov 0   ;;  %s2740_s0 = inlined_call_operand.vmem [shape: bf16[128,1152], index: 0, kind: input, shape index: {}]   ;;  %s2741_s1 = inlined_call_operand.vmem [shape: bf16[1152,128], index: 1, kind: input, shape index: {}]   ;;  %s2742_s2 = inlined_call_operand.vmem [shape: f32[1,128], index: 2, kind: input, shape index: {}]   ;;  %s2743_s3 = inlined_call_operand.vmem [shape: f32[1,128], index: 3, kind: input, shape index: {}]   ;;  %s2744_s4 = inlined_call_operand.vmem [shape: bf16[128,128], index: 4, kind: input, shape index: {}]   ;;  %s2745_s5 = inlined_call_operand.vmem [shape: bf16[128,128], index: 5, kind: output, shape index: {}]  }
   0x1   :  { %s2379_s20 = smov 0  }
   0x2 LB: > { %s34_s21 = sadd.s32 1, %s2339_s19  ;;  %p1783_p0 = scmp.ge.s32.totalorder %s2343_s20, 1  ;;  %s2343_s20 = sphi %s2379_s20, %s15_s20   ;;  %s2339_s19 = sphi %s2377_s19, %s2759_s19   ;;  %s2335_s18 = sphi %s2375_s18, %s2758_s18  }
   0x3   : > { %p36_p1 = scmp.ge.s32.totalorder %s34_s21, 2  ;;  %p265_p2 = scmp.lt.s32.totalorder %s2343_s20, 3 }
   0x5   : > { %s2761_s21 = smov (%p36_p1, %s34_s21), 0  ;;  %p266_p3 = pnand %p1783_p0, %p265_p2 }
   0x7   : > { %269 = sbr.rel (%p266_p3) target bundleno = 322 (0x142), region = 40 }
   0xc   : > { %v2197_v0 = vld [vmem:[%s2741_s1 + $0x78] sm:$0xff]   ;;  %v2201_v4 = vld [vmem:[%s2741_s1 + $0x70] sm:$0xff]   ;;  %v2205_v8 = vld [vmem:[%s2741_s1 + $0x68] sm:$0xff]   ;;  %s1784_s6 = sshll.u32 %s2335_s18, 3 }
   0xd   : > { %v2198_v1 = vld [vmem:[%s2741_s1 + $0xf8] sm:$0xff]   ;;  %1960 = vmatprep.subr.bf16.mxu0 %v2197_v0  ;;  %v2202_v5 = vld [vmem:[%s2741_s1 + $0xf0] sm:$0xff]   ;;  %v2206_v9 = vld [vmem:[%s2741_s1 + $0xe8] sm:$0xff]   ;;  %p325_p4 = scmp.lt.s32.totalorder %s1784_s6, 15 }
   0xe   : > { %v2199_v2 = vld [vmem:[%s2741_s1 + $0x38] sm:$0xff]   ;;  %2000 = vmatprep.subr.bf16.mxu1 %v2198_v1  ;;  %v2203_v6 = vld [vmem:[%s2741_s1 + $0x30] sm:$0xff]   ;;  %v2207_v10 = vld [vmem:[%s2741_s1 + $0x28] sm:$0xff]  }
   0xf   : > { %v2200_v3 = vld [vmem:[%s2741_s1 + $0xb8] sm:$0xff]   ;;  %1961 = vmatpush3.bf16.msra.mxu0 %v2199_v2  ;;  %v2204_v7 = vld [vmem:[%s2741_s1 + $0xb0] sm:$0xff]   ;;  %v2208_v11 = vld [vmem:[%s2741_s1 + $0xa8] sm:$0xff]   ;;  %s2763_s6 = smov (!%p325_p4, %s1784_s6), 15 }
  0x10   : > { %2001 = vmatpush3.bf16.msra.mxu1 %v2200_v3  ;;  %1962 = vmatprep.subr.bf16.mxu0 %v2201_v4  ;;  %v2209_v12 = vld [vmem:[%s2741_s1 + $0x60] sm:$0xff]   ;;  %v2213_v16 = vld [vmem:[%s2741_s1 + $0x58] sm:$0xff]   ;;  %v2217_v20 = vld [vmem:[%s2741_s1 + $0x50] sm:$0xff]   ;;  %s2172_s8 = smul.u32 36, %s2763_s6 }
  0x11   : > { %2002 = vmatprep.subr.bf16.mxu1 %v2202_v5  ;;  %v2210_v13 = vld [vmem:[%s2741_s1 + $0xe0] sm:$0xff]   ;;  %v2214_v17 = vld [vmem:[%s2741_s1 + $0xd8] sm:$0xff]   ;;  %v2218_v21 = vld [vmem:[%s2741_s1 + $0xd0] sm:$0xff]  }
  0x12   : > { %v2211_v14 = vld [vmem:[%s2741_s1 + $0x20] sm:$0xff]   ;;  %v2215_v18 = vld [vmem:[%s2741_s1 + $0x18] sm:$0xff]   ;;  %v2219_v22 = vld [vmem:[%s2741_s1 + $0x10] sm:$0xff]   ;;  %s2492_s22 = scalar_lea.vmem %s2740_s0, %s2172_s8 }
  0x13   : > { %1963 = vmatpush3.bf16.msra.mxu0 %v2203_v6  ;;  %v2212_v15 = vld [vmem:[%s2741_s1 + $0xa0] sm:$0xff]   ;;  %v2216_v19 = vld [vmem:[%s2741_s1 + $0x98] sm:$0xff]   ;;  %v2220_v23 = vld [vmem:[%s2741_s1 + $0x90] sm:$0xff]  }
  0x14   : > { %2003 = vmatpush3.bf16.msra.mxu1 %v2204_v7  ;;  %1964 = vmatprep.subr.bf16.mxu0 %v2205_v8  ;;  %v2221_v24 = vld [vmem:[%s2741_s1 + $0x48] sm:$0xff]   ;;  %v2225_v28 = vld [vmem:[%s2741_s1 + $0x40] sm:$0xff]   ;;  %v2235_v36 = vld [vmem:[%s2741_s1 + $0x178] sm:$0xff]  }
  0x15   : > { %2004 = vmatprep.subr.bf16.mxu1 %v2206_v9  ;;  %v2222_v25 = vld [vmem:[%s2741_s1 + $0xc8] sm:$0xff]   ;;  %v2226_v29 = vld [vmem:[%s2741_s1 + $0xc0] sm:$0xff]   ;;  %v2236_v37 = vld [vmem:[%s2741_s1 + $0x1f8] sm:$0xff]  }
  0x16   : > { %v2223_v26 = vld [vmem:[%s2741_s1 + $0x8] sm:$0xff]   ;;  %v2227_v30 = vld [vmem:[%s2741_s1] sm:$0xff]   ;;  %v2237_v38 = vld [vmem:[%s2741_s1 + $0x138] sm:$0xff]  }
  0x17   : > { %1965 = vmatpush3.bf16.msra.mxu0 %v2207_v10  ;;  %v2224_v27 = vld [vmem:[%s2741_s1 + $0x88] sm:$0xff]   ;;  %v2228_v31 = vld [vmem:[%s2741_s1 + $0x80] sm:$0xff]   ;;  %v2238_v39 = vld [vmem:[%s2741_s1 + $0x1b8] sm:$0xff]  }
  0x18   : > { %2005 = vmatpush3.bf16.msra.mxu1 %v2208_v11  ;;  %1966 = vmatprep.subr.bf16.mxu0 %v2209_v12  ;;  %v2229_v32 = vld [vmem:[%s2492_s22] ss:$36 sps:$4 sm:$0xff]   ;;  %v2232_v34 = vld [vmem:[%s2492_s22 + $0x8] ss:$36 sps:$4 sm:$0xff]   ;;  %v2239_v40 = vld [vmem:[%s2741_s1 + $0x170] sm:$0xff]  }
  0x19   : > { %2006 = vmatprep.subr.bf16.mxu1 %v2210_v13  ;;  %v2231_v33 = vld [vmem:[%s2492_s22 + $0x4] ss:$36 sps:$4 sm:$0xff]   ;;  %v2234_v35 = vld [vmem:[%s2492_s22 + $0xc] ss:$36 sps:$4 sm:$0xff]   ;;  %v2245_v45 = vld [vmem:[%s2492_s22 + $0x54] ss:$36 sps:$4 sm:$0xff]  }
  0x1a   : > { %1221 = vmatprep.mubr.bf16.mxu0 %v2231_v33  ;;  %1286 = vmatprep.mubr.bf16.mxu1 %v2234_v35  ;;  %v2240_v41 = vld [vmem:[%s2741_s1 + $0x1f0] sm:$0xff]   ;;  %v2247_v46 = vld [vmem:[%s2492_s22 + $0x48] ss:$36 sps:$4 sm:$0xff]   ;;  %v2253_v52 = vld [vmem:[%s2741_s1 + $0x160] sm:$0xff]  }
  0x1b   : > { %1967 = vmatpush3.bf16.msra.mxu0 %v2211_v14  ;;  %v2241_v42 = vld [vmem:[%s2741_s1 + $0x130] sm:$0xff]   ;;  %v2249_v48 = vld [vmem:[%s2741_s1 + $0x168] sm:$0xff]   ;;  %v2254_v53 = vld [vmem:[%s2741_s1 + $0x1e0] sm:$0xff]  }
  0x1c   : > { %2007 = vmatpush3.bf16.msra.mxu1 %v2212_v15  ;;  %1968 = vmatprep.subr.bf16.mxu0 %v2213_v16  ;;  %v2242_v43 = vld [vmem:[%s2741_s1 + $0x1b0] sm:$0xff]   ;;  %v2250_v49 = vld [vmem:[%s2741_s1 + $0x1e8] sm:$0xff]   ;;  %v2255_v54 = vld [vmem:[%s2741_s1 + $0x120] sm:$0xff]  }
  0x1d   : > { %2008 = vmatprep.subr.bf16.mxu1 %v2214_v17  ;;  %v2243_v44 = vld [vmem:[%s2492_s22 + $0x4c] ss:$36 sps:$4 sm:$0xff]   ;;  %v2256_v55 = vld [vmem:[%s2741_s1 + $0x1a0] sm:$0xff]   ;;  %v2257_v56 = vld [vmem:[%s2492_s22 + $0x94] ss:$36 sps:$4 sm:$0xff]  }
  0x1e   : > { %v2248_v47 = vld [vmem:[%s2492_s22 + $0x50] ss:$36 sps:$4 sm:$0xff]   ;;  %v2251_v50 = vld [vmem:[%s2741_s1 + $0x128] sm:$0xff]   ;;  %v2259_v57 = vld [vmem:[%s2492_s22 + $0x9c] ss:$36 sps:$4 sm:$0xff]  }
  0x1f   : > { %1969 = vmatpush3.bf16.msra.mxu0 %v2215_v18  ;;  %v2252_v51 = vld [vmem:[%s2741_s1 + $0x1a8] sm:$0xff]   ;;  %v2261_v58 = vld [vmem:[%s2492_s22 + $0x90] ss:$36 sps:$4 sm:$0xff]   ;;  %v2262_v59 = vld [vmem:[%s2492_s22 + $0x98] ss:$36 sps:$4 sm:$0xff]  }
  0x20   : > { %2009 = vmatpush3.bf16.msra.mxu1 %v2216_v19  ;;  %1970 = vmatprep.subr.bf16.mxu0 %v2217_v20  ;;  %v2263_v60 = vld [vmem:[%s2741_s1 + $0x158] sm:$0xff]   ;;  %v2267_v0 = vld [vmem:[%s2741_s1 + $0x150] sm:$0xff]   ;;  %v2273_v5 = vld [vmem:[%s2492_s22 + $0xe4] ss:$36 sps:$4 sm:$0xff]  }
  0x21   : > { %2010 = vmatprep.subr.bf16.mxu1 %v2218_v21  ;;  %v2264_v61 = vld [vmem:[%s2741_s1 + $0x1d8] sm:$0xff]   ;;  %v2268_v1 = vld [vmem:[%s2741_s1 + $0x1d0] sm:$0xff]   ;;  %v2276_v7 = vld [vmem:[%s2492_s22 + $0xe0] ss:$36 sps:$4 sm:$0xff]  }
  0x22   : > { %v2265_v62 = vld [vmem:[%s2741_s1 + $0x118] sm:$0xff]   ;;  %v2269_v2 = vld [vmem:[%s2741_s1 + $0x110] sm:$0xff]   ;;  %v2277_v8 = vld [vmem:[%s2741_s1 + $0x148] sm:$0xff]  }
  0x23   : > { %1971 = vmatpush3.bf16.msra.mxu0 %v2219_v22  ;;  %v2266_v63 = vld [vmem:[%s2741_s1 + $0x198] sm:$0xff]   ;;  %v2270_v3 = vld [vmem:[%s2741_s1 + $0x190] sm:$0xff]   ;;  %v2278_v9 = vld [vmem:[%s2741_s1 + $0x1c8] sm:$0xff]  }
  0x24   : > { %2011 = vmatpush3.bf16.msra.mxu1 %v2220_v23  ;;  %1972 = vmatprep.subr.bf16.mxu0 %v2221_v24  ;;  %v2271_v4 = vld [vmem:[%s2492_s22 + $0xdc] ss:$36 sps:$4 sm:$0xff]   ;;  %v2279_v10 = vld [vmem:[%s2741_s1 + $0x108] sm:$0xff]   ;;  %v2285_v16 = vld [vmem:[%s2492_s22 + $0x10] ss:$36 sps:$4 sm:$0xff]  }
  0x25   : > { %2012 = vmatprep.subr.bf16.mxu1 %v2222_v25  ;;  %v2275_v6 = vld [vmem:[%s2492_s22 + $0xd8] ss:$36 sps:$4 sm:$0xff]   ;;  %v2280_v11 = vld [vmem:[%s2741_s1 + $0x188] sm:$0xff]   ;;  %v2281_v12 = vld [vmem:[%s2741_s1 + $0x140] sm:$0xff]  }
  0x26   : > { %v2282_v13 = vld [vmem:[%s2741_s1 + $0x1c0] sm:$0xff]   ;;  %v2287_v17 = vld [vmem:[%s2492_s22 + $0x14] ss:$36 sps:$4 sm:$0xff]   ;;  %v2309_v33 = vld [vmem:[%s2492_s22 + $0xec] ss:$36 sps:$4 sm:$0xff]  }
  0x27   : > { %1973 = vmatpush3.bf16.msra.mxu0 %v2223_v26  ;;  %v2283_v14 = vld [vmem:[%s2741_s1 + $0x100] sm:$0xff]   ;;  %v2288_v18 = vld [vmem:[%s2492_s22 + $0x18] ss:$36 sps:$4 sm:$0xff]   ;;  %v2292_v21 = vld [vmem:[%s2741_s1 + $0x230] sm:$0xff]  }
  0x28   : > { %2013 = vmatpush3.bf16.msra.mxu1 %v2224_v27  ;;  %1974 = vmatprep.subr.bf16.mxu0 %v2225_v28  ;;  %v2284_v15 = vld [vmem:[%s2741_s1 + $0x180] sm:$0xff]   ;;  %v2291_v20 = vld [vmem:[%s2741_s1 + $0x238] sm:$0xff]   ;;  %v2299_v26 = vld [vmem:[%s2741_s1 + $0x228] sm:$0xff]  }
  0x29   : > { %2014 = vmatprep.subr.bf16.mxu1 %v2226_v29  ;;  %v2290_v19 = vld [vmem:[%s2492_s22 + $0x1c] ss:$36 sps:$4 sm:$0xff]   ;;  %v2295_v23 = vld [vmem:[%s2492_s22 + $0x64] ss:$36 sps:$4 sm:$0xff]   ;;  %v2303_v28 = vld [vmem:[%s2492_s22 + $0xac] ss:$36 sps:$4 sm:$0xff]  }
  0x2a   : > { %v2293_v22 = vld [vmem:[%s2492_s22 + $0x5c] ss:$36 sps:$4 sm:$0xff]   ;;  %v2301_v27 = vld [vmem:[%s2492_s22 + $0xa4] ss:$36 sps:$4 sm:$0xff]   ;;  %v2308_v35 = vld [vmem:[%s2741_s1 + $0x210] sm:$0xff]  }
  0x2b   : > { %1975 = vmatpush3.bf16.msra.mxu0 %v2227_v30  ;;  %v2297_v24 = vld [vmem:[%s2492_s22 + $0x58] ss:$36 sps:$4 sm:$0xff]   ;;  %v2298_v25 = vld [vmem:[%s2492_s22 + $0x60] ss:$36 sps:$4 sm:$0xff]  }
  0x2c   : > { %2015 = vmatpush3.bf16.msra.mxu1 %v2228_v31  ;;  %2040 = vmatprep.subr.bf16.mxu0 %v2235_v36  ;;  %v2300_v29 = vld [vmem:[%s2741_s1 + $0x220] sm:$0xff]   ;;  %v2306_v31 = vld [vmem:[%s2492_s22 + $0xa8] ss:$36 sps:$4 sm:$0xff]  }
  0x2d   : > { %2080 = vmatprep.subr.bf16.mxu1 %v2236_v37  ;;  %v2305_v30 = vld [vmem:[%s2492_s22 + $0xa0] ss:$36 sps:$4 sm:$0xff]   ;;  %v2313_v36 = vld [vmem:[%s2492_s22 + $0xe8] ss:$36 sps:$4 sm:$0xff]  }
  0x2e   : > { %1222 = vmatmul.mubr.bf16.vlgmr.msra.gmra.mxu0 %v2229_v32  ;;  %v2307_v32 = vld [vmem:[%s2741_s1 + $0x218] sm:$0xff]   ;;  %v2315_v37 = vld [vmem:[%s2741_s1 + $0x208] sm:$0xff]  }
  0x2f   : > { %1287 = vmatmul.mubr.bf16.vlgmr.msra.gmra.mxu1 %v2232_v34  ;;  %2041 = vmatpush3.bf16.msra.mxu0 %v2237_v38  ;;  %v2311_v34 = vld [vmem:[%s2492_s22 + $0xf4] ss:$36 sps:$4 sm:$0xff]  }
  0x30   : > { %2081 = vmatpush3.bf16.msra.mxu1 %v2238_v39  ;;  %2042 = vmatprep.subr.bf16.mxu0 %v2239_v40  ;;  %v2314_v38 = vld [vmem:[%s2492_s22 + $0xf0] ss:$36 sps:$4 sm:$0xff]   ;;  %v2317_v39 = vld [vmem:[%s2492_s22 + $0x20] ss:$36 sps:$4 sm:$0xff]  }
  0x31   : > { %2082 = vmatprep.subr.bf16.mxu1 %v2240_v41  ;;  %1229 = vmatprep.mubr.bf16.mxu0 %v2243_v44  ;;  %v2318_v40 = vld [vmem:[%s2492_s22 + $0xb0] ss:$36 sps:$4 sm:$0xff]   ;;  %v2316_v41 = vld [vmem:[%s2741_s1 + $0x200] sm:$0xff]  }
  0x32   : > { %1294 = vmatprep.mubr.bf16.mxu1 %v2245_v45 }
  0x33   : > { %2043 = vmatpush3.bf16.msra.mxu0 %v2241_v42  ;;  %v2319_v42 = vld [vmem:[%s2492_s22 + $0x68] ss:$36 sps:$4 sm:$0xff]  }
  0x34   : > { %2083 = vmatpush3.bf16.msra.mxu1 %v2242_v43  ;;  %2044 = vmatprep.subr.bf16.mxu0 %v2249_v48  ;;  %v2320_v43 = vld [vmem:[%s2492_s22 + $0xf8] ss:$36 sps:$4 sm:$0xff]   ;;  %s1787_s22 = sshll.u32 %s2763_s6, 2 }
  0x35   : > { %2084 = vmatprep.subr.bf16.mxu1 %v2250_v49  ;;  %s2698_s29 = scalar_lea.vmem %s2744_s4, %s1787_s22  ;;  %s366_s12 = scalar_lea.vmem %s2745_s5, %s1787_s22 }
  0x36   : > { %1230 = vmatmul.mubr.bf16.gmra.mxu0 %v2247_v46 }
  0x37   : > { %1295 = vmatmul.mubr.bf16.gmra.mxu1 %v2248_v47  ;;  %2045 = vmatpush3.bf16.msra.mxu0 %v2251_v50 }
  0x38   : > { %2085 = vmatpush3.bf16.msra.mxu1 %v2252_v51  ;;  %2046 = vmatprep.subr.bf16.mxu0 %v2253_v52 }
  0x39   : > { %2086 = vmatprep.subr.bf16.mxu1 %v2254_v53  ;;  %1237 = vmatprep.mubr.bf16.mxu0 %v2257_v56 }
  0x3a   : > { %1302 = vmatprep.mubr.bf16.mxu1 %v2259_v57 }
  0x3b   : > { %2047 = vmatpush3.bf16.msra.mxu0 %v2255_v54 }
  0x3c   : > { %2087 = vmatpush3.bf16.msra.mxu1 %v2256_v55  ;;  %2048 = vmatprep.subr.bf16.mxu0 %v2263_v60 }
  0x3d   : > { %2088 = vmatprep.subr.bf16.mxu1 %v2264_v61 }
  0x3e   : > { %1238 = vmatmul.mubr.bf16.gmra.mxu0 %v2261_v58 }
  0x3f   : > { %1303 = vmatmul.mubr.bf16.gmra.mxu1 %v2262_v59  ;;  %2049 = vmatpush3.bf16.msra.mxu0 %v2265_v62 }
  0x40   : > { %2089 = vmatpush3.bf16.msra.mxu1 %v2266_v63  ;;  %2050 = vmatprep.subr.bf16.mxu0 %v2267_v0 }
  0x41   : > { %2090 = vmatprep.subr.bf16.mxu1 %v2268_v1  ;;  %1245 = vmatprep.mubr.bf16.mxu0 %v2271_v4 }
  0x42   : > { %1310 = vmatprep.mubr.bf16.mxu1 %v2273_v5 }
  0x43   : > { %2051 = vmatpush3.bf16.msra.mxu0 %v2269_v2 }
  0x44   : > { %2091 = vmatpush3.bf16.msra.mxu1 %v2270_v3  ;;  %2052 = vmatprep.subr.bf16.mxu0 %v2277_v8 }
  0x45   : > { %2092 = vmatprep.subr.bf16.mxu1 %v2278_v9 }
  0x46   : > { %1246 = vmatmul.mubr.bf16.gmra.mxu0 %v2275_v6 }
  0x47   : > { %1311 = vmatmul.mubr.bf16.gmra.mxu1 %v2276_v7  ;;  %2053 = vmatpush3.bf16.msra.mxu0 %v2279_v10 }
  0x48   : > { %2093 = vmatpush3.bf16.msra.mxu1 %v2280_v11  ;;  %2054 = vmatprep.subr.bf16.mxu0 %v2281_v12 }
  0x49   : > { %2094 = vmatprep.subr.bf16.mxu1 %v2282_v13  ;;  %1351 = vmatprep.mubr.bf16.mxu0 %v2287_v17 }
  0x4a   : > { %1416 = vmatprep.mubr.bf16.mxu1 %v2290_v19 }
  0x4b   : > { %2055 = vmatpush3.bf16.msra.mxu0 %v2283_v14 }
  0x4c   : > { %2095 = vmatpush3.bf16.msra.mxu1 %v2284_v15  ;;  %2132 = vmatprep.subr.bf16.mxu0 %v2291_v20 }
  0x4d   : > { %2156 = vmatprep.subr.bf16.mxu1 %v2291_v20 }
  0x4e   : > { %1352 = vmatmul.mubr.bf16.vlgmr.msra.gmra.mxu0 %v2285_v16 }
  0x4f   : > { %1417 = vmatmul.mubr.bf16.vlgmr.msra.gmra.mxu1 %v2288_v18  ;;  %2133 = vmatpush3.bf16.msra.mxu0 %v2291_v20 }
  0x50   : > { %2164 = vmatpush3.bf16.msra.mxu1 %v2291_v20  ;;  %2134 = vmatprep.subr.bf16.mxu0 %v2292_v21 }
  0x51   : > { %2157 = vmatprep.subr.bf16.mxu1 %v2292_v21  ;;  %1359 = vmatprep.mubr.bf16.mxu0 %v2293_v22 }
  0x52   : > { %1424 = vmatprep.mubr.bf16.mxu1 %v2295_v23 }
  0x53   : > { %2135 = vmatpush3.bf16.msra.mxu0 %v2292_v21 }
  0x54   : > { %2165 = vmatpush3.bf16.msra.mxu1 %v2292_v21  ;;  %2136 = vmatprep.subr.bf16.mxu0 %v2299_v26 }
  0x55   : > { %2158 = vmatprep.subr.bf16.mxu1 %v2299_v26 }
  0x56   : > { %1360 = vmatmul.mubr.bf16.gmra.mxu0 %v2297_v24 }
  0x57   : > { %1425 = vmatmul.mubr.bf16.gmra.mxu1 %v2298_v25  ;;  %1367 = vmatprep.mubr.bf16.mxu0 %v2301_v27 }
  0x58   : > { %2137 = vmatpush3.bf16.msra.mxu0 %v2299_v26  ;;  %1432 = vmatprep.mubr.bf16.mxu1 %v2303_v28 }
  0x59   : > { %2166 = vmatpush3.bf16.msra.mxu1 %v2299_v26  ;;  %2138 = vmatprep.subr.bf16.mxu0 %v2300_v29 }
  0x5a   : > { %2159 = vmatprep.subr.bf16.mxu1 %v2300_v29 }
  0x5c   : > { %2139 = vmatpush3.bf16.msra.mxu0 %v2300_v29 }
  0x5d   : > { %2167 = vmatpush3.bf16.msra.mxu1 %v2300_v29  ;;  %2140 = vmatprep.subr.bf16.mxu0 %v2307_v32 }
  0x5e   : > { %1368 = vmatmul.mubr.bf16.gmra.mxu0 %v2305_v30  ;;  %2160 = vmatprep.subr.bf16.mxu1 %v2307_v32 }
  0x5f   : > { %1433 = vmatmul.mubr.bf16.gmra.mxu1 %v2306_v31  ;;  %1375 = vmatprep.mubr.bf16.mxu0 %v2309_v33 }
  0x60   : > { %2141 = vmatpush3.bf16.msra.mxu0 %v2307_v32  ;;  %1440 = vmatprep.mubr.bf16.mxu1 %v2311_v34 }
  0x61   : > { %2168 = vmatpush3.bf16.msra.mxu1 %v2307_v32  ;;  %2142 = vmatprep.subr.bf16.mxu0 %v2308_v35 }
  0x62   : > { %2161 = vmatprep.subr.bf16.mxu1 %v2308_v35 }
  0x64   : > { %2143 = vmatpush3.bf16.msra.mxu0 %v2308_v35 }
  0x65   : > { %2169 = vmatpush3.bf16.msra.mxu1 %v2308_v35  ;;  %2144 = vmatprep.subr.bf16.mxu0 %v2315_v37 }
  0x66   : > { %1376 = vmatmul.mubr.bf16.gmra.mxu0 %v2313_v36  ;;  %2162 = vmatprep.subr.bf16.mxu1 %v2315_v37 }
  0x67   : > { %1441 = vmatmul.mubr.bf16.gmra.mxu1 %v2314_v38  ;;  %2148 = vmatprep.mubr.bf16.mxu0 %v2317_v39 }
  0x68   : > { %2145 = vmatpush3.bf16.msra.mxu0 %v2315_v37  ;;  %2152 = vmatprep.mubr.bf16.mxu1 %v2318_v40 }
  0x69   : > { %2170 = vmatpush3.bf16.msra.mxu1 %v2315_v37  ;;  %2146 = vmatprep.subr.bf16.mxu0 %v2316_v41 }
  0x6a   : > { %2163 = vmatprep.subr.bf16.mxu1 %v2316_v41 }
  0x6c   : > { %2147 = vmatpush3.bf16.msra.mxu0 %v2316_v41 }
  0x6d   : > { %2171 = vmatpush3.bf16.msra.mxu1 %v2316_v41 }
  0x6f   : > { %2149 = vmatmul.mubr.bf16.vlgmr.msra.gmra.mxu0 %v2319_v42 }
  0x70   : > { %2153 = vmatmul.mubr.bf16.vlgmr.msra.gmra.mxu1 %v2320_v43 }
  0xee   : > { %v1976_v44 = vpop.f32.mrf.mxu0 }
  0xef   : > { %v2016_v45 = vpop.f32.mrf.mxu1 }
  0xf0   : > { %v1977_v46 = vpop.f32.mrf.mxu0 }
  0xf1   : > { %v2017_v47 = vpop.f32.mrf.mxu1  ;;  %v1978_v33 = vadd.f32 %v1977_v46, %v1976_v44 }
  0xf2   : > { %v2656_v48 = vpop.f32.mrf.mxu0  ;;  %v2018_v34 = vadd.f32 %v2017_v47, %v2016_v45 }
  0xf3   : > { %v2658_v49 = vpop.f32.mrf.mxu1 }
  0xf4   : > { %v2660_v50 = vpop.f32.mrf.mxu0 }
  0xf5   : > { %v2662_v51 = vpop.f32.mrf.mxu1 }
  0xf6   : > { %v1982_v52 = vpop.f32.mrf.mxu0 }
  0xf7   : > { %v2022_v53 = vpop.f32.mrf.mxu1 }
  0xf8   : > { %v1983_v54 = vpop.f32.mrf.mxu0 }
  0xf9   : > { %v2023_v55 = vpop.f32.mrf.mxu1  ;;  %v1984_v37 = vadd.f32 %v1983_v54, %v1982_v52 }
  0xfa   : > { %v1985_v56 = vpop.f32.mrf.mxu0  ;;  %v2024_v38 = vadd.f32 %v2023_v55, %v2022_v53  ;;  %v1981_v55 = vadd.f32 %v2660_v50, %v2656_v48 }
  0xfb   : > { %v2025_v57 = vpop.f32.mrf.mxu1 }
  0xfc   : > { %v1986_v58 = vpop.f32.mrf.mxu0 }
  0xfd   : > { %v2026_v59 = vpop.f32.mrf.mxu1  ;;  %v1987_v41 = vadd.f32 %v1986_v58, %v1985_v56  ;;  %v2021_v56 = vadd.f32 %v2662_v51, %v2658_v49 }
  0xfe   : > { %v1988_v60 = vpop.f32.mrf.mxu0  ;;  %v2027_v42 = vadd.f32 %v2026_v59, %v2025_v57 }
  0xff   : > { %v2028_v61 = vpop.f32.mrf.mxu1 }
 0x100   : > { %v1989_v62 = vpop.f32.mrf.mxu0  ;;  %v1300_v57 = vadd.f32 %v2027_v42, %v1987_v41 }
 0x101   : > { %v2029_v63 = vpop.f32.mrf.mxu1 }
 0x102   : > { %v2664_v0 = vpop.f32.mrf.mxu0 }
 0x103   : > { %v2666_v1 = vpop.f32.mrf.mxu1 }
 0x104   : > { %v2668_v2 = vpop.f32.mrf.mxu0 }
 0x105   : > { %v2670_v3 = vpop.f32.mrf.mxu1  ;;  %v1993_v48 = vadd.f32 %v2668_v2, %v2664_v0 }
 0x106   : > { %v1994_v4 = vpop.f32.mrf.mxu0  ;;  %v2033_v49 = vadd.f32 %v2670_v3, %v2666_v1 }
 0x107   : > { %v2034_v5 = vpop.f32.mrf.mxu1 }
 0x108   : > { %v1995_v6 = vpop.f32.mrf.mxu0 }
 0x109   : > { %v2035_v7 = vpop.f32.mrf.mxu1  ;;  %v1996_v39 = vadd.f32 %v1995_v6, %v1994_v4 }
 0x10a   : > { %v1997_v8 = vpop.f32.mrf.mxu0  ;;  %v2036_v40 = vadd.f32 %v2035_v7, %v2034_v5 }
 0x10b   : > { %v2037_v9 = vpop.f32.mrf.mxu1 }
 0x10c   : > { %v1998_v10 = vpop.f32.mrf.mxu0  ;;  %v1313_v52 = vadd.f32 %v2036_v40, %v1996_v39 }
 0x10d   : > { %v2038_v11 = vpop.f32.mrf.mxu1  ;;  %v1999_v44 = vadd.f32 %v1998_v10, %v1997_v8 }
 0x10e   : > { %v2056_v12 = vpop.f32.mrf.mxu0  ;;  %v2039_v45 = vadd.f32 %v2038_v11, %v2037_v9  ;;  %v2705_v11 = vld [vmem:[%s2698_s29 + $0x8] sm:$0xff]  }
 0x10f   : > { %v2672_v13 = vpop.f32.mrf.mxu1 }
 0x110   : > { %v2057_v14 = vpop.f32.mrf.mxu0  ;;  %v1316_v50 = vadd.f32 %v2039_v45, %v1999_v44  ;;  %v1955_v45 = vld [vmem:[%s2698_s29 + $0x10] sm:$0xff]  }
 0x111   : > { %v2674_v15 = vpop.f32.mrf.mxu1  ;;  %v2058_v53 = vadd.f32 %v2057_v14, %v2056_v12  ;;  %v1292_v12 = vadd.f32 %v2021_v56, %v1981_v55 }
 0x112   : > { %2746 = vst [vmem:[#allocation3_spill] sm:$0xff] %v2674_v15  ;;  %v2059_v16 = vpop.f32.mrf.mxu0  ;;  %v1289_v15 = vadd.f32 %v2018_v34, %v1978_v33 }
 0x113   : > { %v2676_v17 = vpop.f32.mrf.mxu1 }
 0x114   : > { %2747 = vst [vmem:[#allocation4_spill] sm:$0xff] %v2676_v17  ;;  %v2060_v18 = vpop.f32.mrf.mxu0  ;;  %v1990_v17 = vadd.f32 %v1989_v62, %v1988_v60  ;;  %v1354_v7 = vadd.f32 %v2058_v53, %v1289_v15  ;;  %v1899_v53 = vld [vmem:[%s2743_s3] ss:$0 sm:$0xff] }
 0x115   : > { %v2678_v19 = vpop.f32.mrf.mxu1  ;;  %v2061_v8 = vadd.f32 %v2060_v18, %v2059_v16 }
 0x116   : > { %2748 = vst [vmem:[#allocation5_spill] sm:$0xff] %v2678_v19  ;;  %v2062_v20 = vpop.f32.mrf.mxu0 }
 0x117   : > { %v2102_v21 = vpop.f32.mrf.mxu1 }
 0x118   : > { %v2063_v22 = vpop.f32.mrf.mxu0 }
 0x119   : > { %v2103_v23 = vpop.f32.mrf.mxu1  ;;  %v2752_v0 = vld [vmem:[#allocation3_spill] sm:$0xff] }
 0x11a   : > { %v2065_v24 = vpop.f32.mrf.mxu0  ;;  %v2104_v9 = vadd.f32 %v2103_v23, %v2102_v21  ;;  %v2098_v2 = vadd.f32 %v2752_v0, %v2672_v13  ;;  %v1898_v21 = vld [vmem:[%s2742_s2] ss:$0 sm:$0xff]  ;;  %v1924_v23 = vunpack.c.l.bf16 %v2705_v11 }
 0x11b   : > { %v2680_v25 = vpop.f32.mrf.mxu1 }
 0x11c   : > { %2749 = vst [vmem:[#allocation6_spill] sm:$0xff] %v2680_v25  ;;  %v2066_v26 = vpop.f32.mrf.mxu0  ;;  %v2064_v25 = vadd.f32 %v2063_v22, %v2062_v20  ;;  %v1419_v33 = vadd.f32 %v2098_v2, %v1354_v7 }
 0x11d   : > { %v2682_v27 = vpop.f32.mrf.mxu1  ;;  %v2756_v39 = vld [vmem:[#allocation5_spill] sm:$0xff] }
 0x11e   : > { %2750 = vst [vmem:[#allocation7_spill] sm:$0xff] %v2682_v27  ;;  %v2068_v28 = vpop.f32.mrf.mxu0  ;;  %v2030_v27 = vadd.f32 %v2029_v63, %v2028_v61  ;;  %v2067_v63 = vadd.f32 %v2066_v26, %v2065_v24  ;;  %v1308_v24 = vadd.f32 %v2033_v49, %v1993_v48 }
 0x11f   : > { %v2108_v29 = vpop.f32.mrf.mxu1 }
 0x120   : > { %v2069_v30 = vpop.f32.mrf.mxu0  ;;  %v1305_v61 = vadd.f32 %v2030_v27, %v1990_v17  ;;  %v1365_v1 = vadd.f32 %v2067_v63, %v1300_v57 }
 0x121   : > { %v2109_v31 = vpop.f32.mrf.mxu1  ;;  %v2070_v58 = vadd.f32 %v2069_v30, %v2068_v28 }
 0x122   : > { %v2071_v32 = vpop.f32.mrf.mxu0  ;;  %v2110_v15 = vadd.f32 %v2109_v31, %v2108_v29  ;;  %v1919_v31 = vld [vmem:[%s2698_s29] sm:$0xff]  }
 0x123   : > { %v2684_v35 = vpop.f32.mrf.mxu1  ;;  %v1370_v14 = vadd.f32 %v2070_v58, %v1305_v61  ;;  %v2753_v26 = vld [vmem:[#allocation6_spill] sm:$0xff] }
 0x124   : > { %2751 = vst [vmem:[#allocation8_spill] sm:$0xff] %v2684_v35  ;;  %v2072_v36 = vpop.f32.mrf.mxu0  ;;  %v1297_v35 = vadd.f32 %v2024_v38, %v1984_v37  ;;  %v2755_v38 = vld [vmem:[#allocation4_spill] sm:$0xff] }
 0x125   : > { %v2686_v43 = vpop.f32.mrf.mxu1  ;;  %v2073_v17 = vadd.f32 %v2072_v36, %v2071_v32  ;;  %v2754_v27 = vld [vmem:[#allocation7_spill] sm:$0xff]  ;;  %v1956_v32 = vld [vmem:[%s2698_s29 + $0x18] sm:$0xff]   ;;  %v1435_v36 = vadd.f32 %v2110_v15, %v1370_v14  ;;  %v2101_v40 = vadd.f32 %v2756_v39, %v2755_v38 }
 0x126   : > { %v2074_v19 = vpop.f32.mrf.mxu0  ;;  %v1362_v62 = vadd.f32 %v2064_v25, %v1297_v35  ;;  %v1357_v25 = vadd.f32 %v2061_v8, %v1292_v12  ;;  %v2107_v28 = vadd.f32 %v2754_v27, %v2753_v26  ;;  %v1932_v55 = vunpack.c.l.bf16 %v1956_v32 }
 0x127   : > { %v2114_v46 = vpop.f32.mrf.mxu1  ;;  %v1373_v34 = vadd.f32 %v2073_v17, %v1308_v24 }
 0x128   : > { %v2075_v47 = vpop.f32.mrf.mxu0  ;;  %v1427_v22 = vadd.f32 %v2104_v9, %v1362_v62  ;;  %v1422_v62 = vadd.f32 %v2101_v40, %v1357_v25 }
 0x129   : > { %v2076_v54 = vadd.f32 %v2075_v47, %v2074_v19  ;;  %v2115_v59 = vpop.f32.mrf.mxu1 }
 0x12a   : > { %v2077_v60 = vpop.f32.mrf.mxu0  ;;  %v2116_v51 = vadd.f32 %v2115_v59, %v2114_v46  ;;  %v1430_v46 = vadd.f32 %v2107_v28, %v1365_v1  ;;  %v1920_v59 = vunpack.c.l.bf16 %v1919_v31 }
 0x12b   : > { %v1378_v4 = vadd.f32 %v2076_v54, %v1313_v52  ;;  %v2117_v5 = vpop.f32.mrf.mxu1  ;;  %v2757_v47 = vld [vmem:[#allocation8_spill] sm:$0xff] }
 0x12c   : > { %v2078_v6 = vpop.f32.mrf.mxu0  ;;  %v2113_v52 = vadd.f32 %v2686_v43, %v2757_v47 }
 0x12d   : > { %v2079_v10 = vadd.f32 %v2078_v6, %v2077_v60  ;;  %v2118_v19 = vpop.f32.mrf.mxu1  ;;  %v1443_v20 = vadd.f32 %v2116_v51, %v1378_v4  ;;  %v1928_v4 = vunpack.c.l.bf16 %v1955_v45 }
 0x12e   : > { %v2119_v16 = vadd.f32 %v2118_v19, %v2117_v5  ;;  %v1925_v5 = vunpack.c.h.bf16 %v2705_v11 }
 0x12f   : > { %v1381_v3 = vadd.f32 %v2079_v10, %v1316_v50  ;;  %v2150_v18 = vpop.f32.mrf.mxu0  ;;  %v1438_v50 = vadd.f32 %v2113_v52, %v1373_v34  ;;  %v1933_v10 = vunpack.c.h.bf16 %v1956_v32 }
 0x130   : > { %v1492_v13 = vadd.f32 %v2150_v18, %v1427_v22  ;;  %v2154_v30 = vpop.f32.mrf.mxu1 }
 0x131   : > { %v1508_v35 = vadd.f32 %v2154_v30, %v1443_v20  ;;  %v1483_v29 = vpop.f32.mrf.mxu0  ;;  %v1446_v37 = vadd.f32 %v2119_v16, %v1381_v3  ;;  %v1921_v20 = vunpack.c.h.bf16 %v1919_v31  ;;  %v1929_v3 = vunpack.c.h.bf16 %v1955_v45 }
 0x132   : > { %v1550_v41 = vmul.f32 %v1898_v21, %v1492_v13  ;;  %v1484_v42 = vadd.f32 %v1483_v29, %v1419_v33  ;;  %v1499_v44 = vpop.f32.mrf.mxu1 }
 0x133   : > { %v1554_v54 = vmul.f32 %v1898_v21, %v1508_v35  ;;  %v1500_v56 = vadd.f32 %v1499_v44, %v1435_v36  ;;  %v2151_v57 = vpop.f32.mrf.mxu0 }
 0x134   : > { %v1548_v58 = vmul.f32 %v1898_v21, %v1484_v42  ;;  %v1495_v60 = vadd.f32 %v2151_v57, %v1430_v46  ;;  %v2155_v61 = vpop.f32.mrf.mxu1  ;;  %v1565_v51 = vadd.f32 %v1899_v53, %v1550_v41 }
 0x135   : > { %v1552_v63 = vmul.f32 %v1898_v21, %v1500_v56  ;;  %v1511_v48 = vadd.f32 %v2155_v61, %v1446_v37  ;;  %v1486_v49 = vpop.f32.mrf.mxu0  ;;  %v1569_v8 = vadd.f32 %v1899_v53, %v1554_v54 }
 0x136   : > { %v1551_v43 = vmul.f32 %v1898_v21, %v1495_v60  ;;  %v1487_v6 = vadd.f32 %v1486_v49, %v1422_v62  ;;  %v1502_v7 = vpop.f32.mrf.mxu1  ;;  %v1563_v14 = vadd.f32 %v1899_v53, %v1548_v58  ;;  %v1589_v22 = vadd.f32 %v1924_v23, %v1565_v51 }
 0x137   : > { %v1555_v9 = vmul.f32 %v1898_v21, %v1511_v48  ;;  %v1503_v12 = vadd.f32 %v1502_v7, %v1438_v50  ;;  %v1567_v0 = vadd.f32 %v1899_v53, %v1552_v63  ;;  %v1593_v16 = vadd.f32 %v1932_v55, %v1569_v8 }
 0x138   : > { %v1566_v17 = vadd.f32 %v1899_v53, %v1551_v43  ;;  %v1549_v19 = vmul.f32 %v1898_v21, %v1487_v6  ;;  %v1587_v25 = vadd.f32 %v1920_v59, %v1563_v14 }
 0x139   : > { %v1570_v2 = vadd.f32 %v1899_v53, %v1555_v9  ;;  %v1553_v1 = vmul.f32 %v1898_v21, %v1503_v12  ;;  %v1591_v28 = vadd.f32 %v1928_v4, %v1567_v0 }
 0x13a   : > { %v1590_v24 = vadd.f32 %v1925_v5, %v1566_v17  ;;  %v1564_v15 = vadd.f32 %v1899_v53, %v1549_v19 }
 0x13b   : > { %v1594_v11 = vadd.f32 %v1933_v10, %v1570_v2  ;;  %v1568_v18 = vadd.f32 %v1899_v53, %v1553_v1 }
 0x13c   : > { %v1942_v26 = vpack.c.bf16 %v1590_v24, %v1589_v22  ;;  %v1588_v27 = vadd.f32 %v1921_v20, %v1564_v15 }
 0x13d   : > { %v1952_v13 = vpack.c.bf16 %v1594_v11, %v1593_v16  ;;  %v1592_v30 = vadd.f32 %v1929_v3, %v1568_v18 }
 0x13e   : > { %1957 = vst [vmem:[%s366_s12 + $0x8] sm:$0xff] %v1942_v26   ;;  %v1937_v21 = vpack.c.bf16 %v1588_v27, %v1587_v25 }
 0x13f   : > { %1959 = vst [vmem:[%s366_s12 + $0x18] sm:$0xff] %v1952_v13   ;;  %v1947_v23 = vpack.c.bf16 %v1592_v30, %v1591_v28 }
 0x140   : > { %1938 = vst [vmem:[%s366_s12] sm:$0xff] %v1937_v21  }
 0x141   : > { %1958 = vst [vmem:[%s366_s12 + $0x10] sm:$0xff] %v1947_v23  }
 0x142 PF: > { %s15_s20 = sadd.s32 1, %s2343_s20   ;;  %s2758_s18 = smov %s2339_s19 }
 0x143   : > { %p12_p5 = scmp.ge.s32.totalorder %s15_s20, 4   ;;  %s2759_s19 = smov %s2761_s21 }
 0x145   :  { %14 = sbr.rel (!%p12_p5) target bundleno = 2 (0x2), region = 90 }

// kernel: net_recam_forward.56
= control target key start
LH: loop header
LB: loop body
LE: loop exit
PB: predicated region body
PF: predicated region fallthrough
CT: control target
= control target key end

     0   :  { %s407_s1 = inlined_call_operand.vmem [shape: bf16[128,128], index: 1, kind: input, shape index: {}]   ;;  %s408_s0 = inlined_call_operand.vmem [shape: bf16[32,128], index: 0, kind: input, shape index: {}]   ;;  %s409_s2 = inlined_call_operand.vmem [shape: f32[1,128], index: 2, kind: input, shape index: {}]   ;;  %s410_s3 = inlined_call_operand.vmem [shape: f32[1,128], index: 3, kind: input, shape index: {}]   ;;  %s411_s4 = inlined_call_operand.vmem [shape: f32[1,128], index: 4, kind: input, shape index: {}]   ;;  %s412_s5 = inlined_call_operand.vmem [shape: f32[1,128], index: 5, kind: input, shape index: {}]   ;;  %s413_s6 = inlined_call_operand.vmem [shape: bf16[32,128], index: 6, kind: output, shape index: {}]  }
   0x1   :  { %v316_v0 = vld [vmem:[%s407_s1 + $0x38] sm:$0xff]   ;;  %v317_v1 = vld [vmem:[%s407_s1 + $0x30] sm:$0xff]   ;;  %v318_v2 = vld [vmem:[%s407_s1 + $0x28] sm:$0xff]  }
   0x2   :  { %296 = vmatprep.subr.bf16.mxu0 %v316_v0  ;;  %v319_v3 = vld [vmem:[%s407_s1 + $0x20] sm:$0xff]   ;;  %v284_v9 = vld [vmem:[%s408_s0 + $0x8] sm:$0xff]   ;;  %v320_v12 = vld [vmem:[%s407_s1 + $0x18] sm:$0xff]  }
   0x3   :  { %297 = vmatpush3.bf16.msra.mxu0 %v316_v0  ;;  %v267_v4 = vld [vmem:[%s408_s0] sm:$0xff]   ;;  %v272_v15 = vunpack.c.l.bf16 %v284_v9  ;;  %v273_v16 = vunpack.c.h.bf16 %v284_v9  ;;  %v321_v19 = vld [vmem:[%s407_s1 + $0x10] sm:$0xff]   ;;  %v322_v23 = vld [vmem:[%s407_s1 + $0x8] sm:$0xff]  }
   0x4   :  { %298 = vmatprep.subr.bf16.mxu0 %v317_v1  ;;  %v246_v5 = vld [vmem:[%s409_s2] ss:$0 sm:$0xff]  ;;  %v268_v6 = vunpack.c.l.bf16 %v267_v4  ;;  %v269_v7 = vunpack.c.h.bf16 %v267_v4 }
   0x5   :  { %v247_v8 = vld [vmem:[%s410_s3] ss:$0 sm:$0xff]  ;;  %v49_v21 = vmul.f32 %v272_v15, %v246_v5  ;;  %v50_v22 = vmul.f32 %v273_v16, %v246_v5 }
   0x6   :  { %v47_v10 = vmul.f32 %v268_v6, %v246_v5  ;;  %v48_v11 = vmul.f32 %v269_v7, %v246_v5  ;;  %v323_v26 = vld [vmem:[%s407_s1] sm:$0xff]  }
   0x7   :  { %299 = vmatpush3.bf16.msra.mxu0 %v317_v1  ;;  %v60_v24 = vadd.f32 %v247_v8, %v49_v21  ;;  %v61_v25 = vadd.f32 %v247_v8, %v50_v22  ;;  %v256_v31 = vld [vmem:[%s411_s4] ss:$0 sm:$0xff] }
   0x8   :  { %300 = vmatprep.subr.bf16.mxu0 %v318_v2  ;;  %v58_v13 = vadd.f32 %v247_v8, %v47_v10  ;;  %v59_v14 = vadd.f32 %v247_v8, %v48_v11  ;;  %v257_v34 = vld [vmem:[%s412_s5] ss:$0 sm:$0xff] }
   0x9   :  { %v64_v27 = vmax.f32 %v60_v24, 0.0  ;;  %v65_v28 = vmax.f32 %v61_v25, 0.0 }
   0xa   :  { %v62_v17 = vmax.f32 %v58_v13, 0.0  ;;  %v63_v18 = vmax.f32 %v59_v14, 0.0 }
   0xb   :  { %301 = vmatpush3.bf16.msra.mxu0 %v318_v2  ;;  %v67_v29 = vpack.c.bf16 %v65_v28, %v64_v27 }
   0xc   :  { %302 = vmatprep.subr.bf16.mxu0 %v319_v3  ;;  %v66_v20 = vpack.c.bf16 %v63_v18, %v62_v17 }
   0xe   :  { %312 = vmatprep.mubr.bf16.mxu0 %v66_v20 }
   0xf   :  { %303 = vmatpush3.bf16.msra.mxu0 %v319_v3 }
  0x10   :  { %304 = vmatprep.subr.bf16.mxu0 %v320_v12 }
  0x13   :  { %305 = vmatpush3.bf16.msra.mxu0 %v320_v12 }
  0x14   :  { %306 = vmatprep.subr.bf16.mxu0 %v321_v19 }
  0x17   :  { %307 = vmatpush3.bf16.msra.mxu0 %v321_v19 }
  0x18   :  { %308 = vmatprep.subr.bf16.mxu0 %v322_v23 }
  0x1b   :  { %309 = vmatpush3.bf16.msra.mxu0 %v322_v23 }
  0x1c   :  { %310 = vmatprep.subr.bf16.mxu0 %v323_v26 }
  0x1f   :  { %311 = vmatpush3.bf16.msra.mxu0 %v323_v26 }
  0x22   :  { %313 = vmatmul.mubr.bf16.vlgmr.msra.gmra.mxu0 %v67_v29 }
  0xe2   :  { %v314_v30 = vpop.f32.mrf.mxu0 }
  0xe3   :  { %v209_v33 = vmul.f32 %v314_v30, %v256_v31 }
  0xe4   :  { %v170_v32 = vpop.f32.mrf.mxu0 }
  0xe5   :  { %v207_v36 = vmul.f32 %v256_v31, %v170_v32  ;;  %v220_v39 = vadd.f32 %v257_v34, %v209_v33 }
  0xe6   :  { %v315_v35 = vpop.f32.mrf.mxu0 }
  0xe7   :  { %v210_v37 = vmul.f32 %v315_v35, %v256_v31  ;;  %v218_v42 = vadd.f32 %v257_v34, %v207_v36 }
  0xe8   :  { %v173_v38 = vpop.f32.mrf.mxu0 }
  0xe9   :  { %v221_v40 = vadd.f32 %v257_v34, %v210_v37  ;;  %v208_v41 = vmul.f32 %v256_v31, %v173_v38 }
  0xeb   :  { %v282_v43 = vpack.c.bf16 %v221_v40, %v220_v39  ;;  %v219_v44 = vadd.f32 %v257_v34, %v208_v41 }
  0xed   :  { %285 = vst [vmem:[%s413_s6 + $0x8] sm:$0xff] %v282_v43   ;;  %v277_v45 = vpack.c.bf16 %v219_v44, %v218_v42 }
  0xef   :  { %278 = vst [vmem:[%s413_s6] sm:$0xff] %v277_v45  }

// kernel: net_recam_forward.55
= control target key start
LH: loop header
LB: loop body
LE: loop exit
PB: predicated region body
PF: predicated region fallthrough
CT: control target
= control target key end

     0   :  { %s1686_s1 = inlined_call_operand.vmem [shape: bf16[1152,128], index: 1, kind: input, shape index: {}]   ;;  %s1687_s0 = inlined_call_operand.vmem [shape: bf16[32,1152], index: 0, kind: input, shape index: {}]   ;;  %s1688_s2 = inlined_call_operand.vmem [shape: f32[1,128], index: 2, kind: input, shape index: {}]   ;;  %s1689_s3 = inlined_call_operand.vmem [shape: f32[1,128], index: 3, kind: input, shape index: {}]   ;;  %s1690_s4 = inlined_call_operand.vmem [shape: bf16[32,128], index: 4, kind: output, shape index: {}]  }
   0x1   :  { %v1281_v0 = vld [vmem:[%s1686_s1 + $0x78] sm:$0xff]   ;;  %v1285_v4 = vld [vmem:[%s1686_s1 + $0x70] sm:$0xff]   ;;  %v1289_v8 = vld [vmem:[%s1686_s1 + $0x68] sm:$0xff]  }
   0x2   :  { %v1282_v1 = vld [vmem:[%s1686_s1 + $0xf8] sm:$0xff]   ;;  %1139 = vmatprep.subr.bf16.mxu0 %v1281_v0  ;;  %v1286_v5 = vld [vmem:[%s1686_s1 + $0xf0] sm:$0xff]   ;;  %v1290_v9 = vld [vmem:[%s1686_s1 + $0xe8] sm:$0xff]  }
   0x3   :  { %v1283_v2 = vld [vmem:[%s1686_s1 + $0x38] sm:$0xff]   ;;  %1167 = vmatprep.subr.bf16.mxu1 %v1282_v1  ;;  %v1287_v6 = vld [vmem:[%s1686_s1 + $0x30] sm:$0xff]   ;;  %v1291_v10 = vld [vmem:[%s1686_s1 + $0x28] sm:$0xff]  }
   0x4   :  { %v1284_v3 = vld [vmem:[%s1686_s1 + $0xb8] sm:$0xff]   ;;  %1140 = vmatpush3.bf16.msra.mxu0 %v1283_v2  ;;  %v1288_v7 = vld [vmem:[%s1686_s1 + $0xb0] sm:$0xff]   ;;  %v1292_v11 = vld [vmem:[%s1686_s1 + $0xa8] sm:$0xff]  }
   0x5   :  { %1168 = vmatpush3.bf16.msra.mxu1 %v1284_v3  ;;  %1141 = vmatprep.subr.bf16.mxu0 %v1285_v4  ;;  %v1293_v12 = vld [vmem:[%s1686_s1 + $0x60] sm:$0xff]   ;;  %v1297_v16 = vld [vmem:[%s1686_s1 + $0x58] sm:$0xff]   ;;  %v1301_v20 = vld [vmem:[%s1686_s1 + $0x50] sm:$0xff]  }
   0x6   :  { %1169 = vmatprep.subr.bf16.mxu1 %v1286_v5  ;;  %v1294_v13 = vld [vmem:[%s1686_s1 + $0xe0] sm:$0xff]   ;;  %v1298_v17 = vld [vmem:[%s1686_s1 + $0xd8] sm:$0xff]   ;;  %v1302_v21 = vld [vmem:[%s1686_s1 + $0xd0] sm:$0xff]  }
   0x7   :  { %v1295_v14 = vld [vmem:[%s1686_s1 + $0x20] sm:$0xff]   ;;  %v1299_v18 = vld [vmem:[%s1686_s1 + $0x18] sm:$0xff]   ;;  %v1303_v22 = vld [vmem:[%s1686_s1 + $0x10] sm:$0xff]  }
   0x8   :  { %1142 = vmatpush3.bf16.msra.mxu0 %v1287_v6  ;;  %v1296_v15 = vld [vmem:[%s1686_s1 + $0xa0] sm:$0xff]   ;;  %v1300_v19 = vld [vmem:[%s1686_s1 + $0x98] sm:$0xff]   ;;  %v1304_v23 = vld [vmem:[%s1686_s1 + $0x90] sm:$0xff]  }
   0x9   :  { %1170 = vmatpush3.bf16.msra.mxu1 %v1288_v7  ;;  %1143 = vmatprep.subr.bf16.mxu0 %v1289_v8  ;;  %v1305_v24 = vld [vmem:[%s1686_s1 + $0x48] sm:$0xff]   ;;  %v1309_v28 = vld [vmem:[%s1686_s1 + $0x40] sm:$0xff]   ;;  %v1319_v36 = vld [vmem:[%s1686_s1 + $0x178] sm:$0xff]  }
   0xa   :  { %1171 = vmatprep.subr.bf16.mxu1 %v1290_v9  ;;  %v1306_v25 = vld [vmem:[%s1686_s1 + $0xc8] sm:$0xff]   ;;  %v1310_v29 = vld [vmem:[%s1686_s1 + $0xc0] sm:$0xff]   ;;  %v1320_v37 = vld [vmem:[%s1686_s1 + $0x138] sm:$0xff]  }
   0xb   :  { %v1307_v26 = vld [vmem:[%s1686_s1 + $0x8] sm:$0xff]   ;;  %v1311_v30 = vld [vmem:[%s1686_s1] sm:$0xff]   ;;  %v1321_v38 = vld [vmem:[%s1686_s1 + $0x1f8] sm:$0xff]  }
   0xc   :  { %1144 = vmatpush3.bf16.msra.mxu0 %v1291_v10  ;;  %v1308_v27 = vld [vmem:[%s1686_s1 + $0x88] sm:$0xff]   ;;  %v1312_v31 = vld [vmem:[%s1686_s1 + $0x80] sm:$0xff]   ;;  %v1322_v39 = vld [vmem:[%s1686_s1 + $0x1b8] sm:$0xff]  }
   0xd   :  { %1172 = vmatpush3.bf16.msra.mxu1 %v1292_v11  ;;  %1145 = vmatprep.subr.bf16.mxu0 %v1293_v12  ;;  %v1313_v32 = vld [vmem:[%s1687_s0] ss:$36 sps:$4 sm:$0xff]   ;;  %v1316_v34 = vld [vmem:[%s1687_s0 + $0x8] ss:$36 sps:$4 sm:$0xff]   ;;  %v1323_v40 = vld [vmem:[%s1686_s1 + $0x170] sm:$0xff]  }
   0xe   :  { %1173 = vmatprep.subr.bf16.mxu1 %v1294_v13  ;;  %v1315_v33 = vld [vmem:[%s1687_s0 + $0x4] ss:$36 sps:$4 sm:$0xff]   ;;  %v1318_v35 = vld [vmem:[%s1687_s0 + $0xc] ss:$36 sps:$4 sm:$0xff]   ;;  %v1335_v52 = vld [vmem:[%s1686_s1 + $0x158] sm:$0xff]  }
   0xf   :  { %750 = vmatprep.mubr.bf16.mxu0 %v1315_v33  ;;  %799 = vmatprep.mubr.bf16.mxu1 %v1318_v35  ;;  %v1324_v41 = vld [vmem:[%s1686_s1 + $0x130] sm:$0xff]   ;;  %v1327_v44 = vld [vmem:[%s1686_s1 + $0x168] sm:$0xff]   ;;  %v1331_v48 = vld [vmem:[%s1686_s1 + $0x160] sm:$0xff]  }
  0x10   :  { %1146 = vmatpush3.bf16.msra.mxu0 %v1295_v14  ;;  %v1325_v42 = vld [vmem:[%s1686_s1 + $0x1f0] sm:$0xff]   ;;  %v1328_v45 = vld [vmem:[%s1686_s1 + $0x128] sm:$0xff]   ;;  %v1332_v49 = vld [vmem:[%s1686_s1 + $0x120] sm:$0xff]  }
  0x11   :  { %1174 = vmatpush3.bf16.msra.mxu1 %v1296_v15  ;;  %1147 = vmatprep.subr.bf16.mxu0 %v1297_v16  ;;  %v1326_v43 = vld [vmem:[%s1686_s1 + $0x1b0] sm:$0xff]   ;;  %v1329_v46 = vld [vmem:[%s1686_s1 + $0x1e8] sm:$0xff]   ;;  %v1333_v50 = vld [vmem:[%s1686_s1 + $0x1e0] sm:$0xff]  }
  0x12   :  { %1175 = vmatprep.subr.bf16.mxu1 %v1298_v17  ;;  %v1330_v47 = vld [vmem:[%s1686_s1 + $0x1a8] sm:$0xff]   ;;  %v1334_v51 = vld [vmem:[%s1686_s1 + $0x1a0] sm:$0xff]   ;;  %v1336_v53 = vld [vmem:[%s1686_s1 + $0x118] sm:$0xff]  }
  0x13   :  { %v1337_v54 = vld [vmem:[%s1687_s0 + $0x4c] ss:$36 sps:$4 sm:$0xff]   ;;  %v1339_v55 = vld [vmem:[%s1687_s0 + $0x54] ss:$36 sps:$4 sm:$0xff]   ;;  %v1353_v4 = vld [vmem:[%s1686_s1 + $0x140] sm:$0xff]  }
  0x14   :  { %1148 = vmatpush3.bf16.msra.mxu0 %v1299_v18  ;;  %v1341_v56 = vld [vmem:[%s1686_s1 + $0x1d8] sm:$0xff]   ;;  %v1342_v57 = vld [vmem:[%s1687_s0 + $0x48] ss:$36 sps:$4 sm:$0xff]   ;;  %v1343_v58 = vld [vmem:[%s1687_s0 + $0x50] ss:$36 sps:$4 sm:$0xff]  }
  0x15   :  { %1176 = vmatpush3.bf16.msra.mxu1 %v1300_v19  ;;  %1149 = vmatprep.subr.bf16.mxu0 %v1301_v20  ;;  %v1344_v59 = vld [vmem:[%s1686_s1 + $0x198] sm:$0xff]   ;;  %v1345_v60 = vld [vmem:[%s1686_s1 + $0x150] sm:$0xff]   ;;  %v1349_v0 = vld [vmem:[%s1686_s1 + $0x148] sm:$0xff]  }
  0x16   :  { %1177 = vmatprep.subr.bf16.mxu1 %v1302_v21  ;;  %v1346_v61 = vld [vmem:[%s1686_s1 + $0x110] sm:$0xff]   ;;  %v1350_v1 = vld [vmem:[%s1686_s1 + $0x108] sm:$0xff]   ;;  %v1354_v5 = vld [vmem:[%s1686_s1 + $0x100] sm:$0xff]  }
  0x17   :  { %v1347_v62 = vld [vmem:[%s1686_s1 + $0x1d0] sm:$0xff]   ;;  %v1351_v2 = vld [vmem:[%s1686_s1 + $0x1c8] sm:$0xff]   ;;  %v1355_v6 = vld [vmem:[%s1686_s1 + $0x1c0] sm:$0xff]  }
  0x18   :  { %1150 = vmatpush3.bf16.msra.mxu0 %v1303_v22  ;;  %v1348_v63 = vld [vmem:[%s1686_s1 + $0x190] sm:$0xff]   ;;  %v1352_v3 = vld [vmem:[%s1686_s1 + $0x188] sm:$0xff]   ;;  %v1359_v9 = vld [vmem:[%s1686_s1 + $0x180] sm:$0xff]  }
  0x19   :  { %1178 = vmatpush3.bf16.msra.mxu1 %v1304_v23  ;;  %1151 = vmatprep.subr.bf16.mxu0 %v1305_v24  ;;  %v1356_v7 = vld [vmem:[%s1687_s0 + $0x10] ss:$36 sps:$4 sm:$0xff]   ;;  %v1360_v10 = vld [vmem:[%s1686_s1 + $0x238] sm:$0xff]   ;;  %v1368_v16 = vld [vmem:[%s1686_s1 + $0x228] sm:$0xff]  }
  0x1a   :  { %1179 = vmatprep.subr.bf16.mxu1 %v1306_v25  ;;  %v1358_v8 = vld [vmem:[%s1687_s0 + $0x14] ss:$36 sps:$4 sm:$0xff]   ;;  %v1363_v12 = vld [vmem:[%s1687_s0 + $0x1c] ss:$36 sps:$4 sm:$0xff]   ;;  %v1369_v17 = vld [vmem:[%s1687_s0 + $0x64] ss:$36 sps:$4 sm:$0xff]  }
  0x1b   :  { %v1361_v11 = vld [vmem:[%s1687_s0 + $0x18] ss:$36 sps:$4 sm:$0xff]   ;;  %v1364_v13 = vld [vmem:[%s1686_s1 + $0x230] sm:$0xff]   ;;  %v1371_v18 = vld [vmem:[%s1687_s0 + $0x60] ss:$36 sps:$4 sm:$0xff]  }
  0x1c   :  { %1152 = vmatpush3.bf16.msra.mxu0 %v1307_v26  ;;  %v1365_v14 = vld [vmem:[%s1687_s0 + $0x5c] ss:$36 sps:$4 sm:$0xff]   ;;  %v1374_v22 = vld [vmem:[%s1686_s1 + $0x210] sm:$0xff]   ;;  %v1375_v23 = vld [vmem:[%s1686_s1 + $0x208] sm:$0xff]  }
  0x1d   :  { %1180 = vmatpush3.bf16.msra.mxu1 %v1308_v27  ;;  %1153 = vmatprep.subr.bf16.mxu0 %v1309_v28  ;;  %v1367_v15 = vld [vmem:[%s1687_s0 + $0x58] ss:$36 sps:$4 sm:$0xff]   ;;  %v1372_v19 = vld [vmem:[%s1686_s1 + $0x220] sm:$0xff]   ;;  %v1378_v25 = vld [vmem:[%s1687_s0 + $0x68] ss:$36 sps:$4 sm:$0xff]  }
  0x1e   :  { %1181 = vmatprep.subr.bf16.mxu1 %v1310_v29  ;;  %v1373_v20 = vld [vmem:[%s1686_s1 + $0x218] sm:$0xff]   ;;  %v1377_v21 = vld [vmem:[%s1687_s0 + $0x20] ss:$36 sps:$4 sm:$0xff]  }
  0x1f   :  { %v1376_v24 = vld [vmem:[%s1686_s1 + $0x200] sm:$0xff]  }
  0x20   :  { %1154 = vmatpush3.bf16.msra.mxu0 %v1311_v30 }
  0x21   :  { %1182 = vmatpush3.bf16.msra.mxu1 %v1312_v31  ;;  %1195 = vmatprep.subr.bf16.mxu0 %v1319_v36 }
  0x22   :  { %1223 = vmatprep.subr.bf16.mxu1 %v1321_v38 }
  0x23   :  { %751 = vmatmul.mubr.bf16.vlgmr.msra.gmra.mxu0 %v1313_v32 }
  0x24   :  { %800 = vmatmul.mubr.bf16.vlgmr.msra.gmra.mxu1 %v1316_v34  ;;  %1196 = vmatpush3.bf16.msra.mxu0 %v1320_v37 }
  0x25   :  { %1224 = vmatpush3.bf16.msra.mxu1 %v1322_v39  ;;  %1197 = vmatprep.subr.bf16.mxu0 %v1323_v40 }
  0x26   :  { %1225 = vmatprep.subr.bf16.mxu1 %v1325_v42  ;;  %758 = vmatprep.mubr.bf16.mxu0 %v1337_v54 }
  0x27   :  { %807 = vmatprep.mubr.bf16.mxu1 %v1339_v55 }
  0x28   :  { %1198 = vmatpush3.bf16.msra.mxu0 %v1324_v41 }
  0x29   :  { %1226 = vmatpush3.bf16.msra.mxu1 %v1326_v43  ;;  %1199 = vmatprep.subr.bf16.mxu0 %v1327_v44 }
  0x2a   :  { %1227 = vmatprep.subr.bf16.mxu1 %v1329_v46 }
  0x2b   :  { %759 = vmatmul.mubr.bf16.gmra.mxu0 %v1342_v57 }
  0x2c   :  { %1200 = vmatpush3.bf16.msra.mxu0 %v1328_v45  ;;  %808 = vmatmul.mubr.bf16.gmra.mxu1 %v1343_v58 }
  0x2d   :  { %1228 = vmatpush3.bf16.msra.mxu1 %v1330_v47  ;;  %1201 = vmatprep.subr.bf16.mxu0 %v1331_v48 }
  0x2e   :  { %1229 = vmatprep.subr.bf16.mxu1 %v1333_v50  ;;  %848 = vmatprep.mubr.bf16.mxu0 %v1358_v8 }
  0x2f   :  { %897 = vmatprep.mubr.bf16.mxu1 %v1363_v12 }
  0x30   :  { %1202 = vmatpush3.bf16.msra.mxu0 %v1332_v49 }
  0x31   :  { %1230 = vmatpush3.bf16.msra.mxu1 %v1334_v51  ;;  %1203 = vmatprep.subr.bf16.mxu0 %v1335_v52 }
  0x32   :  { %1231 = vmatprep.subr.bf16.mxu1 %v1341_v56 }
  0x34   :  { %1204 = vmatpush3.bf16.msra.mxu0 %v1336_v53 }
  0x35   :  { %1232 = vmatpush3.bf16.msra.mxu1 %v1344_v59  ;;  %1205 = vmatprep.subr.bf16.mxu0 %v1345_v60 }
  0x36   :  { %1233 = vmatprep.subr.bf16.mxu1 %v1347_v62 }
  0x38   :  { %1206 = vmatpush3.bf16.msra.mxu0 %v1346_v61 }
  0x39   :  { %1234 = vmatpush3.bf16.msra.mxu1 %v1348_v63  ;;  %1207 = vmatprep.subr.bf16.mxu0 %v1349_v0 }
  0x3a   :  { %1235 = vmatprep.subr.bf16.mxu1 %v1351_v2 }
  0x3c   :  { %1208 = vmatpush3.bf16.msra.mxu0 %v1350_v1 }
  0x3d   :  { %1236 = vmatpush3.bf16.msra.mxu1 %v1352_v3  ;;  %1209 = vmatprep.subr.bf16.mxu0 %v1353_v4 }
  0x3e   :  { %1237 = vmatprep.subr.bf16.mxu1 %v1355_v6 }
  0x40   :  { %1210 = vmatpush3.bf16.msra.mxu0 %v1354_v5 }
  0x41   :  { %1238 = vmatpush3.bf16.msra.mxu1 %v1359_v9  ;;  %1261 = vmatprep.subr.bf16.mxu0 %v1360_v10 }
  0x43   :  { %849 = vmatmul.mubr.bf16.vlgmr.msra.gmra.mxu0 %v1356_v7 }
  0x44   :  { %1262 = vmatpush3.bf16.msra.mxu0 %v1360_v10  ;;  %898 = vmatmul.mubr.bf16.vlgmr.msra.gmra.mxu1 %v1361_v11 }
  0x45   :  { %1263 = vmatprep.subr.bf16.mxu0 %v1364_v13  ;;  %856 = vmatprep.mubr.bf16.mxu0 %v1365_v14 }
  0x46   :  { %905 = vmatprep.mubr.bf16.mxu1 %v1369_v17 }
  0x48   :  { %1264 = vmatpush3.bf16.msra.mxu0 %v1364_v13 }
  0x49   :  { %1265 = vmatprep.subr.bf16.mxu0 %v1368_v16 }
  0x4b   :  { %857 = vmatmul.mubr.bf16.gmra.mxu0 %v1367_v15 }
  0x4c   :  { %1266 = vmatpush3.bf16.msra.mxu0 %v1368_v16  ;;  %906 = vmatmul.mubr.bf16.gmra.mxu1 %v1371_v18  ;;  %v1118_v18 = vld [vmem:[%s1688_s2] ss:$0 sm:$0xff] }
  0x4d   :  { %1267 = vmatprep.subr.bf16.mxu0 %v1372_v19  ;;  %1277 = vmatprep.mubr.bf16.mxu0 %v1377_v21 }
  0x50   :  { %1268 = vmatpush3.bf16.msra.mxu0 %v1372_v19 }
  0x51   :  { %1269 = vmatprep.subr.bf16.mxu0 %v1373_v20 }
  0x54   :  { %1270 = vmatpush3.bf16.msra.mxu0 %v1373_v20 }
  0x55   :  { %1271 = vmatprep.subr.bf16.mxu0 %v1374_v22 }
  0x58   :  { %1272 = vmatpush3.bf16.msra.mxu0 %v1374_v22 }
  0x59   :  { %1273 = vmatprep.subr.bf16.mxu0 %v1375_v23 }
  0x5c   :  { %1274 = vmatpush3.bf16.msra.mxu0 %v1375_v23 }
  0x5d   :  { %1275 = vmatprep.subr.bf16.mxu0 %v1376_v24 }
  0x60   :  { %1276 = vmatpush3.bf16.msra.mxu0 %v1376_v24 }
  0x63   :  { %1278 = vmatmul.mubr.bf16.vlgmr.msra.gmra.mxu0 %v1378_v25 }
  0xe3   :  { %v1155_v26 = vpop.f32.mrf.mxu0 }
  0xe4   :  { %v1183_v27 = vpop.f32.mrf.mxu1 }
  0xe5   :  { %v1156_v28 = vpop.f32.mrf.mxu0 }
  0xe6   :  { %v1184_v29 = vpop.f32.mrf.mxu1  ;;  %v1157_v57 = vadd.f32 %v1156_v28, %v1155_v26 }
  0xe7   :  { %v1158_v30 = vpop.f32.mrf.mxu0  ;;  %v1185_v58 = vadd.f32 %v1184_v29, %v1183_v27  ;;  %v1119_v27 = vld [vmem:[%s1689_s3] ss:$0 sm:$0xff] }
  0xe8   :  { %v1186_v31 = vpop.f32.mrf.mxu1 }
  0xe9   :  { %v1159_v32 = vpop.f32.mrf.mxu0  ;;  %v802_v2 = vadd.f32 %v1185_v58, %v1157_v57 }
  0xea   :  { %v1187_v34 = vpop.f32.mrf.mxu1  ;;  %v1160_v3 = vadd.f32 %v1159_v32, %v1158_v30 }
  0xeb   :  { %v1161_v33 = vpop.f32.mrf.mxu0  ;;  %v1188_v4 = vadd.f32 %v1187_v34, %v1186_v31 }
  0xec   :  { %v1189_v35 = vpop.f32.mrf.mxu1 }
  0xed   :  { %v1162_v36 = vpop.f32.mrf.mxu0  ;;  %v805_v13 = vadd.f32 %v1188_v4, %v1160_v3 }
  0xee   :  { %v1190_v37 = vpop.f32.mrf.mxu1  ;;  %v1163_v55 = vadd.f32 %v1162_v36, %v1161_v33 }
  0xef   :  { %v1164_v38 = vpop.f32.mrf.mxu0  ;;  %v1191_v56 = vadd.f32 %v1190_v37, %v1189_v35 }
  0xf0   :  { %v1192_v39 = vpop.f32.mrf.mxu1 }
  0xf1   :  { %v1165_v40 = vpop.f32.mrf.mxu0  ;;  %v810_v62 = vadd.f32 %v1191_v56, %v1163_v55 }
  0xf2   :  { %v1193_v42 = vpop.f32.mrf.mxu1  ;;  %v1166_v63 = vadd.f32 %v1165_v40, %v1164_v38 }
  0xf3   :  { %v1194_v0 = vadd.f32 %v1193_v42, %v1192_v39 }
  0xf5   :  { %v813_v9 = vadd.f32 %v1194_v0, %v1166_v63 }
 0x103   :  { %v1211_v41 = vpop.f32.mrf.mxu0 }
 0x104   :  { %v1239_v44 = vpop.f32.mrf.mxu1 }
 0x105   :  { %v1212_v43 = vpop.f32.mrf.mxu0 }
 0x106   :  { %v1240_v46 = vpop.f32.mrf.mxu1  ;;  %v1213_v1 = vadd.f32 %v1212_v43, %v1211_v41 }
 0x107   :  { %v1214_v45 = vpop.f32.mrf.mxu0  ;;  %v1241_v11 = vadd.f32 %v1240_v46, %v1239_v44 }
 0x108   :  { %v1242_v48 = vpop.f32.mrf.mxu1  ;;  %v851_v10 = vadd.f32 %v1213_v1, %v802_v2 }
 0x109   :  { %v1215_v47 = vpop.f32.mrf.mxu0 }
 0x10a   :  { %v1243_v50 = vpop.f32.mrf.mxu1  ;;  %v1216_v12 = vadd.f32 %v1215_v47, %v1214_v45  ;;  %v900_v22 = vadd.f32 %v1241_v11, %v851_v10 }
 0x10b   :  { %v1217_v49 = vpop.f32.mrf.mxu0  ;;  %v1244_v20 = vadd.f32 %v1243_v50, %v1242_v48 }
 0x10c   :  { %v1245_v52 = vpop.f32.mrf.mxu1  ;;  %v854_v19 = vadd.f32 %v1216_v12, %v805_v13 }
 0x10d   :  { %v1218_v51 = vpop.f32.mrf.mxu0 }
 0x10e   :  { %v1246_v54 = vpop.f32.mrf.mxu1  ;;  %v1219_v59 = vadd.f32 %v1218_v51, %v1217_v49  ;;  %v903_v31 = vadd.f32 %v1244_v20, %v854_v19 }
 0x10f   :  { %v1220_v53 = vpop.f32.mrf.mxu0  ;;  %v1247_v6 = vadd.f32 %v1246_v54, %v1245_v52 }
 0x110   :  { %v1248_v61 = vpop.f32.mrf.mxu1  ;;  %v859_v5 = vadd.f32 %v1219_v59, %v810_v62 }
 0x111   :  { %v1221_v60 = vpop.f32.mrf.mxu0 }
 0x112   :  { %v1222_v7 = vadd.f32 %v1221_v60, %v1220_v53  ;;  %v1249_v8 = vpop.f32.mrf.mxu1  ;;  %v908_v16 = vadd.f32 %v1247_v6, %v859_v5 }
 0x113   :  { %v1250_v15 = vadd.f32 %v1249_v8, %v1248_v61 }
 0x114   :  { %v862_v14 = vadd.f32 %v1222_v7, %v813_v9 }
 0x116   :  { %v911_v26 = vadd.f32 %v1250_v15, %v862_v14 }
 0x123   :  { %v1279_v17 = vpop.f32.mrf.mxu0 }
 0x124   :  { %v957_v21 = vadd.f32 %v1279_v17, %v908_v16 }
 0x125   :  { %v948_v23 = vpop.f32.mrf.mxu0 }
 0x126   :  { %v987_v24 = vmul.f32 %v1118_v18, %v957_v21  ;;  %v949_v25 = vadd.f32 %v948_v23, %v900_v22 }
 0x127   :  { %v1280_v28 = vpop.f32.mrf.mxu0 }
 0x128   :  { %v985_v29 = vmul.f32 %v1118_v18, %v949_v25  ;;  %v960_v30 = vadd.f32 %v1280_v28, %v911_v26  ;;  %v998_v33 = vadd.f32 %v1119_v27, %v987_v24 }
 0x129   :  { %v951_v32 = vpop.f32.mrf.mxu0 }
 0x12a   :  { %v988_v34 = vmul.f32 %v1118_v18, %v960_v30  ;;  %v952_v35 = vadd.f32 %v951_v32, %v903_v31  ;;  %v996_v36 = vadd.f32 %v1119_v27, %v985_v29  ;;  %v1002_v39 = vmax.f32 %v998_v33, 0.0 }
 0x12c   :  { %v999_v37 = vadd.f32 %v1119_v27, %v988_v34  ;;  %v986_v38 = vmul.f32 %v1118_v18, %v952_v35  ;;  %v1000_v42 = vmax.f32 %v996_v36, 0.0 }
 0x12e   :  { %v1003_v40 = vmax.f32 %v999_v37, 0.0  ;;  %v997_v41 = vadd.f32 %v1119_v27, %v986_v38 }
 0x130   :  { %v1136_v43 = vpack.c.bf16 %v1003_v40, %v1002_v39  ;;  %v1001_v44 = vmax.f32 %v997_v41, 0.0 }
 0x132   :  { %1138 = vst [vmem:[%s1690_s4 + $0x8] sm:$0xff] %v1136_v43   ;;  %v1131_v45 = vpack.c.bf16 %v1001_v44, %v1000_v42 }
 0x134   :  { %1132 = vst [vmem:[%s1690_s4] sm:$0xff] %v1131_v45  }

// kernel: net_recam_forward.57
= control target key start
LH: loop header
LB: loop body
LE: loop exit
PB: predicated region body
PF: predicated region fallthrough
CT: control target
= control target key end

     0   :  { %s1717_s1 = inlined_call_operand.vmem [shape: bf16[1152,128], index: 1, kind: input, shape index: {}]   ;;  %s1718_s0 = inlined_call_operand.vmem [shape: bf16[32,1152], index: 0, kind: input, shape index: {}]   ;;  %s1719_s2 = inlined_call_operand.vmem [shape: f32[1,128], index: 2, kind: input, shape index: {}]   ;;  %s1720_s4 = inlined_call_operand.vmem [shape: bf16[32,128], index: 4, kind: input, shape index: {}]   ;;  %s1721_s3 = inlined_call_operand.vmem [shape: f32[1,128], index: 3, kind: input, shape index: {}]   ;;  %s1722_s5 = inlined_call_operand.vmem [shape: bf16[32,128], index: 5, kind: output, shape index: {}]  }
   0x1   :  { %v1301_v0 = vld [vmem:[%s1717_s1 + $0x78] sm:$0xff]   ;;  %v1305_v4 = vld [vmem:[%s1717_s1 + $0x70] sm:$0xff]   ;;  %v1309_v8 = vld [vmem:[%s1717_s1 + $0x68] sm:$0xff]  }
   0x2   :  { %v1302_v1 = vld [vmem:[%s1717_s1 + $0xf8] sm:$0xff]   ;;  %1159 = vmatprep.subr.bf16.mxu0 %v1301_v0  ;;  %v1306_v5 = vld [vmem:[%s1717_s1 + $0xf0] sm:$0xff]   ;;  %v1310_v9 = vld [vmem:[%s1717_s1 + $0xe8] sm:$0xff]  }
   0x3   :  { %v1303_v2 = vld [vmem:[%s1717_s1 + $0x38] sm:$0xff]   ;;  %1187 = vmatprep.subr.bf16.mxu1 %v1302_v1  ;;  %v1307_v6 = vld [vmem:[%s1717_s1 + $0x30] sm:$0xff]   ;;  %v1311_v10 = vld [vmem:[%s1717_s1 + $0x28] sm:$0xff]  }
   0x4   :  { %v1304_v3 = vld [vmem:[%s1717_s1 + $0xb8] sm:$0xff]   ;;  %1160 = vmatpush3.bf16.msra.mxu0 %v1303_v2  ;;  %v1308_v7 = vld [vmem:[%s1717_s1 + $0xb0] sm:$0xff]   ;;  %v1312_v11 = vld [vmem:[%s1717_s1 + $0xa8] sm:$0xff]  }
   0x5   :  { %1188 = vmatpush3.bf16.msra.mxu1 %v1304_v3  ;;  %1161 = vmatprep.subr.bf16.mxu0 %v1305_v4  ;;  %v1313_v12 = vld [vmem:[%s1717_s1 + $0x60] sm:$0xff]   ;;  %v1317_v16 = vld [vmem:[%s1717_s1 + $0x58] sm:$0xff]   ;;  %v1321_v20 = vld [vmem:[%s1717_s1 + $0x50] sm:$0xff]  }
   0x6   :  { %1189 = vmatprep.subr.bf16.mxu1 %v1306_v5  ;;  %v1314_v13 = vld [vmem:[%s1717_s1 + $0xe0] sm:$0xff]   ;;  %v1318_v17 = vld [vmem:[%s1717_s1 + $0xd8] sm:$0xff]   ;;  %v1322_v21 = vld [vmem:[%s1717_s1 + $0xd0] sm:$0xff]  }
   0x7   :  { %v1315_v14 = vld [vmem:[%s1717_s1 + $0x20] sm:$0xff]   ;;  %v1319_v18 = vld [vmem:[%s1717_s1 + $0x18] sm:$0xff]   ;;  %v1323_v22 = vld [vmem:[%s1717_s1 + $0x10] sm:$0xff]  }
   0x8   :  { %1162 = vmatpush3.bf16.msra.mxu0 %v1307_v6  ;;  %v1316_v15 = vld [vmem:[%s1717_s1 + $0xa0] sm:$0xff]   ;;  %v1320_v19 = vld [vmem:[%s1717_s1 + $0x98] sm:$0xff]   ;;  %v1324_v23 = vld [vmem:[%s1717_s1 + $0x90] sm:$0xff]  }
   0x9   :  { %1190 = vmatpush3.bf16.msra.mxu1 %v1308_v7  ;;  %1163 = vmatprep.subr.bf16.mxu0 %v1309_v8  ;;  %v1325_v24 = vld [vmem:[%s1717_s1 + $0x48] sm:$0xff]   ;;  %v1329_v28 = vld [vmem:[%s1717_s1 + $0x40] sm:$0xff]   ;;  %v1339_v36 = vld [vmem:[%s1717_s1 + $0x178] sm:$0xff]  }
   0xa   :  { %1191 = vmatprep.subr.bf16.mxu1 %v1310_v9  ;;  %v1326_v25 = vld [vmem:[%s1717_s1 + $0xc8] sm:$0xff]   ;;  %v1330_v29 = vld [vmem:[%s1717_s1 + $0xc0] sm:$0xff]   ;;  %v1340_v37 = vld [vmem:[%s1717_s1 + $0x138] sm:$0xff]  }
   0xb   :  { %v1327_v26 = vld [vmem:[%s1717_s1 + $0x8] sm:$0xff]   ;;  %v1331_v30 = vld [vmem:[%s1717_s1] sm:$0xff]   ;;  %v1341_v38 = vld [vmem:[%s1717_s1 + $0x1f8] sm:$0xff]  }
   0xc   :  { %1164 = vmatpush3.bf16.msra.mxu0 %v1311_v10  ;;  %v1328_v27 = vld [vmem:[%s1717_s1 + $0x88] sm:$0xff]   ;;  %v1332_v31 = vld [vmem:[%s1717_s1 + $0x80] sm:$0xff]   ;;  %v1342_v39 = vld [vmem:[%s1717_s1 + $0x1b8] sm:$0xff]  }
   0xd   :  { %1192 = vmatpush3.bf16.msra.mxu1 %v1312_v11  ;;  %1165 = vmatprep.subr.bf16.mxu0 %v1313_v12  ;;  %v1333_v32 = vld [vmem:[%s1718_s0] ss:$36 sps:$4 sm:$0xff]   ;;  %v1336_v34 = vld [vmem:[%s1718_s0 + $0x8] ss:$36 sps:$4 sm:$0xff]   ;;  %v1343_v40 = vld [vmem:[%s1717_s1 + $0x170] sm:$0xff]  }
   0xe   :  { %1193 = vmatprep.subr.bf16.mxu1 %v1314_v13  ;;  %v1335_v33 = vld [vmem:[%s1718_s0 + $0x4] ss:$36 sps:$4 sm:$0xff]   ;;  %v1338_v35 = vld [vmem:[%s1718_s0 + $0xc] ss:$36 sps:$4 sm:$0xff]   ;;  %v1355_v52 = vld [vmem:[%s1717_s1 + $0x158] sm:$0xff]  }
   0xf   :  { %753 = vmatprep.mubr.bf16.mxu0 %v1335_v33  ;;  %802 = vmatprep.mubr.bf16.mxu1 %v1338_v35  ;;  %v1344_v41 = vld [vmem:[%s1717_s1 + $0x130] sm:$0xff]   ;;  %v1347_v44 = vld [vmem:[%s1717_s1 + $0x168] sm:$0xff]   ;;  %v1351_v48 = vld [vmem:[%s1717_s1 + $0x160] sm:$0xff]  }
  0x10   :  { %1166 = vmatpush3.bf16.msra.mxu0 %v1315_v14  ;;  %v1345_v42 = vld [vmem:[%s1717_s1 + $0x1f0] sm:$0xff]   ;;  %v1348_v45 = vld [vmem:[%s1717_s1 + $0x128] sm:$0xff]   ;;  %v1352_v49 = vld [vmem:[%s1717_s1 + $0x120] sm:$0xff]  }
  0x11   :  { %1194 = vmatpush3.bf16.msra.mxu1 %v1316_v15  ;;  %1167 = vmatprep.subr.bf16.mxu0 %v1317_v16  ;;  %v1346_v43 = vld [vmem:[%s1717_s1 + $0x1b0] sm:$0xff]   ;;  %v1349_v46 = vld [vmem:[%s1717_s1 + $0x1e8] sm:$0xff]   ;;  %v1353_v50 = vld [vmem:[%s1717_s1 + $0x1e0] sm:$0xff]  }
  0x12   :  { %1195 = vmatprep.subr.bf16.mxu1 %v1318_v17  ;;  %v1350_v47 = vld [vmem:[%s1717_s1 + $0x1a8] sm:$0xff]   ;;  %v1354_v51 = vld [vmem:[%s1717_s1 + $0x1a0] sm:$0xff]   ;;  %v1356_v53 = vld [vmem:[%s1717_s1 + $0x118] sm:$0xff]  }
  0x13   :  { %v1357_v54 = vld [vmem:[%s1718_s0 + $0x4c] ss:$36 sps:$4 sm:$0xff]   ;;  %v1359_v55 = vld [vmem:[%s1718_s0 + $0x54] ss:$36 sps:$4 sm:$0xff]   ;;  %v1373_v4 = vld [vmem:[%s1717_s1 + $0x140] sm:$0xff]  }
  0x14   :  { %1168 = vmatpush3.bf16.msra.mxu0 %v1319_v18  ;;  %v1361_v56 = vld [vmem:[%s1717_s1 + $0x1d8] sm:$0xff]   ;;  %v1362_v57 = vld [vmem:[%s1718_s0 + $0x48] ss:$36 sps:$4 sm:$0xff]   ;;  %v1363_v58 = vld [vmem:[%s1718_s0 + $0x50] ss:$36 sps:$4 sm:$0xff]  }
  0x15   :  { %1196 = vmatpush3.bf16.msra.mxu1 %v1320_v19  ;;  %1169 = vmatprep.subr.bf16.mxu0 %v1321_v20  ;;  %v1364_v59 = vld [vmem:[%s1717_s1 + $0x198] sm:$0xff]   ;;  %v1365_v60 = vld [vmem:[%s1717_s1 + $0x150] sm:$0xff]   ;;  %v1369_v0 = vld [vmem:[%s1717_s1 + $0x148] sm:$0xff]  }
  0x16   :  { %1197 = vmatprep.subr.bf16.mxu1 %v1322_v21  ;;  %v1366_v61 = vld [vmem:[%s1717_s1 + $0x110] sm:$0xff]   ;;  %v1370_v1 = vld [vmem:[%s1717_s1 + $0x108] sm:$0xff]   ;;  %v1374_v5 = vld [vmem:[%s1717_s1 + $0x100] sm:$0xff]  }
  0x17   :  { %v1367_v62 = vld [vmem:[%s1717_s1 + $0x1d0] sm:$0xff]   ;;  %v1371_v2 = vld [vmem:[%s1717_s1 + $0x1c8] sm:$0xff]   ;;  %v1375_v6 = vld [vmem:[%s1717_s1 + $0x1c0] sm:$0xff]  }
  0x18   :  { %1170 = vmatpush3.bf16.msra.mxu0 %v1323_v22  ;;  %v1368_v63 = vld [vmem:[%s1717_s1 + $0x190] sm:$0xff]   ;;  %v1372_v3 = vld [vmem:[%s1717_s1 + $0x188] sm:$0xff]   ;;  %v1379_v9 = vld [vmem:[%s1717_s1 + $0x180] sm:$0xff]  }
  0x19   :  { %1198 = vmatpush3.bf16.msra.mxu1 %v1324_v23  ;;  %1171 = vmatprep.subr.bf16.mxu0 %v1325_v24  ;;  %v1376_v7 = vld [vmem:[%s1718_s0 + $0x10] ss:$36 sps:$4 sm:$0xff]   ;;  %v1380_v10 = vld [vmem:[%s1717_s1 + $0x238] sm:$0xff]   ;;  %v1388_v16 = vld [vmem:[%s1717_s1 + $0x228] sm:$0xff]  }
  0x1a   :  { %1199 = vmatprep.subr.bf16.mxu1 %v1326_v25  ;;  %v1378_v8 = vld [vmem:[%s1718_s0 + $0x14] ss:$36 sps:$4 sm:$0xff]   ;;  %v1383_v12 = vld [vmem:[%s1718_s0 + $0x1c] ss:$36 sps:$4 sm:$0xff]   ;;  %v1389_v17 = vld [vmem:[%s1718_s0 + $0x64] ss:$36 sps:$4 sm:$0xff]  }
  0x1b   :  { %v1381_v11 = vld [vmem:[%s1718_s0 + $0x18] ss:$36 sps:$4 sm:$0xff]   ;;  %v1384_v13 = vld [vmem:[%s1717_s1 + $0x230] sm:$0xff]   ;;  %v1391_v18 = vld [vmem:[%s1718_s0 + $0x60] ss:$36 sps:$4 sm:$0xff]  }
  0x1c   :  { %1172 = vmatpush3.bf16.msra.mxu0 %v1327_v26  ;;  %v1385_v14 = vld [vmem:[%s1718_s0 + $0x5c] ss:$36 sps:$4 sm:$0xff]   ;;  %v1394_v22 = vld [vmem:[%s1717_s1 + $0x210] sm:$0xff]   ;;  %v1395_v23 = vld [vmem:[%s1717_s1 + $0x208] sm:$0xff]  }
  0x1d   :  { %1200 = vmatpush3.bf16.msra.mxu1 %v1328_v27  ;;  %1173 = vmatprep.subr.bf16.mxu0 %v1329_v28  ;;  %v1387_v15 = vld [vmem:[%s1718_s0 + $0x58] ss:$36 sps:$4 sm:$0xff]   ;;  %v1392_v19 = vld [vmem:[%s1717_s1 + $0x220] sm:$0xff]   ;;  %v1398_v25 = vld [vmem:[%s1718_s0 + $0x68] ss:$36 sps:$4 sm:$0xff]  }
  0x1e   :  { %1201 = vmatprep.subr.bf16.mxu1 %v1330_v29  ;;  %v1393_v20 = vld [vmem:[%s1717_s1 + $0x218] sm:$0xff]   ;;  %v1397_v21 = vld [vmem:[%s1718_s0 + $0x20] ss:$36 sps:$4 sm:$0xff]  }
  0x1f   :  { %v1396_v24 = vld [vmem:[%s1717_s1 + $0x200] sm:$0xff]  }
  0x20   :  { %1174 = vmatpush3.bf16.msra.mxu0 %v1331_v30 }
  0x21   :  { %1202 = vmatpush3.bf16.msra.mxu1 %v1332_v31  ;;  %1215 = vmatprep.subr.bf16.mxu0 %v1339_v36 }
  0x22   :  { %1243 = vmatprep.subr.bf16.mxu1 %v1341_v38 }
  0x23   :  { %754 = vmatmul.mubr.bf16.vlgmr.msra.gmra.mxu0 %v1333_v32 }
  0x24   :  { %803 = vmatmul.mubr.bf16.vlgmr.msra.gmra.mxu1 %v1336_v34  ;;  %1216 = vmatpush3.bf16.msra.mxu0 %v1340_v37 }
  0x25   :  { %1244 = vmatpush3.bf16.msra.mxu1 %v1342_v39  ;;  %1217 = vmatprep.subr.bf16.mxu0 %v1343_v40 }
  0x26   :  { %1245 = vmatprep.subr.bf16.mxu1 %v1345_v42  ;;  %761 = vmatprep.mubr.bf16.mxu0 %v1357_v54 }
  0x27   :  { %810 = vmatprep.mubr.bf16.mxu1 %v1359_v55 }
  0x28   :  { %1218 = vmatpush3.bf16.msra.mxu0 %v1344_v41 }
  0x29   :  { %1246 = vmatpush3.bf16.msra.mxu1 %v1346_v43  ;;  %1219 = vmatprep.subr.bf16.mxu0 %v1347_v44 }
  0x2a   :  { %1247 = vmatprep.subr.bf16.mxu1 %v1349_v46 }
  0x2b   :  { %762 = vmatmul.mubr.bf16.gmra.mxu0 %v1362_v57 }
  0x2c   :  { %1220 = vmatpush3.bf16.msra.mxu0 %v1348_v45  ;;  %811 = vmatmul.mubr.bf16.gmra.mxu1 %v1363_v58 }
  0x2d   :  { %1248 = vmatpush3.bf16.msra.mxu1 %v1350_v47  ;;  %1221 = vmatprep.subr.bf16.mxu0 %v1351_v48 }
  0x2e   :  { %1249 = vmatprep.subr.bf16.mxu1 %v1353_v50  ;;  %851 = vmatprep.mubr.bf16.mxu0 %v1378_v8 }
  0x2f   :  { %900 = vmatprep.mubr.bf16.mxu1 %v1383_v12 }
  0x30   :  { %1222 = vmatpush3.bf16.msra.mxu0 %v1352_v49 }
  0x31   :  { %1250 = vmatpush3.bf16.msra.mxu1 %v1354_v51  ;;  %1223 = vmatprep.subr.bf16.mxu0 %v1355_v52 }
  0x32   :  { %1251 = vmatprep.subr.bf16.mxu1 %v1361_v56 }
  0x34   :  { %1224 = vmatpush3.bf16.msra.mxu0 %v1356_v53 }
  0x35   :  { %1252 = vmatpush3.bf16.msra.mxu1 %v1364_v59  ;;  %1225 = vmatprep.subr.bf16.mxu0 %v1365_v60 }
  0x36   :  { %1253 = vmatprep.subr.bf16.mxu1 %v1367_v62 }
  0x38   :  { %1226 = vmatpush3.bf16.msra.mxu0 %v1366_v61 }
  0x39   :  { %1254 = vmatpush3.bf16.msra.mxu1 %v1368_v63  ;;  %1227 = vmatprep.subr.bf16.mxu0 %v1369_v0 }
  0x3a   :  { %1255 = vmatprep.subr.bf16.mxu1 %v1371_v2 }
  0x3c   :  { %1228 = vmatpush3.bf16.msra.mxu0 %v1370_v1 }
  0x3d   :  { %1256 = vmatpush3.bf16.msra.mxu1 %v1372_v3  ;;  %1229 = vmatprep.subr.bf16.mxu0 %v1373_v4 }
  0x3e   :  { %1257 = vmatprep.subr.bf16.mxu1 %v1375_v6 }
  0x40   :  { %1230 = vmatpush3.bf16.msra.mxu0 %v1374_v5 }
  0x41   :  { %1258 = vmatpush3.bf16.msra.mxu1 %v1379_v9  ;;  %1281 = vmatprep.subr.bf16.mxu0 %v1380_v10 }
  0x43   :  { %852 = vmatmul.mubr.bf16.vlgmr.msra.gmra.mxu0 %v1376_v7 }
  0x44   :  { %1282 = vmatpush3.bf16.msra.mxu0 %v1380_v10  ;;  %901 = vmatmul.mubr.bf16.vlgmr.msra.gmra.mxu1 %v1381_v11 }
  0x45   :  { %1283 = vmatprep.subr.bf16.mxu0 %v1384_v13  ;;  %859 = vmatprep.mubr.bf16.mxu0 %v1385_v14 }
  0x46   :  { %908 = vmatprep.mubr.bf16.mxu1 %v1389_v17 }
  0x48   :  { %1284 = vmatpush3.bf16.msra.mxu0 %v1384_v13 }
  0x49   :  { %1285 = vmatprep.subr.bf16.mxu0 %v1388_v16 }
  0x4b   :  { %860 = vmatmul.mubr.bf16.gmra.mxu0 %v1387_v15 }
  0x4c   :  { %1286 = vmatpush3.bf16.msra.mxu0 %v1388_v16  ;;  %909 = vmatmul.mubr.bf16.gmra.mxu1 %v1391_v18  ;;  %v1129_v18 = vld [vmem:[%s1719_s2] ss:$0 sm:$0xff] }
  0x4d   :  { %1287 = vmatprep.subr.bf16.mxu0 %v1392_v19  ;;  %1297 = vmatprep.mubr.bf16.mxu0 %v1397_v21 }
  0x50   :  { %1288 = vmatpush3.bf16.msra.mxu0 %v1392_v19 }
  0x51   :  { %1289 = vmatprep.subr.bf16.mxu0 %v1393_v20 }
  0x54   :  { %1290 = vmatpush3.bf16.msra.mxu0 %v1393_v20 }
  0x55   :  { %1291 = vmatprep.subr.bf16.mxu0 %v1394_v22 }
  0x58   :  { %1292 = vmatpush3.bf16.msra.mxu0 %v1394_v22 }
  0x59   :  { %1293 = vmatprep.subr.bf16.mxu0 %v1395_v23 }
  0x5c   :  { %1294 = vmatpush3.bf16.msra.mxu0 %v1395_v23 }
  0x5d   :  { %1295 = vmatprep.subr.bf16.mxu0 %v1396_v24 }
  0x60   :  { %1296 = vmatpush3.bf16.msra.mxu0 %v1396_v24 }
  0x63   :  { %1298 = vmatmul.mubr.bf16.vlgmr.msra.gmra.mxu0 %v1398_v25  ;;  %v1157_v25 = vld [vmem:[%s1720_s4 + $0x8] sm:$0xff]  }
  0xe3   :  { %v1175_v26 = vpop.f32.mrf.mxu0 }
  0xe4   :  { %v1203_v27 = vpop.f32.mrf.mxu1 }
  0xe5   :  { %v1176_v28 = vpop.f32.mrf.mxu0 }
  0xe6   :  { %v1204_v29 = vpop.f32.mrf.mxu1  ;;  %v1177_v57 = vadd.f32 %v1176_v28, %v1175_v26  ;;  %v1130_v28 = vld [vmem:[%s1721_s3] ss:$0 sm:$0xff] }
  0xe7   :  { %v1178_v30 = vpop.f32.mrf.mxu0  ;;  %v1205_v58 = vadd.f32 %v1204_v29, %v1203_v27 }
  0xe8   :  { %v1206_v31 = vpop.f32.mrf.mxu1 }
  0xe9   :  { %v1179_v32 = vpop.f32.mrf.mxu0  ;;  %v805_v2 = vadd.f32 %v1205_v58, %v1177_v57 }
  0xea   :  { %v1207_v34 = vpop.f32.mrf.mxu1  ;;  %v1180_v3 = vadd.f32 %v1179_v32, %v1178_v30 }
  0xeb   :  { %v1181_v33 = vpop.f32.mrf.mxu0  ;;  %v1208_v4 = vadd.f32 %v1207_v34, %v1206_v31  ;;  %v1140_v31 = vld [vmem:[%s1720_s4] sm:$0xff]   ;;  %v1145_v34 = vunpack.c.l.bf16 %v1157_v25 }
  0xec   :  { %v1209_v35 = vpop.f32.mrf.mxu1 }
  0xed   :  { %v1182_v36 = vpop.f32.mrf.mxu0  ;;  %v808_v13 = vadd.f32 %v1208_v4, %v1180_v3 }
  0xee   :  { %v1210_v37 = vpop.f32.mrf.mxu1  ;;  %v1183_v55 = vadd.f32 %v1182_v36, %v1181_v33 }
  0xef   :  { %v1184_v38 = vpop.f32.mrf.mxu0  ;;  %v1211_v56 = vadd.f32 %v1210_v37, %v1209_v35 }
  0xf0   :  { %v1212_v39 = vpop.f32.mrf.mxu1 }
  0xf1   :  { %v1185_v40 = vpop.f32.mrf.mxu0  ;;  %v813_v62 = vadd.f32 %v1211_v56, %v1183_v55 }
  0xf2   :  { %v1213_v42 = vpop.f32.mrf.mxu1  ;;  %v1186_v63 = vadd.f32 %v1185_v40, %v1184_v38  ;;  %v1146_v38 = vunpack.c.h.bf16 %v1157_v25  ;;  %v1141_v40 = vunpack.c.l.bf16 %v1140_v31 }
  0xf3   :  { %v1214_v0 = vadd.f32 %v1213_v42, %v1212_v39 }
  0xf5   :  { %v816_v9 = vadd.f32 %v1214_v0, %v1186_v63 }
 0x103   :  { %v1231_v41 = vpop.f32.mrf.mxu0 }
 0x104   :  { %v1259_v44 = vpop.f32.mrf.mxu1 }
 0x105   :  { %v1232_v43 = vpop.f32.mrf.mxu0 }
 0x106   :  { %v1260_v46 = vpop.f32.mrf.mxu1  ;;  %v1233_v1 = vadd.f32 %v1232_v43, %v1231_v41 }
 0x107   :  { %v1234_v45 = vpop.f32.mrf.mxu0  ;;  %v1261_v11 = vadd.f32 %v1260_v46, %v1259_v44  ;;  %v1142_v44 = vunpack.c.h.bf16 %v1140_v31 }
 0x108   :  { %v1262_v48 = vpop.f32.mrf.mxu1  ;;  %v854_v10 = vadd.f32 %v1233_v1, %v805_v2 }
 0x109   :  { %v1235_v47 = vpop.f32.mrf.mxu0 }
 0x10a   :  { %v1263_v50 = vpop.f32.mrf.mxu1  ;;  %v1236_v12 = vadd.f32 %v1235_v47, %v1234_v45  ;;  %v903_v22 = vadd.f32 %v1261_v11, %v854_v10 }
 0x10b   :  { %v1237_v49 = vpop.f32.mrf.mxu0  ;;  %v1264_v20 = vadd.f32 %v1263_v50, %v1262_v48 }
 0x10c   :  { %v1265_v52 = vpop.f32.mrf.mxu1  ;;  %v857_v19 = vadd.f32 %v1236_v12, %v808_v13 }
 0x10d   :  { %v1238_v51 = vpop.f32.mrf.mxu0 }
 0x10e   :  { %v1266_v54 = vpop.f32.mrf.mxu1  ;;  %v1239_v59 = vadd.f32 %v1238_v51, %v1237_v49  ;;  %v906_v33 = vadd.f32 %v1264_v20, %v857_v19 }
 0x10f   :  { %v1240_v53 = vpop.f32.mrf.mxu0  ;;  %v1267_v6 = vadd.f32 %v1266_v54, %v1265_v52 }
 0x110   :  { %v1268_v61 = vpop.f32.mrf.mxu1  ;;  %v862_v5 = vadd.f32 %v1239_v59, %v813_v62 }
 0x111   :  { %v1241_v60 = vpop.f32.mrf.mxu0 }
 0x112   :  { %v1242_v7 = vadd.f32 %v1241_v60, %v1240_v53  ;;  %v1269_v8 = vpop.f32.mrf.mxu1  ;;  %v911_v16 = vadd.f32 %v1267_v6, %v862_v5 }
 0x113   :  { %v1270_v15 = vadd.f32 %v1269_v8, %v1268_v61 }
 0x114   :  { %v865_v14 = vadd.f32 %v1242_v7, %v816_v9 }
 0x116   :  { %v914_v27 = vadd.f32 %v1270_v15, %v865_v14 }
 0x123   :  { %v1299_v17 = vpop.f32.mrf.mxu0 }
 0x124   :  { %v960_v21 = vadd.f32 %v1299_v17, %v911_v16 }
 0x125   :  { %v951_v23 = vpop.f32.mrf.mxu0 }
 0x126   :  { %v990_v24 = vmul.f32 %v1129_v18, %v960_v21  ;;  %v952_v26 = vadd.f32 %v951_v23, %v903_v22 }
 0x127   :  { %v1300_v29 = vpop.f32.mrf.mxu0 }
 0x128   :  { %v988_v30 = vmul.f32 %v1129_v18, %v952_v26  ;;  %v963_v32 = vadd.f32 %v1300_v29, %v914_v27  ;;  %v1001_v36 = vadd.f32 %v1130_v28, %v990_v24 }
 0x129   :  { %v954_v35 = vpop.f32.mrf.mxu0 }
 0x12a   :  { %v991_v37 = vmul.f32 %v1129_v18, %v963_v32  ;;  %v955_v39 = vadd.f32 %v954_v35, %v906_v33  ;;  %v999_v41 = vadd.f32 %v1130_v28, %v988_v30  ;;  %v1013_v45 = vadd.f32 %v1145_v34, %v1001_v36 }
 0x12c   :  { %v1002_v42 = vadd.f32 %v1130_v28, %v991_v37  ;;  %v989_v43 = vmul.f32 %v1129_v18, %v955_v39  ;;  %v1011_v48 = vadd.f32 %v1141_v40, %v999_v41 }
 0x12e   :  { %v1014_v46 = vadd.f32 %v1146_v38, %v1002_v42  ;;  %v1000_v47 = vadd.f32 %v1130_v28, %v989_v43 }
 0x130   :  { %v1155_v49 = vpack.c.bf16 %v1014_v46, %v1013_v45  ;;  %v1012_v50 = vadd.f32 %v1142_v44, %v1000_v47 }
 0x132   :  { %1158 = vst [vmem:[%s1722_s5 + $0x8] sm:$0xff] %v1155_v49   ;;  %v1150_v51 = vpack.c.bf16 %v1012_v50, %v1011_v48 }
 0x134   :  { %1151 = vst [vmem:[%s1722_s5] sm:$0xff] %v1150_v51  }

// kernel: net_recam_forward.62
= control target key start
LH: loop header
LB: loop body
LE: loop exit
PB: predicated region body
PF: predicated region fallthrough
CT: control target
= control target key end

     0   :  { %vm1150_vm0 = vmmov 0   ;;  %s1416_s1 = inlined_call_operand.vmem [shape: bf16[1152,128], index: 1, kind: input, shape index: {}]   ;;  %s1417_s0 = inlined_call_operand.vmem [shape: bf16[8,1152], index: 0, kind: input, shape index: {}]   ;;  %s1418_s2 = inlined_call_operand.vmem [shape: f32[1,128], index: 2, kind: input, shape index: {}]   ;;  %s1419_s3 = inlined_call_operand.vmem [shape: f32[1,128], index: 3, kind: input, shape index: {}]   ;;  %s1420_s4 = inlined_call_operand.vmem [shape: bf16[8,128], index: 4, kind: output, shape index: {}]  }
   0x1   :  { %v1068_v0 = vld [vmem:[%s1416_s1 + $0x78] sm:$0xff]   ;;  %v1072_v4 = vld [vmem:[%s1416_s1 + $0x70] sm:$0xff]   ;;  %v1076_v8 = vld [vmem:[%s1416_s1 + $0x68] sm:$0xff]  }
   0x2   :  { %v1069_v1 = vld [vmem:[%s1416_s1 + $0xf8] sm:$0xff]   ;;  %949 = vmatprep.subr.bf16.mxu0 %v1068_v0  ;;  %v1073_v5 = vld [vmem:[%s1416_s1 + $0xf0] sm:$0xff]   ;;  %v1077_v9 = vld [vmem:[%s1416_s1 + $0xe8] sm:$0xff]  }
   0x3   :  { %v1070_v2 = vld [vmem:[%s1416_s1 + $0x38] sm:$0xff]   ;;  %971 = vmatprep.subr.bf16.mxu1 %v1069_v1  ;;  %v1074_v6 = vld [vmem:[%s1416_s1 + $0x30] sm:$0xff]   ;;  %v1078_v10 = vld [vmem:[%s1416_s1 + $0x28] sm:$0xff]  }
   0x4   :  { %v1071_v3 = vld [vmem:[%s1416_s1 + $0xb8] sm:$0xff]   ;;  %950 = vmatpush3.bf16.msra.mxu0 %v1070_v2  ;;  %v1075_v7 = vld [vmem:[%s1416_s1 + $0xb0] sm:$0xff]   ;;  %v1079_v11 = vld [vmem:[%s1416_s1 + $0xa8] sm:$0xff]  }
   0x5   :  { %972 = vmatpush3.bf16.msra.mxu1 %v1071_v3  ;;  %951 = vmatprep.subr.bf16.mxu0 %v1072_v4  ;;  %v1080_v12 = vld [vmem:[%s1416_s1 + $0x60] sm:$0xff]   ;;  %v1084_v16 = vld [vmem:[%s1416_s1 + $0x58] sm:$0xff]   ;;  %v1088_v20 = vld [vmem:[%s1416_s1 + $0x50] sm:$0xff]  }
   0x6   :  { %973 = vmatprep.subr.bf16.mxu1 %v1073_v5  ;;  %v1081_v13 = vld [vmem:[%s1416_s1 + $0xe0] sm:$0xff]   ;;  %v1085_v17 = vld [vmem:[%s1416_s1 + $0xd8] sm:$0xff]   ;;  %v1089_v21 = vld [vmem:[%s1416_s1 + $0xd0] sm:$0xff]  }
   0x7   :  { %v1082_v14 = vld [vmem:[%s1416_s1 + $0x20] sm:$0xff]   ;;  %v1086_v18 = vld [vmem:[%s1416_s1 + $0x18] sm:$0xff]   ;;  %v1090_v22 = vld [vmem:[%s1416_s1 + $0x10] sm:$0xff]  }
   0x8   :  { %952 = vmatpush3.bf16.msra.mxu0 %v1074_v6  ;;  %v1083_v15 = vld [vmem:[%s1416_s1 + $0xa0] sm:$0xff]   ;;  %v1087_v19 = vld [vmem:[%s1416_s1 + $0x98] sm:$0xff]   ;;  %v1091_v23 = vld [vmem:[%s1416_s1 + $0x90] sm:$0xff]  }
   0x9   :  { %974 = vmatpush3.bf16.msra.mxu1 %v1075_v7  ;;  %953 = vmatprep.subr.bf16.mxu0 %v1076_v8  ;;  %v1092_v24 = vld [vmem:[%s1416_s1 + $0x48] sm:$0xff]   ;;  %v1096_v28 = vld [vmem:[%s1416_s1 + $0x40] sm:$0xff]   ;;  %v1104_v38 = vld [vmem:[%s1416_s1 + $0x178] sm:$0xff]  }
   0xa   :  { %975 = vmatprep.subr.bf16.mxu1 %v1077_v9  ;;  %v1093_v25 = vld [vmem:[%s1416_s1 + $0xc8] sm:$0xff]   ;;  %v1097_v29 = vld [vmem:[%s1416_s1 + $0xc0] sm:$0xff]   ;;  %v1105_v39 = vld [vmem:[%s1416_s1 + $0x138] sm:$0xff]  }
   0xb   :  { %v1094_v26 = vld [vmem:[%s1416_s1 + $0x8] sm:$0xff]   ;;  %v1098_v30 = vld [vmem:[%s1416_s1] sm:$0xff]   ;;  %v1106_v40 = vld [vmem:[%s1416_s1 + $0x1f8] sm:$0xff]  }
   0xc   :  { %954 = vmatpush3.bf16.msra.mxu0 %v1078_v10  ;;  %v1095_v27 = vld [vmem:[%s1416_s1 + $0x88] sm:$0xff]   ;;  %v1099_v31 = vld [vmem:[%s1416_s1 + $0x80] sm:$0xff]   ;;  %v1107_v41 = vld [vmem:[%s1416_s1 + $0x1b8] sm:$0xff]  }
   0xd   :  { %976 = vmatpush3.bf16.msra.mxu1 %v1079_v11  ;;  %955 = vmatprep.subr.bf16.mxu0 %v1080_v12  ;;  %v23_v32 = vld [vmem:[%s1417_s0] sm:$0xff]  ;;  %v24_v33 = vld [vmem:[%s1417_s0 + $0x8] sm:$0xff]  ;;  %v1108_v42 = vld [vmem:[%s1416_s1 + $0x170] sm:$0xff]  }
   0xe   :  { %977 = vmatprep.subr.bf16.mxu1 %v1081_v13  ;;  %v866_v34 = vcombine.low %v23_v32, %v23_v32  ;;  %v867_v35 = vcombine.high %v23_v32, %v23_v32  ;;  %v868_v36 = vcombine.low %v24_v33, %v24_v33  ;;  %v869_v37 = vcombine.high %v24_v33, %v24_v33  ;;  %v1109_v43 = vld [vmem:[%s1416_s1 + $0x130] sm:$0xff]   ;;  %v1112_v46 = vld [vmem:[%s1416_s1 + $0x168] sm:$0xff]   ;;  %v1116_v50 = vld [vmem:[%s1416_s1 + $0x160] sm:$0xff]  }
   0xf   :  { %v1110_v44 = vld [vmem:[%s1416_s1 + $0x1f0] sm:$0xff]   ;;  %v1113_v47 = vld [vmem:[%s1416_s1 + $0x128] sm:$0xff]   ;;  %v1117_v51 = vld [vmem:[%s1416_s1 + $0x120] sm:$0xff]   ;;  %v1149_v13 = vmov 0.0  }
  0x10   :  { %956 = vmatpush3.bf16.msra.mxu0 %v1082_v14  ;;  %669 = vmatprep.mubr.bf16.mxu0 %v867_v35  ;;  %v1111_v45 = vld [vmem:[%s1416_s1 + $0x1b0] sm:$0xff]   ;;  %v1114_v48 = vld [vmem:[%s1416_s1 + $0x1e8] sm:$0xff]   ;;  %v1118_v52 = vld [vmem:[%s1416_s1 + $0x1e0] sm:$0xff]  }
  0x11   :  { %978 = vmatpush3.bf16.msra.mxu1 %v1083_v15  ;;  %957 = vmatprep.subr.bf16.mxu0 %v1084_v16  ;;  %v1115_v49 = vld [vmem:[%s1416_s1 + $0x1a8] sm:$0xff]   ;;  %v1119_v53 = vld [vmem:[%s1416_s1 + $0x1a0] sm:$0xff]   ;;  %v1120_v54 = vld [vmem:[%s1416_s1 + $0x158] sm:$0xff]  }
  0x12   :  { %979 = vmatprep.subr.bf16.mxu1 %v1085_v17  ;;  %709 = vmatprep.mubr.bf16.mxu1 %v869_v37  ;;  %v1121_v55 = vld [vmem:[%s1416_s1 + $0x118] sm:$0xff]   ;;  %v1124_v58 = vld [vmem:[%s1416_s1 + $0x150] sm:$0xff]   ;;  %v1128_v62 = vld [vmem:[%s1416_s1 + $0x148] sm:$0xff]  }
  0x13   :  { %v1122_v56 = vld [vmem:[%s1416_s1 + $0x1d8] sm:$0xff]   ;;  %v1125_v59 = vld [vmem:[%s1416_s1 + $0x110] sm:$0xff]   ;;  %v1129_v63 = vld [vmem:[%s1416_s1 + $0x108] sm:$0xff]  }
  0x14   :  { %958 = vmatpush3.bf16.msra.mxu0 %v1086_v18  ;;  %v1123_v57 = vld [vmem:[%s1416_s1 + $0x198] sm:$0xff]   ;;  %v1126_v60 = vld [vmem:[%s1416_s1 + $0x1d0] sm:$0xff]   ;;  %v1130_v0 = vld [vmem:[%s1416_s1 + $0x1c8] sm:$0xff]  }
  0x15   :  { %980 = vmatpush3.bf16.msra.mxu1 %v1087_v19  ;;  %959 = vmatprep.subr.bf16.mxu0 %v1088_v20  ;;  %v1127_v61 = vld [vmem:[%s1416_s1 + $0x190] sm:$0xff]   ;;  %v1131_v1 = vld [vmem:[%s1416_s1 + $0x188] sm:$0xff]   ;;  %v1132_v2 = vld [vmem:[%s1416_s1 + $0x140] sm:$0xff]  }
  0x16   :  { %981 = vmatprep.subr.bf16.mxu1 %v1089_v21  ;;  %v1133_v3 = vld [vmem:[%s1416_s1 + $0x100] sm:$0xff]   ;;  %v25_v5 = vld [vmem:[%s1417_s0 + $0x10] sm:$0xff]  ;;  %v26_v9 = vld [vmem:[%s1417_s0 + $0x18] sm:$0xff] }
  0x17   :  { %v1134_v4 = vld [vmem:[%s1416_s1 + $0x1c0] sm:$0xff]   ;;  %v871_v6 = vcombine.high %v25_v5, %v25_v5  ;;  %v870_v8 = vcombine.low %v25_v5, %v25_v5  ;;  %v872_v10 = vcombine.low %v26_v9, %v26_v9  ;;  %v873_v11 = vcombine.high %v26_v9, %v26_v9  ;;  %v1140_v12 = vld [vmem:[%s1416_s1 + $0x238] sm:$0xff]   ;;  %v1141_v14 = vld [vmem:[%s1416_s1 + $0x230] sm:$0xff]  }
  0x18   :  { %960 = vmatpush3.bf16.msra.mxu0 %v1090_v22  ;;  %v1137_v7 = vld [vmem:[%s1416_s1 + $0x180] sm:$0xff]   ;;  %v1142_v15 = vld [vmem:[%s1416_s1 + $0x228] sm:$0xff]   ;;  %v1144_v17 = vld [vmem:[%s1416_s1 + $0x218] sm:$0xff]  }
  0x19   :  { %982 = vmatpush3.bf16.msra.mxu1 %v1091_v23  ;;  %961 = vmatprep.subr.bf16.mxu0 %v1092_v24  ;;  %v1143_v16 = vld [vmem:[%s1416_s1 + $0x220] sm:$0xff]   ;;  %v1145_v18 = vld [vmem:[%s1416_s1 + $0x210] sm:$0xff]   ;;  %v1146_v19 = vld [vmem:[%s1416_s1 + $0x208] sm:$0xff]  }
  0x1a   :  { %983 = vmatprep.subr.bf16.mxu1 %v1093_v25  ;;  %v1147_v20 = vld [vmem:[%s1416_s1 + $0x200] sm:$0xff]  }
  0x1b   :  { %v1148_v21 = vld [vmem:[%s1417_s0 + $0x20] ss:$0 sps:$4 sm:$0xff]  }
  0x1c   :  { %962 = vmatpush3.bf16.msra.mxu0 %v1094_v26 }
  0x1d   :  { %984 = vmatpush3.bf16.msra.mxu1 %v1095_v27  ;;  %963 = vmatprep.subr.bf16.mxu0 %v1096_v28 }
  0x1e   :  { %985 = vmatprep.subr.bf16.mxu1 %v1097_v29 }
  0x20   :  { %964 = vmatpush3.bf16.msra.mxu0 %v1098_v30 }
  0x21   :  { %986 = vmatpush3.bf16.msra.mxu1 %v1099_v31  ;;  %993 = vmatprep.subr.bf16.mxu0 %v1104_v38 }
  0x22   :  { %1015 = vmatprep.subr.bf16.mxu1 %v1106_v40 }
  0x23   :  { %670 = vmatmul.mubr.bf16.vlgmr.msra.gmra.mxu0 %v866_v34 }
  0x24   :  { %710 = vmatmul.mubr.bf16.vlgmr.msra.gmra.mxu1 %v868_v36  ;;  %994 = vmatpush3.bf16.msra.mxu0 %v1105_v39 }
  0x25   :  { %1016 = vmatpush3.bf16.msra.mxu1 %v1107_v41  ;;  %995 = vmatprep.subr.bf16.mxu0 %v1108_v42 }
  0x26   :  { %1017 = vmatprep.subr.bf16.mxu1 %v1110_v44  ;;  %749 = vmatprep.mubr.bf16.mxu0 %v871_v6 }
  0x27   :  { %789 = vmatprep.mubr.bf16.mxu1 %v873_v11 }
  0x28   :  { %996 = vmatpush3.bf16.msra.mxu0 %v1109_v43 }
  0x29   :  { %1018 = vmatpush3.bf16.msra.mxu1 %v1111_v45  ;;  %997 = vmatprep.subr.bf16.mxu0 %v1112_v46  ;;  %v947_v46 = vld [vmem:[%s1418_s2] ss:$0 sm:$0xff] }
  0x2a   :  { %1019 = vmatprep.subr.bf16.mxu1 %v1114_v48  ;;  %v948_v48 = vld [vmem:[%s1419_s3] ss:$0 sm:$0xff] }
  0x2c   :  { %998 = vmatpush3.bf16.msra.mxu0 %v1113_v47 }
  0x2d   :  { %1020 = vmatpush3.bf16.msra.mxu1 %v1115_v49  ;;  %999 = vmatprep.subr.bf16.mxu0 %v1116_v50 }
  0x2e   :  { %1021 = vmatprep.subr.bf16.mxu1 %v1118_v52 }
  0x30   :  { %1000 = vmatpush3.bf16.msra.mxu0 %v1117_v51 }
  0x31   :  { %1022 = vmatpush3.bf16.msra.mxu1 %v1119_v53  ;;  %1001 = vmatprep.subr.bf16.mxu0 %v1120_v54 }
  0x32   :  { %1023 = vmatprep.subr.bf16.mxu1 %v1122_v56 }
  0x34   :  { %1002 = vmatpush3.bf16.msra.mxu0 %v1121_v55 }
  0x35   :  { %1024 = vmatpush3.bf16.msra.mxu1 %v1123_v57  ;;  %1003 = vmatprep.subr.bf16.mxu0 %v1124_v58 }
  0x36   :  { %1025 = vmatprep.subr.bf16.mxu1 %v1126_v60 }
  0x38   :  { %1004 = vmatpush3.bf16.msra.mxu0 %v1125_v59 }
  0x39   :  { %1026 = vmatpush3.bf16.msra.mxu1 %v1127_v61  ;;  %1005 = vmatprep.subr.bf16.mxu0 %v1128_v62 }
  0x3a   :  { %1027 = vmatprep.subr.bf16.mxu1 %v1130_v0 }
  0x3c   :  { %1006 = vmatpush3.bf16.msra.mxu0 %v1129_v63 }
  0x3d   :  { %1028 = vmatpush3.bf16.msra.mxu1 %v1131_v1  ;;  %1007 = vmatprep.subr.bf16.mxu0 %v1132_v2 }
  0x3e   :  { %1029 = vmatprep.subr.bf16.mxu1 %v1134_v4 }
  0x40   :  { %1008 = vmatpush3.bf16.msra.mxu0 %v1133_v3 }
  0x41   :  { %1030 = vmatpush3.bf16.msra.mxu1 %v1137_v7  ;;  %1046 = vmatprep.subr.bf16.mxu0 %v1149_v13 }
  0x43   :  { %750 = vmatmul.mubr.bf16.vlgmr.msra.gmra.mxu0 %v870_v8 }
  0x44   :  { %1047 = vmatpush3.bf16.msra.mxu0 %v1140_v12  ;;  %790 = vmatmul.mubr.bf16.vlgmr.msra.gmra.mxu1 %v872_v10 }
  0x45   :  { %1048 = vmatprep.subr.bf16.mxu0 %v1149_v13  ;;  %1062 = vmatprep.mubr.msk.bf16.mxu0 %vm1150_vm0, %v1149_v13 }
  0x48   :  { %1049 = vmatpush3.bf16.msra.mxu0 %v1141_v14 }
  0x49   :  { %1050 = vmatprep.subr.bf16.mxu0 %v1149_v13 }
  0x4c   :  { %1051 = vmatpush3.bf16.msra.mxu0 %v1142_v15 }
  0x4d   :  { %1052 = vmatprep.subr.bf16.mxu0 %v1149_v13 }
  0x50   :  { %1053 = vmatpush3.bf16.msra.mxu0 %v1143_v16 }
  0x51   :  { %1054 = vmatprep.subr.bf16.mxu0 %v1149_v13 }
  0x54   :  { %1055 = vmatpush3.bf16.msra.mxu0 %v1144_v17 }
  0x55   :  { %1056 = vmatprep.subr.bf16.mxu0 %v1149_v13 }
  0x58   :  { %1057 = vmatpush3.bf16.msra.mxu0 %v1145_v18 }
  0x59   :  { %1058 = vmatprep.subr.bf16.mxu0 %v1149_v13 }
  0x5c   :  { %1059 = vmatpush3.bf16.msra.mxu0 %v1146_v19 }
  0x5d   :  { %1060 = vmatprep.subr.bf16.mxu0 %v1149_v13 }
  0x60   :  { %1061 = vmatpush3.bf16.msra.mxu0 %v1147_v20 }
  0x63   :  { %1063 = vmatmul.mubr.bf16.vlgmr.msra.gmra.mxu0 %v1148_v21 }
  0xe3   :  { %v965_v22 = vpop.f32.mrf.mxu0 }
  0xe4   :  { %v987_v23 = vpop.f32.mrf.mxu1 }
  0xe5   :  { %v966_v24 = vpop.f32.mrf.mxu0 }
  0xe6   :  { %v988_v25 = vpop.f32.mrf.mxu1  ;;  %v967_v38 = vadd.f32 %v966_v24, %v965_v22 }
  0xe7   :  { %v968_v26 = vpop.f32.mrf.mxu0  ;;  %v989_v39 = vadd.f32 %v988_v25, %v987_v23 }
  0xe8   :  { %v990_v27 = vpop.f32.mrf.mxu1 }
  0xe9   :  { %v969_v28 = vpop.f32.mrf.mxu0  ;;  %v712_v41 = vadd.f32 %v989_v39, %v967_v38 }
  0xea   :  { %v991_v29 = vpop.f32.mrf.mxu1 }
 0x103   :  { %v1009_v30 = vpop.f32.mrf.mxu0 }
 0x104   :  { %v1031_v31 = vpop.f32.mrf.mxu1 }
 0x105   :  { %v1010_v32 = vpop.f32.mrf.mxu0 }
 0x106   :  { %v1032_v33 = vpop.f32.mrf.mxu1  ;;  %v1011_v40 = vadd.f32 %v1010_v32, %v1009_v30 }
 0x107   :  { %v1012_v34 = vpop.f32.mrf.mxu0  ;;  %v1033_v43 = vadd.f32 %v1032_v33, %v1031_v31 }
 0x108   :  { %v1034_v35 = vpop.f32.mrf.mxu1  ;;  %v752_v42 = vadd.f32 %v1011_v40, %v712_v41 }
 0x109   :  { %v1013_v36 = vpop.f32.mrf.mxu0 }
 0x10a   :  { %v1035_v37 = vpop.f32.mrf.mxu1  ;;  %v792_v44 = vadd.f32 %v1033_v43, %v752_v42 }
 0x123   :  { %v831_v45 = vpop.f32.mrf.mxu0 }
 0x124   :  { %v832_v47 = vadd.f32 %v831_v45, %v792_v44 }
 0x125   :  { %v1064_v49 = vpop.f32.mrf.mxu0 }
 0x126   :  { %v850_v50 = vmul.f32 %v947_v46, %v832_v47 }
 0x127   :  { %v834_v51 = vpop.f32.mrf.mxu0 }
 0x128   :  { %v858_v52 = vadd.f32 %v948_v48, %v850_v50 }
 0x129   :  { %v1065_v53 = vpop.f32.mrf.mxu0 }
 0x12a   :  { %v859_v54 = vmax.f32 %v858_v52, 0.0 }
 0x12c   :  { %v860_v55 = vpack.c.bf16 %v859_v54, %v859_v54 }
 0x12e   :  { %861 = vst [vmem:[%s1420_s4] sm:$0xf] %v860_v55 }

// kernel: net_recam_forward.63
= control target key start
LH: loop header
LB: loop body
LE: loop exit
PB: predicated region body
PF: predicated region fallthrough
CT: control target
= control target key end

     0   :  { %v233_v0 = vmov 0.0   ;;  %vm234_vm0 = vmmov 0   ;;  %s312_s1 = inlined_call_operand.vmem [shape: bf16[128,128], index: 1, kind: input, shape index: {}]   ;;  %s313_s0 = inlined_call_operand.vmem [shape: bf16[8,128], index: 0, kind: input, shape index: {}]   ;;  %s314_s2 = inlined_call_operand.vmem [shape: f32[1,128], index: 2, kind: input, shape index: {}]   ;;  %s315_s3 = inlined_call_operand.vmem [shape: f32[1,128], index: 3, kind: input, shape index: {}]   ;;  %s316_s4 = inlined_call_operand.vmem [shape: f32[1,128], index: 4, kind: input, shape index: {}]   ;;  %s317_s5 = inlined_call_operand.vmem [shape: f32[1,128], index: 5, kind: input, shape index: {}]   ;;  %s318_s6 = inlined_call_operand.vmem [shape: bf16[8,128], index: 6, kind: output, shape index: {}]  }
   0x1   :  { %203 = vmatprep.subr.bf16.mxu0 %v233_v0  ;;  %v225_v1 = vld [vmem:[%s312_s1 + $0x38] sm:$0xff]   ;;  %219 = vmatprep.mubr.msk.bf16.mxu0 %vm234_vm0, %v233_v0  ;;  %v226_v2 = vld [vmem:[%s312_s1 + $0x30] sm:$0xff]   ;;  %v227_v3 = vld [vmem:[%s312_s1 + $0x28] sm:$0xff]  }
   0x2   :  { %204 = vmatpush3.bf16.msra.mxu0 %v225_v1  ;;  %v228_v4 = vld [vmem:[%s312_s1 + $0x20] sm:$0xff]   ;;  %v229_v7 = vld [vmem:[%s312_s1 + $0x18] sm:$0xff]   ;;  %v230_v10 = vld [vmem:[%s312_s1 + $0x10] sm:$0xff]  }
   0x3   :  { %205 = vmatprep.subr.bf16.mxu0 %v233_v0  ;;  %v29_v5 = vld [vmem:[%s313_s0] sm:$0xf]  ;;  %v231_v13 = vld [vmem:[%s312_s1 + $0x8] sm:$0xff]  }
   0x4   :  { %v30_v6 = vunpack.c.l.bf16 %v29_v5  ;;  %v182_v8 = vld [vmem:[%s314_s2] ss:$0 sm:$0xff] }
   0x5   :  { %v183_v11 = vld [vmem:[%s315_s3] ss:$0 sm:$0xff] }
   0x6   :  { %206 = vmatpush3.bf16.msra.mxu0 %v226_v2  ;;  %v38_v9 = vmul.f32 %v182_v8, %v30_v6  ;;  %v232_v15 = vld [vmem:[%s312_s1] sm:$0xff]  }
   0x7   :  { %207 = vmatprep.subr.bf16.mxu0 %v233_v0  ;;  %v192_v17 = vld [vmem:[%s316_s4] ss:$0 sm:$0xff] }
   0x8   :  { %v46_v12 = vadd.f32 %v183_v11, %v38_v9  ;;  %v193_v19 = vld [vmem:[%s317_s5] ss:$0 sm:$0xff] }
   0xa   :  { %208 = vmatpush3.bf16.msra.mxu0 %v227_v3  ;;  %v47_v14 = vmax.f32 %v46_v12, 0.0 }
   0xb   :  { %209 = vmatprep.subr.bf16.mxu0 %v233_v0 }
   0xc   :  { %v48_v16 = vpack.c.bf16 %v47_v14, %v47_v14 }
   0xe   :  { %210 = vmatpush3.bf16.msra.mxu0 %v228_v4 }
   0xf   :  { %211 = vmatprep.subr.bf16.mxu0 %v233_v0 }
  0x12   :  { %212 = vmatpush3.bf16.msra.mxu0 %v229_v7 }
  0x13   :  { %213 = vmatprep.subr.bf16.mxu0 %v233_v0 }
  0x16   :  { %214 = vmatpush3.bf16.msra.mxu0 %v230_v10 }
  0x17   :  { %215 = vmatprep.subr.bf16.mxu0 %v233_v0 }
  0x1a   :  { %216 = vmatpush3.bf16.msra.mxu0 %v231_v13 }
  0x1b   :  { %217 = vmatprep.subr.bf16.mxu0 %v233_v0 }
  0x1e   :  { %218 = vmatpush3.bf16.msra.mxu0 %v232_v15 }
  0x21   :  { %220 = vmatmul.mubr.bf16.vlgmr.msra.gmra.mxu0 %v48_v16 }
  0xe1   :  { %v148_v18 = vpop.f32.mrf.mxu0 }
  0xe2   :  { %v167_v20 = vmul.f32 %v192_v17, %v148_v18 }
  0xe3   :  { %v221_v21 = vpop.f32.mrf.mxu0 }
  0xe4   :  { %v175_v22 = vadd.f32 %v193_v19, %v167_v20 }
  0xe5   :  { %v151_v23 = vpop.f32.mrf.mxu0 }
  0xe6   :  { %v176_v24 = vpack.c.bf16 %v175_v22, %v175_v22 }
  0xe7   :  { %v222_v25 = vpop.f32.mrf.mxu0 }
  0xe8   :  { %177 = vst [vmem:[%s318_s6] sm:$0xf] %v176_v24 }

// kernel: net_recam_forward.64
= control target key start
LH: loop header
LB: loop body
LE: loop exit
PB: predicated region body
PF: predicated region fallthrough
CT: control target
= control target key end

     0   :  { %vm1155_vm0 = vmmov 0   ;;  %s1429_s1 = inlined_call_operand.vmem [shape: bf16[1152,128], index: 1, kind: input, shape index: {}]   ;;  %s1430_s0 = inlined_call_operand.vmem [shape: bf16[8,1152], index: 0, kind: input, shape index: {}]   ;;  %s1431_s2 = inlined_call_operand.vmem [shape: f32[1,128], index: 2, kind: input, shape index: {}]   ;;  %s1432_s4 = inlined_call_operand.vmem [shape: bf16[8,128], index: 4, kind: input, shape index: {}]   ;;  %s1433_s3 = inlined_call_operand.vmem [shape: f32[1,128], index: 3, kind: input, shape index: {}]   ;;  %s1434_s5 = inlined_call_operand.vmem [shape: bf16[8,128], index: 5, kind: output, shape index: {}]  }
   0x1   :  { %v1073_v0 = vld [vmem:[%s1429_s1 + $0x78] sm:$0xff]   ;;  %v1077_v4 = vld [vmem:[%s1429_s1 + $0x70] sm:$0xff]   ;;  %v1081_v8 = vld [vmem:[%s1429_s1 + $0x68] sm:$0xff]  }
   0x2   :  { %v1074_v1 = vld [vmem:[%s1429_s1 + $0xf8] sm:$0xff]   ;;  %954 = vmatprep.subr.bf16.mxu0 %v1073_v0  ;;  %v1078_v5 = vld [vmem:[%s1429_s1 + $0xf0] sm:$0xff]   ;;  %v1082_v9 = vld [vmem:[%s1429_s1 + $0xe8] sm:$0xff]  }
   0x3   :  { %v1075_v2 = vld [vmem:[%s1429_s1 + $0x38] sm:$0xff]   ;;  %976 = vmatprep.subr.bf16.mxu1 %v1074_v1  ;;  %v1079_v6 = vld [vmem:[%s1429_s1 + $0x30] sm:$0xff]   ;;  %v1083_v10 = vld [vmem:[%s1429_s1 + $0x28] sm:$0xff]  }
   0x4   :  { %v1076_v3 = vld [vmem:[%s1429_s1 + $0xb8] sm:$0xff]   ;;  %955 = vmatpush3.bf16.msra.mxu0 %v1075_v2  ;;  %v1080_v7 = vld [vmem:[%s1429_s1 + $0xb0] sm:$0xff]   ;;  %v1084_v11 = vld [vmem:[%s1429_s1 + $0xa8] sm:$0xff]  }
   0x5   :  { %977 = vmatpush3.bf16.msra.mxu1 %v1076_v3  ;;  %956 = vmatprep.subr.bf16.mxu0 %v1077_v4  ;;  %v1085_v12 = vld [vmem:[%s1429_s1 + $0x60] sm:$0xff]   ;;  %v1089_v16 = vld [vmem:[%s1429_s1 + $0x58] sm:$0xff]   ;;  %v1093_v20 = vld [vmem:[%s1429_s1 + $0x50] sm:$0xff]  }
   0x6   :  { %978 = vmatprep.subr.bf16.mxu1 %v1078_v5  ;;  %v1086_v13 = vld [vmem:[%s1429_s1 + $0xe0] sm:$0xff]   ;;  %v1090_v17 = vld [vmem:[%s1429_s1 + $0xd8] sm:$0xff]   ;;  %v1094_v21 = vld [vmem:[%s1429_s1 + $0xd0] sm:$0xff]  }
   0x7   :  { %v1087_v14 = vld [vmem:[%s1429_s1 + $0x20] sm:$0xff]   ;;  %v1091_v18 = vld [vmem:[%s1429_s1 + $0x18] sm:$0xff]   ;;  %v1095_v22 = vld [vmem:[%s1429_s1 + $0x10] sm:$0xff]  }
   0x8   :  { %957 = vmatpush3.bf16.msra.mxu0 %v1079_v6  ;;  %v1088_v15 = vld [vmem:[%s1429_s1 + $0xa0] sm:$0xff]   ;;  %v1092_v19 = vld [vmem:[%s1429_s1 + $0x98] sm:$0xff]   ;;  %v1096_v23 = vld [vmem:[%s1429_s1 + $0x90] sm:$0xff]  }
   0x9   :  { %979 = vmatpush3.bf16.msra.mxu1 %v1080_v7  ;;  %958 = vmatprep.subr.bf16.mxu0 %v1081_v8  ;;  %v1097_v24 = vld [vmem:[%s1429_s1 + $0x48] sm:$0xff]   ;;  %v1101_v28 = vld [vmem:[%s1429_s1 + $0x40] sm:$0xff]   ;;  %v1109_v38 = vld [vmem:[%s1429_s1 + $0x178] sm:$0xff]  }
   0xa   :  { %980 = vmatprep.subr.bf16.mxu1 %v1082_v9  ;;  %v1098_v25 = vld [vmem:[%s1429_s1 + $0xc8] sm:$0xff]   ;;  %v1102_v29 = vld [vmem:[%s1429_s1 + $0xc0] sm:$0xff]   ;;  %v1110_v39 = vld [vmem:[%s1429_s1 + $0x138] sm:$0xff]  }
   0xb   :  { %v1099_v26 = vld [vmem:[%s1429_s1 + $0x8] sm:$0xff]   ;;  %v1103_v30 = vld [vmem:[%s1429_s1] sm:$0xff]   ;;  %v1111_v40 = vld [vmem:[%s1429_s1 + $0x1f8] sm:$0xff]  }
   0xc   :  { %959 = vmatpush3.bf16.msra.mxu0 %v1083_v10  ;;  %v1100_v27 = vld [vmem:[%s1429_s1 + $0x88] sm:$0xff]   ;;  %v1104_v31 = vld [vmem:[%s1429_s1 + $0x80] sm:$0xff]   ;;  %v1112_v41 = vld [vmem:[%s1429_s1 + $0x1b8] sm:$0xff]  }
   0xd   :  { %981 = vmatpush3.bf16.msra.mxu1 %v1084_v11  ;;  %960 = vmatprep.subr.bf16.mxu0 %v1085_v12  ;;  %v26_v32 = vld [vmem:[%s1430_s0] sm:$0xff]  ;;  %v27_v33 = vld [vmem:[%s1430_s0 + $0x8] sm:$0xff]  ;;  %v1113_v42 = vld [vmem:[%s1429_s1 + $0x170] sm:$0xff]  }
   0xe   :  { %982 = vmatprep.subr.bf16.mxu1 %v1086_v13  ;;  %v871_v34 = vcombine.low %v26_v32, %v26_v32  ;;  %v872_v35 = vcombine.high %v26_v32, %v26_v32  ;;  %v873_v36 = vcombine.low %v27_v33, %v27_v33  ;;  %v874_v37 = vcombine.high %v27_v33, %v27_v33  ;;  %v1114_v43 = vld [vmem:[%s1429_s1 + $0x130] sm:$0xff]   ;;  %v1117_v46 = vld [vmem:[%s1429_s1 + $0x168] sm:$0xff]   ;;  %v1121_v50 = vld [vmem:[%s1429_s1 + $0x160] sm:$0xff]  }
   0xf   :  { %v1115_v44 = vld [vmem:[%s1429_s1 + $0x1f0] sm:$0xff]   ;;  %v1118_v47 = vld [vmem:[%s1429_s1 + $0x128] sm:$0xff]   ;;  %v1122_v51 = vld [vmem:[%s1429_s1 + $0x120] sm:$0xff]   ;;  %v1154_v13 = vmov 0.0  }
  0x10   :  { %961 = vmatpush3.bf16.msra.mxu0 %v1087_v14  ;;  %672 = vmatprep.mubr.bf16.mxu0 %v872_v35  ;;  %v1116_v45 = vld [vmem:[%s1429_s1 + $0x1b0] sm:$0xff]   ;;  %v1119_v48 = vld [vmem:[%s1429_s1 + $0x1e8] sm:$0xff]   ;;  %v1123_v52 = vld [vmem:[%s1429_s1 + $0x1e0] sm:$0xff]  }
  0x11   :  { %983 = vmatpush3.bf16.msra.mxu1 %v1088_v15  ;;  %962 = vmatprep.subr.bf16.mxu0 %v1089_v16  ;;  %v1120_v49 = vld [vmem:[%s1429_s1 + $0x1a8] sm:$0xff]   ;;  %v1124_v53 = vld [vmem:[%s1429_s1 + $0x1a0] sm:$0xff]   ;;  %v1125_v54 = vld [vmem:[%s1429_s1 + $0x158] sm:$0xff]  }
  0x12   :  { %984 = vmatprep.subr.bf16.mxu1 %v1090_v17  ;;  %712 = vmatprep.mubr.bf16.mxu1 %v874_v37  ;;  %v1126_v55 = vld [vmem:[%s1429_s1 + $0x118] sm:$0xff]   ;;  %v1129_v58 = vld [vmem:[%s1429_s1 + $0x150] sm:$0xff]   ;;  %v1133_v62 = vld [vmem:[%s1429_s1 + $0x148] sm:$0xff]  }
  0x13   :  { %v1127_v56 = vld [vmem:[%s1429_s1 + $0x1d8] sm:$0xff]   ;;  %v1130_v59 = vld [vmem:[%s1429_s1 + $0x110] sm:$0xff]   ;;  %v1134_v63 = vld [vmem:[%s1429_s1 + $0x108] sm:$0xff]  }
  0x14   :  { %963 = vmatpush3.bf16.msra.mxu0 %v1091_v18  ;;  %v1128_v57 = vld [vmem:[%s1429_s1 + $0x198] sm:$0xff]   ;;  %v1131_v60 = vld [vmem:[%s1429_s1 + $0x1d0] sm:$0xff]   ;;  %v1135_v0 = vld [vmem:[%s1429_s1 + $0x1c8] sm:$0xff]  }
  0x15   :  { %985 = vmatpush3.bf16.msra.mxu1 %v1092_v19  ;;  %964 = vmatprep.subr.bf16.mxu0 %v1093_v20  ;;  %v1132_v61 = vld [vmem:[%s1429_s1 + $0x190] sm:$0xff]   ;;  %v1136_v1 = vld [vmem:[%s1429_s1 + $0x188] sm:$0xff]   ;;  %v1137_v2 = vld [vmem:[%s1429_s1 + $0x140] sm:$0xff]  }
  0x16   :  { %986 = vmatprep.subr.bf16.mxu1 %v1094_v21  ;;  %v1138_v3 = vld [vmem:[%s1429_s1 + $0x100] sm:$0xff]   ;;  %v28_v5 = vld [vmem:[%s1430_s0 + $0x10] sm:$0xff]  ;;  %v29_v9 = vld [vmem:[%s1430_s0 + $0x18] sm:$0xff] }
  0x17   :  { %v1139_v4 = vld [vmem:[%s1429_s1 + $0x1c0] sm:$0xff]   ;;  %v876_v6 = vcombine.high %v28_v5, %v28_v5  ;;  %v875_v8 = vcombine.low %v28_v5, %v28_v5  ;;  %v877_v10 = vcombine.low %v29_v9, %v29_v9  ;;  %v878_v11 = vcombine.high %v29_v9, %v29_v9  ;;  %v1145_v12 = vld [vmem:[%s1429_s1 + $0x238] sm:$0xff]   ;;  %v1146_v14 = vld [vmem:[%s1429_s1 + $0x230] sm:$0xff]  }
  0x18   :  { %965 = vmatpush3.bf16.msra.mxu0 %v1095_v22  ;;  %v1142_v7 = vld [vmem:[%s1429_s1 + $0x180] sm:$0xff]   ;;  %v1147_v15 = vld [vmem:[%s1429_s1 + $0x228] sm:$0xff]   ;;  %v1149_v17 = vld [vmem:[%s1429_s1 + $0x218] sm:$0xff]  }
  0x19   :  { %987 = vmatpush3.bf16.msra.mxu1 %v1096_v23  ;;  %966 = vmatprep.subr.bf16.mxu0 %v1097_v24  ;;  %v1148_v16 = vld [vmem:[%s1429_s1 + $0x220] sm:$0xff]   ;;  %v1150_v18 = vld [vmem:[%s1429_s1 + $0x210] sm:$0xff]   ;;  %v1151_v19 = vld [vmem:[%s1429_s1 + $0x208] sm:$0xff]  }
  0x1a   :  { %988 = vmatprep.subr.bf16.mxu1 %v1098_v25  ;;  %v1152_v20 = vld [vmem:[%s1429_s1 + $0x200] sm:$0xff]  }
  0x1b   :  { %v1153_v21 = vld [vmem:[%s1430_s0 + $0x20] ss:$0 sps:$4 sm:$0xff]  }
  0x1c   :  { %967 = vmatpush3.bf16.msra.mxu0 %v1099_v26 }
  0x1d   :  { %989 = vmatpush3.bf16.msra.mxu1 %v1100_v27  ;;  %968 = vmatprep.subr.bf16.mxu0 %v1101_v28 }
  0x1e   :  { %990 = vmatprep.subr.bf16.mxu1 %v1102_v29 }
  0x20   :  { %969 = vmatpush3.bf16.msra.mxu0 %v1103_v30 }
  0x21   :  { %991 = vmatpush3.bf16.msra.mxu1 %v1104_v31  ;;  %998 = vmatprep.subr.bf16.mxu0 %v1109_v38 }
  0x22   :  { %1020 = vmatprep.subr.bf16.mxu1 %v1111_v40 }
  0x23   :  { %673 = vmatmul.mubr.bf16.vlgmr.msra.gmra.mxu0 %v871_v34 }
  0x24   :  { %713 = vmatmul.mubr.bf16.vlgmr.msra.gmra.mxu1 %v873_v36  ;;  %999 = vmatpush3.bf16.msra.mxu0 %v1110_v39 }
  0x25   :  { %1021 = vmatpush3.bf16.msra.mxu1 %v1112_v41  ;;  %1000 = vmatprep.subr.bf16.mxu0 %v1113_v42 }
  0x26   :  { %1022 = vmatprep.subr.bf16.mxu1 %v1115_v44  ;;  %752 = vmatprep.mubr.bf16.mxu0 %v876_v6 }
  0x27   :  { %792 = vmatprep.mubr.bf16.mxu1 %v878_v11 }
  0x28   :  { %1001 = vmatpush3.bf16.msra.mxu0 %v1114_v43 }
  0x29   :  { %1023 = vmatpush3.bf16.msra.mxu1 %v1116_v45  ;;  %1002 = vmatprep.subr.bf16.mxu0 %v1117_v46  ;;  %v952_v46 = vld [vmem:[%s1431_s2] ss:$0 sm:$0xff] }
  0x2a   :  { %1024 = vmatprep.subr.bf16.mxu1 %v1119_v48 }
  0x2c   :  { %1003 = vmatpush3.bf16.msra.mxu0 %v1118_v47  ;;  %v862_v47 = vld [vmem:[%s1432_s4] sm:$0xf] }
  0x2d   :  { %1025 = vmatpush3.bf16.msra.mxu1 %v1120_v49  ;;  %1004 = vmatprep.subr.bf16.mxu0 %v1121_v50  ;;  %v953_v49 = vld [vmem:[%s1433_s3] ss:$0 sm:$0xff] }
  0x2e   :  { %1026 = vmatprep.subr.bf16.mxu1 %v1123_v52  ;;  %v863_v52 = vunpack.c.l.bf16 %v862_v47 }
  0x30   :  { %1005 = vmatpush3.bf16.msra.mxu0 %v1122_v51 }
  0x31   :  { %1027 = vmatpush3.bf16.msra.mxu1 %v1124_v53  ;;  %1006 = vmatprep.subr.bf16.mxu0 %v1125_v54 }
  0x32   :  { %1028 = vmatprep.subr.bf16.mxu1 %v1127_v56 }
  0x34   :  { %1007 = vmatpush3.bf16.msra.mxu0 %v1126_v55 }
  0x35   :  { %1029 = vmatpush3.bf16.msra.mxu1 %v1128_v57  ;;  %1008 = vmatprep.subr.bf16.mxu0 %v1129_v58 }
  0x36   :  { %1030 = vmatprep.subr.bf16.mxu1 %v1131_v60 }
  0x38   :  { %1009 = vmatpush3.bf16.msra.mxu0 %v1130_v59 }
  0x39   :  { %1031 = vmatpush3.bf16.msra.mxu1 %v1132_v61  ;;  %1010 = vmatprep.subr.bf16.mxu0 %v1133_v62 }
  0x3a   :  { %1032 = vmatprep.subr.bf16.mxu1 %v1135_v0 }
  0x3c   :  { %1011 = vmatpush3.bf16.msra.mxu0 %v1134_v63 }
  0x3d   :  { %1033 = vmatpush3.bf16.msra.mxu1 %v1136_v1  ;;  %1012 = vmatprep.subr.bf16.mxu0 %v1137_v2 }
  0x3e   :  { %1034 = vmatprep.subr.bf16.mxu1 %v1139_v4 }
  0x40   :  { %1013 = vmatpush3.bf16.msra.mxu0 %v1138_v3 }
  0x41   :  { %1035 = vmatpush3.bf16.msra.mxu1 %v1142_v7  ;;  %1051 = vmatprep.subr.bf16.mxu0 %v1154_v13 }
  0x43   :  { %753 = vmatmul.mubr.bf16.vlgmr.msra.gmra.mxu0 %v875_v8 }
  0x44   :  { %1052 = vmatpush3.bf16.msra.mxu0 %v1145_v12  ;;  %793 = vmatmul.mubr.bf16.vlgmr.msra.gmra.mxu1 %v877_v10 }
  0x45   :  { %1053 = vmatprep.subr.bf16.mxu0 %v1154_v13  ;;  %1067 = vmatprep.mubr.msk.bf16.mxu0 %vm1155_vm0, %v1154_v13 }
  0x48   :  { %1054 = vmatpush3.bf16.msra.mxu0 %v1146_v14 }
  0x49   :  { %1055 = vmatprep.subr.bf16.mxu0 %v1154_v13 }
  0x4c   :  { %1056 = vmatpush3.bf16.msra.mxu0 %v1147_v15 }
  0x4d   :  { %1057 = vmatprep.subr.bf16.mxu0 %v1154_v13 }
  0x50   :  { %1058 = vmatpush3.bf16.msra.mxu0 %v1148_v16 }
  0x51   :  { %1059 = vmatprep.subr.bf16.mxu0 %v1154_v13 }
  0x54   :  { %1060 = vmatpush3.bf16.msra.mxu0 %v1149_v17 }
  0x55   :  { %1061 = vmatprep.subr.bf16.mxu0 %v1154_v13 }
  0x58   :  { %1062 = vmatpush3.bf16.msra.mxu0 %v1150_v18 }
  0x59   :  { %1063 = vmatprep.subr.bf16.mxu0 %v1154_v13 }
  0x5c   :  { %1064 = vmatpush3.bf16.msra.mxu0 %v1151_v19 }
  0x5d   :  { %1065 = vmatprep.subr.bf16.mxu0 %v1154_v13 }
  0x60   :  { %1066 = vmatpush3.bf16.msra.mxu0 %v1152_v20 }
  0x63   :  { %1068 = vmatmul.mubr.bf16.vlgmr.msra.gmra.mxu0 %v1153_v21 }
  0xe3   :  { %v970_v22 = vpop.f32.mrf.mxu0 }
  0xe4   :  { %v992_v23 = vpop.f32.mrf.mxu1 }
  0xe5   :  { %v971_v24 = vpop.f32.mrf.mxu0 }
  0xe6   :  { %v993_v25 = vpop.f32.mrf.mxu1  ;;  %v972_v38 = vadd.f32 %v971_v24, %v970_v22 }
  0xe7   :  { %v973_v26 = vpop.f32.mrf.mxu0  ;;  %v994_v39 = vadd.f32 %v993_v25, %v992_v23 }
  0xe8   :  { %v995_v27 = vpop.f32.mrf.mxu1 }
  0xe9   :  { %v974_v28 = vpop.f32.mrf.mxu0  ;;  %v715_v41 = vadd.f32 %v994_v39, %v972_v38 }
  0xea   :  { %v996_v29 = vpop.f32.mrf.mxu1 }
 0x103   :  { %v1014_v30 = vpop.f32.mrf.mxu0 }
 0x104   :  { %v1036_v31 = vpop.f32.mrf.mxu1 }
 0x105   :  { %v1015_v32 = vpop.f32.mrf.mxu0 }
 0x106   :  { %v1037_v33 = vpop.f32.mrf.mxu1  ;;  %v1016_v40 = vadd.f32 %v1015_v32, %v1014_v30 }
 0x107   :  { %v1017_v34 = vpop.f32.mrf.mxu0  ;;  %v1038_v43 = vadd.f32 %v1037_v33, %v1036_v31 }
 0x108   :  { %v1039_v35 = vpop.f32.mrf.mxu1  ;;  %v755_v42 = vadd.f32 %v1016_v40, %v715_v41 }
 0x109   :  { %v1018_v36 = vpop.f32.mrf.mxu0 }
 0x10a   :  { %v1040_v37 = vpop.f32.mrf.mxu1  ;;  %v795_v44 = vadd.f32 %v1038_v43, %v755_v42 }
 0x123   :  { %v834_v45 = vpop.f32.mrf.mxu0 }
 0x124   :  { %v835_v48 = vadd.f32 %v834_v45, %v795_v44 }
 0x125   :  { %v1069_v50 = vpop.f32.mrf.mxu0 }
 0x126   :  { %v853_v51 = vmul.f32 %v952_v46, %v835_v48 }
 0x127   :  { %v837_v53 = vpop.f32.mrf.mxu0 }
 0x128   :  { %v861_v54 = vadd.f32 %v953_v49, %v853_v51 }
 0x129   :  { %v1070_v55 = vpop.f32.mrf.mxu0 }
 0x12a   :  { %v864_v56 = vadd.f32 %v863_v52, %v861_v54 }
 0x12c   :  { %v865_v57 = vpack.c.bf16 %v864_v56, %v864_v56 }
 0x12e   :  { %866 = vst [vmem:[%s1434_s5] sm:$0xf] %v865_v57 }

// kernel: net_recam_forward.85
= control target key start
LH: loop header
LB: loop body
LE: loop exit
PB: predicated region body
PF: predicated region fallthrough
CT: control target
= control target key end

     0   :  { %v265_v1 = vmov 0   ;;  %v178_v18 = vlaneseq  ;;  %s359_s1 = inlined_call_operand.vmem [shape: bf16[128,256], index: 1, kind: input, shape index: {}]   ;;  %s360_s0 = inlined_call_operand.vmem [shape: bf16[8,128], index: 0, kind: input, shape index: {}]   ;;  %s361_s2 = inlined_call_operand.vmem [shape: f32[1,256], index: 2, kind: input, shape index: {}]   ;;  %s362_s3 = inlined_call_operand.vmem [shape: f32[1,256], index: 3, kind: input, shape index: {}]   ;;  %s363_s4 = inlined_call_operand.vmem [shape: bf16[8,256], index: 4, kind: input, shape index: {}]   ;;  %s364_s5 = inlined_call_operand.vmem [shape: bf16[8,256], index: 5, kind: output, shape index: {}]  }
   0x1   :  { %v241_v0 = vld [vmem:[%s359_s1 + $0x74] ss:$8 sps:$4 sm:$0xff]   ;;  %158 = vmatprep.mubr.bf16.mxu0 %v265_v1  ;;  %v243_v2 = vld [vmem:[%s359_s1 + $0x70] ss:$8 sps:$4 sm:$0xff]   ;;  %v244_v3 = vld [vmem:[%s359_s1 + $0x64] ss:$8 sps:$4 sm:$0xff]  }
   0x2   :  { %126 = vmatprep.subr.bf16.mxu0 %v241_v0  ;;  %v246_v4 = vld [vmem:[%s359_s1 + $0x60] ss:$8 sps:$4 sm:$0xff]   ;;  %v247_v5 = vld [vmem:[%s359_s1 + $0x54] ss:$8 sps:$4 sm:$0xff]   ;;  %v249_v6 = vld [vmem:[%s359_s1 + $0x50] ss:$8 sps:$4 sm:$0xff]  }
   0x3   :  { %127 = vmatpush1.bf16.msra.mxu0 %v243_v2  ;;  %v250_v7 = vld [vmem:[%s359_s1 + $0x44] ss:$8 sps:$4 sm:$0xff]   ;;  %v252_v8 = vld [vmem:[%s359_s1 + $0x40] ss:$8 sps:$4 sm:$0xff]   ;;  %v253_v9 = vld [vmem:[%s359_s1 + $0x34] ss:$8 sps:$4 sm:$0xff]  }
   0x4   :  { %128 = vmatprep.subr.bf16.mxu0 %v244_v3  ;;  %v255_v10 = vld [vmem:[%s359_s1 + $0x30] ss:$8 sps:$4 sm:$0xff]   ;;  %v256_v11 = vld [vmem:[%s359_s1 + $0x24] ss:$8 sps:$4 sm:$0xff]   ;;  %v258_v12 = vld [vmem:[%s359_s1 + $0x20] ss:$8 sps:$4 sm:$0xff]  }
   0x5   :  { %v259_v13 = vld [vmem:[%s359_s1 + $0x14] ss:$8 sps:$4 sm:$0xff]   ;;  %v261_v14 = vld [vmem:[%s359_s1 + $0x10] ss:$8 sps:$4 sm:$0xff]   ;;  %v262_v15 = vld [vmem:[%s359_s1 + $0x4] ss:$8 sps:$4 sm:$0xff]  }
   0x6   :  { %v264_v16 = vld [vmem:[%s359_s1] ss:$8 sps:$4 sm:$0xff]   ;;  %v179_v19 = vshrl.u32 %v178_v18, 7 }
   0x7   :  { %129 = vmatpush1.bf16.msra.mxu0 %v246_v4  ;;  %v27_v17 = vld [vmem:[%s360_s0] sm:$0xf] }
   0x8   :  { %130 = vmatprep.subr.bf16.mxu0 %v247_v5  ;;  %v180_v20 = vsub.s32 0, %v179_v19  ;;  %v176_v21 = vld [vmem:[%s361_s2] sm:$0x3]  ;;  %v184_v22 = vsub.s32 1, %v179_v19 }
   0x9   :  { %v190_v23 = vld [vmem:[%s362_s3] sm:$0x3] }
   0xa   :  { %v181_v24 = vrot.slane %v176_v21, %v180_v20  ;;  %v195_v25 = vrot.slane %v190_v23, %v180_v20  ;;  %v185_v26 = vrot.slane %v176_v21, %v184_v22  ;;  %v204_v28 = vld [vmem:[%s363_s4] sm:$0xff]  ;;  %v199_v30 = vrot.slane %v190_v23, %v184_v22 }
   0xb   :  { %131 = vmatpush1.bf16.msra.mxu0 %v249_v6  ;;  %v205_v33 = vunpack.c.l.bf16 %v204_v28  ;;  %v206_v35 = vunpack.c.h.bf16 %v204_v28 }
   0xc   :  { %132 = vmatprep.subr.bf16.mxu0 %v250_v7 }
   0xf   :  { %133 = vmatpush1.bf16.msra.mxu0 %v252_v8 }
  0x10   :  { %134 = vmatprep.subr.bf16.mxu0 %v253_v9 }
  0x13   :  { %135 = vmatpush1.bf16.msra.mxu0 %v255_v10 }
  0x14   :  { %136 = vmatprep.subr.bf16.mxu0 %v256_v11 }
  0x17   :  { %137 = vmatpush1.bf16.msra.mxu0 %v258_v12 }
  0x18   :  { %138 = vmatprep.subr.bf16.mxu0 %v259_v13 }
  0x1b   :  { %139 = vmatpush1.bf16.msra.mxu0 %v261_v14 }
  0x1c   :  { %140 = vmatprep.subr.bf16.mxu0 %v262_v15 }
  0x1f   :  { %141 = vmatpush1.bf16.msra.mxu0 %v264_v16 }
  0x22   :  { %159 = vmatmul.mubr.bf16.vlgmr.msra.gmra.mxu0 %v27_v17 }
  0xe2   :  { %v160_v27 = vpop.f32.mrf.mxu0 }
  0xe3   :  { %v188_v29 = vmul.f32 %v181_v24, %v160_v27 }
  0xe4   :  { %v162_v31 = vpop.f32.mrf.mxu0 }
  0xe5   :  { %v202_v32 = vadd.f32 %v195_v25, %v188_v29  ;;  %v189_v34 = vmul.f32 %v185_v26, %v162_v31 }
  0xe6   :  { %v164_v36 = vpop.f32.mrf.mxu0 }
  0xe7   :  { %v203_v37 = vadd.f32 %v199_v30, %v189_v34  ;;  %v207_v39 = vadd.f32 %v205_v33, %v202_v32 }
  0xe8   :  { %v165_v38 = vpop.f32.mrf.mxu0 }
  0xe9   :  { %v208_v40 = vadd.f32 %v206_v35, %v203_v37 }
  0xeb   :  { %v239_v41 = vpack.c.bf16 %v208_v40, %v207_v39 }
  0xed   :  { %217 = vst [vmem:[%s364_s5] sm:$0xff] %v239_v41 }

// kernel: net_recam_forward.83
= control target key start
LH: loop header
LB: loop body
LE: loop exit
PB: predicated region body
PF: predicated region fallthrough
CT: control target
= control target key end

     0   :  { %v234_v0 = vmov 0.0   ;;  %vm235_vm0 = vmmov 0   ;;  %s313_s1 = inlined_call_operand.vmem [shape: bf16[128,128], index: 1, kind: input, shape index: {}]   ;;  %s314_s0 = inlined_call_operand.vmem [shape: bf16[8,128], index: 0, kind: input, shape index: {}]   ;;  %s315_s2 = inlined_call_operand.vmem [shape: f32[1,128], index: 2, kind: input, shape index: {}]   ;;  %s316_s3 = inlined_call_operand.vmem [shape: f32[1,128], index: 3, kind: input, shape index: {}]   ;;  %s317_s4 = inlined_call_operand.vmem [shape: f32[1,128], index: 4, kind: input, shape index: {}]   ;;  %s318_s5 = inlined_call_operand.vmem [shape: f32[1,128], index: 5, kind: input, shape index: {}]   ;;  %s319_s6 = inlined_call_operand.vmem [shape: bf16[8,128], index: 6, kind: output, shape index: {}]  }
   0x1   :  { %204 = vmatprep.subr.bf16.mxu0 %v234_v0  ;;  %v226_v1 = vld [vmem:[%s313_s1 + $0x38] sm:$0xff]   ;;  %220 = vmatprep.mubr.msk.bf16.mxu0 %vm235_vm0, %v234_v0  ;;  %v227_v2 = vld [vmem:[%s313_s1 + $0x30] sm:$0xff]   ;;  %v228_v3 = vld [vmem:[%s313_s1 + $0x28] sm:$0xff]  }
   0x2   :  { %205 = vmatpush3.bf16.msra.mxu0 %v226_v1  ;;  %v229_v4 = vld [vmem:[%s313_s1 + $0x20] sm:$0xff]   ;;  %v230_v7 = vld [vmem:[%s313_s1 + $0x18] sm:$0xff]   ;;  %v231_v10 = vld [vmem:[%s313_s1 + $0x10] sm:$0xff]  }
   0x3   :  { %206 = vmatprep.subr.bf16.mxu0 %v234_v0  ;;  %v29_v5 = vld [vmem:[%s314_s0] sm:$0xf]  ;;  %v232_v13 = vld [vmem:[%s313_s1 + $0x8] sm:$0xff]  }
   0x4   :  { %v30_v6 = vunpack.c.l.bf16 %v29_v5  ;;  %v183_v8 = vld [vmem:[%s315_s2] ss:$0 sm:$0xff] }
   0x5   :  { %v184_v11 = vld [vmem:[%s316_s3] ss:$0 sm:$0xff] }
   0x6   :  { %207 = vmatpush3.bf16.msra.mxu0 %v227_v2  ;;  %v38_v9 = vmul.f32 %v183_v8, %v30_v6  ;;  %v233_v15 = vld [vmem:[%s313_s1] sm:$0xff]  }
   0x7   :  { %208 = vmatprep.subr.bf16.mxu0 %v234_v0  ;;  %v193_v17 = vld [vmem:[%s317_s4] ss:$0 sm:$0xff] }
   0x8   :  { %v46_v12 = vadd.f32 %v184_v11, %v38_v9  ;;  %v194_v19 = vld [vmem:[%s318_s5] ss:$0 sm:$0xff] }
   0xa   :  { %209 = vmatpush3.bf16.msra.mxu0 %v228_v3  ;;  %v47_v14 = vmax.f32 %v46_v12, 0.0 }
   0xb   :  { %210 = vmatprep.subr.bf16.mxu0 %v234_v0 }
   0xc   :  { %v48_v16 = vpack.c.bf16 %v47_v14, %v47_v14 }
   0xe   :  { %211 = vmatpush3.bf16.msra.mxu0 %v229_v4 }
   0xf   :  { %212 = vmatprep.subr.bf16.mxu0 %v234_v0 }
  0x12   :  { %213 = vmatpush3.bf16.msra.mxu0 %v230_v7 }
  0x13   :  { %214 = vmatprep.subr.bf16.mxu0 %v234_v0 }
  0x16   :  { %215 = vmatpush3.bf16.msra.mxu0 %v231_v10 }
  0x17   :  { %216 = vmatprep.subr.bf16.mxu0 %v234_v0 }
  0x1a   :  { %217 = vmatpush3.bf16.msra.mxu0 %v232_v13 }
  0x1b   :  { %218 = vmatprep.subr.bf16.mxu0 %v234_v0 }
  0x1e   :  { %219 = vmatpush3.bf16.msra.mxu0 %v233_v15 }
  0x21   :  { %221 = vmatmul.mubr.bf16.vlgmr.msra.gmra.mxu0 %v48_v16 }
  0xe1   :  { %v148_v18 = vpop.f32.mrf.mxu0 }
  0xe2   :  { %v167_v20 = vmul.f32 %v193_v17, %v148_v18 }
  0xe3   :  { %v222_v21 = vpop.f32.mrf.mxu0 }
  0xe4   :  { %v175_v22 = vadd.f32 %v194_v19, %v167_v20 }
  0xe5   :  { %v151_v23 = vpop.f32.mrf.mxu0 }
  0xe6   :  { %v176_v24 = vmax.f32 %v175_v22, 0.0 }
  0xe7   :  { %v223_v25 = vpop.f32.mrf.mxu0 }
  0xe8   :  { %v177_v26 = vpack.c.bf16 %v176_v24, %v176_v24 }
  0xea   :  { %178 = vst [vmem:[%s319_s6] sm:$0xf] %v177_v26 }

// kernel: net_recam_forward.82
= control target key start
LH: loop header
LB: loop body
LE: loop exit
PB: predicated region body
PF: predicated region fallthrough
CT: control target
= control target key end

     0   :  { %v284_v1 = vmov 0   ;;  %v200_v25 = vlaneseq  ;;  %s386_s1 = inlined_call_operand.vmem [shape: bf16[128,256], index: 1, kind: input, shape index: {}]   ;;  %s387_s0 = inlined_call_operand.vmem [shape: bf16[8,128], index: 0, kind: input, shape index: {}]   ;;  %s388_s2 = inlined_call_operand.vmem [shape: f32[1,128], index: 2, kind: input, shape index: {}]   ;;  %s389_s3 = inlined_call_operand.vmem [shape: f32[1,128], index: 3, kind: input, shape index: {}]   ;;  %s390_s4 = inlined_call_operand.vmem [shape: f32[1,256], index: 4, kind: input, shape index: {}]   ;;  %s391_s5 = inlined_call_operand.vmem [shape: f32[1,256], index: 5, kind: input, shape index: {}]   ;;  %s392_s6 = inlined_call_operand.vmem [shape: bf16[8,256], index: 6, kind: output, shape index: {}]  }
   0x1   :  { %v260_v0 = vld [vmem:[%s386_s1 + $0x74] ss:$8 sps:$4 sm:$0xff]   ;;  %180 = vmatprep.mubr.bf16.mxu0 %v284_v1  ;;  %v262_v2 = vld [vmem:[%s386_s1 + $0x70] ss:$8 sps:$4 sm:$0xff]   ;;  %v263_v3 = vld [vmem:[%s386_s1 + $0x64] ss:$8 sps:$4 sm:$0xff]  }
   0x2   :  { %148 = vmatprep.subr.bf16.mxu0 %v260_v0  ;;  %v265_v4 = vld [vmem:[%s386_s1 + $0x60] ss:$8 sps:$4 sm:$0xff]   ;;  %v266_v5 = vld [vmem:[%s386_s1 + $0x54] ss:$8 sps:$4 sm:$0xff]   ;;  %v268_v6 = vld [vmem:[%s386_s1 + $0x50] ss:$8 sps:$4 sm:$0xff]  }
   0x3   :  { %149 = vmatpush1.bf16.msra.mxu0 %v262_v2  ;;  %v269_v7 = vld [vmem:[%s386_s1 + $0x44] ss:$8 sps:$4 sm:$0xff]   ;;  %v271_v8 = vld [vmem:[%s386_s1 + $0x40] ss:$8 sps:$4 sm:$0xff]   ;;  %v272_v10 = vld [vmem:[%s386_s1 + $0x34] ss:$8 sps:$4 sm:$0xff]  }
   0x4   :  { %150 = vmatprep.subr.bf16.mxu0 %v263_v3  ;;  %v30_v9 = vld [vmem:[%s387_s0] sm:$0xf]  ;;  %v274_v12 = vld [vmem:[%s386_s1 + $0x30] ss:$8 sps:$4 sm:$0xff]   ;;  %v275_v14 = vld [vmem:[%s386_s1 + $0x24] ss:$8 sps:$4 sm:$0xff]  }
   0x5   :  { %v31_v11 = vunpack.c.l.bf16 %v30_v9  ;;  %v239_v13 = vld [vmem:[%s388_s2] ss:$0 sm:$0xff]  ;;  %v278_v18 = vld [vmem:[%s386_s1 + $0x14] ss:$8 sps:$4 sm:$0xff]   ;;  %v280_v20 = vld [vmem:[%s386_s1 + $0x10] ss:$8 sps:$4 sm:$0xff]  }
   0x6   :  { %v277_v16 = vld [vmem:[%s386_s1 + $0x20] ss:$8 sps:$4 sm:$0xff]   ;;  %v281_v21 = vld [vmem:[%s386_s1 + $0x4] ss:$8 sps:$4 sm:$0xff]   ;;  %v201_v26 = vshrl.u32 %v200_v25, 7 }
   0x7   :  { %151 = vmatpush1.bf16.msra.mxu0 %v265_v4  ;;  %v39_v15 = vmul.f32 %v239_v13, %v31_v11  ;;  %v240_v17 = vld [vmem:[%s389_s3] ss:$0 sm:$0xff] }
   0x8   :  { %152 = vmatprep.subr.bf16.mxu0 %v266_v5  ;;  %v283_v23 = vld [vmem:[%s386_s1] ss:$8 sps:$4 sm:$0xff]   ;;  %v202_v27 = vsub.s32 0, %v201_v26  ;;  %v206_v29 = vsub.s32 1, %v201_v26 }
   0x9   :  { %v47_v19 = vadd.f32 %v240_v17, %v39_v15  ;;  %v198_v28 = vld [vmem:[%s390_s4] sm:$0x3] }
   0xa   :  { %v203_v30 = vrot.slane %v198_v28, %v202_v27  ;;  %v212_v31 = vld [vmem:[%s391_s5] sm:$0x3]  ;;  %v207_v32 = vrot.slane %v198_v28, %v206_v29 }
   0xb   :  { %153 = vmatpush1.bf16.msra.mxu0 %v268_v6  ;;  %v48_v22 = vmax.f32 %v47_v19, 0.0  ;;  %v217_v35 = vrot.slane %v212_v31, %v202_v27  ;;  %v221_v36 = vrot.slane %v212_v31, %v206_v29 }
   0xc   :  { %154 = vmatprep.subr.bf16.mxu0 %v269_v7 }
   0xd   :  { %v49_v24 = vpack.c.bf16 %v48_v22, %v48_v22 }
   0xf   :  { %155 = vmatpush1.bf16.msra.mxu0 %v271_v8 }
  0x10   :  { %156 = vmatprep.subr.bf16.mxu0 %v272_v10 }
  0x13   :  { %157 = vmatpush1.bf16.msra.mxu0 %v274_v12 }
  0x14   :  { %158 = vmatprep.subr.bf16.mxu0 %v275_v14 }
  0x17   :  { %159 = vmatpush1.bf16.msra.mxu0 %v277_v16 }
  0x18   :  { %160 = vmatprep.subr.bf16.mxu0 %v278_v18 }
  0x1b   :  { %161 = vmatpush1.bf16.msra.mxu0 %v280_v20 }
  0x1c   :  { %162 = vmatprep.subr.bf16.mxu0 %v281_v21 }
  0x1f   :  { %163 = vmatpush1.bf16.msra.mxu0 %v283_v23 }
  0x22   :  { %181 = vmatmul.mubr.bf16.vlgmr.msra.gmra.mxu0 %v49_v24 }
  0xe2   :  { %v182_v33 = vpop.f32.mrf.mxu0 }
  0xe3   :  { %v210_v34 = vmul.f32 %v203_v30, %v182_v33 }
  0xe4   :  { %v184_v37 = vpop.f32.mrf.mxu0 }
  0xe5   :  { %v211_v38 = vmul.f32 %v207_v32, %v184_v37  ;;  %v224_v40 = vadd.f32 %v217_v35, %v210_v34 }
  0xe6   :  { %v186_v39 = vpop.f32.mrf.mxu0 }
  0xe7   :  { %v225_v41 = vadd.f32 %v221_v36, %v211_v38 }
  0xe8   :  { %v187_v42 = vpop.f32.mrf.mxu0 }
  0xe9   :  { %v258_v43 = vpack.c.bf16 %v225_v41, %v224_v40 }
  0xeb   :  { %234 = vst [vmem:[%s392_s6] sm:$0xff] %v258_v43 }

// kernel: net_recam_forward.87
= control target key start
LH: loop header
LB: loop body
LE: loop exit
PB: predicated region body
PF: predicated region fallthrough
CT: control target
= control target key end

     0   :  { %v34_v5 = vlaneseq  ;;  %s419_s1 = inlined_call_operand.vmem [shape: bf16[256,128], index: 1, kind: input, shape index: {}]   ;;  %s420_s0 = inlined_call_operand.vmem [shape: bf16[8,256], index: 0, kind: input, shape index: {}]   ;;  %s421_s2 = inlined_call_operand.vmem [shape: f32[1,256], index: 2, kind: input, shape index: {}]   ;;  %s422_s3 = inlined_call_operand.vmem [shape: f32[1,256], index: 3, kind: input, shape index: {}]   ;;  %s423_s4 = inlined_call_operand.vmem [shape: f32[1,128], index: 4, kind: input, shape index: {}]   ;;  %s424_s5 = inlined_call_operand.vmem [shape: f32[1,128], index: 5, kind: input, shape index: {}]   ;;  %s425_s6 = inlined_call_operand.vmem [shape: bf16[8,128], index: 6, kind: output, shape index: {}]  }
   0x1   :  { %v302_v0 = vld [vmem:[%s419_s1 + $0x78] sm:$0xff]   ;;  %v304_v2 = vld [vmem:[%s419_s1 + $0x70] sm:$0xff]   ;;  %v306_v4 = vld [vmem:[%s419_s1 + $0x68] sm:$0xff]  }
   0x2   :  { %v303_v1 = vld [vmem:[%s419_s1 + $0x38] sm:$0xff]   ;;  %280 = vmatprep.subr.bf16.mxu0 %v302_v0  ;;  %v305_v3 = vld [vmem:[%s419_s1 + $0x30] sm:$0xff]   ;;  %v307_v6 = vld [vmem:[%s419_s1 + $0x28] sm:$0xff]   ;;  %v35_v8 = vshrl.u32 %v34_v5, 7 }
   0x3   :  { %281 = vmatpush3.bf16.msra.mxu0 %v303_v1  ;;  %v308_v7 = vld [vmem:[%s419_s1 + $0x60] sm:$0xff]   ;;  %v310_v10 = vld [vmem:[%s419_s1 + $0x58] sm:$0xff]   ;;  %v312_v14 = vld [vmem:[%s419_s1 + $0x50] sm:$0xff]  }
   0x4   :  { %282 = vmatprep.subr.bf16.mxu0 %v304_v2  ;;  %v309_v9 = vld [vmem:[%s419_s1 + $0x20] sm:$0xff]   ;;  %v36_v11 = vsub.s32 0, %v35_v8  ;;  %v40_v12 = vsub.s32 1, %v35_v8  ;;  %v311_v13 = vld [vmem:[%s419_s1 + $0x18] sm:$0xff]   ;;  %v313_v24 = vld [vmem:[%s419_s1 + $0x10] sm:$0xff]  }
   0x5   :  { %v29_v15 = vld [vmem:[%s420_s0] sm:$0xff]  ;;  %v314_v27 = vld [vmem:[%s419_s1 + $0x48] sm:$0xff]  }
   0x6   :  { %v32_v16 = vld [vmem:[%s421_s2] sm:$0x3]  ;;  %v30_v18 = vunpack.c.l.bf16 %v29_v15  ;;  %v31_v19 = vunpack.c.h.bf16 %v29_v15  ;;  %v315_v30 = vld [vmem:[%s419_s1 + $0x8] sm:$0xff]  }
   0x7   :  { %283 = vmatpush3.bf16.msra.mxu0 %v305_v3  ;;  %v46_v17 = vld [vmem:[%s422_s3] sm:$0x3]  ;;  %v37_v20 = vrot.slane %v32_v16, %v36_v11  ;;  %v41_v21 = vrot.slane %v32_v16, %v40_v12 }
   0x8   :  { %284 = vmatprep.subr.bf16.mxu0 %v306_v4  ;;  %v51_v22 = vrot.slane %v46_v17, %v36_v11  ;;  %v55_v23 = vrot.slane %v46_v17, %v40_v12  ;;  %v316_v32 = vld [vmem:[%s419_s1 + $0x40] sm:$0xff]  }
   0x9   :  { %v45_v25 = vmul.f32 %v41_v21, %v31_v19  ;;  %v44_v26 = vmul.f32 %v37_v20, %v30_v18  ;;  %v317_v35 = vld [vmem:[%s419_s1] sm:$0xff]  }
   0xa   :  { %v278_v39 = vld [vmem:[%s423_s4] ss:$0 sm:$0xff] }
   0xb   :  { %285 = vmatpush3.bf16.msra.mxu0 %v307_v6  ;;  %v59_v28 = vadd.f32 %v55_v23, %v45_v25  ;;  %v58_v29 = vadd.f32 %v51_v22, %v44_v26  ;;  %v279_v41 = vld [vmem:[%s424_s5] ss:$0 sm:$0xff] }
   0xc   :  { %286 = vmatprep.subr.bf16.mxu0 %v308_v7 }
   0xd   :  { %v61_v31 = vmax.f32 %v59_v28, 0.0  ;;  %v60_v34 = vmax.f32 %v58_v29, 0.0 }
   0xf   :  { %287 = vmatpush3.bf16.msra.mxu0 %v309_v9  ;;  %v63_v33 = vpack.c.bf16 %v61_v31, %v61_v31  ;;  %v62_v36 = vpack.c.bf16 %v60_v34, %v60_v34 }
  0x10   :  { %288 = vmatprep.subr.bf16.mxu0 %v310_v10 }
  0x11   :  { %225 = vmatprep.mubr.bf16.mxu0 %v63_v33 }
  0x13   :  { %289 = vmatpush3.bf16.msra.mxu0 %v311_v13 }
  0x14   :  { %290 = vmatprep.subr.bf16.mxu0 %v312_v14 }
  0x17   :  { %291 = vmatpush3.bf16.msra.mxu0 %v313_v24 }
  0x18   :  { %292 = vmatprep.subr.bf16.mxu0 %v314_v27 }
  0x1b   :  { %293 = vmatpush3.bf16.msra.mxu0 %v315_v30 }
  0x1c   :  { %294 = vmatprep.subr.bf16.mxu0 %v316_v32 }
  0x1f   :  { %295 = vmatpush3.bf16.msra.mxu0 %v317_v35 }
  0x22   :  { %226 = vmatmul.mubr.bf16.vlgmr.msra.gmra.mxu0 %v62_v36 }
  0xe2   :  { %v296_v37 = vpop.f32.mrf.mxu0 }
  0xe4   :  { %v297_v38 = vpop.f32.mrf.mxu0 }
  0xe5   :  { %v298_v40 = vadd.f32 %v297_v38, %v296_v37 }
  0xe6   :  { %v299_v42 = vpop.f32.mrf.mxu0 }
  0xe7   :  { %v246_v43 = vmul.f32 %v298_v40, %v278_v39 }
  0xe8   :  { %v300_v44 = vpop.f32.mrf.mxu0 }
  0xe9   :  { %v254_v45 = vadd.f32 %v279_v41, %v246_v43 }
  0xeb   :  { %v255_v46 = vmax.f32 %v254_v45, 0.0 }
  0xed   :  { %v256_v47 = vpack.c.bf16 %v255_v46, %v255_v46 }
  0xef   :  { %257 = vst [vmem:[%s425_s6] sm:$0xf] %v256_v47 }

// kernel: net_recam_forward.88
= control target key start
LH: loop header
LB: loop body
LE: loop exit
PB: predicated region body
PF: predicated region fallthrough
CT: control target
= control target key end

     0   :  { %s2059_s1 = inlined_call_operand.vmem [shape: bf16[1152,256], index: 1, kind: input, shape index: {}]   ;;  %s2060_s0 = inlined_call_operand.vmem [shape: bf16[8,1152], index: 0, kind: input, shape index: {}]   ;;  %s2061_s2 = inlined_call_operand.vmem [shape: f32[1,256], index: 2, kind: input, shape index: {}]   ;;  %s2062_s3 = inlined_call_operand.vmem [shape: f32[1,256], index: 3, kind: input, shape index: {}]   ;;  %s2063_s4 = inlined_call_operand.vmem [shape: bf16[8,256], index: 4, kind: output, shape index: {}]  }
   0x1   :  { %v1340_v0 = vld [vmem:[%s2059_s1 + $0x74] ss:$8 sps:$4 sm:$0xff]   ;;  %v1344_v2 = vld [vmem:[%s2059_s1 + $0x70] ss:$8 sps:$4 sm:$0xff]   ;;  %v1346_v4 = vld [vmem:[%s2059_s1 + $0x64] ss:$8 sps:$4 sm:$0xff]  }
   0x2   :  { %v1342_v1 = vld [vmem:[%s2059_s1 + $0x174] ss:$8 sps:$4 sm:$0xff]   ;;  %927 = vmatprep.subr.bf16.mxu0 %v1340_v0  ;;  %v1345_v3 = vld [vmem:[%s2059_s1 + $0x170] ss:$8 sps:$4 sm:$0xff]   ;;  %v1348_v5 = vld [vmem:[%s2059_s1 + $0x164] ss:$8 sps:$4 sm:$0xff]  }
   0x3   :  { %968 = vmatprep.subr.bf16.mxu1 %v1342_v1  ;;  %928 = vmatpush1.bf16.msra.mxu0 %v1344_v2  ;;  %v1350_v6 = vld [vmem:[%s2059_s1 + $0x60] ss:$8 sps:$4 sm:$0xff]   ;;  %v1352_v8 = vld [vmem:[%s2059_s1 + $0x54] ss:$8 sps:$4 sm:$0xff]   ;;  %v1356_v10 = vld [vmem:[%s2059_s1 + $0x50] ss:$8 sps:$4 sm:$0xff]  }
   0x4   :  { %969 = vmatpush1.bf16.msra.mxu1 %v1345_v3  ;;  %929 = vmatprep.subr.bf16.mxu0 %v1346_v4  ;;  %v1351_v7 = vld [vmem:[%s2059_s1 + $0x160] ss:$8 sps:$4 sm:$0xff]   ;;  %v1354_v9 = vld [vmem:[%s2059_s1 + $0x154] ss:$8 sps:$4 sm:$0xff]   ;;  %v1357_v11 = vld [vmem:[%s2059_s1 + $0x150] ss:$8 sps:$4 sm:$0xff]  }
   0x5   :  { %970 = vmatprep.subr.bf16.mxu1 %v1348_v5  ;;  %v1358_v12 = vld [vmem:[%s2059_s1 + $0x44] ss:$8 sps:$4 sm:$0xff]   ;;  %v1362_v14 = vld [vmem:[%s2059_s1 + $0x40] ss:$8 sps:$4 sm:$0xff]   ;;  %v1364_v16 = vld [vmem:[%s2059_s1 + $0x34] ss:$8 sps:$4 sm:$0xff]  }
   0x6   :  { %v1360_v13 = vld [vmem:[%s2059_s1 + $0x144] ss:$8 sps:$4 sm:$0xff]   ;;  %v1363_v15 = vld [vmem:[%s2059_s1 + $0x140] ss:$8 sps:$4 sm:$0xff]   ;;  %v1366_v17 = vld [vmem:[%s2059_s1 + $0x134] ss:$8 sps:$4 sm:$0xff]  }
   0x7   :  { %930 = vmatpush1.bf16.msra.mxu0 %v1350_v6  ;;  %v1368_v18 = vld [vmem:[%s2059_s1 + $0x30] ss:$8 sps:$4 sm:$0xff]   ;;  %v1370_v20 = vld [vmem:[%s2059_s1 + $0x24] ss:$8 sps:$4 sm:$0xff]   ;;  %v1374_v22 = vld [vmem:[%s2059_s1 + $0x20] ss:$8 sps:$4 sm:$0xff]  }
   0x8   :  { %971 = vmatpush1.bf16.msra.mxu1 %v1351_v7  ;;  %931 = vmatprep.subr.bf16.mxu0 %v1352_v8  ;;  %v1369_v19 = vld [vmem:[%s2059_s1 + $0x130] ss:$8 sps:$4 sm:$0xff]   ;;  %v1372_v21 = vld [vmem:[%s2059_s1 + $0x124] ss:$8 sps:$4 sm:$0xff]   ;;  %v1375_v23 = vld [vmem:[%s2059_s1 + $0x120] ss:$8 sps:$4 sm:$0xff]  }
   0x9   :  { %972 = vmatprep.subr.bf16.mxu1 %v1354_v9  ;;  %v1376_v24 = vld [vmem:[%s2059_s1 + $0x14] ss:$8 sps:$4 sm:$0xff]   ;;  %v1380_v26 = vld [vmem:[%s2059_s1 + $0x10] ss:$8 sps:$4 sm:$0xff]   ;;  %v1382_v28 = vld [vmem:[%s2059_s1 + $0x4] ss:$8 sps:$4 sm:$0xff]  }
   0xa   :  { %v1378_v25 = vld [vmem:[%s2059_s1 + $0x114] ss:$8 sps:$4 sm:$0xff]   ;;  %v1381_v27 = vld [vmem:[%s2059_s1 + $0x110] ss:$8 sps:$4 sm:$0xff]   ;;  %v1384_v29 = vld [vmem:[%s2059_s1 + $0x104] ss:$8 sps:$4 sm:$0xff]  }
   0xb   :  { %932 = vmatpush1.bf16.msra.mxu0 %v1356_v10  ;;  %v1386_v30 = vld [vmem:[%s2059_s1] ss:$8 sps:$4 sm:$0xff]   ;;  %v1388_v32 = vld [vmem:[%s2059_s1 + $0xf4] ss:$8 sps:$4 sm:$0xff]   ;;  %v1392_v34 = vld [vmem:[%s2059_s1 + $0xf0] ss:$8 sps:$4 sm:$0xff]  }
   0xc   :  { %973 = vmatpush1.bf16.msra.mxu1 %v1357_v11  ;;  %933 = vmatprep.subr.bf16.mxu0 %v1358_v12  ;;  %v1387_v31 = vld [vmem:[%s2059_s1 + $0x100] ss:$8 sps:$4 sm:$0xff]   ;;  %v1390_v33 = vld [vmem:[%s2059_s1 + $0x1f4] ss:$8 sps:$4 sm:$0xff]   ;;  %v1393_v35 = vld [vmem:[%s2059_s1 + $0x1f0] ss:$8 sps:$4 sm:$0xff]  }
   0xd   :  { %974 = vmatprep.subr.bf16.mxu1 %v1360_v13  ;;  %v1394_v36 = vld [vmem:[%s2059_s1 + $0xe4] ss:$8 sps:$4 sm:$0xff]   ;;  %v1398_v38 = vld [vmem:[%s2059_s1 + $0xe0] ss:$8 sps:$4 sm:$0xff]   ;;  %v1400_v40 = vld [vmem:[%s2059_s1 + $0xd4] ss:$8 sps:$4 sm:$0xff]  }
   0xe   :  { %v1396_v37 = vld [vmem:[%s2059_s1 + $0x1e4] ss:$8 sps:$4 sm:$0xff]   ;;  %v1399_v39 = vld [vmem:[%s2059_s1 + $0x1e0] ss:$8 sps:$4 sm:$0xff]   ;;  %v1402_v41 = vld [vmem:[%s2059_s1 + $0x1d4] ss:$8 sps:$4 sm:$0xff]  }
   0xf   :  { %934 = vmatpush1.bf16.msra.mxu0 %v1362_v14  ;;  %v1404_v42 = vld [vmem:[%s2059_s1 + $0xd0] ss:$8 sps:$4 sm:$0xff]   ;;  %v1406_v44 = vld [vmem:[%s2059_s1 + $0xc4] ss:$8 sps:$4 sm:$0xff]   ;;  %v1410_v49 = vld [vmem:[%s2059_s1 + $0xc0] ss:$8 sps:$4 sm:$0xff]  }
  0x10   :  { %975 = vmatpush1.bf16.msra.mxu1 %v1363_v15  ;;  %935 = vmatprep.subr.bf16.mxu0 %v1364_v16  ;;  %v1405_v43 = vld [vmem:[%s2059_s1 + $0x1d0] ss:$8 sps:$4 sm:$0xff]   ;;  %v1408_v45 = vld [vmem:[%s2059_s1 + $0x1c4] ss:$8 sps:$4 sm:$0xff]   ;;  %v1411_v50 = vld [vmem:[%s2059_s1 + $0x1c0] ss:$8 sps:$4 sm:$0xff]  }
  0x11   :  { %976 = vmatprep.subr.bf16.mxu1 %v1366_v17  ;;  %v24_v46 = vld [vmem:[%s2060_s0] sm:$0xff]  ;;  %v25_v48 = vld [vmem:[%s2060_s0 + $0x8] sm:$0xff]  ;;  %v1412_v52 = vld [vmem:[%s2059_s1 + $0xb4] ss:$8 sps:$4 sm:$0xff]  }
  0x12   :  { %v1185_v47 = vcombine.high %v24_v46, %v24_v46  ;;  %v1187_v51 = vcombine.high %v25_v48, %v25_v48  ;;  %v1414_v53 = vld [vmem:[%s2059_s1 + $0x1b4] ss:$8 sps:$4 sm:$0xff]   ;;  %v1416_v54 = vld [vmem:[%s2059_s1 + $0xb0] ss:$8 sps:$4 sm:$0xff]   ;;  %v1418_v56 = vld [vmem:[%s2059_s1 + $0xa4] ss:$8 sps:$4 sm:$0xff]   ;;  %v1184_v6 = vcombine.low %v24_v46, %v24_v46  ;;  %v1186_v7 = vcombine.low %v25_v48, %v25_v48 }
  0x13   :  { %936 = vmatpush1.bf16.msra.mxu0 %v1368_v18  ;;  %v1417_v55 = vld [vmem:[%s2059_s1 + $0x1b0] ss:$8 sps:$4 sm:$0xff]   ;;  %v1420_v57 = vld [vmem:[%s2059_s1 + $0x1a4] ss:$8 sps:$4 sm:$0xff]   ;;  %v1422_v58 = vld [vmem:[%s2059_s1 + $0xa0] ss:$8 sps:$4 sm:$0xff]  }
  0x14   :  { %977 = vmatpush1.bf16.msra.mxu1 %v1369_v19  ;;  %937 = vmatprep.subr.bf16.mxu0 %v1370_v20  ;;  %v1423_v59 = vld [vmem:[%s2059_s1 + $0x1a0] ss:$8 sps:$4 sm:$0xff]   ;;  %v1424_v60 = vld [vmem:[%s2059_s1 + $0x94] ss:$8 sps:$4 sm:$0xff]   ;;  %v1428_v62 = vld [vmem:[%s2059_s1 + $0x90] ss:$8 sps:$4 sm:$0xff]  }
  0x15   :  { %978 = vmatprep.subr.bf16.mxu1 %v1372_v21  ;;  %959 = vmatprep.mubr.bf16.mxu0 %v1185_v47  ;;  %v1426_v61 = vld [vmem:[%s2059_s1 + $0x194] ss:$8 sps:$4 sm:$0xff]   ;;  %v1429_v63 = vld [vmem:[%s2059_s1 + $0x190] ss:$8 sps:$4 sm:$0xff]   ;;  %v1430_v0 = vld [vmem:[%s2059_s1 + $0x84] ss:$8 sps:$4 sm:$0xff]  }
  0x16   :  { %1000 = vmatprep.mubr.bf16.mxu1 %v1187_v51  ;;  %v1432_v1 = vld [vmem:[%s2059_s1 + $0x184] ss:$8 sps:$4 sm:$0xff]   ;;  %v1434_v2 = vld [vmem:[%s2059_s1 + $0x80] ss:$8 sps:$4 sm:$0xff]   ;;  %v1442_v4 = vld [vmem:[%s2059_s1 + $0x274] ss:$8 sps:$4 sm:$0xff]  }
  0x17   :  { %938 = vmatpush1.bf16.msra.mxu0 %v1374_v22  ;;  %v1435_v3 = vld [vmem:[%s2059_s1 + $0x180] ss:$8 sps:$4 sm:$0xff]   ;;  %v1445_v5 = vld [vmem:[%s2059_s1 + $0x374] ss:$8 sps:$4 sm:$0xff]   ;;  %v1440_v8 = vld [vmem:[%s2059_s1 + $0x270] ss:$8 sps:$4 sm:$0xff]  }
  0x18   :  { %979 = vmatpush1.bf16.msra.mxu1 %v1375_v23  ;;  %939 = vmatprep.subr.bf16.mxu0 %v1376_v24  ;;  %v1443_v9 = vld [vmem:[%s2059_s1 + $0x370] ss:$8 sps:$4 sm:$0xff]   ;;  %v1448_v10 = vld [vmem:[%s2059_s1 + $0x264] ss:$8 sps:$4 sm:$0xff]   ;;  %v1446_v12 = vld [vmem:[%s2059_s1 + $0x260] ss:$8 sps:$4 sm:$0xff]  }
  0x19   :  { %980 = vmatprep.subr.bf16.mxu1 %v1378_v25  ;;  %v1451_v11 = vld [vmem:[%s2059_s1 + $0x364] ss:$8 sps:$4 sm:$0xff]   ;;  %v1449_v13 = vld [vmem:[%s2059_s1 + $0x360] ss:$8 sps:$4 sm:$0xff]   ;;  %v1454_v14 = vld [vmem:[%s2059_s1 + $0x254] ss:$8 sps:$4 sm:$0xff]  }
  0x1a   :  { %v1457_v15 = vld [vmem:[%s2059_s1 + $0x354] ss:$8 sps:$4 sm:$0xff]   ;;  %v1452_v16 = vld [vmem:[%s2059_s1 + $0x250] ss:$8 sps:$4 sm:$0xff]   ;;  %v1460_v18 = vld [vmem:[%s2059_s1 + $0x244] ss:$8 sps:$4 sm:$0xff]  }
  0x1b   :  { %940 = vmatpush1.bf16.msra.mxu0 %v1380_v26  ;;  %v1455_v17 = vld [vmem:[%s2059_s1 + $0x350] ss:$8 sps:$4 sm:$0xff]   ;;  %v1463_v19 = vld [vmem:[%s2059_s1 + $0x344] ss:$8 sps:$4 sm:$0xff]   ;;  %v1458_v20 = vld [vmem:[%s2059_s1 + $0x240] ss:$8 sps:$4 sm:$0xff]  }
  0x1c   :  { %981 = vmatpush1.bf16.msra.mxu1 %v1381_v27  ;;  %941 = vmatprep.subr.bf16.mxu0 %v1382_v28  ;;  %v1461_v21 = vld [vmem:[%s2059_s1 + $0x340] ss:$8 sps:$4 sm:$0xff]   ;;  %v1466_v22 = vld [vmem:[%s2059_s1 + $0x234] ss:$8 sps:$4 sm:$0xff]   ;;  %v1464_v24 = vld [vmem:[%s2059_s1 + $0x230] ss:$8 sps:$4 sm:$0xff]  }
  0x1d   :  { %982 = vmatprep.subr.bf16.mxu1 %v1384_v29  ;;  %v1469_v23 = vld [vmem:[%s2059_s1 + $0x334] ss:$8 sps:$4 sm:$0xff]   ;;  %v1467_v25 = vld [vmem:[%s2059_s1 + $0x330] ss:$8 sps:$4 sm:$0xff]   ;;  %v1472_v26 = vld [vmem:[%s2059_s1 + $0x224] ss:$8 sps:$4 sm:$0xff]  }
  0x1e   :  { %v1475_v27 = vld [vmem:[%s2059_s1 + $0x324] ss:$8 sps:$4 sm:$0xff]   ;;  %v1470_v28 = vld [vmem:[%s2059_s1 + $0x220] ss:$8 sps:$4 sm:$0xff]   ;;  %v1505_v51 = vld [vmem:[%s2059_s1 + $0x3d4] ss:$8 sps:$4 sm:$0xff]  }
  0x1f   :  { %942 = vmatpush1.bf16.msra.mxu0 %v1386_v30  ;;  %v1473_v29 = vld [vmem:[%s2059_s1 + $0x320] ss:$8 sps:$4 sm:$0xff]   ;;  %v1478_v30 = vld [vmem:[%s2059_s1 + $0x214] ss:$8 sps:$4 sm:$0xff]   ;;  %v1496_v46 = vld [vmem:[%s2059_s1 + $0x2e4] ss:$8 sps:$4 sm:$0xff]  }
  0x20   :  { %983 = vmatpush1.bf16.msra.mxu1 %v1387_v31  ;;  %943 = vmatprep.subr.bf16.mxu0 %v1388_v32  ;;  %v1481_v31 = vld [vmem:[%s2059_s1 + $0x314] ss:$8 sps:$4 sm:$0xff]   ;;  %v1499_v47 = vld [vmem:[%s2059_s1 + $0x3e4] ss:$8 sps:$4 sm:$0xff]   ;;  %v1494_v48 = vld [vmem:[%s2059_s1 + $0x2e0] ss:$8 sps:$4 sm:$0xff]  }
  0x21   :  { %984 = vmatprep.subr.bf16.mxu1 %v1390_v33  ;;  %v1870_v32 = vld [vmem:[%s2060_s0 + $0x10] sm:$0xff] }
  0x22   :  { %v1476_v33 = vld [vmem:[%s2059_s1 + $0x210] ss:$8 sps:$4 sm:$0xff]  }
  0x23   :  { %944 = vmatpush2.bf16.msra.mxu0 %v1392_v34  ;;  %v1479_v34 = vld [vmem:[%s2059_s1 + $0x310] ss:$8 sps:$4 sm:$0xff]  }
  0x24   :  { %985 = vmatpush2.bf16.msra.mxu1 %v1393_v35  ;;  %945 = vmatprep.subr.bf16.mxu0 %v1394_v36  ;;  %v1189_v35 = vcombine.high %v1870_v32, %v1870_v32  ;;  %v1883_v36 = vld [vmem:[%s2060_s0 + $0x18] sm:$0xff] }
  0x25   :  { %986 = vmatprep.subr.bf16.mxu1 %v1396_v37  ;;  %v1484_v37 = vld [vmem:[%s2059_s1 + $0x204] ss:$8 sps:$4 sm:$0xff]  }
  0x27   :  { %946 = vmatpush2.bf16.msra.mxu0 %v1398_v38  ;;  %v1191_v38 = vcombine.high %v1883_v36, %v1883_v36 }
  0x28   :  { %987 = vmatpush2.bf16.msra.mxu1 %v1399_v39  ;;  %947 = vmatprep.subr.bf16.mxu0 %v1400_v40  ;;  %v1487_v39 = vld [vmem:[%s2059_s1 + $0x304] ss:$8 sps:$4 sm:$0xff]   ;;  %v1482_v40 = vld [vmem:[%s2059_s1 + $0x200] ss:$8 sps:$4 sm:$0xff]  }
  0x29   :  { %988 = vmatprep.subr.bf16.mxu1 %v1402_v41  ;;  %v1485_v41 = vld [vmem:[%s2059_s1 + $0x300] ss:$8 sps:$4 sm:$0xff]  }
  0x2b   :  { %948 = vmatpush2.bf16.msra.mxu0 %v1404_v42  ;;  %v1490_v42 = vld [vmem:[%s2059_s1 + $0x2f4] ss:$8 sps:$4 sm:$0xff]  }
  0x2c   :  { %989 = vmatpush2.bf16.msra.mxu1 %v1405_v43  ;;  %949 = vmatprep.subr.bf16.mxu0 %v1406_v44  ;;  %v1493_v43 = vld [vmem:[%s2059_s1 + $0x3f4] ss:$8 sps:$4 sm:$0xff]   ;;  %v1488_v44 = vld [vmem:[%s2059_s1 + $0x2f0] ss:$8 sps:$4 sm:$0xff]  }
  0x2d   :  { %990 = vmatprep.subr.bf16.mxu1 %v1408_v45  ;;  %v1491_v45 = vld [vmem:[%s2059_s1 + $0x3f0] ss:$8 sps:$4 sm:$0xff]  }
  0x2f   :  { %950 = vmatpush2.bf16.msra.mxu0 %v1410_v49  ;;  %v1497_v49 = vld [vmem:[%s2059_s1 + $0x3e0] ss:$8 sps:$4 sm:$0xff]  }
  0x30   :  { %991 = vmatpush2.bf16.msra.mxu1 %v1411_v50  ;;  %951 = vmatprep.subr.bf16.mxu0 %v1412_v52  ;;  %v1502_v50 = vld [vmem:[%s2059_s1 + $0x2d4] ss:$8 sps:$4 sm:$0xff]   ;;  %v1500_v52 = vld [vmem:[%s2059_s1 + $0x2d0] ss:$8 sps:$4 sm:$0xff]  }
  0x31   :  { %992 = vmatprep.subr.bf16.mxu1 %v1414_v53  ;;  %v1503_v53 = vld [vmem:[%s2059_s1 + $0x3d0] ss:$8 sps:$4 sm:$0xff]  }
  0x33   :  { %952 = vmatpush2.bf16.msra.mxu0 %v1416_v54  ;;  %v1508_v54 = vld [vmem:[%s2059_s1 + $0x2c4] ss:$8 sps:$4 sm:$0xff]  }
  0x34   :  { %993 = vmatpush2.bf16.msra.mxu1 %v1417_v55  ;;  %953 = vmatprep.subr.bf16.mxu0 %v1418_v56  ;;  %v1511_v55 = vld [vmem:[%s2059_s1 + $0x3c4] ss:$8 sps:$4 sm:$0xff]   ;;  %v1506_v56 = vld [vmem:[%s2059_s1 + $0x2c0] ss:$8 sps:$4 sm:$0xff]  }
  0x35   :  { %994 = vmatprep.subr.bf16.mxu1 %v1420_v57  ;;  %v1509_v57 = vld [vmem:[%s2059_s1 + $0x3c0] ss:$8 sps:$4 sm:$0xff]  }
  0x37   :  { %954 = vmatpush2.bf16.msra.mxu0 %v1422_v58  ;;  %v1514_v58 = vld [vmem:[%s2059_s1 + $0x2b4] ss:$8 sps:$4 sm:$0xff]  }
  0x38   :  { %995 = vmatpush2.bf16.msra.mxu1 %v1423_v59  ;;  %955 = vmatprep.subr.bf16.mxu0 %v1424_v60  ;;  %v1517_v59 = vld [vmem:[%s2059_s1 + $0x3b4] ss:$8 sps:$4 sm:$0xff]   ;;  %v1512_v60 = vld [vmem:[%s2059_s1 + $0x2b0] ss:$8 sps:$4 sm:$0xff]  }
  0x39   :  { %996 = vmatprep.subr.bf16.mxu1 %v1426_v61  ;;  %v1515_v61 = vld [vmem:[%s2059_s1 + $0x3b0] ss:$8 sps:$4 sm:$0xff]  }
  0x3b   :  { %956 = vmatpush2.bf16.msra.mxu0 %v1428_v62  ;;  %v1520_v62 = vld [vmem:[%s2059_s1 + $0x2a4] ss:$8 sps:$4 sm:$0xff]  }
  0x3c   :  { %997 = vmatpush2.bf16.msra.mxu1 %v1429_v63  ;;  %957 = vmatprep.subr.bf16.mxu0 %v1430_v0  ;;  %v1523_v63 = vld [vmem:[%s2059_s1 + $0x3a4] ss:$8 sps:$4 sm:$0xff]   ;;  %v1518_v0 = vld [vmem:[%s2059_s1 + $0x2a0] ss:$8 sps:$4 sm:$0xff]  }
  0x3d   :  { %998 = vmatprep.subr.bf16.mxu1 %v1432_v1  ;;  %v1521_v1 = vld [vmem:[%s2059_s1 + $0x3a0] ss:$8 sps:$4 sm:$0xff]  }
  0x3f   :  { %958 = vmatpush2.bf16.msra.mxu0 %v1434_v2  ;;  %v1526_v2 = vld [vmem:[%s2059_s1 + $0x294] ss:$8 sps:$4 sm:$0xff]  }
  0x40   :  { %999 = vmatpush2.bf16.msra.mxu1 %v1435_v3  ;;  %1009 = vmatprep.subr.bf16.mxu0 %v1442_v4  ;;  %v1529_v3 = vld [vmem:[%s2059_s1 + $0x394] ss:$8 sps:$4 sm:$0xff]   ;;  %v1524_v4 = vld [vmem:[%s2059_s1 + $0x290] ss:$8 sps:$4 sm:$0xff]  }
  0x41   :  { %1050 = vmatprep.subr.bf16.mxu1 %v1445_v5  ;;  %v1527_v5 = vld [vmem:[%s2059_s1 + $0x390] ss:$8 sps:$4 sm:$0xff]  }
  0x42   :  { %960 = vmatmul.mubr.bf16.vlgmr.msra.gmra.mxu0 %v1184_v6  ;;  %v1532_v6 = vld [vmem:[%s2059_s1 + $0x284] ss:$8 sps:$4 sm:$0xff]  }
  0x43   :  { %1001 = vmatmul.mubr.bf16.vlgmr.msra.gmra.mxu1 %v1186_v7  ;;  %1010 = vmatpush1.bf16.msra.mxu0 %v1440_v8  ;;  %v1535_v7 = vld [vmem:[%s2059_s1 + $0x384] ss:$8 sps:$4 sm:$0xff]   ;;  %v1530_v8 = vld [vmem:[%s2059_s1 + $0x280] ss:$8 sps:$4 sm:$0xff]  }
  0x44   :  { %1051 = vmatpush1.bf16.msra.mxu1 %v1443_v9  ;;  %1011 = vmatprep.subr.bf16.mxu0 %v1448_v10  ;;  %v1533_v9 = vld [vmem:[%s2059_s1 + $0x380] ss:$8 sps:$4 sm:$0xff]   ;;  %v1540_v10 = vld [vmem:[%s2059_s1 + $0x474] ss:$8 sps:$4 sm:$0xff]  }
  0x45   :  { %1052 = vmatprep.subr.bf16.mxu1 %v1451_v11  ;;  %1041 = vmatprep.mubr.bf16.mxu0 %v1189_v35  ;;  %v1188_v11 = vcombine.low %v1870_v32, %v1870_v32 }
  0x46   :  { %1082 = vmatprep.mubr.bf16.mxu1 %v1191_v38 }
  0x47   :  { %1012 = vmatpush1.bf16.msra.mxu0 %v1446_v12  ;;  %v1190_v12 = vcombine.low %v1883_v36, %v1883_v36 }
  0x48   :  { %1053 = vmatpush1.bf16.msra.mxu1 %v1449_v13  ;;  %1013 = vmatprep.subr.bf16.mxu0 %v1454_v14  ;;  %v1538_v13 = vld [vmem:[%s2059_s1 + $0x470] ss:$8 sps:$4 sm:$0xff]   ;;  %v1545_v14 = vld [vmem:[%s2059_s1 + $0x464] ss:$8 sps:$4 sm:$0xff]  }
  0x49   :  { %1054 = vmatprep.subr.bf16.mxu1 %v1457_v15  ;;  %v1543_v15 = vld [vmem:[%s2059_s1 + $0x460] ss:$8 sps:$4 sm:$0xff]  }
  0x4b   :  { %1014 = vmatpush1.bf16.msra.mxu0 %v1452_v16  ;;  %v1565_v16 = vmov 0  }
  0x4c   :  { %1055 = vmatpush1.bf16.msra.mxu1 %v1455_v17  ;;  %1015 = vmatprep.subr.bf16.mxu0 %v1460_v18  ;;  %v1548_v17 = vld [vmem:[%s2059_s1 + $0x454] ss:$8 sps:$4 sm:$0xff]   ;;  %v1546_v18 = vld [vmem:[%s2059_s1 + $0x450] ss:$8 sps:$4 sm:$0xff]  }
  0x4d   :  { %1056 = vmatprep.subr.bf16.mxu1 %v1463_v19  ;;  %v1551_v19 = vld [vmem:[%s2059_s1 + $0x444] ss:$8 sps:$4 sm:$0xff]  }
  0x4f   :  { %1016 = vmatpush1.bf16.msra.mxu0 %v1458_v20  ;;  %v1549_v20 = vld [vmem:[%s2059_s1 + $0x440] ss:$8 sps:$4 sm:$0xff]  }
  0x50   :  { %1057 = vmatpush1.bf16.msra.mxu1 %v1461_v21  ;;  %1017 = vmatprep.subr.bf16.mxu0 %v1466_v22  ;;  %v1554_v21 = vld [vmem:[%s2059_s1 + $0x434] ss:$8 sps:$4 sm:$0xff]   ;;  %v1552_v22 = vld [vmem:[%s2059_s1 + $0x430] ss:$8 sps:$4 sm:$0xff]  }
  0x51   :  { %1058 = vmatprep.subr.bf16.mxu1 %v1469_v23  ;;  %v1557_v23 = vld [vmem:[%s2059_s1 + $0x424] ss:$8 sps:$4 sm:$0xff]  }
  0x53   :  { %1018 = vmatpush1.bf16.msra.mxu0 %v1464_v24  ;;  %v1555_v24 = vld [vmem:[%s2059_s1 + $0x420] ss:$8 sps:$4 sm:$0xff]  }
  0x54   :  { %1059 = vmatpush1.bf16.msra.mxu1 %v1467_v25  ;;  %1019 = vmatprep.subr.bf16.mxu0 %v1472_v26  ;;  %v1560_v25 = vld [vmem:[%s2059_s1 + $0x414] ss:$8 sps:$4 sm:$0xff]   ;;  %v1558_v26 = vld [vmem:[%s2059_s1 + $0x410] ss:$8 sps:$4 sm:$0xff]  }
  0x55   :  { %1060 = vmatprep.subr.bf16.mxu1 %v1475_v27  ;;  %v1563_v27 = vld [vmem:[%s2059_s1 + $0x404] ss:$8 sps:$4 sm:$0xff]  }
  0x57   :  { %1020 = vmatpush1.bf16.msra.mxu0 %v1470_v28  ;;  %v1561_v28 = vld [vmem:[%s2059_s1 + $0x400] ss:$8 sps:$4 sm:$0xff]  }
  0x58   :  { %1061 = vmatpush1.bf16.msra.mxu1 %v1473_v29  ;;  %1021 = vmatprep.subr.bf16.mxu0 %v1478_v30  ;;  %v1564_v29 = vld [vmem:[%s2060_s0 + $0x20] ss:$0 sps:$4 sm:$0xff]  }
  0x59   :  { %1062 = vmatprep.subr.bf16.mxu1 %v1481_v31 }
  0x5b   :  { %1022 = vmatpush1.bf16.msra.mxu0 %v1476_v33 }
  0x5c   :  { %1063 = vmatpush1.bf16.msra.mxu1 %v1479_v34  ;;  %1023 = vmatprep.subr.bf16.mxu0 %v1484_v37 }
  0x5d   :  { %1064 = vmatprep.subr.bf16.mxu1 %v1487_v39 }
  0x5f   :  { %1024 = vmatpush1.bf16.msra.mxu0 %v1482_v40 }
  0x60   :  { %1065 = vmatpush1.bf16.msra.mxu1 %v1485_v41  ;;  %1025 = vmatprep.subr.bf16.mxu0 %v1490_v42 }
  0x61   :  { %1066 = vmatprep.subr.bf16.mxu1 %v1493_v43 }
  0x63   :  { %1026 = vmatpush2.bf16.msra.mxu0 %v1488_v44 }
  0x64   :  { %1067 = vmatpush2.bf16.msra.mxu1 %v1491_v45  ;;  %1027 = vmatprep.subr.bf16.mxu0 %v1496_v46 }
  0x65   :  { %1068 = vmatprep.subr.bf16.mxu1 %v1499_v47 }
  0x67   :  { %1028 = vmatpush2.bf16.msra.mxu0 %v1494_v48  ;;  %v1143_v48 = vlaneseq }
  0x68   :  { %1069 = vmatpush2.bf16.msra.mxu1 %v1497_v49  ;;  %1029 = vmatprep.subr.bf16.mxu0 %v1502_v50 }
  0x69   :  { %1070 = vmatprep.subr.bf16.mxu1 %v1505_v51  ;;  %v1144_v49 = vshrl.u32 %v1143_v48, 7 }
  0x6b   :  { %1030 = vmatpush2.bf16.msra.mxu0 %v1500_v52  ;;  %v1145_v51 = vsub.s32 0, %v1144_v49  ;;  %v1141_v52 = vld [vmem:[%s2061_s2] sm:$0x3] }
  0x6c   :  { %1071 = vmatpush2.bf16.msra.mxu1 %v1503_v53  ;;  %1031 = vmatprep.subr.bf16.mxu0 %v1508_v54  ;;  %v1149_v54 = vsub.s32 1, %v1144_v49 }
  0x6d   :  { %1072 = vmatprep.subr.bf16.mxu1 %v1511_v55  ;;  %v1155_v55 = vld [vmem:[%s2062_s3] sm:$0x3] }
  0x6f   :  { %1032 = vmatpush2.bf16.msra.mxu0 %v1506_v56 }
  0x70   :  { %1073 = vmatpush2.bf16.msra.mxu1 %v1509_v57  ;;  %1033 = vmatprep.subr.bf16.mxu0 %v1514_v58  ;;  %v1146_v57 = vrot.slane %v1141_v52, %v1145_v51 }
  0x71   :  { %1074 = vmatprep.subr.bf16.mxu1 %v1517_v59 }
  0x73   :  { %1034 = vmatpush2.bf16.msra.mxu0 %v1512_v60 }
  0x74   :  { %1075 = vmatpush2.bf16.msra.mxu1 %v1515_v61  ;;  %1035 = vmatprep.subr.bf16.mxu0 %v1520_v62  ;;  %v1160_v61 = vrot.slane %v1155_v55, %v1145_v51  ;;  %v1150_v62 = vrot.slane %v1141_v52, %v1149_v54 }
  0x75   :  { %1076 = vmatprep.subr.bf16.mxu1 %v1523_v63 }
  0x77   :  { %1036 = vmatpush2.bf16.msra.mxu0 %v1518_v0 }
  0x78   :  { %1077 = vmatpush2.bf16.msra.mxu1 %v1521_v1  ;;  %1037 = vmatprep.subr.bf16.mxu0 %v1526_v2  ;;  %v1164_v2 = vrot.slane %v1155_v55, %v1149_v54 }
  0x79   :  { %1078 = vmatprep.subr.bf16.mxu1 %v1529_v3 }
  0x7b   :  { %1038 = vmatpush2.bf16.msra.mxu0 %v1524_v4 }
  0x7c   :  { %1079 = vmatpush2.bf16.msra.mxu1 %v1527_v5  ;;  %1039 = vmatprep.subr.bf16.mxu0 %v1532_v6 }
  0x7d   :  { %1080 = vmatprep.subr.bf16.mxu1 %v1535_v7 }
  0x7f   :  { %1040 = vmatpush2.bf16.msra.mxu0 %v1530_v8 }
  0x80   :  { %1081 = vmatpush2.bf16.msra.mxu1 %v1533_v9  ;;  %1091 = vmatprep.subr.bf16.mxu0 %v1540_v10 }
  0x82   :  { %1042 = vmatmul.mubr.bf16.vlgmr.msra.gmra.mxu0 %v1188_v11 }
  0x83   :  { %1083 = vmatmul.mubr.bf16.vlgmr.msra.gmra.mxu1 %v1190_v12  ;;  %1092 = vmatpush1.bf16.msra.mxu0 %v1538_v13 }
  0x84   :  { %1123 = vmatprep.mubr.bf16.mxu0 %v1565_v16  ;;  %1093 = vmatprep.subr.bf16.mxu0 %v1545_v14 }
  0x87   :  { %1094 = vmatpush1.bf16.msra.mxu0 %v1543_v15 }
  0x88   :  { %1095 = vmatprep.subr.bf16.mxu0 %v1548_v17 }
  0x8b   :  { %1096 = vmatpush1.bf16.msra.mxu0 %v1546_v18 }
  0x8c   :  { %1097 = vmatprep.subr.bf16.mxu0 %v1551_v19 }
  0x8f   :  { %1098 = vmatpush1.bf16.msra.mxu0 %v1549_v20 }
  0x90   :  { %1099 = vmatprep.subr.bf16.mxu0 %v1554_v21 }
  0x93   :  { %1100 = vmatpush1.bf16.msra.mxu0 %v1552_v22 }
  0x94   :  { %1101 = vmatprep.subr.bf16.mxu0 %v1557_v23 }
  0x97   :  { %1102 = vmatpush1.bf16.msra.mxu0 %v1555_v24 }
  0x98   :  { %1103 = vmatprep.subr.bf16.mxu0 %v1560_v25 }
  0x9b   :  { %1104 = vmatpush1.bf16.msra.mxu0 %v1558_v26 }
  0x9c   :  { %1105 = vmatprep.subr.bf16.mxu0 %v1563_v27 }
  0x9f   :  { %1106 = vmatpush1.bf16.msra.mxu0 %v1561_v28 }
  0xa2   :  { %1124 = vmatmul.mubr.bf16.vlgmr.msra.gmra.mxu0 %v1564_v29 }
 0x102   :  { %v961_v30 = vpop.f32.mrf.mxu0 }
 0x103   :  { %v1002_v31 = vpop.f32.mrf.mxu1 }
 0x104   :  { %v1003_v32 = vadd.f32 %v1002_v31, %v961_v30  ;;  %v963_v33 = vpop.f32.mrf.mxu0 }
 0x105   :  { %v1004_v34 = vpop.f32.mrf.mxu1 }
 0x106   :  { %v1005_v35 = vadd.f32 %v1004_v34, %v963_v33  ;;  %v965_v36 = vpop.f32.mrf.mxu0 }
 0x107   :  { %v1006_v37 = vpop.f32.mrf.mxu1 }
 0x108   :  { %v966_v38 = vpop.f32.mrf.mxu0 }
 0x109   :  { %v1007_v39 = vpop.f32.mrf.mxu1 }
 0x142   :  { %v1043_v40 = vpop.f32.mrf.mxu0 }
 0x143   :  { %v1084_v41 = vpop.f32.mrf.mxu1  ;;  %v1044_v50 = vadd.f32 %v1043_v40, %v1003_v32 }
 0x144   :  { %v1045_v42 = vpop.f32.mrf.mxu0 }
 0x145   :  { %v1086_v43 = vpop.f32.mrf.mxu1  ;;  %v1046_v53 = vadd.f32 %v1045_v42, %v1005_v35  ;;  %v1085_v56 = vadd.f32 %v1084_v41, %v1044_v50 }
 0x146   :  { %v1047_v44 = vpop.f32.mrf.mxu0 }
 0x147   :  { %v1088_v45 = vpop.f32.mrf.mxu1  ;;  %v1087_v59 = vadd.f32 %v1086_v43, %v1046_v53 }
 0x148   :  { %v1048_v46 = vpop.f32.mrf.mxu0 }
 0x149   :  { %v1089_v47 = vpop.f32.mrf.mxu1 }
 0x162   :  { %v1125_v58 = vpop.f32.mrf.mxu0 }
 0x163   :  { %v1126_v60 = vadd.f32 %v1125_v58, %v1085_v56 }
 0x164   :  { %v1127_v63 = vpop.f32.mrf.mxu0 }
 0x165   :  { %v1153_v0 = vmul.f32 %v1146_v57, %v1126_v60  ;;  %v1128_v1 = vadd.f32 %v1127_v63, %v1087_v59 }
 0x166   :  { %v1129_v3 = vpop.f32.mrf.mxu0 }
 0x167   :  { %v1167_v4 = vadd.f32 %v1160_v61, %v1153_v0  ;;  %v1154_v5 = vmul.f32 %v1150_v62, %v1128_v1 }
 0x168   :  { %v1130_v6 = vpop.f32.mrf.mxu0 }
 0x169   :  { %v1168_v7 = vadd.f32 %v1164_v2, %v1154_v5  ;;  %v1169_v8 = vmax.f32 %v1167_v4, 0.0 }
 0x16b   :  { %v1170_v9 = vmax.f32 %v1168_v7, 0.0 }
 0x16d   :  { %v1338_v10 = vpack.c.bf16 %v1170_v9, %v1169_v8 }
 0x16f   :  { %1179 = vst [vmem:[%s2063_s4] sm:$0xff] %v1338_v10 }

// kernel: net_recam_forward.89
= control target key start
LH: loop header
LB: loop body
LE: loop exit
PB: predicated region body
PF: predicated region fallthrough
CT: control target
= control target key end

     0   :  { %s1197_s18 = smov 0   ;;  %s1199_s19 = smov 0   ;;  %s1382_s0 = inlined_call_operand.vmem [shape: bf16[8,256], index: 0, kind: input, shape index: {}]   ;;  %s1383_s1 = inlined_call_operand.vmem [shape: bf16[256,512], index: 1, kind: input, shape index: {}]   ;;  %s1384_s2 = inlined_call_operand.vmem [shape: f32[1,512], index: 2, kind: input, shape index: {}]   ;;  %s1385_s3 = inlined_call_operand.vmem [shape: f32[1,512], index: 3, kind: input, shape index: {}]   ;;  %s1386_s4 = inlined_call_operand.vmem [shape: bf16[8,512], index: 4, kind: input, shape index: {}]   ;;  %s1387_s5 = inlined_call_operand.vmem [shape: bf16[8,512], index: 5, kind: output, shape index: {}]  }
   0x1   :  { %s1201_s20 = smov 0   ;;  %s1203_s21 = smov 0  }
   0x2   :  { %s1205_s22 = smov 0  }
   0x3 LB: > { %s30_s23 = sadd.s32 1, %s1161_s21  ;;  %p78_p1 = scmp.ne.s32.totalorder %s1153_s19, %s1149_s18  ;;  %s1165_s22 = sphi %s1205_s22, %s15_s22   ;;  %s1161_s21 = sphi %s1203_s21, %s1391_s21   ;;  %s1157_s20 = sphi %s1201_s20, %s1390_s20   ;;  %s1153_s19 = sphi %s1199_s19, %s1389_s19   ;;  %s1149_s18 = sphi %s1197_s18, %s1388_s18  }
   0x4   : > { %p32_p0 = scmp.ge.s32.totalorder %s30_s23, 2  ;;  %p79_p2 = scmp.eq.s32.totalorder %s1165_s22, 0 }
   0x5   : > { %s71_s25 = sadd.s32 1, %s1153_s19  ;;  %p986_p5 = scmp.ge.s32.totalorder %s1165_s22, 2 }
   0x6   : > { %s1393_s23 = smov (%p32_p0, %s30_s23), 0  ;;  %p80_p3 = por %p79_p2, %p78_p1 }
   0x7   : > { %s67_s24 = ssub.s32 %s1161_s21, %s1393_s23  ;;  %225 = sbr.rel (%p986_p5) target bundleno = 32 (0x20), region = 20 }
   0x8   : > { %p69_p4 = scmp.eq.s32.totalorder %s67_s24, 0 }
   0xa   : > { %s1232_s26 = scalar_select %p69_p4, %s1153_s19, %s71_s25  }
   0xc   : > { %228 = sbr.rel (!%p80_p3) target bundleno = 32 (0x20), region = 24  ;;  %s230_s27 = sand.u32 (%p80_p3), 1, %s1153_s19  }
   0xd   : > { %s1035_s28 = sshll.u32 (%p80_p3), %s1161_s21, 3  ;;  %s987_s29 = sshll.u32 (%p80_p3), %s230_s27, 8 }
   0xe   : > { %s1240_s7 = scalar_lea.vmem (%p80_p3), %s1383_s1, %s1035_s28  ;;  %s1245_s8 = scalar_lea.vmem (%p80_p3), [#allocation3], %s987_s29 }
   0xf   : > { %v329_v0 = vld [vmem:[%s1240_s7] sm:$0xff] (%p80_p3)  ;;  %v331_v1 = vld [vmem:[%s1240_s7 + $0x10] sm:$0xff] (%p80_p3) }
  0x10   : > { %v333_v2 = vld [vmem:[%s1240_s7 + $0x20] sm:$0xff] (%p80_p3)  ;;  %330 = vst [vmem:[%s1245_s8] sm:$0xff] (%p80_p3), %v329_v0  ;;  %332 = vst [vmem:[%s1245_s8 + $0x8] sm:$0xff] (%p80_p3), %v331_v1  ;;  %v335_v3 = vld [vmem:[%s1240_s7 + $0x30] sm:$0xff] (%p80_p3) }
  0x11   : > { %334 = vst [vmem:[%s1245_s8 + $0x10] sm:$0xff] %v333_v2  ;;  %v337_v4 = vld [vmem:[%s1240_s7 + $0x40] sm:$0xff]  ;;  %v339_v5 = vld [vmem:[%s1240_s7 + $0x50] sm:$0xff]  ;;  %336 = vst [vmem:[%s1245_s8 + $0x18] sm:$0xff] %v335_v3 }
  0x12   : > { %338 = vst [vmem:[%s1245_s8 + $0x20] sm:$0xff] %v337_v4  ;;  %340 = vst [vmem:[%s1245_s8 + $0x28] sm:$0xff] %v339_v5  ;;  %v341_v6 = vld [vmem:[%s1240_s7 + $0x60] sm:$0xff]  ;;  %v343_v7 = vld [vmem:[%s1240_s7 + $0x70] sm:$0xff] }
  0x13   : > { %v345_v8 = vld [vmem:[%s1240_s7 + $0x80] sm:$0xff]  ;;  %342 = vst [vmem:[%s1245_s8 + $0x30] sm:$0xff] %v341_v6  ;;  %344 = vst [vmem:[%s1245_s8 + $0x38] sm:$0xff] %v343_v7  ;;  %v347_v9 = vld [vmem:[%s1240_s7 + $0x90] sm:$0xff] }
  0x14   : > { %346 = vst [vmem:[%s1245_s8 + $0x40] sm:$0xff] %v345_v8  ;;  %v349_v10 = vld [vmem:[%s1240_s7 + $0xa0] sm:$0xff]  ;;  %v351_v11 = vld [vmem:[%s1240_s7 + $0xb0] sm:$0xff]  ;;  %348 = vst [vmem:[%s1245_s8 + $0x48] sm:$0xff] %v347_v9 }
  0x15   : > { %350 = vst [vmem:[%s1245_s8 + $0x50] sm:$0xff] %v349_v10  ;;  %352 = vst [vmem:[%s1245_s8 + $0x58] sm:$0xff] %v351_v11  ;;  %v353_v12 = vld [vmem:[%s1240_s7 + $0xc0] sm:$0xff]  ;;  %v355_v13 = vld [vmem:[%s1240_s7 + $0xd0] sm:$0xff] }
  0x16   : > { %v357_v14 = vld [vmem:[%s1240_s7 + $0xe0] sm:$0xff]  ;;  %354 = vst [vmem:[%s1245_s8 + $0x60] sm:$0xff] %v353_v12  ;;  %356 = vst [vmem:[%s1245_s8 + $0x68] sm:$0xff] %v355_v13  ;;  %v359_v15 = vld [vmem:[%s1240_s7 + $0xf0] sm:$0xff] }
  0x17   : > { %358 = vst [vmem:[%s1245_s8 + $0x70] sm:$0xff] %v357_v14  ;;  %v361_v16 = vld [vmem:[%s1240_s7 + $0x100] sm:$0xff]  ;;  %v363_v17 = vld [vmem:[%s1240_s7 + $0x110] sm:$0xff]  ;;  %360 = vst [vmem:[%s1245_s8 + $0x78] sm:$0xff] %v359_v15 }
  0x18   : > { %362 = vst [vmem:[%s1245_s8 + $0x80] sm:$0xff] %v361_v16  ;;  %364 = vst [vmem:[%s1245_s8 + $0x88] sm:$0xff] %v363_v17  ;;  %v365_v18 = vld [vmem:[%s1240_s7 + $0x120] sm:$0xff]  ;;  %v367_v19 = vld [vmem:[%s1240_s7 + $0x130] sm:$0xff] }
  0x19   : > { %v369_v20 = vld [vmem:[%s1240_s7 + $0x140] sm:$0xff]  ;;  %366 = vst [vmem:[%s1245_s8 + $0x90] sm:$0xff] %v365_v18  ;;  %368 = vst [vmem:[%s1245_s8 + $0x98] sm:$0xff] %v367_v19  ;;  %v371_v21 = vld [vmem:[%s1240_s7 + $0x150] sm:$0xff] }
  0x1a   : > { %370 = vst [vmem:[%s1245_s8 + $0xa0] sm:$0xff] %v369_v20  ;;  %v373_v22 = vld [vmem:[%s1240_s7 + $0x160] sm:$0xff]  ;;  %v375_v23 = vld [vmem:[%s1240_s7 + $0x170] sm:$0xff]  ;;  %372 = vst [vmem:[%s1245_s8 + $0xa8] sm:$0xff] %v371_v21 }
  0x1b   : > { %374 = vst [vmem:[%s1245_s8 + $0xb0] sm:$0xff] %v373_v22  ;;  %376 = vst [vmem:[%s1245_s8 + $0xb8] sm:$0xff] %v375_v23  ;;  %v377_v24 = vld [vmem:[%s1240_s7 + $0x180] sm:$0xff]  ;;  %v379_v25 = vld [vmem:[%s1240_s7 + $0x190] sm:$0xff] }
  0x1c   : > { %v381_v26 = vld [vmem:[%s1240_s7 + $0x1a0] sm:$0xff]  ;;  %378 = vst [vmem:[%s1245_s8 + $0xc0] sm:$0xff] %v377_v24  ;;  %380 = vst [vmem:[%s1245_s8 + $0xc8] sm:$0xff] %v379_v25  ;;  %v383_v27 = vld [vmem:[%s1240_s7 + $0x1b0] sm:$0xff] }
  0x1d   : > { %382 = vst [vmem:[%s1245_s8 + $0xd0] sm:$0xff] %v381_v26  ;;  %v385_v28 = vld [vmem:[%s1240_s7 + $0x1c0] sm:$0xff]  ;;  %v387_v29 = vld [vmem:[%s1240_s7 + $0x1d0] sm:$0xff]  ;;  %384 = vst [vmem:[%s1245_s8 + $0xd8] sm:$0xff] %v383_v27 }
  0x1e   : > { %386 = vst [vmem:[%s1245_s8 + $0xe0] sm:$0xff] %v385_v28  ;;  %388 = vst [vmem:[%s1245_s8 + $0xe8] sm:$0xff] %v387_v29  ;;  %v389_v30 = vld [vmem:[%s1240_s7 + $0x1e0] sm:$0xff]  ;;  %v391_v31 = vld [vmem:[%s1240_s7 + $0x1f0] sm:$0xff] }
  0x1f   : > { %390 = vst [vmem:[%s1245_s8 + $0xf0] sm:$0xff] %v389_v30  ;;  %392 = vst [vmem:[%s1245_s8 + $0xf8] sm:$0xff] %v391_v31 }
  0x20 PF: > { %p990_p6 = scmp.ge.s32.totalorder %s1165_s22, 1  ;;  %p426_p7 = scmp.lt.s32.totalorder %s1165_s22, 3 }
  0x22   : > { %p427_p8 = pnand %p990_p6, %p426_p7 }
  0x23   : > { %s433_s9 = sand.u32 (!%p427_p8), 1, %s1149_s18   ;;  %s992_s14 = sshll.u32 (!%p427_p8), %s1157_s20, 1 }
  0x24   : > { %430 = sbr.rel (%p427_p8) target bundleno = 311 (0x137), region = 74  ;;  %s991_s12 = sshll.u32 (!%p427_p8), %s433_s9, 8 }
  0x25   : > { %s1318_s13 = scalar_lea.vmem (!%p427_p8), [#allocation3], %s991_s12  ;;  %p503_p9 = scmp.lt.s32.totalorder (!%p427_p8), %s992_s14, 3 }
  0x29   : > { %v1314_v32 = vld [vmem:[%s1382_s0] sm:$0xff]  ;;  %v1080_v36 = vld [vmem:[%s1318_s13 + $0x64] ss:$8 sps:$4 sm:$0xff]   ;;  %v1082_v37 = vld [vmem:[%s1318_s13 + $0x60] ss:$8 sps:$4 sm:$0xff]   ;;  %v792_v3 = vlaneseq  ;;  %s1395_s14 = smov (!%p503_p9, %s992_s14), 3 }
  0x2a   : > { %v999_v33 = vcombine.high %v1314_v32, %v1314_v32  ;;  %v1077_v34 = vld [vmem:[%s1318_s13 + $0x74] ss:$8 sps:$4 sm:$0xff]   ;;  %v1079_v35 = vld [vmem:[%s1318_s13 + $0x70] ss:$8 sps:$4 sm:$0xff]   ;;  %v1086_v40 = vld [vmem:[%s1318_s13 + $0x44] ss:$8 sps:$4 sm:$0xff]   ;;  %v998_v2 = vcombine.low %v1314_v32, %v1314_v32  ;;  %s505_s17 = scalar_lea.vmem %s1384_s2, %s1395_s14  ;;  %s510_s25 = scalar_lea.vmem %s1385_s3, %s1395_s14 }
  0x2b   : > { %740 = vmatprep.subr.bf16.mxu0 %v1077_v34  ;;  %v1083_v38 = vld [vmem:[%s1318_s13 + $0x54] ss:$8 sps:$4 sm:$0xff]   ;;  %v1085_v39 = vld [vmem:[%s1318_s13 + $0x50] ss:$8 sps:$4 sm:$0xff]   ;;  %v1088_v41 = vld [vmem:[%s1318_s13 + $0x40] ss:$8 sps:$4 sm:$0xff]  }
  0x2c   : > { %772 = vmatprep.mubr.bf16.mxu0 %v999_v33  ;;  %741 = vmatpush1.bf16.msra.mxu0 %v1079_v35  ;;  %v1089_v42 = vld [vmem:[%s1318_s13 + $0x34] ss:$8 sps:$4 sm:$0xff]   ;;  %v1091_v43 = vld [vmem:[%s1318_s13 + $0x30] ss:$8 sps:$4 sm:$0xff]   ;;  %v1092_v44 = vld [vmem:[%s1318_s13 + $0x24] ss:$8 sps:$4 sm:$0xff]  }
  0x2d   : > { %742 = vmatprep.subr.bf16.mxu0 %v1080_v36  ;;  %v1094_v45 = vld [vmem:[%s1318_s13 + $0x20] ss:$8 sps:$4 sm:$0xff]   ;;  %v1095_v46 = vld [vmem:[%s1318_s13 + $0x14] ss:$8 sps:$4 sm:$0xff]   ;;  %v1097_v47 = vld [vmem:[%s1318_s13 + $0x10] ss:$8 sps:$4 sm:$0xff]  }
  0x2e   : > { %v1098_v48 = vld [vmem:[%s1318_s13 + $0x4] ss:$8 sps:$4 sm:$0xff]   ;;  %v1100_v49 = vld [vmem:[%s1318_s13] ss:$8 sps:$4 sm:$0xff]   ;;  %v1101_v50 = vld [vmem:[%s1318_s13 + $0xf4] ss:$8 sps:$4 sm:$0xff]  }
  0x2f   : > { %v1103_v51 = vld [vmem:[%s1318_s13 + $0xf0] ss:$8 sps:$4 sm:$0xff]   ;;  %v1104_v52 = vld [vmem:[%s1318_s13 + $0xe4] ss:$8 sps:$4 sm:$0xff]   ;;  %v1106_v53 = vld [vmem:[%s1318_s13 + $0xe0] ss:$8 sps:$4 sm:$0xff]  }
  0x30   : > { %743 = vmatpush1.bf16.msra.mxu0 %v1082_v37  ;;  %v1107_v54 = vld [vmem:[%s1318_s13 + $0xd4] ss:$8 sps:$4 sm:$0xff]   ;;  %v1109_v55 = vld [vmem:[%s1318_s13 + $0xd0] ss:$8 sps:$4 sm:$0xff]   ;;  %v1110_v56 = vld [vmem:[%s1318_s13 + $0xc4] ss:$8 sps:$4 sm:$0xff]  }
  0x31   : > { %744 = vmatprep.subr.bf16.mxu0 %v1083_v38  ;;  %v1112_v57 = vld [vmem:[%s1318_s13 + $0xc0] ss:$8 sps:$4 sm:$0xff]   ;;  %v1113_v58 = vld [vmem:[%s1318_s13 + $0xb4] ss:$8 sps:$4 sm:$0xff]   ;;  %v1115_v59 = vld [vmem:[%s1318_s13 + $0xb0] ss:$8 sps:$4 sm:$0xff]  }
  0x32   : > { %v1116_v60 = vld [vmem:[%s1318_s13 + $0xa4] ss:$8 sps:$4 sm:$0xff]   ;;  %v1118_v61 = vld [vmem:[%s1318_s13 + $0xa0] ss:$8 sps:$4 sm:$0xff]   ;;  %v1119_v62 = vld [vmem:[%s1318_s13 + $0x94] ss:$8 sps:$4 sm:$0xff]  }
  0x33   : > { %v1121_v63 = vld [vmem:[%s1318_s13 + $0x90] ss:$8 sps:$4 sm:$0xff]   ;;  %v1122_v0 = vld [vmem:[%s1318_s13 + $0x84] ss:$8 sps:$4 sm:$0xff]   ;;  %v1124_v1 = vld [vmem:[%s1318_s13 + $0x80] ss:$8 sps:$4 sm:$0xff]  }
  0x34   : > { %745 = vmatpush1.bf16.msra.mxu0 %v1085_v39  ;;  %v793_v4 = vshrl.u32 %v792_v3, 7  ;;  %s995_s27 = sshll.u32 %s1395_s14, 2  ;;  %v790_v6 = vld [vmem:[%s505_s17] sm:$0x3] }
  0x35   : > { %746 = vmatprep.subr.bf16.mxu0 %v1086_v40  ;;  %v804_v8 = vld [vmem:[%s510_s25] sm:$0x3]  ;;  %s520_s20 = scalar_lea.vmem %s1386_s4, %s995_s27  ;;  %s530_s7 = scalar_lea.vmem %s1387_s5, %s995_s27 }
  0x36   : > { %v794_v5 = vsub.s32 0, %v793_v4  ;;  %v798_v7 = vsub.s32 1, %v793_v4  ;;  %v818_v13 = vld [vmem:[%s520_s20] sm:$0xff] }
  0x37   : > { %v819_v18 = vunpack.c.l.bf16 %v818_v13  ;;  %v820_v20 = vunpack.c.h.bf16 %v818_v13 }
  0x38   : > { %747 = vmatpush1.bf16.msra.mxu0 %v1088_v41  ;;  %v795_v9 = vrot.slane %v790_v6, %v794_v5  ;;  %v809_v10 = vrot.slane %v804_v8, %v794_v5  ;;  %v799_v11 = vrot.slane %v790_v6, %v798_v7  ;;  %v813_v15 = vrot.slane %v804_v8, %v798_v7 }
  0x39   : > { %748 = vmatprep.subr.bf16.mxu0 %v1089_v42 }
  0x3c   : > { %749 = vmatpush1.bf16.msra.mxu0 %v1091_v43 }
  0x3d   : > { %750 = vmatprep.subr.bf16.mxu0 %v1092_v44 }
  0x40   : > { %751 = vmatpush1.bf16.msra.mxu0 %v1094_v45 }
  0x41   : > { %752 = vmatprep.subr.bf16.mxu0 %v1095_v46 }
  0x44   : > { %753 = vmatpush1.bf16.msra.mxu0 %v1097_v47 }
  0x45   : > { %754 = vmatprep.subr.bf16.mxu0 %v1098_v48 }
  0x48   : > { %755 = vmatpush1.bf16.msra.mxu0 %v1100_v49 }
  0x49   : > { %756 = vmatprep.subr.bf16.mxu0 %v1101_v50 }
  0x4c   : > { %757 = vmatpush2.bf16.msra.mxu0 %v1103_v51 }
  0x4d   : > { %758 = vmatprep.subr.bf16.mxu0 %v1104_v52 }
  0x50   : > { %759 = vmatpush2.bf16.msra.mxu0 %v1106_v53 }
  0x51   : > { %760 = vmatprep.subr.bf16.mxu0 %v1107_v54 }
  0x54   : > { %761 = vmatpush2.bf16.msra.mxu0 %v1109_v55 }
  0x55   : > { %762 = vmatprep.subr.bf16.mxu0 %v1110_v56 }
  0x58   : > { %763 = vmatpush2.bf16.msra.mxu0 %v1112_v57 }
  0x59   : > { %764 = vmatprep.subr.bf16.mxu0 %v1113_v58 }
  0x5c   : > { %765 = vmatpush2.bf16.msra.mxu0 %v1115_v59 }
  0x5d   : > { %766 = vmatprep.subr.bf16.mxu0 %v1116_v60 }
  0x60   : > { %767 = vmatpush2.bf16.msra.mxu0 %v1118_v61 }
  0x61   : > { %768 = vmatprep.subr.bf16.mxu0 %v1119_v62 }
  0x64   : > { %769 = vmatpush2.bf16.msra.mxu0 %v1121_v63 }
  0x65   : > { %770 = vmatprep.subr.bf16.mxu0 %v1122_v0 }
  0x68   : > { %771 = vmatpush2.bf16.msra.mxu0 %v1124_v1 }
  0x6b   : > { %773 = vmatmul.mubr.bf16.vlgmr.msra.gmra.mxu0 %v998_v2 }
 0x12b   : > { %v774_v12 = vpop.f32.mrf.mxu0 }
 0x12c   : > { %v802_v14 = vmul.f32 %v795_v9, %v774_v12 }
 0x12d   : > { %v776_v16 = vpop.f32.mrf.mxu0 }
 0x12e   : > { %v816_v17 = vadd.f32 %v809_v10, %v802_v14  ;;  %v803_v19 = vmul.f32 %v799_v11, %v776_v16 }
 0x12f   : > { %v778_v21 = vpop.f32.mrf.mxu0 }
 0x130   : > { %v817_v22 = vadd.f32 %v813_v15, %v803_v19  ;;  %v821_v24 = vadd.f32 %v819_v18, %v816_v17 }
 0x131   : > { %v779_v23 = vpop.f32.mrf.mxu0 }
 0x132   : > { %v822_v25 = vadd.f32 %v820_v20, %v817_v22 }
 0x134   : > { %v1036_v26 = vpack.c.bf16 %v822_v25, %v821_v24 }
 0x136   : > { %831 = vst [vmem:[%s530_s7] sm:$0xff] %v1036_v26 }
 0x137 PF: > { %s15_s22 = sadd.s32 1, %s1165_s22   ;;  %s1388_s18 = smov %s1153_s19 }
 0x138   : > { %p12_p10 = scmp.ge.s32.totalorder %s15_s22, 4   ;;  %s1389_s19 = smov %s1232_s26 }
 0x139   : > { %s1390_s20 = smov %s1161_s21  ;;  %s1391_s21 = smov %s1393_s23 }
 0x13a   :  { %14 = sbr.rel (!%p12_p10) target bundleno = 3 (0x3), region = 133 }

// kernel: net_recam_forward.86
= control target key start
LH: loop header
LB: loop body
LE: loop exit
PB: predicated region body
PF: predicated region fallthrough
CT: control target
= control target key end

     0   :  { %s1255_s21 = smov 0   ;;  %s1257_s22 = smov 0   ;;  %s1455_s0 = inlined_call_operand.vmem [shape: bf16[8,256], index: 0, kind: input, shape index: {}]   ;;  %s1456_s1 = inlined_call_operand.vmem [shape: bf16[256,512], index: 1, kind: input, shape index: {}]   ;;  %s1457_s2 = inlined_call_operand.vmem [shape: f32[1,256], index: 2, kind: input, shape index: {}]   ;;  %s1458_s3 = inlined_call_operand.vmem [shape: f32[1,256], index: 3, kind: input, shape index: {}]   ;;  %s1459_s4 = inlined_call_operand.vmem [shape: f32[1,512], index: 4, kind: input, shape index: {}]   ;;  %s1460_s5 = inlined_call_operand.vmem [shape: f32[1,512], index: 5, kind: input, shape index: {}]   ;;  %s1461_s6 = inlined_call_operand.vmem [shape: bf16[8,512], index: 6, kind: output, shape index: {}]  }
   0x1   :  { %s1259_s23 = smov 0   ;;  %s1261_s24 = smov 0  }
   0x2   :  { %s1263_s25 = smov 0  }
   0x3 LB: > { %s31_s26 = sadd.s32 1, %s1214_s24  ;;  %p79_p1 = scmp.ne.s32.totalorder %s1206_s22, %s1202_s21  ;;  %s1218_s25 = sphi %s1263_s25, %s16_s25   ;;  %s1214_s24 = sphi %s1261_s24, %s1465_s24   ;;  %s1210_s23 = sphi %s1259_s23, %s1464_s23   ;;  %s1206_s22 = sphi %s1257_s22, %s1463_s22   ;;  %s1202_s21 = sphi %s1255_s21, %s1462_s21  }
   0x4   : > { %p33_p0 = scmp.ge.s32.totalorder %s31_s26, 2  ;;  %p80_p2 = scmp.eq.s32.totalorder %s1218_s25, 0 }
   0x5   : > { %s72_s28 = sadd.s32 1, %s1206_s22  ;;  %p1045_p5 = scmp.ge.s32.totalorder %s1218_s25, 2 }
   0x6   : > { %s1467_s26 = smov (%p33_p0, %s31_s26), 0  ;;  %p81_p3 = por %p80_p2, %p79_p1 }
   0x7   : > { %s68_s27 = ssub.s32 %s1214_s24, %s1467_s26  ;;  %266 = sbr.rel (%p1045_p5) target bundleno = 32 (0x20), region = 28 }
   0x8   : > { %p70_p4 = scmp.eq.s32.totalorder %s68_s27, 0 }
   0xa   : > { %s1290_s29 = scalar_select %p70_p4, %s1206_s22, %s72_s28  }
   0xc   : > { %269 = sbr.rel (!%p81_p3) target bundleno = 32 (0x20), region = 32  ;;  %s271_s30 = sand.u32 (%p81_p3), 1, %s1206_s22  }
   0xd   : > { %s1090_s7 = sshll.u32 (%p81_p3), %s1214_s24, 3  ;;  %s1046_s8 = sshll.u32 (%p81_p3), %s271_s30, 8 }
   0xe   : > { %s1298_s11 = scalar_lea.vmem (%p81_p3), %s1456_s1, %s1090_s7  ;;  %s1303_s12 = scalar_lea.vmem (%p81_p3), [#allocation3], %s1046_s8 }
   0xf   : > { %v370_v0 = vld [vmem:[%s1298_s11] sm:$0xff] (%p81_p3)  ;;  %v372_v1 = vld [vmem:[%s1298_s11 + $0x10] sm:$0xff] (%p81_p3) }
  0x10   : > { %v374_v2 = vld [vmem:[%s1298_s11 + $0x20] sm:$0xff] (%p81_p3)  ;;  %371 = vst [vmem:[%s1303_s12] sm:$0xff] (%p81_p3), %v370_v0  ;;  %373 = vst [vmem:[%s1303_s12 + $0x8] sm:$0xff] (%p81_p3), %v372_v1  ;;  %v376_v3 = vld [vmem:[%s1298_s11 + $0x30] sm:$0xff] (%p81_p3) }
  0x11   : > { %375 = vst [vmem:[%s1303_s12 + $0x10] sm:$0xff] %v374_v2  ;;  %v378_v4 = vld [vmem:[%s1298_s11 + $0x40] sm:$0xff]  ;;  %v380_v5 = vld [vmem:[%s1298_s11 + $0x50] sm:$0xff]  ;;  %377 = vst [vmem:[%s1303_s12 + $0x18] sm:$0xff] %v376_v3 }
  0x12   : > { %379 = vst [vmem:[%s1303_s12 + $0x20] sm:$0xff] %v378_v4  ;;  %381 = vst [vmem:[%s1303_s12 + $0x28] sm:$0xff] %v380_v5  ;;  %v382_v6 = vld [vmem:[%s1298_s11 + $0x60] sm:$0xff]  ;;  %v384_v7 = vld [vmem:[%s1298_s11 + $0x70] sm:$0xff] }
  0x13   : > { %v386_v8 = vld [vmem:[%s1298_s11 + $0x80] sm:$0xff]  ;;  %383 = vst [vmem:[%s1303_s12 + $0x30] sm:$0xff] %v382_v6  ;;  %385 = vst [vmem:[%s1303_s12 + $0x38] sm:$0xff] %v384_v7  ;;  %v388_v9 = vld [vmem:[%s1298_s11 + $0x90] sm:$0xff] }
  0x14   : > { %387 = vst [vmem:[%s1303_s12 + $0x40] sm:$0xff] %v386_v8  ;;  %v390_v10 = vld [vmem:[%s1298_s11 + $0xa0] sm:$0xff]  ;;  %v392_v11 = vld [vmem:[%s1298_s11 + $0xb0] sm:$0xff]  ;;  %389 = vst [vmem:[%s1303_s12 + $0x48] sm:$0xff] %v388_v9 }
  0x15   : > { %391 = vst [vmem:[%s1303_s12 + $0x50] sm:$0xff] %v390_v10  ;;  %393 = vst [vmem:[%s1303_s12 + $0x58] sm:$0xff] %v392_v11  ;;  %v394_v12 = vld [vmem:[%s1298_s11 + $0xc0] sm:$0xff]  ;;  %v396_v13 = vld [vmem:[%s1298_s11 + $0xd0] sm:$0xff] }
  0x16   : > { %v398_v14 = vld [vmem:[%s1298_s11 + $0xe0] sm:$0xff]  ;;  %395 = vst [vmem:[%s1303_s12 + $0x60] sm:$0xff] %v394_v12  ;;  %397 = vst [vmem:[%s1303_s12 + $0x68] sm:$0xff] %v396_v13  ;;  %v400_v15 = vld [vmem:[%s1298_s11 + $0xf0] sm:$0xff] }
  0x17   : > { %399 = vst [vmem:[%s1303_s12 + $0x70] sm:$0xff] %v398_v14  ;;  %v402_v16 = vld [vmem:[%s1298_s11 + $0x100] sm:$0xff]  ;;  %v404_v17 = vld [vmem:[%s1298_s11 + $0x110] sm:$0xff]  ;;  %401 = vst [vmem:[%s1303_s12 + $0x78] sm:$0xff] %v400_v15 }
  0x18   : > { %403 = vst [vmem:[%s1303_s12 + $0x80] sm:$0xff] %v402_v16  ;;  %405 = vst [vmem:[%s1303_s12 + $0x88] sm:$0xff] %v404_v17  ;;  %v406_v18 = vld [vmem:[%s1298_s11 + $0x120] sm:$0xff]  ;;  %v408_v19 = vld [vmem:[%s1298_s11 + $0x130] sm:$0xff] }
  0x19   : > { %v410_v20 = vld [vmem:[%s1298_s11 + $0x140] sm:$0xff]  ;;  %407 = vst [vmem:[%s1303_s12 + $0x90] sm:$0xff] %v406_v18  ;;  %409 = vst [vmem:[%s1303_s12 + $0x98] sm:$0xff] %v408_v19  ;;  %v412_v21 = vld [vmem:[%s1298_s11 + $0x150] sm:$0xff] }
  0x1a   : > { %411 = vst [vmem:[%s1303_s12 + $0xa0] sm:$0xff] %v410_v20  ;;  %v414_v22 = vld [vmem:[%s1298_s11 + $0x160] sm:$0xff]  ;;  %v416_v23 = vld [vmem:[%s1298_s11 + $0x170] sm:$0xff]  ;;  %413 = vst [vmem:[%s1303_s12 + $0xa8] sm:$0xff] %v412_v21 }
  0x1b   : > { %415 = vst [vmem:[%s1303_s12 + $0xb0] sm:$0xff] %v414_v22  ;;  %417 = vst [vmem:[%s1303_s12 + $0xb8] sm:$0xff] %v416_v23  ;;  %v418_v24 = vld [vmem:[%s1298_s11 + $0x180] sm:$0xff]  ;;  %v420_v25 = vld [vmem:[%s1298_s11 + $0x190] sm:$0xff] }
  0x1c   : > { %v422_v26 = vld [vmem:[%s1298_s11 + $0x1a0] sm:$0xff]  ;;  %419 = vst [vmem:[%s1303_s12 + $0xc0] sm:$0xff] %v418_v24  ;;  %421 = vst [vmem:[%s1303_s12 + $0xc8] sm:$0xff] %v420_v25  ;;  %v424_v27 = vld [vmem:[%s1298_s11 + $0x1b0] sm:$0xff] }
  0x1d   : > { %423 = vst [vmem:[%s1303_s12 + $0xd0] sm:$0xff] %v422_v26  ;;  %v426_v28 = vld [vmem:[%s1298_s11 + $0x1c0] sm:$0xff]  ;;  %v428_v29 = vld [vmem:[%s1298_s11 + $0x1d0] sm:$0xff]  ;;  %425 = vst [vmem:[%s1303_s12 + $0xd8] sm:$0xff] %v424_v27 }
  0x1e   : > { %427 = vst [vmem:[%s1303_s12 + $0xe0] sm:$0xff] %v426_v28  ;;  %429 = vst [vmem:[%s1303_s12 + $0xe8] sm:$0xff] %v428_v29  ;;  %v430_v30 = vld [vmem:[%s1298_s11 + $0x1e0] sm:$0xff]  ;;  %v432_v31 = vld [vmem:[%s1298_s11 + $0x1f0] sm:$0xff] }
  0x1f   : > { %431 = vst [vmem:[%s1303_s12 + $0xf0] sm:$0xff] %v430_v30  ;;  %433 = vst [vmem:[%s1303_s12 + $0xf8] sm:$0xff] %v432_v31 }
  0x20 PF: > { %p1049_p6 = scmp.ge.s32.totalorder %s1218_s25, 1  ;;  %p454_p7 = scmp.lt.s32.totalorder %s1218_s25, 3 }
  0x22   : > { %p455_p8 = pnand %p1049_p6, %p454_p7 }
  0x23   : > { %s461_s13 = sand.u32 (!%p455_p8), 1, %s1202_s21   ;;  %s1051_s21 = sshll.u32 (!%p455_p8), %s1210_s23, 1 }
  0x24   : > { %458 = sbr.rel (%p455_p8) target bundleno = 310 (0x136), region = 78  ;;  %s1050_s14 = sshll.u32 (!%p455_p8), %s461_s13, 8 }
  0x25   : > { %s1384_s27 = scalar_lea.vmem (!%p455_p8), [#allocation3], %s1050_s14  ;;  %p542_p9 = scmp.lt.s32.totalorder (!%p455_p8), %s1051_s21, 3 }
  0x29   : > { %v572_v32 = vlaneseq  ;;  %v1372_v33 = vld [vmem:[%s1455_s0] sm:$0xff]  ;;  %v1135_v41 = vld [vmem:[%s1384_s27 + $0x64] ss:$8 sps:$4 sm:$0xff]   ;;  %v1137_v42 = vld [vmem:[%s1384_s27 + $0x60] ss:$8 sps:$4 sm:$0xff]   ;;  %s1469_s21 = smov (!%p542_p9, %s1051_s21), 3 }
  0x2a   : > { %v1377_v34 = vld [vmem:[%s1457_s2] sm:$0x3]  ;;  %v1132_v37 = vld [vmem:[%s1384_s27 + $0x74] ss:$8 sps:$4 sm:$0xff]   ;;  %v569_v39 = vunpack.c.h.bf16 %v1372_v33  ;;  %v1141_v49 = vld [vmem:[%s1384_s27 + $0x44] ss:$8 sps:$4 sm:$0xff]   ;;  %v568_v7 = vunpack.c.l.bf16 %v1372_v33  ;;  %s544_s7 = scalar_lea.vmem %s1459_s4, %s1469_s21  ;;  %s549_s10 = scalar_lea.vmem %s1460_s5, %s1469_s21 }
  0x2b   : > { %v573_v35 = vshrl.u32 %v572_v32, 7  ;;  %v1382_v36 = vld [vmem:[%s1458_s3] sm:$0x3]  ;;  %796 = vmatprep.subr.bf16.mxu0 %v1132_v37  ;;  %v1138_v45 = vld [vmem:[%s1384_s27 + $0x54] ss:$8 sps:$4 sm:$0xff]   ;;  %s1054_s23 = sshll.u32 %s1469_s21, 2 }
  0x2c   : > { %v1134_v38 = vld [vmem:[%s1384_s27 + $0x70] ss:$8 sps:$4 sm:$0xff]   ;;  %v1143_v51 = vld [vmem:[%s1384_s27 + $0x40] ss:$8 sps:$4 sm:$0xff]   ;;  %v1144_v53 = vld [vmem:[%s1384_s27 + $0x34] ss:$8 sps:$4 sm:$0xff]   ;;  %s559_s13 = scalar_lea.vmem %s1461_s6, %s1054_s23 }
  0x2d   : > { %v1389_v40 = vsub.s32 1, %v573_v35  ;;  %797 = vmatpush1.bf16.msra.mxu0 %v1134_v38  ;;  %v1140_v47 = vld [vmem:[%s1384_s27 + $0x50] ss:$8 sps:$4 sm:$0xff]   ;;  %v1147_v55 = vld [vmem:[%s1384_s27 + $0x24] ss:$8 sps:$4 sm:$0xff]   ;;  %v574_v4 = vsub.s32 0, %v573_v35 }
  0x2e   : > { %798 = vmatprep.subr.bf16.mxu0 %v1135_v41  ;;  %v1146_v54 = vld [vmem:[%s1384_s27 + $0x30] ss:$8 sps:$4 sm:$0xff]   ;;  %v1149_v56 = vld [vmem:[%s1384_s27 + $0x20] ss:$8 sps:$4 sm:$0xff]   ;;  %v1150_v57 = vld [vmem:[%s1384_s27 + $0x14] ss:$8 sps:$4 sm:$0xff]  }
  0x2f   : > { %v579_v43 = vrot.slane %v1377_v34, %v1389_v40  ;;  %v593_v44 = vrot.slane %v1382_v36, %v1389_v40  ;;  %v1152_v58 = vld [vmem:[%s1384_s27 + $0x10] ss:$8 sps:$4 sm:$0xff]   ;;  %v1153_v59 = vld [vmem:[%s1384_s27 + $0x4] ss:$8 sps:$4 sm:$0xff]   ;;  %v1155_v60 = vld [vmem:[%s1384_s27] ss:$8 sps:$4 sm:$0xff]   ;;  %v575_v8 = vrot.slane %v1377_v34, %v574_v4  ;;  %v589_v11 = vrot.slane %v1382_v36, %v574_v4 }
  0x30   : > { %v1156_v61 = vld [vmem:[%s1384_s27 + $0xf4] ss:$8 sps:$4 sm:$0xff]   ;;  %v1158_v62 = vld [vmem:[%s1384_s27 + $0xf0] ss:$8 sps:$4 sm:$0xff]   ;;  %v1159_v63 = vld [vmem:[%s1384_s27 + $0xe4] ss:$8 sps:$4 sm:$0xff]  }
  0x31   : > { %v583_v46 = vmul.f32 %v579_v43, %v569_v39  ;;  %799 = vmatpush1.bf16.msra.mxu0 %v1137_v42  ;;  %v1161_v0 = vld [vmem:[%s1384_s27 + $0xe0] ss:$8 sps:$4 sm:$0xff]   ;;  %v1162_v1 = vld [vmem:[%s1384_s27 + $0xd4] ss:$8 sps:$4 sm:$0xff]   ;;  %v1164_v2 = vld [vmem:[%s1384_s27 + $0xd0] ss:$8 sps:$4 sm:$0xff]   ;;  %v582_v12 = vmul.f32 %v575_v8, %v568_v7 }
  0x32   : > { %800 = vmatprep.subr.bf16.mxu0 %v1138_v45  ;;  %v1165_v3 = vld [vmem:[%s1384_s27 + $0xc4] ss:$8 sps:$4 sm:$0xff]   ;;  %v1167_v5 = vld [vmem:[%s1384_s27 + $0xc0] ss:$8 sps:$4 sm:$0xff]   ;;  %v1168_v6 = vld [vmem:[%s1384_s27 + $0xb4] ss:$8 sps:$4 sm:$0xff]  }
  0x33   : > { %v597_v48 = vadd.f32 %v593_v44, %v583_v46  ;;  %v1170_v9 = vld [vmem:[%s1384_s27 + $0xb0] ss:$8 sps:$4 sm:$0xff]   ;;  %v1171_v10 = vld [vmem:[%s1384_s27 + $0xa4] ss:$8 sps:$4 sm:$0xff]   ;;  %v1173_v13 = vld [vmem:[%s1384_s27 + $0xa0] ss:$8 sps:$4 sm:$0xff]   ;;  %v596_v15 = vadd.f32 %v589_v11, %v582_v12 }
  0x34   : > { %v1174_v14 = vld [vmem:[%s1384_s27 + $0x94] ss:$8 sps:$4 sm:$0xff]   ;;  %v1176_v16 = vld [vmem:[%s1384_s27 + $0x90] ss:$8 sps:$4 sm:$0xff]   ;;  %v1177_v17 = vld [vmem:[%s1384_s27 + $0x84] ss:$8 sps:$4 sm:$0xff]  }
  0x35   : > { %v599_v50 = vmax.f32 %v597_v48, 0.0  ;;  %801 = vmatpush1.bf16.msra.mxu0 %v1140_v47  ;;  %v598_v18 = vmax.f32 %v596_v15, 0.0  ;;  %v1179_v19 = vld [vmem:[%s1384_s27 + $0x80] ss:$8 sps:$4 sm:$0xff]   ;;  %v846_v21 = vld [vmem:[%s544_s7] sm:$0x3] }
  0x36   : > { %802 = vmatprep.subr.bf16.mxu0 %v1141_v49  ;;  %v851_v22 = vrot.slane %v846_v21, %v574_v4  ;;  %v860_v23 = vld [vmem:[%s549_s10] sm:$0x3]  ;;  %v855_v24 = vrot.slane %v846_v21, %v1389_v40 }
  0x37   : > { %v601_v52 = vpack.c.bf16 %v599_v50, %v599_v50  ;;  %v600_v20 = vpack.c.bf16 %v598_v18, %v598_v18  ;;  %v865_v27 = vrot.slane %v860_v23, %v574_v4  ;;  %v869_v28 = vrot.slane %v860_v23, %v1389_v40 }
  0x39   : > { %828 = vmatprep.mubr.bf16.mxu0 %v601_v52  ;;  %803 = vmatpush1.bf16.msra.mxu0 %v1143_v51 }
  0x3a   : > { %804 = vmatprep.subr.bf16.mxu0 %v1144_v53 }
  0x3d   : > { %805 = vmatpush1.bf16.msra.mxu0 %v1146_v54 }
  0x3e   : > { %806 = vmatprep.subr.bf16.mxu0 %v1147_v55 }
  0x41   : > { %807 = vmatpush1.bf16.msra.mxu0 %v1149_v56 }
  0x42   : > { %808 = vmatprep.subr.bf16.mxu0 %v1150_v57 }
  0x45   : > { %809 = vmatpush1.bf16.msra.mxu0 %v1152_v58 }
  0x46   : > { %810 = vmatprep.subr.bf16.mxu0 %v1153_v59 }
  0x49   : > { %811 = vmatpush1.bf16.msra.mxu0 %v1155_v60 }
  0x4a   : > { %812 = vmatprep.subr.bf16.mxu0 %v1156_v61 }
  0x4d   : > { %813 = vmatpush2.bf16.msra.mxu0 %v1158_v62 }
  0x4e   : > { %814 = vmatprep.subr.bf16.mxu0 %v1159_v63 }
  0x51   : > { %815 = vmatpush2.bf16.msra.mxu0 %v1161_v0 }
  0x52   : > { %816 = vmatprep.subr.bf16.mxu0 %v1162_v1 }
  0x55   : > { %817 = vmatpush2.bf16.msra.mxu0 %v1164_v2 }
  0x56   : > { %818 = vmatprep.subr.bf16.mxu0 %v1165_v3 }
  0x59   : > { %819 = vmatpush2.bf16.msra.mxu0 %v1167_v5 }
  0x5a   : > { %820 = vmatprep.subr.bf16.mxu0 %v1168_v6 }
  0x5d   : > { %821 = vmatpush2.bf16.msra.mxu0 %v1170_v9 }
  0x5e   : > { %822 = vmatprep.subr.bf16.mxu0 %v1171_v10 }
  0x61   : > { %823 = vmatpush2.bf16.msra.mxu0 %v1173_v13 }
  0x62   : > { %824 = vmatprep.subr.bf16.mxu0 %v1174_v14 }
  0x65   : > { %825 = vmatpush2.bf16.msra.mxu0 %v1176_v16 }
  0x66   : > { %826 = vmatprep.subr.bf16.mxu0 %v1177_v17 }
  0x69   : > { %827 = vmatpush2.bf16.msra.mxu0 %v1179_v19 }
  0x6c   : > { %829 = vmatmul.mubr.bf16.vlgmr.msra.gmra.mxu0 %v600_v20 }
 0x12c   : > { %v830_v25 = vpop.f32.mrf.mxu0 }
 0x12d   : > { %v858_v26 = vmul.f32 %v851_v22, %v830_v25 }
 0x12e   : > { %v832_v29 = vpop.f32.mrf.mxu0 }
 0x12f   : > { %v859_v30 = vmul.f32 %v855_v24, %v832_v29  ;;  %v872_v32 = vadd.f32 %v865_v27, %v858_v26 }
 0x130   : > { %v834_v31 = vpop.f32.mrf.mxu0 }
 0x131   : > { %v873_v33 = vadd.f32 %v869_v28, %v859_v30 }
 0x132   : > { %v835_v34 = vpop.f32.mrf.mxu0 }
 0x133   : > { %v1091_v35 = vpack.c.bf16 %v873_v33, %v872_v32 }
 0x135   : > { %882 = vst [vmem:[%s559_s13] sm:$0xff] %v1091_v35 }
 0x136 PF: > { %s16_s25 = sadd.s32 1, %s1218_s25   ;;  %s1462_s21 = smov %s1206_s22 }
 0x137   : > { %p13_p10 = scmp.ge.s32.totalorder %s16_s25, 4   ;;  %s1463_s22 = smov %s1290_s29 }
 0x138   : > { %s1464_s23 = smov %s1214_s24  ;;  %s1465_s24 = smov %s1467_s26 }
 0x139   :  { %15 = sbr.rel (!%p13_p10) target bundleno = 3 (0x3), region = 140 }

// kernel: net_recam_forward.90
= control target key start
LH: loop header
LB: loop body
LE: loop exit
PB: predicated region body
PF: predicated region fallthrough
CT: control target
= control target key end

     0   :  { %v37_v21 = vlaneseq  ;;  %s722_s1 = inlined_call_operand.vmem [shape: bf16[512,128], index: 1, kind: input, shape index: {}]   ;;  %s723_s0 = inlined_call_operand.vmem [shape: bf16[8,512], index: 0, kind: input, shape index: {}]   ;;  %s724_s2 = inlined_call_operand.vmem [shape: f32[1,512], index: 2, kind: input, shape index: {}]   ;;  %s725_s3 = inlined_call_operand.vmem [shape: f32[1,512], index: 3, kind: input, shape index: {}]   ;;  %s726_s4 = inlined_call_operand.vmem [shape: f32[1,128], index: 4, kind: input, shape index: {}]   ;;  %s727_s5 = inlined_call_operand.vmem [shape: f32[1,128], index: 5, kind: input, shape index: {}]   ;;  %s728_s6 = inlined_call_operand.vmem [shape: f32[8,128], index: 6, kind: output, shape index: {}]  }
   0x1   :  { %v538_v0 = vld [vmem:[%s722_s1 + $0x78] sm:$0xff]   ;;  %v542_v4 = vld [vmem:[%s722_s1 + $0x70] sm:$0xff]   ;;  %v546_v8 = vld [vmem:[%s722_s1 + $0x68] sm:$0xff]  }
   0x2   :  { %v539_v1 = vld [vmem:[%s722_s1 + $0xf8] sm:$0xff]   ;;  %494 = vmatprep.subr.bf16.mxu0 %v538_v0  ;;  %v543_v5 = vld [vmem:[%s722_s1 + $0xf0] sm:$0xff]   ;;  %v547_v9 = vld [vmem:[%s722_s1 + $0xe8] sm:$0xff]   ;;  %v38_v26 = vshrl.u32 %v37_v21, 7 }
   0x3   :  { %v540_v2 = vld [vmem:[%s722_s1 + $0x38] sm:$0xff]   ;;  %516 = vmatprep.subr.bf16.mxu1 %v539_v1  ;;  %v544_v6 = vld [vmem:[%s722_s1 + $0x30] sm:$0xff]   ;;  %v548_v10 = vld [vmem:[%s722_s1 + $0x28] sm:$0xff]  }
   0x4   :  { %v541_v3 = vld [vmem:[%s722_s1 + $0xb8] sm:$0xff]   ;;  %495 = vmatpush3.bf16.msra.mxu0 %v540_v2  ;;  %v545_v7 = vld [vmem:[%s722_s1 + $0xb0] sm:$0xff]   ;;  %v549_v11 = vld [vmem:[%s722_s1 + $0xa8] sm:$0xff]   ;;  %v43_v31 = vsub.s32 1, %v38_v26  ;;  %v51_v33 = vsub.s32 3, %v38_v26  ;;  %v39_v35 = vsub.s32 0, %v38_v26 }
   0x5   :  { %517 = vmatpush3.bf16.msra.mxu1 %v541_v3  ;;  %496 = vmatprep.subr.bf16.mxu0 %v542_v4  ;;  %v550_v12 = vld [vmem:[%s722_s1 + $0x60] sm:$0xff]   ;;  %v554_v16 = vld [vmem:[%s722_s1 + $0x58] sm:$0xff]   ;;  %v558_v20 = vld [vmem:[%s722_s1 + $0x50] sm:$0xff]   ;;  %v47_v37 = vsub.s32 2, %v38_v26 }
   0x6   :  { %518 = vmatprep.subr.bf16.mxu1 %v543_v5  ;;  %v551_v13 = vld [vmem:[%s722_s1 + $0xe0] sm:$0xff]   ;;  %v555_v17 = vld [vmem:[%s722_s1 + $0xd8] sm:$0xff]   ;;  %v559_v22 = vld [vmem:[%s722_s1 + $0xd0] sm:$0xff]  }
   0x7   :  { %v552_v14 = vld [vmem:[%s722_s1 + $0x20] sm:$0xff]   ;;  %v556_v18 = vld [vmem:[%s722_s1 + $0x18] sm:$0xff]   ;;  %v560_v23 = vld [vmem:[%s722_s1 + $0x10] sm:$0xff]  }
   0x8   :  { %497 = vmatpush3.bf16.msra.mxu0 %v544_v6  ;;  %v553_v15 = vld [vmem:[%s722_s1 + $0xa0] sm:$0xff]   ;;  %v557_v19 = vld [vmem:[%s722_s1 + $0x98] sm:$0xff]   ;;  %v561_v24 = vld [vmem:[%s722_s1 + $0x90] sm:$0xff]  }
   0x9   :  { %519 = vmatpush3.bf16.msra.mxu1 %v545_v7  ;;  %498 = vmatprep.subr.bf16.mxu0 %v546_v8  ;;  %v562_v25 = vld [vmem:[%s722_s1 + $0x48] sm:$0xff]   ;;  %v566_v30 = vld [vmem:[%s722_s1 + $0x40] sm:$0xff]  }
   0xa   :  { %520 = vmatprep.subr.bf16.mxu1 %v547_v9  ;;  %v563_v27 = vld [vmem:[%s722_s1 + $0xc8] sm:$0xff]   ;;  %v567_v32 = vld [vmem:[%s722_s1 + $0xc0] sm:$0xff]  }
   0xb   :  { %v564_v28 = vld [vmem:[%s722_s1 + $0x8] sm:$0xff]   ;;  %v568_v34 = vld [vmem:[%s722_s1] sm:$0xff]  }
   0xc   :  { %499 = vmatpush3.bf16.msra.mxu0 %v548_v10  ;;  %v565_v29 = vld [vmem:[%s722_s1 + $0x88] sm:$0xff]   ;;  %v569_v36 = vld [vmem:[%s722_s1 + $0x80] sm:$0xff]  }
   0xd   :  { %521 = vmatpush3.bf16.msra.mxu1 %v549_v11  ;;  %500 = vmatprep.subr.bf16.mxu0 %v550_v12  ;;  %v29_v38 = vld [vmem:[%s723_s0] sm:$0xff]  ;;  %v30_v45 = vld [vmem:[%s723_s0 + $0x8] sm:$0xff] }
   0xe   :  { %522 = vmatprep.subr.bf16.mxu1 %v551_v13  ;;  %v35_v39 = vld [vmem:[%s724_s2] sm:$0xf]  ;;  %v31_v41 = vunpack.c.l.bf16 %v29_v38  ;;  %v32_v42 = vunpack.c.h.bf16 %v29_v38  ;;  %v33_v46 = vunpack.c.l.bf16 %v30_v45  ;;  %v34_v47 = vunpack.c.h.bf16 %v30_v45 }
   0xf   :  { %v61_v40 = vld [vmem:[%s725_s3] sm:$0xf]  ;;  %v44_v43 = vrot.slane %v35_v39, %v43_v31  ;;  %v52_v48 = vrot.slane %v35_v39, %v51_v33  ;;  %v40_v51 = vrot.slane %v35_v39, %v39_v35  ;;  %v48_v53 = vrot.slane %v35_v39, %v47_v37 }
  0x10   :  { %501 = vmatpush3.bf16.msra.mxu0 %v552_v14  ;;  %v70_v44 = vrot.slane %v61_v40, %v43_v31  ;;  %v78_v49 = vrot.slane %v61_v40, %v51_v33  ;;  %v66_v52 = vrot.slane %v61_v40, %v39_v35  ;;  %v74_v55 = vrot.slane %v61_v40, %v47_v37  ;;  %v492_v12 = vld [vmem:[%s726_s4] ss:$0 sm:$0xff] }
  0x11   :  { %523 = vmatpush3.bf16.msra.mxu1 %v553_v15  ;;  %502 = vmatprep.subr.bf16.mxu0 %v554_v16  ;;  %v58_v50 = vmul.f32 %v44_v43, %v32_v42  ;;  %v60_v54 = vmul.f32 %v52_v48, %v34_v47  ;;  %v57_v57 = vmul.f32 %v40_v51, %v31_v41  ;;  %v493_v16 = vld [vmem:[%s727_s5] ss:$0 sm:$0xff] }
  0x12   :  { %524 = vmatprep.subr.bf16.mxu1 %v555_v17  ;;  %v59_v58 = vmul.f32 %v48_v53, %v33_v46 }
  0x13   :  { %v84_v56 = vadd.f32 %v70_v44, %v58_v50  ;;  %v86_v59 = vadd.f32 %v78_v49, %v60_v54  ;;  %v83_v61 = vadd.f32 %v66_v52, %v57_v57 }
  0x14   :  { %503 = vmatpush3.bf16.msra.mxu0 %v556_v18  ;;  %v85_v62 = vadd.f32 %v74_v55, %v59_v58 }
  0x15   :  { %525 = vmatpush3.bf16.msra.mxu1 %v557_v19  ;;  %504 = vmatprep.subr.bf16.mxu0 %v558_v20  ;;  %v88_v60 = vmax.f32 %v84_v56, 0.0  ;;  %v90_v63 = vmax.f32 %v86_v59, 0.0  ;;  %v87_v1 = vmax.f32 %v83_v61, 0.0 }
  0x16   :  { %526 = vmatprep.subr.bf16.mxu1 %v559_v22  ;;  %v89_v2 = vmax.f32 %v85_v62, 0.0 }
  0x17   :  { %v92_v0 = vpack.c.bf16 %v88_v60, %v88_v60  ;;  %v94_v3 = vpack.c.bf16 %v90_v63, %v90_v63  ;;  %v91_v4 = vpack.c.bf16 %v87_v1, %v87_v1 }
  0x18   :  { %505 = vmatpush3.bf16.msra.mxu0 %v560_v23  ;;  %v93_v5 = vpack.c.bf16 %v89_v2, %v89_v2 }
  0x19   :  { %527 = vmatpush3.bf16.msra.mxu1 %v561_v24  ;;  %506 = vmatprep.subr.bf16.mxu0 %v562_v25 }
  0x1a   :  { %528 = vmatprep.subr.bf16.mxu1 %v563_v27  ;;  %384 = vmatprep.mubr.bf16.mxu0 %v92_v0 }
  0x1b   :  { %424 = vmatprep.mubr.bf16.mxu1 %v94_v3 }
  0x1c   :  { %507 = vmatpush3.bf16.msra.mxu0 %v564_v28 }
  0x1d   :  { %529 = vmatpush3.bf16.msra.mxu1 %v565_v29  ;;  %508 = vmatprep.subr.bf16.mxu0 %v566_v30 }
  0x1e   :  { %530 = vmatprep.subr.bf16.mxu1 %v567_v32 }
  0x20   :  { %509 = vmatpush3.bf16.msra.mxu0 %v568_v34 }
  0x21   :  { %531 = vmatpush3.bf16.msra.mxu1 %v569_v36 }
  0x23   :  { %385 = vmatmul.mubr.bf16.vlgmr.msra.gmra.mxu0 %v91_v4 }
  0x24   :  { %425 = vmatmul.mubr.bf16.vlgmr.msra.gmra.mxu1 %v93_v5 }
  0xe3   :  { %v510_v6 = vpop.f32.mrf.mxu0 }
  0xe4   :  { %v532_v7 = vpop.f32.mrf.mxu1 }
  0xe5   :  { %v511_v8 = vpop.f32.mrf.mxu0 }
  0xe6   :  { %v533_v9 = vpop.f32.mrf.mxu1  ;;  %v512_v10 = vadd.f32 %v511_v8, %v510_v6 }
  0xe7   :  { %v534_v11 = vadd.f32 %v533_v9, %v532_v7  ;;  %v513_v13 = vpop.f32.mrf.mxu0 }
  0xe8   :  { %v535_v14 = vpop.f32.mrf.mxu1 }
  0xe9   :  { %v427_v15 = vadd.f32 %v534_v11, %v512_v10  ;;  %v514_v17 = vpop.f32.mrf.mxu0 }
  0xea   :  { %v536_v18 = vpop.f32.mrf.mxu1 }
  0xeb   :  { %v445_v19 = vmul.f32 %v492_v12, %v427_v15 }
  0xed   :  { %v453_v20 = vadd.f32 %v493_v16, %v445_v19 }
  0xef   :  { %v454_v21 = vmax.f32 %v453_v20, 0.0 }
  0xf1   :  { %455 = vst [vmem:[%s728_s6] sm:$0xff] %v454_v21 }

// kernel: net_recam_forward.92
= control target key start
LH: loop header
LB: loop body
LE: loop exit
PB: predicated region body
PF: predicated region fallthrough
CT: control target
= control target key end

     0   :  { %v205_v0 = vmov 0.0   ;;  %vm206_vm0 = vmmov 0   ;;  %s268_s1 = inlined_call_operand.vmem [shape: bf16[128,128], index: 1, kind: input, shape index: {}]   ;;  %s269_s0 = inlined_call_operand.vmem [shape: bf16[8,128], index: 0, kind: input, shape index: {}]   ;;  %s270_s2 = inlined_call_operand.vmem [shape: f32[1,128], index: 2, kind: input, shape index: {}]   ;;  %s271_s3 = inlined_call_operand.vmem [shape: f32[1,128], index: 3, kind: input, shape index: {}]   ;;  %s272_s4 = inlined_call_operand.vmem [shape: f32[8,128], index: 4, kind: output, shape index: {}]  }
   0x1   :  { %175 = vmatprep.subr.bf16.mxu0 %v205_v0  ;;  %v197_v1 = vld [vmem:[%s268_s1 + $0x38] sm:$0xff]   ;;  %191 = vmatprep.mubr.msk.bf16.mxu0 %vm206_vm0, %v205_v0  ;;  %v198_v2 = vld [vmem:[%s268_s1 + $0x30] sm:$0xff]   ;;  %v199_v3 = vld [vmem:[%s268_s1 + $0x28] sm:$0xff]  }
   0x2   :  { %176 = vmatpush3.bf16.msra.mxu0 %v197_v1  ;;  %v200_v4 = vld [vmem:[%s268_s1 + $0x20] sm:$0xff]   ;;  %v201_v5 = vld [vmem:[%s268_s1 + $0x18] sm:$0xff]   ;;  %v202_v6 = vld [vmem:[%s268_s1 + $0x10] sm:$0xff]  }
   0x3   :  { %177 = vmatprep.subr.bf16.mxu0 %v205_v0  ;;  %v203_v7 = vld [vmem:[%s268_s1 + $0x8] sm:$0xff]   ;;  %v204_v8 = vld [vmem:[%s268_s1] sm:$0xff]  }
   0x4   :  { %v23_v9 = vld [vmem:[%s269_s0] sm:$0xf] }
   0x5   :  { %v164_v10 = vld [vmem:[%s270_s2] ss:$0 sm:$0xff] }
   0x6   :  { %178 = vmatpush3.bf16.msra.mxu0 %v198_v2  ;;  %v165_v12 = vld [vmem:[%s271_s3] ss:$0 sm:$0xff] }
   0x7   :  { %179 = vmatprep.subr.bf16.mxu0 %v205_v0 }
   0xa   :  { %180 = vmatpush3.bf16.msra.mxu0 %v199_v3 }
   0xb   :  { %181 = vmatprep.subr.bf16.mxu0 %v205_v0 }
   0xe   :  { %182 = vmatpush3.bf16.msra.mxu0 %v200_v4 }
   0xf   :  { %183 = vmatprep.subr.bf16.mxu0 %v205_v0 }
  0x12   :  { %184 = vmatpush3.bf16.msra.mxu0 %v201_v5 }
  0x13   :  { %185 = vmatprep.subr.bf16.mxu0 %v205_v0 }
  0x16   :  { %186 = vmatpush3.bf16.msra.mxu0 %v202_v6 }
  0x17   :  { %187 = vmatprep.subr.bf16.mxu0 %v205_v0 }
  0x1a   :  { %188 = vmatpush3.bf16.msra.mxu0 %v203_v7 }
  0x1b   :  { %189 = vmatprep.subr.bf16.mxu0 %v205_v0 }
  0x1e   :  { %190 = vmatpush3.bf16.msra.mxu0 %v204_v8 }
  0x21   :  { %192 = vmatmul.mubr.bf16.vlgmr.msra.gmra.mxu0 %v23_v9 }
  0xe1   :  { %v123_v11 = vpop.f32.mrf.mxu0 }
  0xe2   :  { %v142_v13 = vmul.f32 %v164_v10, %v123_v11 }
  0xe3   :  { %v193_v14 = vpop.f32.mrf.mxu0 }
  0xe4   :  { %v150_v15 = vadd.f32 %v165_v12, %v142_v13 }
  0xe5   :  { %v126_v16 = vpop.f32.mrf.mxu0 }
  0xe6   :  { %151 = vst [vmem:[%s272_s4] sm:$0xff] %v150_v15 }
  0xe7   :  { %v194_v17 = vpop.f32.mrf.mxu0 }

// kernel: net_recam_forward.93
= control target key start
LH: loop header
LB: loop body
LE: loop exit
PB: predicated region body
PF: predicated region fallthrough
CT: control target
= control target key end

     0   :  { %s485_s9 = smov 0   ;;  %s535_s0 = inlined_call_operand.vmem [shape: bf16[2,8,128], index: 0, kind: input, shape index: {}]   ;;  %s536_s1 = inlined_call_operand.vmem [shape: bf16[2,8,128], index: 1, kind: input, shape index: {}]   ;;  %s537_s2 = inlined_call_operand.vmem [shape: f32[2,128,128], index: 2, kind: output, shape index: {}]  }
   0x1 LB: > { %s402_s10 = sadd.s32 4294967295, %s468_s9   ;;  %p406_p0 = scmp.ge.s32.totalorder %s468_s9, 1  ;;  %s468_s9 = sphi %s485_s9, %s12_s9  }
   0x2   : > { %p120_p1 = scmp.lt.s32.totalorder %s468_s9, 3 }
   0x4   : > { %p121_p2 = pnand %p406_p0, %p120_p1 }
   0x5   : > { %p145_p3 = scmp.lt.s32.totalorder (!%p121_p2), %s402_s10, 1 }
   0x6   : > { %124 = sbr.rel (%p121_p2) target bundleno = 344 (0x158), region = 28 }
   0xb   : > { %s539_s10 = smov (!%p145_p3, %s402_s10), 1  ;;  %vm202_vm0 = vcmask 1043456   ;;  %vm177_vm1 = vcmask 64512  }
   0xc   : > { %s407_s11 = sshll.u32 %s539_s10, 2  ;;  %s421_s18 = sshll.u32 %s539_s10, 7 }
   0xd   : > { %s148_s14 = scalar_lea.vmem %s535_s0, %s407_s11  ;;  %s152_s17 = scalar_lea.vmem %s536_s1, %s407_s11 }
   0xe   : > { %v159_v0 = vld [vmem:[%s148_s14] sm:$0xf]  ;;  %s514_s21 = scalar_lea.vmem %s537_s2, %s421_s18 }
   0xf   : > { %161 = vxpose.xlu0.c.b16.start.end [1/1] (short) %v159_v0, 128  ;;  %v160_v1 = vld [vmem:[%s152_s17] sm:$0xf] }
  0x10   : > { %451 = vmatprep.subr.msk.bf16.mxu0 %vm202_vm0, %v160_v1  ;;  %v204_v2 = vsel %vm202_vm0, %v160_v1, 0  ;;  %452 = vmatprep.subr.msk.bf16.mxu1 %vm202_vm0, %v160_v1 }
  0x11   : > { %432 = vmatpush3.bf16.msra.mxu0 %v204_v2  ;;  %450 = vmatpush3.bf16.msra.mxu1 %v204_v2 }
  0x71   : > { %v169_v3 = vpop.trf.xlu0 }
  0x72   : > { %433 = vmatprep.mubr.msk.bf16.mxu0 %vm177_vm1, %v169_v3 }
  0x75   : > { %v170_v4 = vpop.trf.xlu0 }
  0x76   : > { %434 = vmatmul.mubr.msk.bf16.vlgmr.msra.gmra.mxu0 %vm177_vm1, %v170_v4 }
  0x79   : > { %v171_v5 = vpop.trf.xlu0 }
  0x7a   : > { %437 = vmatprep.mubr.msk.bf16.mxu0 %vm177_vm1, %v171_v5 }
  0x7d   : > { %v172_v6 = vpop.trf.xlu0 }
  0x7e   : > { %438 = vmatmul.mubr.msk.bf16.gmra.mxu0 %vm177_vm1, %v172_v6 }
  0x81   : > { %v173_v7 = vpop.trf.xlu0 }
  0x82   : > { %441 = vmatprep.mubr.msk.bf16.mxu1 %vm177_vm1, %v173_v7 }
  0x85   : > { %v174_v8 = vpop.trf.xlu0 }
  0x86   : > { %442 = vmatmul.mubr.msk.bf16.vlgmr.msra.gmra.mxu1 %vm177_vm1, %v174_v8 }
  0x89   : > { %v175_v9 = vpop.trf.xlu0 }
  0x8a   : > { %445 = vmatprep.mubr.msk.bf16.mxu1 %vm177_vm1, %v175_v9 }
  0x8d   : > { %v176_v10 = vpop.trf.xlu0 }
  0x8e   : > { %446 = vmatmul.mubr.msk.bf16.gmra.mxu1 %vm177_vm1, %v176_v10 }
 0x136   : > { %v435_v11 = vpop.f32.mrf.mxu0 }
 0x137   : > { %v305_v12 = vmul.f32 0.25, %v435_v11 }
 0x138   : > { %v240_v13 = vpop.f32.mrf.mxu0 }
 0x139   : > { %321 = vst [vmem:[%s514_s21 + $0x10] sm:$0xff] %v305_v12  ;;  %v303_v14 = vmul.f32 0.25, %v240_v13 }
 0x13a   : > { %v436_v15 = vpop.f32.mrf.mxu0 }
 0x13b   : > { %319 = vst [vmem:[%s514_s21] sm:$0xff] %v303_v14  ;;  %v306_v16 = vmul.f32 0.25, %v436_v15 }
 0x13c   : > { %v243_v17 = vpop.f32.mrf.mxu0 }
 0x13d   : > { %322 = vst [vmem:[%s514_s21 + $0x18] sm:$0xff] %v306_v16  ;;  %v304_v18 = vmul.f32 0.25, %v243_v17 }
 0x13e   : > { %v439_v19 = vpop.f32.mrf.mxu0 }
 0x13f   : > { %320 = vst [vmem:[%s514_s21 + $0x8] sm:$0xff] %v304_v18  ;;  %v309_v20 = vmul.f32 0.25, %v439_v19 }
 0x140   : > { %v256_v21 = vpop.f32.mrf.mxu0 }
 0x141   : > { %325 = vst [vmem:[%s514_s21 + $0x30] sm:$0xff] %v309_v20  ;;  %v307_v22 = vmul.f32 0.25, %v256_v21 }
 0x142   : > { %v440_v23 = vpop.f32.mrf.mxu0 }
 0x143   : > { %323 = vst [vmem:[%s514_s21 + $0x20] sm:$0xff] %v307_v22  ;;  %v310_v24 = vmul.f32 0.25, %v440_v23 }
 0x144   : > { %v259_v25 = vpop.f32.mrf.mxu0 }
 0x145   : > { %326 = vst [vmem:[%s514_s21 + $0x38] sm:$0xff] %v310_v24  ;;  %v308_v26 = vmul.f32 0.25, %v259_v25 }
 0x146   : > { %v443_v27 = vpop.f32.mrf.mxu1 }
 0x147   : > { %324 = vst [vmem:[%s514_s21 + $0x28] sm:$0xff] %v308_v26  ;;  %v313_v28 = vmul.f32 0.25, %v443_v27 }
 0x148   : > { %v272_v29 = vpop.f32.mrf.mxu1 }
 0x149   : > { %329 = vst [vmem:[%s514_s21 + $0x50] sm:$0xff] %v313_v28  ;;  %v311_v30 = vmul.f32 0.25, %v272_v29 }
 0x14a   : > { %v444_v31 = vpop.f32.mrf.mxu1 }
 0x14b   : > { %327 = vst [vmem:[%s514_s21 + $0x40] sm:$0xff] %v311_v30  ;;  %v314_v32 = vmul.f32 0.25, %v444_v31 }
 0x14c   : > { %v275_v33 = vpop.f32.mrf.mxu1 }
 0x14d   : > { %330 = vst [vmem:[%s514_s21 + $0x58] sm:$0xff] %v314_v32  ;;  %v312_v34 = vmul.f32 0.25, %v275_v33 }
 0x14e   : > { %v447_v35 = vpop.f32.mrf.mxu1 }
 0x14f   : > { %328 = vst [vmem:[%s514_s21 + $0x48] sm:$0xff] %v312_v34  ;;  %v317_v36 = vmul.f32 0.25, %v447_v35 }
 0x150   : > { %v288_v37 = vpop.f32.mrf.mxu1 }
 0x151   : > { %333 = vst [vmem:[%s514_s21 + $0x70] sm:$0xff] %v317_v36  ;;  %v315_v38 = vmul.f32 0.25, %v288_v37 }
 0x152   : > { %v448_v39 = vpop.f32.mrf.mxu1 }
 0x153   : > { %331 = vst [vmem:[%s514_s21 + $0x60] sm:$0xff] %v315_v38  ;;  %v318_v40 = vmul.f32 0.25, %v448_v39 }
 0x154   : > { %v291_v41 = vpop.f32.mrf.mxu1 }
 0x155   : > { %334 = vst [vmem:[%s514_s21 + $0x78] sm:$0xff] %v318_v40  ;;  %v316_v42 = vmul.f32 0.25, %v291_v41 }
 0x157   : > { %332 = vst [vmem:[%s514_s21 + $0x68] sm:$0xff] %v316_v42 }
 0x158 PF: > { %s12_s9 = sadd.s32 1, %s468_s9  }
 0x159   : > { %p9_p4 = scmp.ge.s32.totalorder %s12_s9, 4  }
 0x15b   :  { %11 = sbr.rel (!%p9_p4) target bundleno = 1 (0x1), region = 61 }

</bundles_post_ra>
